<compile_context>
chip_gen: v5e
topology: v5e:2x2
jax: 0.10.0
libtpu: 0.0.40
codegen_flags: <defaults>
</compile_context>

<pallas_src>
import functools
import math

import jax
import jax.numpy as jnp
from jax.experimental import pallas as pl
from jax.experimental.pallas import tpu as pltpu

INV_SQRT_2 = 1.0 / math.sqrt(2.0)
ACT_SCALE = 1.0 / 0.6  # ScaledSiLU scale used by GemNet's "silu" activation
BF16 = jnp.bfloat16


def _scaled_silu(x):
    return jax.nn.silu(x) * ACT_SCALE


def _residual(x, w1, w2):
    # ResidualLayer: (x + act(act(x@W1)@W2)) / sqrt(2); bf16 matmul operands, f32 math.
    y = _scaled_silu(jnp.dot(x.astype(BF16), w1, preferred_element_type=jnp.float32))
    y = _scaled_silu(jnp.dot(y.astype(BF16), w2, preferred_element_type=jnp.float32))
    return (x + y) * INV_SQRT_2


# ----------------------------------------------------------------------------- utils
def _round_up(n, m):
    return ((n + m - 1) // m) * m


def _choose_tile(n, target):
    return min(target, _round_up(max(n, 1), 8))


def _pad_rows(x, n_pad):
    pad = n_pad - x.shape[0]
    if pad == 0:
        return x
    return jnp.concatenate([x, jnp.zeros((pad,) + x.shape[1:], x.dtype)], axis=0)


def _pad_idx(idx, n_pad, fill):
    idx = idx.astype(jnp.int32)
    pad = n_pad - idx.shape[0]
    if pad == 0:
        return idx
    return jnp.concatenate([idx, jnp.full((pad,), fill, jnp.int32)])


def _stack_res(pairs, d):
    # Stack residual-layer weights into (L, D, D) bf16 arrays (one fused input per stack).
    if len(pairs) == 0:
        z = jnp.zeros((1, d, d), BF16)
        return z, z, 0
    return (jnp.stack([p[0] for p in pairs]).astype(BF16),
            jnp.stack([p[1] for p in pairs]).astype(BF16),
            len(pairs))


def _clip_tile(j, lo, hi):
    # Clamp reduction-tile index into [lo, max(hi-1, lo)] so out-of-range steps
    # revisit the same block (no DMA) and stay in bounds.
    return jnp.clip(j, lo, jnp.maximum(hi - 1, lo))


# ----------------------------------------------------------------------------- kernels
def _edge_pre_kernel(m_ref, rad_ref, wca_ref, wba_ref, wrbf_ref, wdown_ref,
                     xca_ref, xdown_ref):
    # Fused: dense_ca  and  trip.dense_ba * trip.mlp_rbf(rad) -> trip.down_projection
    m_bf = m_ref[...].astype(BF16)
    xca_ref[...] = _scaled_silu(
        jnp.dot(m_bf, wca_ref[...], preferred_element_type=jnp.float32)
    ).astype(xca_ref.dtype)
    x_ba = _scaled_silu(jnp.dot(m_bf, wba_ref[...], preferred_element_type=jnp.float32))
    rad_emb = jnp.dot(rad_ref[...].astype(BF16), wrbf_ref[...],
                      preferred_element_type=jnp.float32)
    x_ba = x_ba * rad_emb  # ScaleFactor scale_rbf == identity at init
    xdown_ref[...] = _scaled_silu(
        jnp.dot(x_ba.astype(BF16), wdown_ref[...], preferred_element_type=jnp.float32)
    ).astype(xdown_ref.dtype)


def _edge_main_kernel(n_before, n_after, n_sph, n_cbf, inv_sqrt_eint,
                      lo_ref, hi_ref,
                      idx_ref, w_ref, rad_ref, xca_ref, m_ref, rbfau_ref,
                      wbil_ref, wup_ref, wrbfau_ref,
                      wb1_ref, wb2_ref, wa1_ref, wa2_ref,
                      o_ref, xau_ref, acc_ref):
    # Fused: one-hot segment sum over (sorted) triplets -> bilinear -> up_projection_ca
    # -> skip combine -> before_skip stack -> m-skip -> after_skip stack,
    # plus the hoisted atom-update operand x_au = m_new * Dense_rbf(rbf_au).
    i = pl.program_id(0)
    j = pl.program_id(1)
    tile_e = o_ref.shape[0]
    tile_t = w_ref.shape[0]
    d_tin = w_ref.shape[1] // n_sph

    @pl.when(j == 0)
    def _():
        acc_ref[...] = jnp.zeros_like(acc_ref)

    # Only accumulate over triplet tiles that can contain this edge tile's indices.
    @pl.when(jnp.logical_and(j >= lo_ref[i], j < hi_ref[i]))
    def _():
        e_ids = i * tile_e + jax.lax.broadcasted_iota(jnp.int32, (tile_e, tile_t), 0)
        onehot = (e_ids == idx_ref[...]).astype(BF16)            # (TE, TT), exact in bf16
        acc_ref[...] += jnp.dot(onehot, w_ref[...],
                                preferred_element_type=jnp.float32)

    @pl.when(j == pl.num_programs(1) - 1)
    def _():
        acc = acc_ref[...]                                        # (TE, S*Din) f32
        rad = rad_ref[...].astype(jnp.float32)                    # (TE, S*C)
        # lane-dense broadcast-MAC: bil_in[e, c*Din+d] = sum_s rad[e,s*C+c]*acc[e,s*Din+d]
        bil_in = jnp.zeros((tile_e, n_cbf * d_tin), jnp.float32)
        for s in range(n_sph):
            rad_s = rad[:, s * n_cbf:(s + 1) * n_cbf]             # (TE, C)
            acc_s = acc[:, s * d_tin:(s + 1) * d_tin]             # (TE, Din)
            bil_in = bil_in + (rad_s[:, :, None] * acc_s[:, None, :]
                               ).reshape(tile_e, n_cbf * d_tin)
        # ScaleFactor scale_cbf_sum == identity at init
        x = jnp.dot(bil_in.astype(BF16), wbil_ref[...],
                    preferred_element_type=jnp.float32)
        x_e2e = _scaled_silu(jnp.dot(x.astype(BF16), wup_ref[...],
                                     preferred_element_type=jnp.float32))
        x = (xca_ref[...].astype(jnp.float32) + x_e2e) * inv_sqrt_eint
        for l in range(n_before):
            x = _residual(x, wb1_ref[l], wb2_ref[l])
        mm = (m_ref[...].astype(jnp.float32) + x) * INV_SQRT_2
        for l in range(n_after):
            mm = _residual(mm, wa1_ref[l], wa2_ref[l])
        o_ref[...] = mm.astype(o_ref.dtype)
        # hoisted atom-update per-edge operand (computed once per edge, not per atom tile)
        rbf_emb = jnp.dot(rbfau_ref[...].astype(BF16), wrbfau_ref[...],
                          preferred_element_type=jnp.float32)
        xau_ref[...] = (mm * rbf_emb).astype(xau_ref.dtype)


def _atom_update_kernel(n_emb, n_res, inv_sqrt_aint,
                        lo_ref, hi_ref,
                        idx_ref, xau_ref, h_ref,
                        w1_ref, we1_ref, we2_ref, wu1_ref, wu2_ref,
                        o_ref, acc_ref):
    # Fused AtomUpdateBlock: segment sum of pre-scaled x_au over (sorted) edges,
    # atom MLP, atom_emb residual stack on h, and the (h + h2)/sqrt(2) skip.
    i = pl.program_id(0)
    j = pl.program_id(1)
    tile_a = o_ref.shape[0]
    tile_e = xau_ref.shape[0]

    @pl.when(j == 0)
    def _():
        acc_ref[...] = jnp.zeros_like(acc_ref)

    @pl.when(jnp.logical_and(j >= lo_ref[i], j < hi_ref[i]))
    def _():
        a_ids = i * tile_a + jax.lax.broadcasted_iota(jnp.int32, (tile_a, tile_e), 0)
        onehot = (a_ids == idx_ref[...]).astype(BF16)             # (TA, TE)
        acc_ref[...] += jnp.dot(onehot, xau_ref[...],
                                preferred_element_type=jnp.float32)

    @pl.when(j == pl.num_programs(1) - 1)
    def _():
        h2 = _scaled_silu(jnp.dot(acc_ref[...].astype(BF16), w1_ref[...],
                                  preferred_element_type=jnp.float32))
        for l in range(n_res):
            h2 = _residual(h2, wu1_ref[l], wu2_ref[l])
        h = h_ref[...].astype(jnp.float32) * inv_sqrt_aint
        for l in range(n_emb):
            h = _residual(h, we1_ref[l], we2_ref[l])
        o_ref[...] = ((h + h2) * INV_SQRT_2).astype(o_ref.dtype)


def _edge_out_kernel(n_res, hs_ref, ht_ref, m_ref, wa_ref, wb_ref, wm_ref,
                     wr1_ref, wr2_ref, o_ref):
    # Fused EdgeEmbedding(concat) + residual_m stack + final m-skip.
    m = m_ref[...].astype(jnp.float32)
    y = (jnp.dot(hs_ref[...].astype(BF16), wa_ref[...],
                 preferred_element_type=jnp.float32)
         + jnp.dot(ht_ref[...].astype(BF16), wb_ref[...],
                   preferred_element_type=jnp.float32)
         + jnp.dot(m.astype(BF16), wm_ref[...],
                   preferred_element_type=jnp.float32))
    m2 = _scaled_silu(y)
    for l in range(n_res):
        m2 = _residual(m2, wr1_ref[l], wr2_ref[l])
    o_ref[...] = ((m + m2) * INV_SQRT_2).astype(o_ref.dtype)


# ----------------------------------------------------------------------------- forward
def interaction_block_forward(params, h, m, bases_e2e, basis_atom_update,
                              edge_index_main, trip_idx_e2e):
    num_atoms, d_atom = h.shape
    num_edges, d_edge = m.shape
    dtype = m.dtype

    rad = bases_e2e["rad"]
    rad_cir, sph_cir = bases_e2e["cir"]
    n_trip = trip_idx_e2e["in"].shape[0]

    d_rbf = rad.shape[1]
    n_cbf, n_sph = rad_cir.shape[1], rad_cir.shape[2]
    tp = params["trip"]
    au = params["atom_update"]
    d_tin = tp["down"].shape[1]
    d_tout = tp["up_ca"].shape[0]

    inv_sqrt_num_eint = 1.0 / math.sqrt(2.0)  # dense_ca + triplet e2e
    inv_sqrt_num_aint = 1.0                   # only the atom-update path

    def bf(w):
        return w.astype(BF16)

    # ---- tiling / padding (row tiles; features ride the lane axis) --------------------
    TE = _choose_tile(num_edges, 128)   # 128 is v5e-VMEM-safe and keeps >=2 tiles on v7x
    TT = _choose_tile(n_trip, 128)
    TA = _choose_tile(num_atoms, 128)
    ne_pad = _round_up(num_edges, TE)
    nt_pad = _round_up(n_trip, TT)
    na_pad = _round_up(num_atoms, TA)
    n_etiles, n_ttiles, n_atiles = ne_pad // TE, nt_pad // TT, na_pad // TA

    m_p = _pad_rows(m, ne_pad)
    h_p = _pad_rows(h, na_pad)
    rad_p = _pad_rows(rad, ne_pad)
    rbf_au_p = _pad_rows(basis_atom_update, ne_pad)
    # lane-dense 2-D circular basis, ordered [e, s*n_cbf + c]
    rad_cir2_p = _pad_rows(
        jnp.transpose(rad_cir, (0, 2, 1)).reshape(num_edges, n_sph * n_cbf), ne_pad)

    # ---- kernel 1: edge preprocessing (dense_ca + trip pre-chain) ----------------------
    x_ca_p, x_down_p = pl.pallas_call(
        _edge_pre_kernel,
        out_shape=(jax.ShapeDtypeStruct((ne_pad, d_edge), jnp.float32),
                   jax.ShapeDtypeStruct((ne_pad, d_tin), BF16)),
        grid=(n_etiles,),
        in_specs=[
            pl.BlockSpec((TE, d_edge), lambda i: (i, 0)),
            pl.BlockSpec((TE, d_rbf), lambda i: (i, 0)),
            pl.BlockSpec((d_edge, d_edge), lambda i: (0, 0)),
            pl.BlockSpec((d_edge, d_edge), lambda i: (0, 0)),
            pl.BlockSpec((d_rbf, d_edge), lambda i: (0, 0)),
            pl.BlockSpec((d_edge, d_tin), lambda i: (0, 0)),
        ],
        out_specs=(pl.BlockSpec((TE, d_edge), lambda i: (i, 0)),
                   pl.BlockSpec((TE, d_tin), lambda i: (i, 0))),
        compiler_params=pltpu.CompilerParams(dimension_semantics=("parallel",)),
    )(m_p, rad_p, bf(params["dense_ca"]), bf(tp["dense_ba"]), bf(tp["mlp_rbf"]),
      bf(tp["down"]))

    # ---- triplet sort by idx_out + hoisted per-triplet "weighted" operand --------------
    idx_in_p = _pad_idx(trip_idx_e2e["in"], nt_pad, 0)
    idx_out_p = _pad_idx(trip_idx_e2e["out"], nt_pad, ne_pad)   # sentinel sorts last, never matches
    idx_agg_p = _pad_idx(trip_idx_e2e["out_agg"], nt_pad, 0)
    trip_perm = jnp.argsort(idx_out_p)
    idx_out_s = idx_out_p[trip_perm]
    idx_in_s = idx_in_p[trip_perm]
    idx_agg_s = idx_agg_p[trip_perm]

    # TODO(synk): fuse these per-row gathers (and the weighted outer product) into a
    # scalar-prefetch-driven in-kernel DMA gather instead of XLA glue.
    x_ba_trip = x_down_p[idx_in_s].astype(jnp.float32)          # (nt_pad, d_tin)
    sph_g = sph_cir[jnp.minimum(idx_out_s, num_edges - 1), idx_agg_s]  # (nt_pad, n_sph)
    weighted = (sph_g[:, :, None] * x_ba_trip[:, None, :]
                ).reshape(nt_pad, n_sph * d_tin).astype(BF16)

    # per-edge-tile triplet-tile ranges (sorted idx_out -> contiguous positions)
    t_starts = jnp.arange(n_etiles, dtype=jnp.int32) * TE
    tpos_lo = jnp.searchsorted(idx_out_s, t_starts).astype(jnp.int32)
    tpos_hi = jnp.searchsorted(idx_out_s, t_starts + TE).astype(jnp.int32)
    t_lo = jnp.minimum(tpos_lo // TT, n_ttiles - 1).astype(jnp.int32)
    t_hi = jnp.minimum((tpos_hi + TT - 1) // TT, n_ttiles).astype(jnp.int32)

    # ---- kernel 2: fused sparse scatter + bilinear + residual stacks + m-skip ----------
    wb1, wb2, n_before = _stack_res(params["before_skip"], d_edge)
    wa1, wa2, n_after = _stack_res(params["after_skip"], d_edge)
    w_bil = bf(tp["bilinear"].reshape(n_cbf * d_tin, d_tout))
    w_up = bf(tp["up_ca"])
    w_rbf_au = bf(au["dense_rbf"])
    idx_out_2d = idx_out_s.reshape(1, nt_pad)

    trip_map = lambda i, j, lo, hi: (_clip_tile(j, lo[i], hi[i]), 0)
    trip_idx_map = lambda i, j, lo, hi: (0, _clip_tile(j, lo[i], hi[i]))
    edge_map = lambda i, j, lo, hi: (i, 0)
    const2 = lambda i, j, lo, hi: (0, 0)
    const3 = lambda i, j, lo, hi: (0, 0, 0)

    # TODO(synk): for v7x, add pipeline_mode=pl.Buffered(1) on the grid-invariant weight
    # blocks and set vmem_limit_bytes from the real block sizes.
    m_new_p, x_au_p = pl.pallas_call(
        functools.partial(_edge_main_kernel, n_before, n_after, n_sph, n_cbf,
                          inv_sqrt_num_eint),
        out_shape=(jax.ShapeDtypeStruct((ne_pad, d_edge), dtype),
                   jax.ShapeDtypeStruct((ne_pad, d_edge), BF16)),
        grid_spec=pltpu.PrefetchScalarGridSpec(
            num_scalar_prefetch=2,
            grid=(n_etiles, n_ttiles),
            in_specs=[
                pl.BlockSpec((1, TT), trip_idx_map),              # sorted idx_out
                pl.BlockSpec((TT, n_sph * d_tin), trip_map),      # precomputed weighted
                pl.BlockSpec((TE, n_sph * n_cbf), edge_map),      # rad_cir (2-D)
                pl.BlockSpec((TE, d_edge), edge_map),             # x_ca skip
                pl.BlockSpec((TE, d_edge), edge_map),             # m
                pl.BlockSpec((TE, d_rbf), edge_map),              # atom-update rbf
                pl.BlockSpec((n_cbf * d_tin, d_tout), const2),
                pl.BlockSpec((d_tout, d_edge), const2),
                pl.BlockSpec((d_rbf, d_edge), const2),
                pl.BlockSpec(wb1.shape, const3),
                pl.BlockSpec(wb2.shape, const3),
                pl.BlockSpec(wa1.shape, const3),
                pl.BlockSpec(wa2.shape, const3),
            ],
            out_specs=(pl.BlockSpec((TE, d_edge), edge_map),
                       pl.BlockSpec((TE, d_edge), edge_map)),
            scratch_shapes=[pltpu.VMEM((TE, n_sph * d_tin), jnp.float32)]),
        compiler_params=pltpu.CompilerParams(
            dimension_semantics=("parallel", "arbitrary")),
    )(t_lo, t_hi, idx_out_2d, weighted, rad_cir2_p, x_ca_p, m_p, rbf_au_p,
      w_bil, w_up, w_rbf_au, wb1, wb2, wa1, wa2)

    # ---- edge sort by target atom + per-atom-tile edge-tile ranges ---------------------
    idx_t_srt = _pad_idx(edge_index_main[1], ne_pad, na_pad)    # sentinel sorts last
    edge_perm = jnp.argsort(idx_t_srt)
    idx_t_s = idx_t_srt[edge_perm]
    x_au_s = x_au_p[edge_perm]                                  # (ne_pad, d_edge) bf16

    a_starts = jnp.arange(n_atiles, dtype=jnp.int32) * TA
    epos_lo = jnp.searchsorted(idx_t_s, a_starts).astype(jnp.int32)
    epos_hi = jnp.searchsorted(idx_t_s, a_starts + TA).astype(jnp.int32)
    e_lo = jnp.minimum(epos_lo // TE, n_etiles - 1).astype(jnp.int32)
    e_hi = jnp.minimum((epos_hi + TE - 1) // TE, n_etiles).astype(jnp.int32)

    # ---- kernel 3: fused atom update (sparse segment sum + MLP + atom_emb + skip) ------
    we1, we2, n_emb = _stack_res(params["atom_emb"], d_atom)
    wu1, wu2, n_res_atom = _stack_res(au["res"], d_atom)
    w1 = bf(au["dense1"])
    idx_t_2d = idx_t_s.reshape(1, ne_pad)

    atom_map = lambda i, j, lo, hi: (i, 0)
    ered_map = lambda i, j, lo, hi: (_clip_tile(j, lo[i], hi[i]), 0)
    eidx_map = lambda i, j, lo, hi: (0, _clip_tile(j, lo[i], hi[i]))

    h_new_p = pl.pallas_call(
        functools.partial(_atom_update_kernel, n_emb, n_res_atom, inv_sqrt_num_aint),
        out_shape=jax.ShapeDtypeStruct((na_pad, d_atom), h.dtype),
        grid_spec=pltpu.PrefetchScalarGridSpec(
            num_scalar_prefetch=2,
            grid=(n_atiles, n_etiles),
            in_specs=[
                pl.BlockSpec((1, TE), eidx_map),                  # sorted target atom idx
                pl.BlockSpec((TE, d_edge), ered_map),             # pre-scaled x_au
                pl.BlockSpec((TA, d_atom), atom_map),             # h
                pl.BlockSpec((d_edge, d_atom), const2),
                pl.BlockSpec(we1.shape, const3),
                pl.BlockSpec(we2.shape, const3),
                pl.BlockSpec(wu1.shape, const3),
                pl.BlockSpec(wu2.shape, const3),
            ],
            out_specs=pl.BlockSpec((TA, d_atom), atom_map),
            scratch_shapes=[pltpu.VMEM((TA, d_edge), jnp.float32)]),
        compiler_params=pltpu.CompilerParams(
            dimension_semantics=("parallel", "arbitrary")),
    )(e_lo, e_hi, idx_t_2d, x_au_s, h_p, w1, we1, we2, wu1, wu2)

    # ---- kernel 4: fused EdgeEmbedding + residual_m stack + final skip -----------------
    # TODO(synk): gather h_s / h_t inside the kernel via per-row DMA instead of XLA glue.
    idx_s_p = _pad_idx(edge_index_main[0], ne_pad, 0)
    idx_t_p4 = jnp.minimum(_pad_idx(edge_index_main[1], ne_pad, 0), num_atoms - 1)
    h_s = h_new_p[idx_s_p]
    h_t = h_new_p[idx_t_p4]
    cc = params["concat"]
    wr1, wr2, n_res_m = _stack_res(params["res_m"], d_edge)

    m_final_p = pl.pallas_call(
        functools.partial(_edge_out_kernel, n_res_m),
        out_shape=jax.ShapeDtypeStruct((ne_pad, d_edge), dtype),
        grid=(n_etiles,),
        in_specs=[
            pl.BlockSpec((TE, d_atom), lambda i: (i, 0)),
            pl.BlockSpec((TE, d_atom), lambda i: (i, 0)),
            pl.BlockSpec((TE, d_edge), lambda i: (i, 0)),
            pl.BlockSpec((d_atom, d_edge), lambda i: (0, 0)),
            pl.BlockSpec((d_atom, d_edge), lambda i: (0, 0)),
            pl.BlockSpec((d_edge, d_edge), lambda i: (0, 0)),
            pl.BlockSpec(wr1.shape, lambda i: (0, 0, 0)),
            pl.BlockSpec(wr2.shape, lambda i: (0, 0, 0)),
        ],
        out_specs=pl.BlockSpec((TE, d_edge), lambda i: (i, 0)),
        compiler_params=pltpu.CompilerParams(dimension_semantics=("parallel",)),
    )(h_s, h_t, m_new_p, bf(cc["wa"]), bf(cc["wb"]), bf(cc["wm"]), wr1, wr2)

    return h_new_p[:num_atoms], m_final_p[:num_edges]


# ----------------------------------------------------------------------------- params
def init_params(key, *, d_atom, d_edge, d_trip_in, d_trip_out, d_rbf, d_cbf,
                num_before_skip, num_after_skip, num_concat, num_atom,
                num_atom_emb_layers):
    keys = iter(jax.random.split(key, 128))

    def w(*shape, scale=0.2):
        return jax.random.normal(next(keys), shape, jnp.float32) * scale

    def res_stack(n, d):
        return [(w(d, d), w(d, d)) for _ in range(n)]

    return {
        "dense_ca": w(d_edge, d_edge),
        "trip": {
            "dense_ba": w(d_edge, d_edge),
            "mlp_rbf": w(d_rbf, d_edge),
            "down": w(d_edge, d_trip_in),
            "bilinear": w(d_cbf, d_trip_in, d_trip_out),
            "up_ca": w(d_trip_out, d_edge),
        },
        "before_skip": res_stack(num_before_skip, d_edge),
        "after_skip": res_stack(num_after_skip, d_edge),
        "atom_emb": res_stack(num_atom_emb_layers, d_atom),
        "atom_update": {
            "dense_rbf": w(d_rbf, d_edge),
            "dense1": w(d_edge, d_atom),
            "res": res_stack(num_atom, d_atom),
        },
        "concat": {
            "wa": w(d_atom, d_edge),
            "wb": w(d_atom, d_edge),
            "wm": w(d_edge, d_edge),
        },
        "res_m": res_stack(num_concat, d_edge),
    }


# ----------------------------------------------------------------------------- main
if __name__ == "__main__":
    # small shapes
    N_ATOMS, N_EDGES, N_TRIP, KMAX = 8, 16, 32, 4
    D_ATOM, D_EDGE = 32, 32
    D_TRIP_IN, D_TRIP_OUT = 16, 16
    D_RBF, D_CBF, N_SPH = 8, 8, 8

    root = jax.random.PRNGKey(0)
    k_param, k_data = jax.random.split(root)
    params = init_params(
        k_param, d_atom=D_ATOM, d_edge=D_EDGE, d_trip_in=D_TRIP_IN,
        d_trip_out=D_TRIP_OUT, d_rbf=D_RBF, d_cbf=D_CBF, num_before_skip=1,
        num_after_skip=1, num_concat=1, num_atom=1, num_atom_emb_layers=1)

    dk = iter(jax.random.split(k_data, 16))
    h = jax.random.normal(next(dk), (N_ATOMS, D_ATOM), jnp.float32)
    m = jax.random.normal(next(dk), (N_EDGES, D_EDGE), jnp.float32)
    bases_e2e = {
        "rad": jax.random.normal(next(dk), (N_EDGES, D_RBF), jnp.float32),
        "cir": (jax.random.normal(next(dk), (N_EDGES, D_CBF, N_SPH), jnp.float32),
                jax.random.normal(next(dk), (N_EDGES, KMAX, N_SPH), jnp.float32)),
    }
    basis_atom_update = jax.random.normal(next(dk), (N_EDGES, D_RBF), jnp.float32)
    edge_index_main = jax.random.randint(next(dk), (2, N_EDGES), 0, N_ATOMS, jnp.int32)
    trip_idx_e2e = {
        "in": jax.random.randint(next(dk), (N_TRIP,), 0, N_EDGES, jnp.int32),
        # (out, out_agg) pairs are unique by construction (valid GemNet indexing)
        "out": (jnp.arange(N_TRIP, dtype=jnp.int32) % N_EDGES),
        "out_agg": (jnp.arange(N_TRIP, dtype=jnp.int32) // N_EDGES),
    }

    fwd = jax.jit(interaction_block_forward)
    h_out, m_out = fwd(params, h, m, bases_e2e, basis_atom_update,
                       edge_index_main, trip_idx_e2e)
    jax.block_until_ready((h_out, m_out))
    assert h_out.shape == (N_ATOMS, D_ATOM) and m_out.shape == (N_EDGES, D_EDGE)
    assert bool(jnp.all(jnp.isfinite(h_out))) and bool(jnp.all(jnp.isfinite(m_out)))
    print("KERNEL_OK")
</pallas_src>

<mosaic_0001>
module attributes {stable_mosaic.version = 11 : i64} {
  func.func @_edge_pre_kernel(%arg0: i32, %arg1: memref<16x32xf32, #tpu.memory_space<vmem>>, %arg2: memref<16x8xf32, #tpu.memory_space<vmem>>, %arg3: memref<32x32xbf16, #tpu.memory_space<vmem>>, %arg4: memref<32x32xbf16, #tpu.memory_space<vmem>>, %arg5: memref<8x32xbf16, #tpu.memory_space<vmem>>, %arg6: memref<32x16xbf16, #tpu.memory_space<vmem>>, %arg7: memref<16x32xf32, #tpu.memory_space<vmem>>, %arg8: memref<16x16xbf16, #tpu.memory_space<vmem>>) attributes {dimension_semantics = [#tpu.dimension_semantics<parallel>], iteration_bounds = array<i64: 1>, scalar_prefetch = 0 : i64, scratch_operands = 0 : i64, tpu.core_type = #tpu.core_type<tc>, window_params = [{transform_indices = @transform_0, window_bounds = array<i64: 16, 32>}, {transform_indices = @transform_1, window_bounds = array<i64: 16, 8>}, {pipeline_mode = #tpu.pipeline_mode<synchronous>, transform_indices = @transform_2, window_bounds = array<i64: 32, 32>}, {pipeline_mode = #tpu.pipeline_mode<synchronous>, transform_indices = @transform_3, window_bounds = array<i64: 32, 32>}, {pipeline_mode = #tpu.pipeline_mode<synchronous>, transform_indices = @transform_4, window_bounds = array<i64: 8, 32>}, {pipeline_mode = #tpu.pipeline_mode<synchronous>, transform_indices = @transform_5, window_bounds = array<i64: 32, 16>}, {transform_indices = @transform_6, window_bounds = array<i64: 16, 32>}, {transform_indices = @transform_7, window_bounds = array<i64: 16, 16>}]} {
    %c0 = arith.constant 0 : index
    %c0_0 = arith.constant 0 : index
    %0 = vector.load %arg1[%c0, %c0_0] : memref<16x32xf32, #tpu.memory_space<vmem>>, vector<16x32xf32>
    %1 = arith.truncf %0 : vector<16x32xf32> to vector<16x32xbf16>
    %c0_1 = arith.constant 0 : index
    %c0_2 = arith.constant 0 : index
    %2 = vector.load %arg3[%c0_1, %c0_2] : memref<32x32xbf16, #tpu.memory_space<vmem>>, vector<32x32xbf16>
    %cst = arith.constant dense<0.000000e+00> : vector<16x32xf32>
    %3 = tpu.matmul %1, %2, %cst {dimension_numbers = #tpu.dot_dimension_numbers<[1], [0], [0], [1], [0, 0, 1, 1], [], []>} : vector<16x32xbf16>, vector<32x32xbf16>, vector<16x32xf32> -> vector<16x32xf32>
    %4 = arith.negf %3 : vector<16x32xf32>
    %5 = math.exp %4 : vector<16x32xf32>
    %cst_3 = arith.constant 1.000000e+00 : f32
    %6 = vector.broadcast %cst_3 : f32 to vector<16x32xf32>
    %7 = arith.addf %6, %5 : vector<16x32xf32>
    %8 = arith.divf %6, %7 : vector<16x32xf32>
    %9 = arith.mulf %3, %8 : vector<16x32xf32>
    %cst_4 = arith.constant 1.66666663 : f32
    %10 = vector.broadcast %cst_4 : f32 to vector<16x32xf32>
    %11 = arith.mulf %9, %10 : vector<16x32xf32>
    %c0_5 = arith.constant 0 : index
    %c0_6 = arith.constant 0 : index
    %12 = vector.load %arg7[%c0_5, %c0_6] : memref<16x32xf32, #tpu.memory_space<vmem>>, vector<16x32xf32>
    tpu.vector_store %arg7[%c0_5, %c0_6], %11 {strides = array<i32>} : memref<16x32xf32, #tpu.memory_space<vmem>>, vector<16x32xf32>,
    %c0_7 = arith.constant 0 : index
    %c0_8 = arith.constant 0 : index
    %13 = vector.load %arg4[%c0_7, %c0_8] : memref<32x32xbf16, #tpu.memory_space<vmem>>, vector<32x32xbf16>
    %cst_9 = arith.constant dense<0.000000e+00> : vector<16x32xf32>
    %14 = tpu.matmul %1, %13, %cst_9 {dimension_numbers = #tpu.dot_dimension_numbers<[1], [0], [0], [1], [0, 0, 1, 1], [], []>} : vector<16x32xbf16>, vector<32x32xbf16>, vector<16x32xf32> -> vector<16x32xf32>
    %15 = arith.negf %14 : vector<16x32xf32>
    %16 = math.exp %15 : vector<16x32xf32>
    %cst_10 = arith.constant 1.000000e+00 : f32
    %17 = vector.broadcast %cst_10 : f32 to vector<16x32xf32>
    %18 = arith.addf %17, %16 : vector<16x32xf32>
    %19 = arith.divf %17, %18 : vector<16x32xf32>
    %20 = arith.mulf %14, %19 : vector<16x32xf32>
    %cst_11 = arith.constant 1.66666663 : f32
    %21 = vector.broadcast %cst_11 : f32 to vector<16x32xf32>
    %22 = arith.mulf %20, %21 : vector<16x32xf32>
    %c0_12 = arith.constant 0 : index
    %c0_13 = arith.constant 0 : index
    %23 = vector.load %arg2[%c0_12, %c0_13] : memref<16x8xf32, #tpu.memory_space<vmem>>, vector<16x8xf32>
    %24 = arith.truncf %23 : vector<16x8xf32> to vector<16x8xbf16>
    %c0_14 = arith.constant 0 : index
    %c0_15 = arith.constant 0 : index
    %25 = vector.load %arg5[%c0_14, %c0_15] : memref<8x32xbf16, #tpu.memory_space<vmem>>, vector<8x32xbf16>
    %cst_16 = arith.constant dense<0.000000e+00> : vector<16x32xf32>
    %26 = tpu.matmul %24, %25, %cst_16 {dimension_numbers = #tpu.dot_dimension_numbers<[1], [0], [0], [1], [0, 0, 1, 1], [], []>} : vector<16x8xbf16>, vector<8x32xbf16>, vector<16x32xf32> -> vector<16x32xf32>
    %27 = arith.mulf %22, %26 : vector<16x32xf32>
    %28 = arith.truncf %27 : vector<16x32xf32> to vector<16x32xbf16>
    %c0_17 = arith.constant 0 : index
    %c0_18 = arith.constant 0 : index
    %29 = vector.load %arg6[%c0_17, %c0_18] : memref<32x16xbf16, #tpu.memory_space<vmem>>, vector<32x16xbf16>
    %cst_19 = arith.constant dense<0.000000e+00> : vector<16x16xf32>
    %30 = tpu.matmul %28, %29, %cst_19 {dimension_numbers = #tpu.dot_dimension_numbers<[1], [0], [0], [1], [0, 0, 1, 1], [], []>} : vector<16x32xbf16>, vector<32x16xbf16>, vector<16x16xf32> -> vector<16x16xf32>
    %31 = arith.negf %30 : vector<16x16xf32>
    %32 = math.exp %31 : vector<16x16xf32>
    %cst_20 = arith.constant 1.000000e+00 : f32
    %33 = vector.broadcast %cst_20 : f32 to vector<16x16xf32>
    %34 = arith.addf %33, %32 : vector<16x16xf32>
    %35 = arith.divf %33, %34 : vector<16x16xf32>
    %36 = arith.mulf %30, %35 : vector<16x16xf32>
    %cst_21 = arith.constant 1.66666663 : f32
    %37 = vector.broadcast %cst_21 : f32 to vector<16x16xf32>
    %38 = arith.mulf %36, %37 : vector<16x16xf32>
    %39 = arith.truncf %38 : vector<16x16xf32> to vector<16x16xbf16>
    %c0_22 = arith.constant 0 : index
    %c0_23 = arith.constant 0 : index
    %40 = vector.load %arg8[%c0_22, %c0_23] : memref<16x16xbf16, #tpu.memory_space<vmem>>, vector<16x16xbf16>
    tpu.vector_store %arg8[%c0_22, %c0_23], %39 {strides = array<i32>} : memref<16x16xbf16, #tpu.memory_space<vmem>>, vector<16x16xbf16>,
    return
  }
  func.func @transform_0(%arg0: i32) -> (i32, i32) {
    %c0_i32 = arith.constant 0 : i32
    %c0_i32_0 = arith.constant 0 : i32
    return %arg0, %c0_i32 : i32, i32
  }
  func.func @transform_1(%arg0: i32) -> (i32, i32) {
    %c0_i32 = arith.constant 0 : i32
    %c0_i32_0 = arith.constant 0 : i32
    return %arg0, %c0_i32 : i32, i32
  }
  func.func @transform_2(%arg0: i32) -> (i32, i32) {
    %c0_i32 = arith.constant 0 : i32
    %c0_i32_0 = arith.constant 0 : i32
    %c0_i32_1 = arith.constant 0 : i32
    return %c0_i32, %c0_i32_0 : i32, i32
  }
  func.func @transform_3(%arg0: i32) -> (i32, i32) {
    %c0_i32 = arith.constant 0 : i32
    %c0_i32_0 = arith.constant 0 : i32
    %c0_i32_1 = arith.constant 0 : i32
    return %c0_i32, %c0_i32_0 : i32, i32
  }
  func.func @transform_4(%arg0: i32) -> (i32, i32) {
    %c0_i32 = arith.constant 0 : i32
    %c0_i32_0 = arith.constant 0 : i32
    %c0_i32_1 = arith.constant 0 : i32
    return %c0_i32, %c0_i32_0 : i32, i32
  }
  func.func @transform_5(%arg0: i32) -> (i32, i32) {
    %c0_i32 = arith.constant 0 : i32
    %c0_i32_0 = arith.constant 0 : i32
    %c0_i32_1 = arith.constant 0 : i32
    return %c0_i32, %c0_i32_0 : i32, i32
  }
  func.func @transform_6(%arg0: i32) -> (i32, i32) {
    %c0_i32 = arith.constant 0 : i32
    %c0_i32_0 = arith.constant 0 : i32
    return %arg0, %c0_i32 : i32, i32
  }
  func.func @transform_7(%arg0: i32) -> (i32, i32) {
    %c0_i32 = arith.constant 0 : i32
    %c0_i32_0 = arith.constant 0 : i32
    return %arg0, %c0_i32 : i32, i32
  }
}

module attributes {stable_mosaic.version = 11 : i64} {
  func.func @_edge_main_kernel(%arg0: i32, %arg1: i32, %arg2: memref<1xi32, #tpu.memory_space<smem>>, %arg3: memref<1xi32, #tpu.memory_space<smem>>, %arg4: memref<1x32xi32, #tpu.memory_space<vmem>>, %arg5: memref<32x128xbf16, #tpu.memory_space<vmem>>, %arg6: memref<16x64xf32, #tpu.memory_space<vmem>>, %arg7: memref<16x32xf32, #tpu.memory_space<vmem>>, %arg8: memref<16x32xf32, #tpu.memory_space<vmem>>, %arg9: memref<16x8xf32, #tpu.memory_space<vmem>>, %arg10: memref<128x16xbf16, #tpu.memory_space<vmem>>, %arg11: memref<16x32xbf16, #tpu.memory_space<vmem>>, %arg12: memref<8x32xbf16, #tpu.memory_space<vmem>>, %arg13: memref<1x32x32xbf16, #tpu.memory_space<vmem>>, %arg14: memref<1x32x32xbf16, #tpu.memory_space<vmem>>, %arg15: memref<1x32x32xbf16, #tpu.memory_space<vmem>>, %arg16: memref<1x32x32xbf16, #tpu.memory_space<vmem>>, %arg17: memref<16x32xf32, #tpu.memory_space<vmem>>, %arg18: memref<16x32xbf16, #tpu.memory_space<vmem>>, %arg19: memref<16x128xf32, #tpu.memory_space<vmem>>) attributes {dimension_semantics = [#tpu.dimension_semantics<parallel>, #tpu.dimension_semantics<arbitrary>], iteration_bounds = array<i64: 1, 1>, scalar_prefetch = 2 : i64, scratch_operands = 1 : i64, tpu.core_type = #tpu.core_type<tc>, window_params = [{transform_indices = @transform_0, window_bounds = array<i64: 1, 32>}, {transform_indices = @transform_1, window_bounds = array<i64: 32, 128>}, {transform_indices = @transform_2, window_bounds = array<i64: 16, 64>}, {transform_indices = @transform_3, window_bounds = array<i64: 16, 32>}, {transform_indices = @transform_4, window_bounds = array<i64: 16, 32>}, {transform_indices = @transform_5, window_bounds = array<i64: 16, 8>}, {pipeline_mode = #tpu.pipeline_mode<synchronous>, transform_indices = @transform_6, window_bounds = array<i64: 128, 16>}, {pipeline_mode = #tpu.pipeline_mode<synchronous>, transform_indices = @transform_7, window_bounds = array<i64: 16, 32>}, {pipeline_mode = #tpu.pipeline_mode<synchronous>, transform_indices = @transform_8, window_bounds = array<i64: 8, 32>}, {pipeline_mode = #tpu.pipeline_mode<synchronous>, transform_indices = @transform_9, window_bounds = array<i64: 1, 32, 32>}, {pipeline_mode = #tpu.pipeline_mode<synchronous>, transform_indices = @transform_10, window_bounds = array<i64: 1, 32, 32>}, {pipeline_mode = #tpu.pipeline_mode<synchronous>, transform_indices = @transform_11, window_bounds = array<i64: 1, 32, 32>}, {pipeline_mode = #tpu.pipeline_mode<synchronous>, transform_indices = @transform_12, window_bounds = array<i64: 1, 32, 32>}, {transform_indices = @transform_13, window_bounds = array<i64: 16, 32>}, {transform_indices = @transform_14, window_bounds = array<i64: 16, 32>}]} {
    %c0_i32 = arith.constant 0 : i32
    %0 = arith.cmpi eq, %arg1, %c0_i32 : i32
    %1 = arith.extui %0 : i1 to i32
    %c0_i32_0 = arith.constant 0 : i32
    %2 = arith.cmpi ne, %1, %c0_i32_0 : i32
    scf.if %2 {
      %cst = arith.constant 0.000000e+00 : f32
      %15 = vector.broadcast %cst : f32 to vector<16x128xf32>
      %c0 = arith.constant 0 : index
      %c0_4 = arith.constant 0 : index
      %16 = vector.load %arg19[%c0, %c0_4] : memref<16x128xf32, #tpu.memory_space<vmem>>, vector<16x128xf32>
      tpu.vector_store %arg19[%c0, %c0_4], %15 {strides = array<i32>} : memref<16x128xf32, #tpu.memory_space<vmem>>, vector<16x128xf32>,
    } else {
    }
    %3 = arith.index_cast %arg0 : i32 to index
    %4 = memref.load %arg2[%3] : memref<1xi32, #tpu.memory_space<smem>>
    %5 = arith.cmpi sge, %arg1, %4 : i32
    %6 = arith.index_cast %arg0 : i32 to index
    %7 = memref.load %arg3[%6] : memref<1xi32, #tpu.memory_space<smem>>
    %8 = arith.cmpi slt, %arg1, %7 : i32
    %9 = arith.andi %5, %8 : i1
    %10 = arith.extui %9 : i1 to i32
    %c0_i32_1 = arith.constant 0 : i32
    %11 = arith.cmpi ne, %10, %c0_i32_1 : i32
    scf.if %11 {
      %c16_i32 = arith.constant 16 : i32
      %15 = arith.muli %arg0, %c16_i32 : i32
      %16 = tpu.iota {dimensions = array<i32: 0>} : vector<16x32xi32>
      %17 = vector.broadcast %15 : i32 to vector<16x32xi32>
      %18 = arith.addi %17, %16 : vector<16x32xi32>
      %c0 = arith.constant 0 : index
      %c0_4 = arith.constant 0 : index
      %19 = vector.load %arg4[%c0, %c0_4] : memref<1x32xi32, #tpu.memory_space<vmem>>, vector<1x32xi32>
      %20 = vector.broadcast %19 : vector<1x32xi32> to vector<16x32xi32>
      %21 = arith.cmpi eq, %18, %20 : vector<16x32xi32>
      %22 = arith.extui %21 : vector<16x32xi1> to vector<16x32xi32>
      %23 = arith.sitofp %22 : vector<16x32xi32> to vector<16x32xf32>
      %24 = arith.truncf %23 : vector<16x32xf32> to vector<16x32xbf16>
      %c0_5 = arith.constant 0 : index
      %c0_6 = arith.constant 0 : index
      %25 = vector.load %arg19[%c0_5, %c0_6] : memref<16x128xf32, #tpu.memory_space<vmem>>, vector<16x128xf32>
      %c0_7 = arith.constant 0 : index
      %c0_8 = arith.constant 0 : index
      %26 = vector.load %arg5[%c0_7, %c0_8] : memref<32x128xbf16, #tpu.memory_space<vmem>>, vector<32x128xbf16>
      %cst = arith.constant dense<0.000000e+00> : vector<16x128xf32>
      %27 = tpu.matmul %24, %26, %cst {dimension_numbers = #tpu.dot_dimension_numbers<[1], [0], [0], [1], [0, 0, 1, 1], [], []>} : vector<16x32xbf16>, vector<32x128xbf16>, vector<16x128xf32> -> vector<16x128xf32>
      %28 = arith.addf %25, %27 : vector<16x128xf32>
      %c0_9 = arith.constant 0 : index
      %c0_10 = arith.constant 0 : index
      %29 = vector.load %arg19[%c0_9, %c0_10] : memref<16x128xf32, #tpu.memory_space<vmem>>, vector<16x128xf32>
      tpu.vector_store %arg19[%c0_9, %c0_10], %28 {strides = array<i32>} : memref<16x128xf32, #tpu.memory_space<vmem>>, vector<16x128xf32>,
    } else {
    }
    %c0_i32_2 = arith.constant 0 : i32
    %12 = arith.cmpi eq, %arg1, %c0_i32_2 : i32
    %13 = arith.extui %12 : i1 to i32
    %c0_i32_3 = arith.constant 0 : i32
    %14 = arith.cmpi ne, %13, %c0_i32_3 : i32
    scf.if %14 {
      %c0 = arith.constant 0 : index
      %c0_4 = arith.constant 0 : index
      %15 = vector.load %arg19[%c0, %c0_4] : memref<16x128xf32, #tpu.memory_space<vmem>>, vector<16x128xf32>
      %c0_5 = arith.constant 0 : index
      %c0_6 = arith.constant 0 : index
      %16 = vector.load %arg6[%c0_5, %c0_6] : memref<16x64xf32, #tpu.memory_space<vmem>>, vector<16x64xf32>
      %cst = arith.constant 0.000000e+00 : f32
      %17 = vector.broadcast %cst : f32 to vector<16x128xf32>
      %18 = vector.extract_strided_slice %16 {offsets = [0, 0], sizes = [16, 8], strides = [1, 1]} : vector<16x64xf32> to vector<16x8xf32>
      %19 = vector.extract_strided_slice %15 {offsets = [0, 0], sizes = [16, 16], strides = [1, 1]} : vector<16x128xf32> to vector<16x16xf32>
      %20 = vector.shape_cast %18 : vector<16x8xf32> to vector<16x8x1xf32>
      %21 = vector.shape_cast %19 : vector<16x16xf32> to vector<16x1x16xf32>
      %22 = vector.broadcast %20 : vector<16x8x1xf32> to vector<16x8x16xf32>
      %23 = vector.broadcast %21 : vector<16x1x16xf32> to vector<16x8x16xf32>
      %24 = arith.mulf %22, %23 : vector<16x8x16xf32>
      %25 = vector.shape_cast %24 : vector<16x8x16xf32> to vector<16x128xf32>
      %26 = arith.addf %17, %25 : vector<16x128xf32>
      %27 = vector.extract_strided_slice %16 {offsets = [0, 8], sizes = [16, 8], strides = [1, 1]} : vector<16x64xf32> to vector<16x8xf32>
      %28 = vector.extract_strided_slice %15 {offsets = [0, 16], sizes = [16, 16], strides = [1, 1]} : vector<16x128xf32> to vector<16x16xf32>
      %29 = vector.shape_cast %27 : vector<16x8xf32> to vector<16x8x1xf32>
      %30 = vector.shape_cast %28 : vector<16x16xf32> to vector<16x1x16xf32>
      %31 = vector.broadcast %29 : vector<16x8x1xf32> to vector<16x8x16xf32>
      %32 = vector.broadcast %30 : vector<16x1x16xf32> to vector<16x8x16xf32>
      %33 = arith.mulf %31, %32 : vector<16x8x16xf32>
      %34 = vector.shape_cast %33 : vector<16x8x16xf32> to vector<16x128xf32>
      %35 = arith.addf %26, %34 : vector<16x128xf32>
      %36 = vector.extract_strided_slice %16 {offsets = [0, 16], sizes = [16, 8], strides = [1, 1]} : vector<16x64xf32> to vector<16x8xf32>
      %37 = vector.extract_strided_slice %15 {offsets = [0, 32], sizes = [16, 16], strides = [1, 1]} : vector<16x128xf32> to vector<16x16xf32>
      %38 = vector.shape_cast %36 : vector<16x8xf32> to vector<16x8x1xf32>
      %39 = vector.shape_cast %37 : vector<16x16xf32> to vector<16x1x16xf32>
      %40 = vector.broadcast %38 : vector<16x8x1xf32> to vector<16x8x16xf32>
      %41 = vector.broadcast %39 : vector<16x1x16xf32> to vector<16x8x16xf32>
      %42 = arith.mulf %40, %41 : vector<16x8x16xf32>
      %43 = vector.shape_cast %42 : vector<16x8x16xf32> to vector<16x128xf32>
      %44 = arith.addf %35, %43 : vector<16x128xf32>
      %45 = vector.extract_strided_slice %16 {offsets = [0, 24], sizes = [16, 8], strides = [1, 1]} : vector<16x64xf32> to vector<16x8xf32>
      %46 = vector.extract_strided_slice %15 {offsets = [0, 48], sizes = [16, 16], strides = [1, 1]} : vector<16x128xf32> to vector<16x16xf32>
      %47 = vector.shape_cast %45 : vector<16x8xf32> to vector<16x8x1xf32>
      %48 = vector.shape_cast %46 : vector<16x16xf32> to vector<16x1x16xf32>
      %49 = vector.broadcast %47 : vector<16x8x1xf32> to vector<16x8x16xf32>
      %50 = vector.broadcast %48 : vector<16x1x16xf32> to vector<16x8x16xf32>
      %51 = arith.mulf %49, %50 : vector<16x8x16xf32>
      %52 = vector.shape_cast %51 : vector<16x8x16xf32> to vector<16x128xf32>
      %53 = arith.addf %44, %52 : vector<16x128xf32>
      %54 = vector.extract_strided_slice %16 {offsets = [0, 32], sizes = [16, 8], strides = [1, 1]} : vector<16x64xf32> to vector<16x8xf32>
      %55 = vector.extract_strided_slice %15 {offsets = [0, 64], sizes = [16, 16], strides = [1, 1]} : vector<16x128xf32> to vector<16x16xf32>
      %56 = vector.shape_cast %54 : vector<16x8xf32> to vector<16x8x1xf32>
      %57 = vector.shape_cast %55 : vector<16x16xf32> to vector<16x1x16xf32>
      %58 = vector.broadcast %56 : vector<16x8x1xf32> to vector<16x8x16xf32>
      %59 = vector.broadcast %57 : vector<16x1x16xf32> to vector<16x8x16xf32>
      %60 = arith.mulf %58, %59 : vector<16x8x16xf32>
      %61 = vector.shape_cast %60 : vector<16x8x16xf32> to vector<16x128xf32>
      %62 = arith.addf %53, %61 : vector<16x128xf32>
      %63 = vector.extract_strided_slice %16 {offsets = [0, 40], sizes = [16, 8], strides = [1, 1]} : vector<16x64xf32> to vector<16x8xf32>
      %64 = vector.extract_strided_slice %15 {offsets = [0, 80], sizes = [16, 16], strides = [1, 1]} : vector<16x128xf32> to vector<16x16xf32>
      %65 = vector.shape_cast %63 : vector<16x8xf32> to vector<16x8x1xf32>
      %66 = vector.shape_cast %64 : vector<16x16xf32> to vector<16x1x16xf32>
      %67 = vector.broadcast %65 : vector<16x8x1xf32> to vector<16x8x16xf32>
      %68 = vector.broadcast %66 : vector<16x1x16xf32> to vector<16x8x16xf32>
      %69 = arith.mulf %67, %68 : vector<16x8x16xf32>
      %70 = vector.shape_cast %69 : vector<16x8x16xf32> to vector<16x128xf32>
      %71 = arith.addf %62, %70 : vector<16x128xf32>
      %72 = vector.extract_strided_slice %16 {offsets = [0, 48], sizes = [16, 8], strides = [1, 1]} : vector<16x64xf32> to vector<16x8xf32>
      %73 = vector.extract_strided_slice %15 {offsets = [0, 96], sizes = [16, 16], strides = [1, 1]} : vector<16x128xf32> to vector<16x16xf32>
      %74 = vector.shape_cast %72 : vector<16x8xf32> to vector<16x8x1xf32>
      %75 = vector.shape_cast %73 : vector<16x16xf32> to vector<16x1x16xf32>
      %76 = vector.broadcast %74 : vector<16x8x1xf32> to vector<16x8x16xf32>
      %77 = vector.broadcast %75 : vector<16x1x16xf32> to vector<16x8x16xf32>
      %78 = arith.mulf %76, %77 : vector<16x8x16xf32>
      %79 = vector.shape_cast %78 : vector<16x8x16xf32> to vector<16x128xf32>
      %80 = arith.addf %71, %79 : vector<16x128xf32>
      %81 = vector.extract_strided_slice %16 {offsets = [0, 56], sizes = [16, 8], strides = [1, 1]} : vector<16x64xf32> to vector<16x8xf32>
      %82 = vector.extract_strided_slice %15 {offsets = [0, 112], sizes = [16, 16], strides = [1, 1]} : vector<16x128xf32> to vector<16x16xf32>
      %83 = vector.shape_cast %81 : vector<16x8xf32> to vector<16x8x1xf32>
      %84 = vector.shape_cast %82 : vector<16x16xf32> to vector<16x1x16xf32>
      %85 = vector.broadcast %83 : vector<16x8x1xf32> to vector<16x8x16xf32>
      %86 = vector.broadcast %84 : vector<16x1x16xf32> to vector<16x8x16xf32>
      %87 = arith.mulf %85, %86 : vector<16x8x16xf32>
      %88 = vector.shape_cast %87 : vector<16x8x16xf32> to vector<16x128xf32>
      %89 = arith.addf %80, %88 : vector<16x128xf32>
      %90 = arith.truncf %89 : vector<16x128xf32> to vector<16x128xbf16>
      %c0_7 = arith.constant 0 : index
      %c0_8 = arith.constant 0 : index
      %91 = vector.load %arg10[%c0_7, %c0_8] : memref<128x16xbf16, #tpu.memory_space<vmem>>, vector<128x16xbf16>
      %cst_9 = arith.constant dense<0.000000e+00> : vector<16x16xf32>
      %92 = tpu.matmul %90, %91, %cst_9 {dimension_numbers = #tpu.dot_dimension_numbers<[1], [0], [0], [1], [0, 0, 1, 1], [], []>} : vector<16x128xbf16>, vector<128x16xbf16>, vector<16x16xf32> -> vector<16x16xf32>
      %93 = arith.truncf %92 : vector<16x16xf32> to vector<16x16xbf16>
      %c0_10 = arith.constant 0 : index
      %c0_11 = arith.constant 0 : index
      %94 = vector.load %arg11[%c0_10, %c0_11] : memref<16x32xbf16, #tpu.memory_space<vmem>>, vector<16x32xbf16>
      %cst_12 = arith.constant dense<0.000000e+00> : vector<16x32xf32>
      %95 = tpu.matmul %93, %94, %cst_12 {dimension_numbers = #tpu.dot_dimension_numbers<[1], [0], [0], [1], [0, 0, 1, 1], [], []>} : vector<16x16xbf16>, vector<16x32xbf16>, vector<16x32xf32> -> vector<16x32xf32>
      %96 = arith.negf %95 : vector<16x32xf32>
      %97 = math.exp %96 : vector<16x32xf32>
      %cst_13 = arith.constant 1.000000e+00 : f32
      %98 = vector.broadcast %cst_13 : f32 to vector<16x32xf32>
      %99 = arith.addf %98, %97 : vector<16x32xf32>
      %100 = arith.divf %98, %99 : vector<16x32xf32>
      %101 = arith.mulf %95, %100 : vector<16x32xf32>
      %cst_14 = arith.constant 1.66666663 : f32
      %102 = vector.broadcast %cst_14 : f32 to vector<16x32xf32>
      %103 = arith.mulf %101, %102 : vector<16x32xf32>
      %c0_15 = arith.constant 0 : index
      %c0_16 = arith.constant 0 : index
      %104 = vector.load %arg7[%c0_15, %c0_16] : memref<16x32xf32, #tpu.memory_space<vmem>>, vector<16x32xf32>
      %105 = arith.addf %104, %103 : vector<16x32xf32>
      %cst_17 = arith.constant 0.707106769 : f32
      %106 = vector.broadcast %cst_17 : f32 to vector<16x32xf32>
      %107 = arith.mulf %105, %106 : vector<16x32xf32>
      %c0_18 = arith.constant 0 : index
      %c0_19 = arith.constant 0 : index
      %c0_20 = arith.constant 0 : index
      %108 = vector.load %arg13[%c0_18, %c0_19, %c0_20] : memref<1x32x32xbf16, #tpu.memory_space<vmem>>, vector<1x32x32xbf16>
      %109 = vector.shape_cast %108 : vector<1x32x32xbf16> to vector<32x32xbf16>
      %c0_21 = arith.constant 0 : index
      %c0_22 = arith.constant 0 : index
      %c0_23 = arith.constant 0 : index
      %110 = vector.load %arg14[%c0_21, %c0_22, %c0_23] : memref<1x32x32xbf16, #tpu.memory_space<vmem>>, vector<1x32x32xbf16>
      %111 = vector.shape_cast %110 : vector<1x32x32xbf16> to vector<32x32xbf16>
      %112 = arith.truncf %107 : vector<16x32xf32> to vector<16x32xbf16>
      %cst_24 = arith.constant dense<0.000000e+00> : vector<16x32xf32>
      %113 = tpu.matmul %112, %109, %cst_24 {dimension_numbers = #tpu.dot_dimension_numbers<[1], [0], [0], [1], [0, 0, 1, 1], [], []>} : vector<16x32xbf16>, vector<32x32xbf16>, vector<16x32xf32> -> vector<16x32xf32>
      %114 = arith.negf %113 : vector<16x32xf32>
      %115 = math.exp %114 : vector<16x32xf32>
      %cst_25 = arith.constant 1.000000e+00 : f32
      %116 = vector.broadcast %cst_25 : f32 to vector<16x32xf32>
      %117 = arith.addf %116, %115 : vector<16x32xf32>
      %118 = arith.divf %116, %117 : vector<16x32xf32>
      %119 = arith.mulf %113, %118 : vector<16x32xf32>
      %cst_26 = arith.constant 1.66666663 : f32
      %120 = vector.broadcast %cst_26 : f32 to vector<16x32xf32>
      %121 = arith.mulf %119, %120 : vector<16x32xf32>
      %122 = arith.truncf %121 : vector<16x32xf32> to vector<16x32xbf16>
      %cst_27 = arith.constant dense<0.000000e+00> : vector<16x32xf32>
      %123 = tpu.matmul %122, %111, %cst_27 {dimension_numbers = #tpu.dot_dimension_numbers<[1], [0], [0], [1], [0, 0, 1, 1], [], []>} : vector<16x32xbf16>, vector<32x32xbf16>, vector<16x32xf32> -> vector<16x32xf32>
      %124 = arith.negf %123 : vector<16x32xf32>
      %125 = math.exp %124 : vector<16x32xf32>
      %cst_28 = arith.constant 1.000000e+00 : f32
      %126 = vector.broadcast %cst_28 : f32 to vector<16x32xf32>
      %127 = arith.addf %126, %125 : vector<16x32xf32>
      %128 = arith.divf %126, %127 : vector<16x32xf32>
      %129 = arith.mulf %123, %128 : vector<16x32xf32>
      %cst_29 = arith.constant 1.66666663 : f32
      %130 = vector.broadcast %cst_29 : f32 to vector<16x32xf32>
      %131 = arith.mulf %129, %130 : vector<16x32xf32>
      %132 = arith.addf %107, %131 : vector<16x32xf32>
      %cst_30 = arith.constant 0.707106769 : f32
      %133 = vector.broadcast %cst_30 : f32 to vector<16x32xf32>
      %134 = arith.mulf %132, %133 : vector<16x32xf32>
      %c0_31 = arith.constant 0 : index
      %c0_32 = arith.constant 0 : index
      %135 = vector.load %arg8[%c0_31, %c0_32] : memref<16x32xf32, #tpu.memory_space<vmem>>, vector<16x32xf32>
      %136 = arith.addf %135, %134 : vector<16x32xf32>
      %cst_33 = arith.constant 0.707106769 : f32
      %137 = vector.broadcast %cst_33 : f32 to vector<16x32xf32>
      %138 = arith.mulf %136, %137 : vector<16x32xf32>
      %c0_34 = arith.constant 0 : index
      %c0_35 = arith.constant 0 : index
      %c0_36 = arith.constant 0 : index
      %139 = vector.load %arg15[%c0_34, %c0_35, %c0_36] : memref<1x32x32xbf16, #tpu.memory_space<vmem>>, vector<1x32x32xbf16>
      %140 = vector.shape_cast %139 : vector<1x32x32xbf16> to vector<32x32xbf16>
      %c0_37 = arith.constant 0 : index
      %c0_38 = arith.constant 0 : index
      %c0_39 = arith.constant 0 : index
      %141 = vector.load %arg16[%c0_37, %c0_38, %c0_39] : memref<1x32x32xbf16, #tpu.memory_space<vmem>>, vector<1x32x32xbf16>
      %142 = vector.shape_cast %141 : vector<1x32x32xbf16> to vector<32x32xbf16>
      %143 = arith.truncf %138 : vector<16x32xf32> to vector<16x32xbf16>
      %cst_40 = arith.constant dense<0.000000e+00> : vector<16x32xf32>
      %144 = tpu.matmul %143, %140, %cst_40 {dimension_numbers = #tpu.dot_dimension_numbers<[1], [0], [0], [1], [0, 0, 1, 1], [], []>} : vector<16x32xbf16>, vector<32x32xbf16>, vector<16x32xf32> -> vector<16x32xf32>
      %145 = arith.negf %144 : vector<16x32xf32>
      %146 = math.exp %145 : vector<16x32xf32>
      %cst_41 = arith.constant 1.000000e+00 : f32
      %147 = vector.broadcast %cst_41 : f32 to vector<16x32xf32>
      %148 = arith.addf %147, %146 : vector<16x32xf32>
      %149 = arith.divf %147, %148 : vector<16x32xf32>
      %150 = arith.mulf %144, %149 : vector<16x32xf32>
      %cst_42 = arith.constant 1.66666663 : f32
      %151 = vector.broadcast %cst_42 : f32 to vector<16x32xf32>
      %152 = arith.mulf %150, %151 : vector<16x32xf32>
      %153 = arith.truncf %152 : vector<16x32xf32> to vector<16x32xbf16>
      %cst_43 = arith.constant dense<0.000000e+00> : vector<16x32xf32>
      %154 = tpu.matmul %153, %142, %cst_43 {dimension_numbers = #tpu.dot_dimension_numbers<[1], [0], [0], [1], [0, 0, 1, 1], [], []>} : vector<16x32xbf16>, vector<32x32xbf16>, vector<16x32xf32> -> vector<16x32xf32>
      %155 = arith.negf %154 : vector<16x32xf32>
      %156 = math.exp %155 : vector<16x32xf32>
      %cst_44 = arith.constant 1.000000e+00 : f32
      %157 = vector.broadcast %cst_44 : f32 to vector<16x32xf32>
      %158 = arith.addf %157, %156 : vector<16x32xf32>
      %159 = arith.divf %157, %158 : vector<16x32xf32>
      %160 = arith.mulf %154, %159 : vector<16x32xf32>
      %cst_45 = arith.constant 1.66666663 : f32
      %161 = vector.broadcast %cst_45 : f32 to vector<16x32xf32>
      %162 = arith.mulf %160, %161 : vector<16x32xf32>
      %163 = arith.addf %138, %162 : vector<16x32xf32>
      %cst_46 = arith.constant 0.707106769 : f32
      %164 = vector.broadcast %cst_46 : f32 to vector<16x32xf32>
      %165 = arith.mulf %163, %164 : vector<16x32xf32>
      %c0_47 = arith.constant 0 : index
      %c0_48 = arith.constant 0 : index
      %166 = vector.load %arg17[%c0_47, %c0_48] : memref<16x32xf32, #tpu.memory_space<vmem>>, vector<16x32xf32>
      tpu.vector_store %arg17[%c0_47, %c0_48], %165 {strides = array<i32>} : memref<16x32xf32, #tpu.memory_space<vmem>>, vector<16x32xf32>,
      %c0_49 = arith.constant 0 : index
      %c0_50 = arith.constant 0 : index
      %167 = vector.load %arg9[%c0_49, %c0_50] : memref<16x8xf32, #tpu.memory_space<vmem>>, vector<16x8xf32>
      %168 = arith.truncf %167 : vector<16x8xf32> to vector<16x8xbf16>
      %c0_51 = arith.constant 0 : index
      %c0_52 = arith.constant 0 : index
      %169 = vector.load %arg12[%c0_51, %c0_52] : memref<8x32xbf16, #tpu.memory_space<vmem>>, vector<8x32xbf16>
      %cst_53 = arith.constant dense<0.000000e+00> : vector<16x32xf32>
      %170 = tpu.matmul %168, %169, %cst_53 {dimension_numbers = #tpu.dot_dimension_numbers<[1], [0], [0], [1], [0, 0, 1, 1], [], []>} : vector<16x8xbf16>, vector<8x32xbf16>, vector<16x32xf32> -> vector<16x32xf32>
      %171 = arith.mulf %165, %170 : vector<16x32xf32>
      %172 = arith.truncf %171 : vector<16x32xf32> to vector<16x32xbf16>
      %c0_54 = arith.constant 0 : index
      %c0_55 = arith.constant 0 : index
      %173 = vector.load %arg18[%c0_54, %c0_55] : memref<16x32xbf16, #tpu.memory_space<vmem>>, vector<16x32xbf16>
      tpu.vector_store %arg18[%c0_54, %c0_55], %172 {strides = array<i32>} : memref<16x32xbf16, #tpu.memory_space<vmem>>, vector<16x32xbf16>,
    } else {
    }
    return
  }
  func.func @transform_0(%arg0: i32, %arg1: i32, %arg2: memref<1xi32, #tpu.memory_space<smem>>, %arg3: memref<1xi32, #tpu.memory_space<smem>>) -> (i32, i32) {
    %0 = arith.index_cast %arg0 : i32 to index
    %1 = memref.load %arg2[%0] : memref<1xi32, #tpu.memory_space<smem>>
    %2 = arith.index_cast %arg0 : i32 to index
    %3 = memref.load %arg3[%2] : memref<1xi32, #tpu.memory_space<smem>>
    %c1_i32 = arith.constant 1 : i32
    %4 = arith.subi %3, %c1_i32 : i32
    %5 = arith.maxsi %4, %1 : i32
    %6 = arith.maxsi %1, %arg1 : i32
    %7 = arith.minsi %5, %6 : i32
    %c0_i32 = arith.constant 0 : i32
    %c0_i32_0 = arith.constant 0 : i32
    return %c0_i32, %7 : i32, i32
  }
  func.func @transform_1(%arg0: i32, %arg1: i32, %arg2: memref<1xi32, #tpu.memory_space<smem>>, %arg3: memref<1xi32, #tpu.memory_space<smem>>) -> (i32, i32) {
    %0 = arith.index_cast %arg0 : i32 to index
    %1 = memref.load %arg2[%0] : memref<1xi32, #tpu.memory_space<smem>>
    %2 = arith.index_cast %arg0 : i32 to index
    %3 = memref.load %arg3[%2] : memref<1xi32, #tpu.memory_space<smem>>
    %c1_i32 = arith.constant 1 : i32
    %4 = arith.subi %3, %c1_i32 : i32
    %5 = arith.maxsi %4, %1 : i32
    %6 = arith.maxsi %1, %arg1 : i32
    %7 = arith.minsi %5, %6 : i32
    %c0_i32 = arith.constant 0 : i32
    %c0_i32_0 = arith.constant 0 : i32
    return %7, %c0_i32 : i32, i32
  }
  func.func @transform_2(%arg0: i32, %arg1: i32, %arg2: memref<1xi32, #tpu.memory_space<smem>>, %arg3: memref<1xi32, #tpu.memory_space<smem>>) -> (i32, i32) {
    %c0_i32 = arith.constant 0 : i32
    %c0_i32_0 = arith.constant 0 : i32
    return %arg0, %c0_i32 : i32, i32
  }
  func.func @transform_3(%arg0: i32, %arg1: i32, %arg2: memref<1xi32, #tpu.memory_space<smem>>, %arg3: memref<1xi32, #tpu.memory_space<smem>>) -> (i32, i32) {
    %c0_i32 = arith.constant 0 : i32
    %c0_i32_0 = arith.constant 0 : i32
    return %arg0, %c0_i32 : i32, i32
  }
  func.func @transform_4(%arg0: i32, %arg1: i32, %arg2: memref<1xi32, #tpu.memory_space<smem>>, %arg3: memref<1xi32, #tpu.memory_space<smem>>) -> (i32, i32) {
    %c0_i32 = arith.constant 0 : i32
    %c0_i32_0 = arith.constant 0 : i32
    return %arg0, %c0_i32 : i32, i32
  }
  func.func @transform_5(%arg0: i32, %arg1: i32, %arg2: memref<1xi32, #tpu.memory_space<smem>>, %arg3: memref<1xi32, #tpu.memory_space<smem>>) -> (i32, i32) {
    %c0_i32 = arith.constant 0 : i32
    %c0_i32_0 = arith.constant 0 : i32
    return %arg0, %c0_i32 : i32, i32
  }
  func.func @transform_6(%arg0: i32, %arg1: i32, %arg2: memref<1xi32, #tpu.memory_space<smem>>, %arg3: memref<1xi32, #tpu.memory_space<smem>>) -> (i32, i32) {
    %c0_i32 = arith.constant 0 : i32
    %c0_i32_0 = arith.constant 0 : i32
    %c0_i32_1 = arith.constant 0 : i32
    return %c0_i32, %c0_i32_0 : i32, i32
  }
  func.func @transform_7(%arg0: i32, %arg1: i32, %arg2: memref<1xi32, #tpu.memory_space<smem>>, %arg3: memref<1xi32, #tpu.memory_space<smem>>) -> (i32, i32) {
    %c0_i32 = arith.constant 0 : i32
    %c0_i32_0 = arith.constant 0 : i32
    %c0_i32_1 = arith.constant 0 : i32
    return %c0_i32, %c0_i32_0 : i32, i32
  }
  func.func @transform_8(%arg0: i32, %arg1: i32, %arg2: memref<1xi32, #tpu.memory_space<smem>>, %arg3: memref<1xi32, #tpu.memory_space<smem>>) -> (i32, i32) {
    %c0_i32 = arith.constant 0 : i32
    %c0_i32_0 = arith.constant 0 : i32
    %c0_i32_1 = arith.constant 0 : i32
    return %c0_i32, %c0_i32_0 : i32, i32
  }
  func.func @transform_9(%arg0: i32, %arg1: i32, %arg2: memref<1xi32, #tpu.memory_space<smem>>, %arg3: memref<1xi32, #tpu.memory_space<smem>>) -> (i32, i32, i32) {
    %c0_i32 = arith.constant 0 : i32
    %c0_i32_0 = arith.constant 0 : i32
    %c0_i32_1 = arith.constant 0 : i32
    %c0_i32_2 = arith.constant 0 : i32
    return %c0_i32, %c0_i32_0, %c0_i32_1 : i32, i32, i32
  }
  func.func @transform_10(%arg0: i32, %arg1: i32, %arg2: memref<1xi32, #tpu.memory_space<smem>>, %arg3: memref<1xi32, #tpu.memory_space<smem>>) -> (i32, i32, i32) {
    %c0_i32 = arith.constant 0 : i32
    %c0_i32_0 = arith.constant 0 : i32
    %c0_i32_1 = arith.constant 0 : i32
    %c0_i32_2 = arith.constant 0 : i32
    return %c0_i32, %c0_i32_0, %c0_i32_1 : i32, i32, i32
  }
  func.func @transform_11(%arg0: i32, %arg1: i32, %arg2: memref<1xi32, #tpu.memory_space<smem>>, %arg3: memref<1xi32, #tpu.memory_space<smem>>) -> (i32, i32, i32) {
    %c0_i32 = arith.constant 0 : i32
    %c0_i32_0 = arith.constant 0 : i32
    %c0_i32_1 = arith.constant 0 : i32
    %c0_i32_2 = arith.constant 0 : i32
    return %c0_i32, %c0_i32_0, %c0_i32_1 : i32, i32, i32
  }
  func.func @transform_12(%arg0: i32, %arg1: i32, %arg2: memref<1xi32, #tpu.memory_space<smem>>, %arg3: memref<1xi32, #tpu.memory_space<smem>>) -> (i32, i32, i32) {
    %c0_i32 = arith.constant 0 : i32
    %c0_i32_0 = arith.constant 0 : i32
    %c0_i32_1 = arith.constant 0 : i32
    %c0_i32_2 = arith.constant 0 : i32
    return %c0_i32, %c0_i32_0, %c0_i32_1 : i32, i32, i32
  }
  func.func @transform_13(%arg0: i32, %arg1: i32, %arg2: memref<1xi32, #tpu.memory_space<smem>>, %arg3: memref<1xi32, #tpu.memory_space<smem>>) -> (i32, i32) {
    %c0_i32 = arith.constant 0 : i32
    %c0_i32_0 = arith.constant 0 : i32
    return %arg0, %c0_i32 : i32, i32
  }
  func.func @transform_14(%arg0: i32, %arg1: i32, %arg2: memref<1xi32, #tpu.memory_space<smem>>, %arg3: memref<1xi32, #tpu.memory_space<smem>>) -> (i32, i32) {
    %c0_i32 = arith.constant 0 : i32
    %c0_i32_0 = arith.constant 0 : i32
    return %arg0, %c0_i32 : i32, i32
  }
}

module attributes {stable_mosaic.version = 11 : i64} {
  func.func @_atom_update_kernel(%arg0: i32, %arg1: i32, %arg2: memref<1xi32, #tpu.memory_space<smem>>, %arg3: memref<1xi32, #tpu.memory_space<smem>>, %arg4: memref<1x16xi32, #tpu.memory_space<vmem>>, %arg5: memref<16x32xbf16, #tpu.memory_space<vmem>>, %arg6: memref<8x32xf32, #tpu.memory_space<vmem>>, %arg7: memref<32x32xbf16, #tpu.memory_space<vmem>>, %arg8: memref<1x32x32xbf16, #tpu.memory_space<vmem>>, %arg9: memref<1x32x32xbf16, #tpu.memory_space<vmem>>, %arg10: memref<1x32x32xbf16, #tpu.memory_space<vmem>>, %arg11: memref<1x32x32xbf16, #tpu.memory_space<vmem>>, %arg12: memref<8x32xf32, #tpu.memory_space<vmem>>, %arg13: memref<8x32xf32, #tpu.memory_space<vmem>>) attributes {dimension_semantics = [#tpu.dimension_semantics<parallel>, #tpu.dimension_semantics<arbitrary>], iteration_bounds = array<i64: 1, 1>, scalar_prefetch = 2 : i64, scratch_operands = 1 : i64, tpu.core_type = #tpu.core_type<tc>, window_params = [{transform_indices = @transform_0, window_bounds = array<i64: 1, 16>}, {transform_indices = @transform_1, window_bounds = array<i64: 16, 32>}, {transform_indices = @transform_2, window_bounds = array<i64: 8, 32>}, {pipeline_mode = #tpu.pipeline_mode<synchronous>, transform_indices = @transform_3, window_bounds = array<i64: 32, 32>}, {pipeline_mode = #tpu.pipeline_mode<synchronous>, transform_indices = @transform_4, window_bounds = array<i64: 1, 32, 32>}, {pipeline_mode = #tpu.pipeline_mode<synchronous>, transform_indices = @transform_5, window_bounds = array<i64: 1, 32, 32>}, {pipeline_mode = #tpu.pipeline_mode<synchronous>, transform_indices = @transform_6, window_bounds = array<i64: 1, 32, 32>}, {pipeline_mode = #tpu.pipeline_mode<synchronous>, transform_indices = @transform_7, window_bounds = array<i64: 1, 32, 32>}, {transform_indices = @transform_8, window_bounds = array<i64: 8, 32>}]} {
    %c0_i32 = arith.constant 0 : i32
    %0 = arith.cmpi eq, %arg1, %c0_i32 : i32
    %1 = arith.extui %0 : i1 to i32
    %c0_i32_0 = arith.constant 0 : i32
    %2 = arith.cmpi ne, %1, %c0_i32_0 : i32
    scf.if %2 {
      %cst = arith.constant 0.000000e+00 : f32
      %15 = vector.broadcast %cst : f32 to vector<8x32xf32>
      %c0 = arith.constant 0 : index
      %c0_4 = arith.constant 0 : index
      %16 = vector.load %arg13[%c0, %c0_4] : memref<8x32xf32, #tpu.memory_space<vmem>>, vector<8x32xf32>
      tpu.vector_store %arg13[%c0, %c0_4], %15 {strides = array<i32>} : memref<8x32xf32, #tpu.memory_space<vmem>>, vector<8x32xf32>,
    } else {
    }
    %3 = arith.index_cast %arg0 : i32 to index
    %4 = memref.load %arg2[%3] : memref<1xi32, #tpu.memory_space<smem>>
    %5 = arith.cmpi sge, %arg1, %4 : i32
    %6 = arith.index_cast %arg0 : i32 to index
    %7 = memref.load %arg3[%6] : memref<1xi32, #tpu.memory_space<smem>>
    %8 = arith.cmpi slt, %arg1, %7 : i32
    %9 = arith.andi %5, %8 : i1
    %10 = arith.extui %9 : i1 to i32
    %c0_i32_1 = arith.constant 0 : i32
    %11 = arith.cmpi ne, %10, %c0_i32_1 : i32
    scf.if %11 {
      %c8_i32 = arith.constant 8 : i32
      %15 = arith.muli %arg0, %c8_i32 : i32
      %16 = tpu.iota {dimensions = array<i32: 0>} : vector<8x16xi32>
      %17 = vector.broadcast %15 : i32 to vector<8x16xi32>
      %18 = arith.addi %17, %16 : vector<8x16xi32>
      %c0 = arith.constant 0 : index
      %c0_4 = arith.constant 0 : index
      %19 = vector.load %arg4[%c0, %c0_4] : memref<1x16xi32, #tpu.memory_space<vmem>>, vector<1x16xi32>
      %20 = vector.broadcast %19 : vector<1x16xi32> to vector<8x16xi32>
      %21 = arith.cmpi eq, %18, %20 : vector<8x16xi32>
      %22 = arith.extui %21 : vector<8x16xi1> to vector<8x16xi32>
      %23 = arith.sitofp %22 : vector<8x16xi32> to vector<8x16xf32>
      %24 = arith.truncf %23 : vector<8x16xf32> to vector<8x16xbf16>
      %c0_5 = arith.constant 0 : index
      %c0_6 = arith.constant 0 : index
      %25 = vector.load %arg13[%c0_5, %c0_6] : memref<8x32xf32, #tpu.memory_space<vmem>>, vector<8x32xf32>
      %c0_7 = arith.constant 0 : index
      %c0_8 = arith.constant 0 : index
      %26 = vector.load %arg5[%c0_7, %c0_8] : memref<16x32xbf16, #tpu.memory_space<vmem>>, vector<16x32xbf16>
      %cst = arith.constant dense<0.000000e+00> : vector<8x32xf32>
      %27 = tpu.matmul %24, %26, %cst {dimension_numbers = #tpu.dot_dimension_numbers<[1], [0], [0], [1], [0, 0, 1, 1], [], []>} : vector<8x16xbf16>, vector<16x32xbf16>, vector<8x32xf32> -> vector<8x32xf32>
      %28 = arith.addf %25, %27 : vector<8x32xf32>
      %c0_9 = arith.constant 0 : index
      %c0_10 = arith.constant 0 : index
      %29 = vector.load %arg13[%c0_9, %c0_10] : memref<8x32xf32, #tpu.memory_space<vmem>>, vector<8x32xf32>
      tpu.vector_store %arg13[%c0_9, %c0_10], %28 {strides = array<i32>} : memref<8x32xf32, #tpu.memory_space<vmem>>, vector<8x32xf32>,
    } else {
    }
    %c0_i32_2 = arith.constant 0 : i32
    %12 = arith.cmpi eq, %arg1, %c0_i32_2 : i32
    %13 = arith.extui %12 : i1 to i32
    %c0_i32_3 = arith.constant 0 : i32
    %14 = arith.cmpi ne, %13, %c0_i32_3 : i32
    scf.if %14 {
      %c0 = arith.constant 0 : index
      %c0_4 = arith.constant 0 : index
      %15 = vector.load %arg13[%c0, %c0_4] : memref<8x32xf32, #tpu.memory_space<vmem>>, vector<8x32xf32>
      %16 = arith.truncf %15 : vector<8x32xf32> to vector<8x32xbf16>
      %c0_5 = arith.constant 0 : index
      %c0_6 = arith.constant 0 : index
      %17 = vector.load %arg7[%c0_5, %c0_6] : memref<32x32xbf16, #tpu.memory_space<vmem>>, vector<32x32xbf16>
      %cst = arith.constant dense<0.000000e+00> : vector<8x32xf32>
      %18 = tpu.matmul %16, %17, %cst {dimension_numbers = #tpu.dot_dimension_numbers<[1], [0], [0], [1], [0, 0, 1, 1], [], []>} : vector<8x32xbf16>, vector<32x32xbf16>, vector<8x32xf32> -> vector<8x32xf32>
      %19 = arith.negf %18 : vector<8x32xf32>
      %20 = math.exp %19 : vector<8x32xf32>
      %cst_7 = arith.constant 1.000000e+00 : f32
      %21 = vector.broadcast %cst_7 : f32 to vector<8x32xf32>
      %22 = arith.addf %21, %20 : vector<8x32xf32>
      %23 = arith.divf %21, %22 : vector<8x32xf32>
      %24 = arith.mulf %18, %23 : vector<8x32xf32>
      %cst_8 = arith.constant 1.66666663 : f32
      %25 = vector.broadcast %cst_8 : f32 to vector<8x32xf32>
      %26 = arith.mulf %24, %25 : vector<8x32xf32>
      %c0_9 = arith.constant 0 : index
      %c0_10 = arith.constant 0 : index
      %c0_11 = arith.constant 0 : index
      %27 = vector.load %arg10[%c0_9, %c0_10, %c0_11] : memref<1x32x32xbf16, #tpu.memory_space<vmem>>, vector<1x32x32xbf16>
      %28 = vector.shape_cast %27 : vector<1x32x32xbf16> to vector<32x32xbf16>
      %c0_12 = arith.constant 0 : index
      %c0_13 = arith.constant 0 : index
      %c0_14 = arith.constant 0 : index
      %29 = vector.load %arg11[%c0_12, %c0_13, %c0_14] : memref<1x32x32xbf16, #tpu.memory_space<vmem>>, vector<1x32x32xbf16>
      %30 = vector.shape_cast %29 : vector<1x32x32xbf16> to vector<32x32xbf16>
      %31 = arith.truncf %26 : vector<8x32xf32> to vector<8x32xbf16>
      %cst_15 = arith.constant dense<0.000000e+00> : vector<8x32xf32>
      %32 = tpu.matmul %31, %28, %cst_15 {dimension_numbers = #tpu.dot_dimension_numbers<[1], [0], [0], [1], [0, 0, 1, 1], [], []>} : vector<8x32xbf16>, vector<32x32xbf16>, vector<8x32xf32> -> vector<8x32xf32>
      %33 = arith.negf %32 : vector<8x32xf32>
      %34 = math.exp %33 : vector<8x32xf32>
      %cst_16 = arith.constant 1.000000e+00 : f32
      %35 = vector.broadcast %cst_16 : f32 to vector<8x32xf32>
      %36 = arith.addf %35, %34 : vector<8x32xf32>
      %37 = arith.divf %35, %36 : vector<8x32xf32>
      %38 = arith.mulf %32, %37 : vector<8x32xf32>
      %cst_17 = arith.constant 1.66666663 : f32
      %39 = vector.broadcast %cst_17 : f32 to vector<8x32xf32>
      %40 = arith.mulf %38, %39 : vector<8x32xf32>
      %41 = arith.truncf %40 : vector<8x32xf32> to vector<8x32xbf16>
      %cst_18 = arith.constant dense<0.000000e+00> : vector<8x32xf32>
      %42 = tpu.matmul %41, %30, %cst_18 {dimension_numbers = #tpu.dot_dimension_numbers<[1], [0], [0], [1], [0, 0, 1, 1], [], []>} : vector<8x32xbf16>, vector<32x32xbf16>, vector<8x32xf32> -> vector<8x32xf32>
      %43 = arith.negf %42 : vector<8x32xf32>
      %44 = math.exp %43 : vector<8x32xf32>
      %cst_19 = arith.constant 1.000000e+00 : f32
      %45 = vector.broadcast %cst_19 : f32 to vector<8x32xf32>
      %46 = arith.addf %45, %44 : vector<8x32xf32>
      %47 = arith.divf %45, %46 : vector<8x32xf32>
      %48 = arith.mulf %42, %47 : vector<8x32xf32>
      %cst_20 = arith.constant 1.66666663 : f32
      %49 = vector.broadcast %cst_20 : f32 to vector<8x32xf32>
      %50 = arith.mulf %48, %49 : vector<8x32xf32>
      %51 = arith.addf %26, %50 : vector<8x32xf32>
      %cst_21 = arith.constant 0.707106769 : f32
      %52 = vector.broadcast %cst_21 : f32 to vector<8x32xf32>
      %53 = arith.mulf %51, %52 : vector<8x32xf32>
      %c0_22 = arith.constant 0 : index
      %c0_23 = arith.constant 0 : index
      %54 = vector.load %arg6[%c0_22, %c0_23] : memref<8x32xf32, #tpu.memory_space<vmem>>, vector<8x32xf32>
      %cst_24 = arith.constant 1.000000e+00 : f32
      %55 = vector.broadcast %cst_24 : f32 to vector<8x32xf32>
      %56 = arith.mulf %54, %55 : vector<8x32xf32>
      %c0_25 = arith.constant 0 : index
      %c0_26 = arith.constant 0 : index
      %c0_27 = arith.constant 0 : index
      %57 = vector.load %arg8[%c0_25, %c0_26, %c0_27] : memref<1x32x32xbf16, #tpu.memory_space<vmem>>, vector<1x32x32xbf16>
      %58 = vector.shape_cast %57 : vector<1x32x32xbf16> to vector<32x32xbf16>
      %c0_28 = arith.constant 0 : index
      %c0_29 = arith.constant 0 : index
      %c0_30 = arith.constant 0 : index
      %59 = vector.load %arg9[%c0_28, %c0_29, %c0_30] : memref<1x32x32xbf16, #tpu.memory_space<vmem>>, vector<1x32x32xbf16>
      %60 = vector.shape_cast %59 : vector<1x32x32xbf16> to vector<32x32xbf16>
      %61 = arith.truncf %56 : vector<8x32xf32> to vector<8x32xbf16>
      %cst_31 = arith.constant dense<0.000000e+00> : vector<8x32xf32>
      %62 = tpu.matmul %61, %58, %cst_31 {dimension_numbers = #tpu.dot_dimension_numbers<[1], [0], [0], [1], [0, 0, 1, 1], [], []>} : vector<8x32xbf16>, vector<32x32xbf16>, vector<8x32xf32> -> vector<8x32xf32>
      %63 = arith.negf %62 : vector<8x32xf32>
      %64 = math.exp %63 : vector<8x32xf32>
      %cst_32 = arith.constant 1.000000e+00 : f32
      %65 = vector.broadcast %cst_32 : f32 to vector<8x32xf32>
      %66 = arith.addf %65, %64 : vector<8x32xf32>
      %67 = arith.divf %65, %66 : vector<8x32xf32>
      %68 = arith.mulf %62, %67 : vector<8x32xf32>
      %cst_33 = arith.constant 1.66666663 : f32
      %69 = vector.broadcast %cst_33 : f32 to vector<8x32xf32>
      %70 = arith.mulf %68, %69 : vector<8x32xf32>
      %71 = arith.truncf %70 : vector<8x32xf32> to vector<8x32xbf16>
      %cst_34 = arith.constant dense<0.000000e+00> : vector<8x32xf32>
      %72 = tpu.matmul %71, %60, %cst_34 {dimension_numbers = #tpu.dot_dimension_numbers<[1], [0], [0], [1], [0, 0, 1, 1], [], []>} : vector<8x32xbf16>, vector<32x32xbf16>, vector<8x32xf32> -> vector<8x32xf32>
      %73 = arith.negf %72 : vector<8x32xf32>
      %74 = math.exp %73 : vector<8x32xf32>
      %cst_35 = arith.constant 1.000000e+00 : f32
      %75 = vector.broadcast %cst_35 : f32 to vector<8x32xf32>
      %76 = arith.addf %75, %74 : vector<8x32xf32>
      %77 = arith.divf %75, %76 : vector<8x32xf32>
      %78 = arith.mulf %72, %77 : vector<8x32xf32>
      %cst_36 = arith.constant 1.66666663 : f32
      %79 = vector.broadcast %cst_36 : f32 to vector<8x32xf32>
      %80 = arith.mulf %78, %79 : vector<8x32xf32>
      %81 = arith.addf %56, %80 : vector<8x32xf32>
      %cst_37 = arith.constant 0.707106769 : f32
      %82 = vector.broadcast %cst_37 : f32 to vector<8x32xf32>
      %83 = arith.mulf %81, %82 : vector<8x32xf32>
      %84 = arith.addf %83, %53 : vector<8x32xf32>
      %cst_38 = arith.constant 0.707106769 : f32
      %85 = vector.broadcast %cst_38 : f32 to vector<8x32xf32>
      %86 = arith.mulf %84, %85 : vector<8x32xf32>
      %c0_39 = arith.constant 0 : index
      %c0_40 = arith.constant 0 : index
      %87 = vector.load %arg12[%c0_39, %c0_40] : memref<8x32xf32, #tpu.memory_space<vmem>>, vector<8x32xf32>
      tpu.vector_store %arg12[%c0_39, %c0_40], %86 {strides = array<i32>} : memref<8x32xf32, #tpu.memory_space<vmem>>, vector<8x32xf32>,
    } else {
    }
    return
  }
  func.func @transform_0(%arg0: i32, %arg1: i32, %arg2: memref<1xi32, #tpu.memory_space<smem>>, %arg3: memref<1xi32, #tpu.memory_space<smem>>) -> (i32, i32) {
    %0 = arith.index_cast %arg0 : i32 to index
    %1 = memref.load %arg2[%0] : memref<1xi32, #tpu.memory_space<smem>>
    %2 = arith.index_cast %arg0 : i32 to index
    %3 = memref.load %arg3[%2] : memref<1xi32, #tpu.memory_space<smem>>
    %c1_i32 = arith.constant 1 : i32
    %4 = arith.subi %3, %c1_i32 : i32
    %5 = arith.maxsi %4, %1 : i32
    %6 = arith.maxsi %1, %arg1 : i32
    %7 = arith.minsi %5, %6 : i32
    %c0_i32 = arith.constant 0 : i32
    %c0_i32_0 = arith.constant 0 : i32
    return %c0_i32, %7 : i32, i32
  }
  func.func @transform_1(%arg0: i32, %arg1: i32, %arg2: memref<1xi32, #tpu.memory_space<smem>>, %arg3: memref<1xi32, #tpu.memory_space<smem>>) -> (i32, i32) {
    %0 = arith.index_cast %arg0 : i32 to index
    %1 = memref.load %arg2[%0] : memref<1xi32, #tpu.memory_space<smem>>
    %2 = arith.index_cast %arg0 : i32 to index
    %3 = memref.load %arg3[%2] : memref<1xi32, #tpu.memory_space<smem>>
    %c1_i32 = arith.constant 1 : i32
    %4 = arith.subi %3, %c1_i32 : i32
    %5 = arith.maxsi %4, %1 : i32
    %6 = arith.maxsi %1, %arg1 : i32
    %7 = arith.minsi %5, %6 : i32
    %c0_i32 = arith.constant 0 : i32
    %c0_i32_0 = arith.constant 0 : i32
    return %7, %c0_i32 : i32, i32
  }
  func.func @transform_2(%arg0: i32, %arg1: i32, %arg2: memref<1xi32, #tpu.memory_space<smem>>, %arg3: memref<1xi32, #tpu.memory_space<smem>>) -> (i32, i32) {
    %c0_i32 = arith.constant 0 : i32
    %c0_i32_0 = arith.constant 0 : i32
    return %arg0, %c0_i32 : i32, i32
  }
  func.func @transform_3(%arg0: i32, %arg1: i32, %arg2: memref<1xi32, #tpu.memory_space<smem>>, %arg3: memref<1xi32, #tpu.memory_space<smem>>) -> (i32, i32) {
    %c0_i32 = arith.constant 0 : i32
    %c0_i32_0 = arith.constant 0 : i32
    %c0_i32_1 = arith.constant 0 : i32
    return %c0_i32, %c0_i32_0 : i32, i32
  }
  func.func @transform_4(%arg0: i32, %arg1: i32, %arg2: memref<1xi32, #tpu.memory_space<smem>>, %arg3: memref<1xi32, #tpu.memory_space<smem>>) -> (i32, i32, i32) {
    %c0_i32 = arith.constant 0 : i32
    %c0_i32_0 = arith.constant 0 : i32
    %c0_i32_1 = arith.constant 0 : i32
    %c0_i32_2 = arith.constant 0 : i32
    return %c0_i32, %c0_i32_0, %c0_i32_1 : i32, i32, i32
  }
  func.func @transform_5(%arg0: i32, %arg1: i32, %arg2: memref<1xi32, #tpu.memory_space<smem>>, %arg3: memref<1xi32, #tpu.memory_space<smem>>) -> (i32, i32, i32) {
    %c0_i32 = arith.constant 0 : i32
    %c0_i32_0 = arith.constant 0 : i32
    %c0_i32_1 = arith.constant 0 : i32
    %c0_i32_2 = arith.constant 0 : i32
    return %c0_i32, %c0_i32_0, %c0_i32_1 : i32, i32, i32
  }
  func.func @transform_6(%arg0: i32, %arg1: i32, %arg2: memref<1xi32, #tpu.memory_space<smem>>, %arg3: memref<1xi32, #tpu.memory_space<smem>>) -> (i32, i32, i32) {
    %c0_i32 = arith.constant 0 : i32
    %c0_i32_0 = arith.constant 0 : i32
    %c0_i32_1 = arith.constant 0 : i32
    %c0_i32_2 = arith.constant 0 : i32
    return %c0_i32, %c0_i32_0, %c0_i32_1 : i32, i32, i32
  }
  func.func @transform_7(%arg0: i32, %arg1: i32, %arg2: memref<1xi32, #tpu.memory_space<smem>>, %arg3: memref<1xi32, #tpu.memory_space<smem>>) -> (i32, i32, i32) {
    %c0_i32 = arith.constant 0 : i32
    %c0_i32_0 = arith.constant 0 : i32
    %c0_i32_1 = arith.constant 0 : i32
    %c0_i32_2 = arith.constant 0 : i32
    return %c0_i32, %c0_i32_0, %c0_i32_1 : i32, i32, i32
  }
  func.func @transform_8(%arg0: i32, %arg1: i32, %arg2: memref<1xi32, #tpu.memory_space<smem>>, %arg3: memref<1xi32, #tpu.memory_space<smem>>) -> (i32, i32) {
    %c0_i32 = arith.constant 0 : i32
    %c0_i32_0 = arith.constant 0 : i32
    return %arg0, %c0_i32 : i32, i32
  }
}

module attributes {stable_mosaic.version = 11 : i64} {
  func.func @_edge_out_kernel(%arg0: i32, %arg1: memref<16x32xf32, #tpu.memory_space<vmem>>, %arg2: memref<16x32xf32, #tpu.memory_space<vmem>>, %arg3: memref<16x32xf32, #tpu.memory_space<vmem>>, %arg4: memref<32x32xbf16, #tpu.memory_space<vmem>>, %arg5: memref<32x32xbf16, #tpu.memory_space<vmem>>, %arg6: memref<32x32xbf16, #tpu.memory_space<vmem>>, %arg7: memref<1x32x32xbf16, #tpu.memory_space<vmem>>, %arg8: memref<1x32x32xbf16, #tpu.memory_space<vmem>>, %arg9: memref<16x32xf32, #tpu.memory_space<vmem>>) attributes {dimension_semantics = [#tpu.dimension_semantics<parallel>], iteration_bounds = array<i64: 1>, scalar_prefetch = 0 : i64, scratch_operands = 0 : i64, tpu.core_type = #tpu.core_type<tc>, window_params = [{transform_indices = @transform_0, window_bounds = array<i64: 16, 32>}, {transform_indices = @transform_1, window_bounds = array<i64: 16, 32>}, {transform_indices = @transform_2, window_bounds = array<i64: 16, 32>}, {pipeline_mode = #tpu.pipeline_mode<synchronous>, transform_indices = @transform_3, window_bounds = array<i64: 32, 32>}, {pipeline_mode = #tpu.pipeline_mode<synchronous>, transform_indices = @transform_4, window_bounds = array<i64: 32, 32>}, {pipeline_mode = #tpu.pipeline_mode<synchronous>, transform_indices = @transform_5, window_bounds = array<i64: 32, 32>}, {pipeline_mode = #tpu.pipeline_mode<synchronous>, transform_indices = @transform_6, window_bounds = array<i64: 1, 32, 32>}, {pipeline_mode = #tpu.pipeline_mode<synchronous>, transform_indices = @transform_7, window_bounds = array<i64: 1, 32, 32>}, {transform_indices = @transform_8, window_bounds = array<i64: 16, 32>}]} {
    %c0 = arith.constant 0 : index
    %c0_0 = arith.constant 0 : index
    %0 = vector.load %arg3[%c0, %c0_0] : memref<16x32xf32, #tpu.memory_space<vmem>>, vector<16x32xf32>
    %c0_1 = arith.constant 0 : index
    %c0_2 = arith.constant 0 : index
    %1 = vector.load %arg1[%c0_1, %c0_2] : memref<16x32xf32, #tpu.memory_space<vmem>>, vector<16x32xf32>
    %2 = arith.truncf %1 : vector<16x32xf32> to vector<16x32xbf16>
    %c0_3 = arith.constant 0 : index
    %c0_4 = arith.constant 0 : index
    %3 = vector.load %arg4[%c0_3, %c0_4] : memref<32x32xbf16, #tpu.memory_space<vmem>>, vector<32x32xbf16>
    %cst = arith.constant dense<0.000000e+00> : vector<16x32xf32>
    %4 = tpu.matmul %2, %3, %cst {dimension_numbers = #tpu.dot_dimension_numbers<[1], [0], [0], [1], [0, 0, 1, 1], [], []>} : vector<16x32xbf16>, vector<32x32xbf16>, vector<16x32xf32> -> vector<16x32xf32>
    %c0_5 = arith.constant 0 : index
    %c0_6 = arith.constant 0 : index
    %5 = vector.load %arg2[%c0_5, %c0_6] : memref<16x32xf32, #tpu.memory_space<vmem>>, vector<16x32xf32>
    %6 = arith.truncf %5 : vector<16x32xf32> to vector<16x32xbf16>
    %c0_7 = arith.constant 0 : index
    %c0_8 = arith.constant 0 : index
    %7 = vector.load %arg5[%c0_7, %c0_8] : memref<32x32xbf16, #tpu.memory_space<vmem>>, vector<32x32xbf16>
    %cst_9 = arith.constant dense<0.000000e+00> : vector<16x32xf32>
    %8 = tpu.matmul %6, %7, %cst_9 {dimension_numbers = #tpu.dot_dimension_numbers<[1], [0], [0], [1], [0, 0, 1, 1], [], []>} : vector<16x32xbf16>, vector<32x32xbf16>, vector<16x32xf32> -> vector<16x32xf32>
    %9 = arith.addf %4, %8 : vector<16x32xf32>
    %10 = arith.truncf %0 : vector<16x32xf32> to vector<16x32xbf16>
    %c0_10 = arith.constant 0 : index
    %c0_11 = arith.constant 0 : index
    %11 = vector.load %arg6[%c0_10, %c0_11] : memref<32x32xbf16, #tpu.memory_space<vmem>>, vector<32x32xbf16>
    %cst_12 = arith.constant dense<0.000000e+00> : vector<16x32xf32>
    %12 = tpu.matmul %10, %11, %cst_12 {dimension_numbers = #tpu.dot_dimension_numbers<[1], [0], [0], [1], [0, 0, 1, 1], [], []>} : vector<16x32xbf16>, vector<32x32xbf16>, vector<16x32xf32> -> vector<16x32xf32>
    %13 = arith.addf %9, %12 : vector<16x32xf32>
    %14 = arith.negf %13 : vector<16x32xf32>
    %15 = math.exp %14 : vector<16x32xf32>
    %cst_13 = arith.constant 1.000000e+00 : f32
    %16 = vector.broadcast %cst_13 : f32 to vector<16x32xf32>
    %17 = arith.addf %16, %15 : vector<16x32xf32>
    %18 = arith.divf %16, %17 : vector<16x32xf32>
    %19 = arith.mulf %13, %18 : vector<16x32xf32>
    %cst_14 = arith.constant 1.66666663 : f32
    %20 = vector.broadcast %cst_14 : f32 to vector<16x32xf32>
    %21 = arith.mulf %19, %20 : vector<16x32xf32>
    %c0_15 = arith.constant 0 : index
    %c0_16 = arith.constant 0 : index
    %c0_17 = arith.constant 0 : index
    %22 = vector.load %arg7[%c0_15, %c0_16, %c0_17] : memref<1x32x32xbf16, #tpu.memory_space<vmem>>, vector<1x32x32xbf16>
    %23 = vector.shape_cast %22 : vector<1x32x32xbf16> to vector<32x32xbf16>
    %c0_18 = arith.constant 0 : index
    %c0_19 = arith.constant 0 : index
    %c0_20 = arith.constant 0 : index
    %24 = vector.load %arg8[%c0_18, %c0_19, %c0_20] : memref<1x32x32xbf16, #tpu.memory_space<vmem>>, vector<1x32x32xbf16>
    %25 = vector.shape_cast %24 : vector<1x32x32xbf16> to vector<32x32xbf16>
    %26 = arith.truncf %21 : vector<16x32xf32> to vector<16x32xbf16>
    %cst_21 = arith.constant dense<0.000000e+00> : vector<16x32xf32>
    %27 = tpu.matmul %26, %23, %cst_21 {dimension_numbers = #tpu.dot_dimension_numbers<[1], [0], [0], [1], [0, 0, 1, 1], [], []>} : vector<16x32xbf16>, vector<32x32xbf16>, vector<16x32xf32> -> vector<16x32xf32>
    %28 = arith.negf %27 : vector<16x32xf32>
    %29 = math.exp %28 : vector<16x32xf32>
    %cst_22 = arith.constant 1.000000e+00 : f32
    %30 = vector.broadcast %cst_22 : f32 to vector<16x32xf32>
    %31 = arith.addf %30, %29 : vector<16x32xf32>
    %32 = arith.divf %30, %31 : vector<16x32xf32>
    %33 = arith.mulf %27, %32 : vector<16x32xf32>
    %cst_23 = arith.constant 1.66666663 : f32
    %34 = vector.broadcast %cst_23 : f32 to vector<16x32xf32>
    %35 = arith.mulf %33, %34 : vector<16x32xf32>
    %36 = arith.truncf %35 : vector<16x32xf32> to vector<16x32xbf16>
    %cst_24 = arith.constant dense<0.000000e+00> : vector<16x32xf32>
    %37 = tpu.matmul %36, %25, %cst_24 {dimension_numbers = #tpu.dot_dimension_numbers<[1], [0], [0], [1], [0, 0, 1, 1], [], []>} : vector<16x32xbf16>, vector<32x32xbf16>, vector<16x32xf32> -> vector<16x32xf32>
    %38 = arith.negf %37 : vector<16x32xf32>
    %39 = math.exp %38 : vector<16x32xf32>
    %cst_25 = arith.constant 1.000000e+00 : f32
    %40 = vector.broadcast %cst_25 : f32 to vector<16x32xf32>
    %41 = arith.addf %40, %39 : vector<16x32xf32>
    %42 = arith.divf %40, %41 : vector<16x32xf32>
    %43 = arith.mulf %37, %42 : vector<16x32xf32>
    %cst_26 = arith.constant 1.66666663 : f32
    %44 = vector.broadcast %cst_26 : f32 to vector<16x32xf32>
    %45 = arith.mulf %43, %44 : vector<16x32xf32>
    %46 = arith.addf %21, %45 : vector<16x32xf32>
    %cst_27 = arith.constant 0.707106769 : f32
    %47 = vector.broadcast %cst_27 : f32 to vector<16x32xf32>
    %48 = arith.mulf %46, %47 : vector<16x32xf32>
    %49 = arith.addf %0, %48 : vector<16x32xf32>
    %cst_28 = arith.constant 0.707106769 : f32
    %50 = vector.broadcast %cst_28 : f32 to vector<16x32xf32>
    %51 = arith.mulf %49, %50 : vector<16x32xf32>
    %c0_29 = arith.constant 0 : index
    %c0_30 = arith.constant 0 : index
    %52 = vector.load %arg9[%c0_29, %c0_30] : memref<16x32xf32, #tpu.memory_space<vmem>>, vector<16x32xf32>
    tpu.vector_store %arg9[%c0_29, %c0_30], %51 {strides = array<i32>} : memref<16x32xf32, #tpu.memory_space<vmem>>, vector<16x32xf32>,
    return
  }
  func.func @transform_0(%arg0: i32) -> (i32, i32) {
    %c0_i32 = arith.constant 0 : i32
    %c0_i32_0 = arith.constant 0 : i32
    return %arg0, %c0_i32 : i32, i32
  }
  func.func @transform_1(%arg0: i32) -> (i32, i32) {
    %c0_i32 = arith.constant 0 : i32
    %c0_i32_0 = arith.constant 0 : i32
    return %arg0, %c0_i32 : i32, i32
  }
  func.func @transform_2(%arg0: i32) -> (i32, i32) {
    %c0_i32 = arith.constant 0 : i32
    %c0_i32_0 = arith.constant 0 : i32
    return %arg0, %c0_i32 : i32, i32
  }
  func.func @transform_3(%arg0: i32) -> (i32, i32) {
    %c0_i32 = arith.constant 0 : i32
    %c0_i32_0 = arith.constant 0 : i32
    %c0_i32_1 = arith.constant 0 : i32
    return %c0_i32, %c0_i32_0 : i32, i32
  }
  func.func @transform_4(%arg0: i32) -> (i32, i32) {
    %c0_i32 = arith.constant 0 : i32
    %c0_i32_0 = arith.constant 0 : i32
    %c0_i32_1 = arith.constant 0 : i32
    return %c0_i32, %c0_i32_0 : i32, i32
  }
  func.func @transform_5(%arg0: i32) -> (i32, i32) {
    %c0_i32 = arith.constant 0 : i32
    %c0_i32_0 = arith.constant 0 : i32
    %c0_i32_1 = arith.constant 0 : i32
    return %c0_i32, %c0_i32_0 : i32, i32
  }
  func.func @transform_6(%arg0: i32) -> (i32, i32, i32) {
    %c0_i32 = arith.constant 0 : i32
    %c0_i32_0 = arith.constant 0 : i32
    %c0_i32_1 = arith.constant 0 : i32
    %c0_i32_2 = arith.constant 0 : i32
    return %c0_i32, %c0_i32_0, %c0_i32_1 : i32, i32, i32
  }
  func.func @transform_7(%arg0: i32) -> (i32, i32, i32) {
    %c0_i32 = arith.constant 0 : i32
    %c0_i32_0 = arith.constant 0 : i32
    %c0_i32_1 = arith.constant 0 : i32
    %c0_i32_2 = arith.constant 0 : i32
    return %c0_i32, %c0_i32_0, %c0_i32_1 : i32, i32, i32
  }
  func.func @transform_8(%arg0: i32) -> (i32, i32) {
    %c0_i32 = arith.constant 0 : i32
    %c0_i32_0 = arith.constant 0 : i32
    return %arg0, %c0_i32 : i32, i32
  }
}

</mosaic_0001>

<bundles_post_ra>
// kernel: interaction_block_forward.4
= control target key start
LH: loop header
LB: loop body
LE: loop exit
PB: predicated region body
PF: predicated region fallthrough
CT: control target
= control target key end

     0   :  { %vm187_vm0 = vcmask 1043456   ;;  %vm183_vm1 = vcmask 64512   ;;  %vm45_vm2 = vcmask 261120   ;;  %s450_s3 = inlined_call_operand.vmem [shape: bf16[32,32], index: 3, kind: input, shape index: {}]   ;;  %s451_s0 = inlined_call_operand.vmem [shape: f32[16,32], index: 0, kind: input, shape index: {}]   ;;  %s452_s4 = inlined_call_operand.vmem [shape: bf16[8,32], index: 4, kind: input, shape index: {}]   ;;  %s453_s1 = inlined_call_operand.vmem [shape: f32[16,8], index: 1, kind: input, shape index: {}]   ;;  %s454_s2 = inlined_call_operand.vmem [shape: bf16[32,32], index: 2, kind: input, shape index: {}]   ;;  %s455_s5 = inlined_call_operand.vmem [shape: bf16[32,16], index: 5, kind: input, shape index: {}]   ;;  %s456_s6 = inlined_call_operand.vmem [shape: f32[16,32], index: 6, kind: output, shape index: {0}]   ;;  %s457_s7 = inlined_call_operand.vmem [shape: bf16[16,16], index: 7, kind: output, shape index: {1}]  }
   0x1   :  { %v333_v0 = vld [vmem:[%s450_s3 + $0x8] sm:$0xff]  ;;  %v332_v1 = vld [vmem:[%s450_s3] sm:$0xff] }
   0x2   :  { %v182_v2 = vld [vmem:[%s452_s4] sm:$0xf]  ;;  %129 = vmatpush.bf16.msra.mxu1 %v333_v0  ;;  %v27_v5 = vld [vmem:[%s451_s0 + $0x8] sm:$0xff] }
   0x3   :  { %v179_v3 = vld [vmem:[%s453_s1] sm:$0xff]  ;;  %v189_v6 = vsel %vm187_vm0, %v182_v2, 0  ;;  %v180_v7 = vld [vmem:[%s453_s1 + $0x8] sm:$0xff] }
   0x4   :  { %v26_v4 = vld [vmem:[%s451_s0] sm:$0xff]  ;;  %198 = vmatpush.bf16.msra.mxu2 %v189_v6  ;;  %v181_v8 = vpack.c.bf16 %v180_v7, %v179_v3  ;;  %v331_v10 = vld [vmem:[%s454_s2 + $0x8] sm:$0xff] }
   0x5   :  { %v28_v9 = vpack.c.bf16 %v27_v5, %v26_v4  ;;  %55 = vmatpush.bf16.msra.mxu0 %v331_v10  ;;  %v330_v11 = vld [vmem:[%s454_s2] sm:$0xff]  ;;  %v335_v14 = vld [vmem:[%s455_s5 + $0x8] sm:$0xff] }
   0x6   :  { %130 = vmatpush.bf16.msra.mxu1 %v332_v1  ;;  %233 = vmatpush.bf16.msra.mxu3 %v335_v14  ;;  %v334_v16 = vld [vmem:[%s455_s5] sm:$0xff] }
   0x7   :  { %318 = vmatmul.msk.bf16.vlgmr.msra.gmra.mxu2 %vm183_vm1, %v181_v8 }
   0x9   :  { %315 = vmatmul.msk.bf16.vlgmr.msra.gmra.mxu1 %vm45_vm2, %v28_v9  ;;  %56 = vmatpush.bf16.msra.mxu0 %v330_v11 }
   0xa   :  { %234 = vmatpush.bf16.msra.mxu3 %v334_v16 }
   0xc   :  { %304 = vmatmul.msk.bf16.vlgmr.msra.gmra.mxu0 %vm45_vm2, %v28_v9 }
  0x86   :  { %v132_v12 = vpop.f32.mrf.mxu1 }
  0x87   :  { %v316_v13 = vmul.f32 -1.442695, %v132_v12 }
  0x89   :  { %336 = vpow2.f32 %v316_v13  ;;  %v58_v51 = vpop.f32.mrf.mxu0 }
  0x8a   :  { %v200_v36 = vpop.f32.mrf.mxu2  ;;  %v305_v52 = vmul.f32 -1.442695, %v58_v51 }
  0x8e   :  { %v134_v15 = vpop.f32.mrf.mxu1 }
  0x8f   :  { %v337_v17 = vpop.eup %336  ;;  %v317_v18 = vmul.f32 -1.442695, %v134_v15 }
  0x90   :  { %v143_v19 = vadd.f32 1.0, %v337_v17 }
  0x91   :  { %338 = vpow2.f32 %v317_v18  ;;  %v60_v53 = vpop.f32.mrf.mxu0 }
  0x92   :  { %340 = vrcp.f32 %v143_v19  ;;  %v156_v26 = vand.u32 2147483648, %v143_v19  ;;  %vm150_vm4 = vweird.f32 %v143_v19  ;;  %v154_v28 = vand.u32 2147483647, %v143_v19  ;;  %v202_v47 = vpop.f32.mrf.mxu2 }
  0x93   :  { %v306_v55 = vmul.f32 -1.442695, %v60_v53 }
  0x94   :  { %v157_v32 = vor.u32 1.1754944e-38, %v156_v26  ;;  %vm155_vm6 = vcmp.eq.f32.partialorder %v154_v28, 8.507059e+37 }
  0x97   :  { %v339_v20 = vpop.eup %338 }
  0x98   :  { %v341_v21 = vpop.eup %340  ;;  %v144_v22 = vadd.f32 1.0, %v339_v20 }
  0x99   :  { %v146_v23 = vmul.f32 %v341_v21, %v143_v19  ;;  %vm151_vm3 = vweird.f32 %v341_v21 }
  0x9a   :  { %342 = vrcp.f32 %v144_v22  ;;  %vm152_vm5 = vmor %vm150_vm4, %vm151_vm3  ;;  %v171_v35 = vand.u32 2147483648, %v144_v22  ;;  %v169_v38 = vand.u32 2147483647, %v144_v22  ;;  %vm165_vm8 = vweird.f32 %v144_v22 }
  0x9b   :  { %v147_v24 = vsub.f32 1.0, %v146_v23  ;;  %344 = vpow2.f32 %v305_v52 }
  0x9c   :  { %v172_v41 = vor.u32 1.1754944e-38, %v171_v35  ;;  %vm170_vm10 = vcmp.eq.f32.partialorder %v169_v38, 8.507059e+37  ;;  %346 = vpow2.f32 %v306_v55 }
  0x9d   :  { %v148_v25 = vmul.f32 %v341_v21, %v147_v24 }
  0x9f   :  { %v149_v27 = vadd.f32 %v341_v21, %v148_v25 }
  0xa0   :  { %v343_v29 = vpop.eup %342 }
  0xa1   :  { %v153_v30 = vsel %vm152_vm5, %v341_v21, %v149_v27  ;;  %v161_v31 = vmul.f32 %v343_v29, %v144_v22  ;;  %vm166_vm7 = vweird.f32 %v343_v29  ;;  %v345_v54 = vpop.eup %344 }
  0xa2   :  { %v158_v34 = vsel %vm155_vm6, %v157_v32, %v153_v30  ;;  %vm167_vm9 = vmor %vm165_vm8, %vm166_vm7  ;;  %v69_v56 = vadd.f32 1.0, %v345_v54  ;;  %v347_v57 = vpop.eup %346  ;;  %vm285_vm8 = vcmask 125952  }
  0xa3   :  { %v162_v33 = vsub.f32 1.0, %v161_v31  ;;  %v175_v39 = vmul.f32 %v158_v34, %v132_v12  ;;  %v70_v59 = vadd.f32 1.0, %v347_v57 }
  0xa4   :  { %348 = vrcp.f32 %v69_v56  ;;  %v82_v61 = vand.u32 2147483648, %v69_v56  ;;  %vm76_vm11 = vweird.f32 %v69_v56  ;;  %v80_v63 = vand.u32 2147483647, %v69_v56 }
  0xa5   :  { %v163_v37 = vmul.f32 %v343_v29, %v162_v33  ;;  %v177_v44 = vmul.f32 1.6666666, %v175_v39  ;;  %350 = vrcp.f32 %v70_v59  ;;  %vm91_vm15 = vweird.f32 %v70_v59 }
  0xa6   :  { %v83_v1 = vor.u32 1.1754944e-38, %v82_v61  ;;  %vm81_vm14 = vcmp.eq.f32.partialorder %v80_v63, 8.507059e+37  ;;  %v97_v7 = vand.u32 2147483648, %v70_v59  ;;  %v95_v10 = vand.u32 2147483647, %v70_v59 }
  0xa7   :  { %v164_v40 = vadd.f32 %v343_v29, %v163_v37  ;;  %v205_v48 = vmul.f32 %v200_v36, %v177_v44 }
  0xa8   :  { %v98_v13 = vor.u32 1.1754944e-38, %v97_v7  ;;  %vm96_vm3 = vcmp.eq.f32.partialorder %v95_v10, 8.507059e+37 }
  0xa9   :  { %v168_v42 = vsel %vm167_vm9, %v343_v29, %v164_v40 }
  0xaa   :  { %v173_v43 = vsel %vm170_vm10, %v172_v41, %v168_v42  ;;  %v349_v58 = vpop.eup %348 }
  0xab   :  { %v176_v45 = vmul.f32 %v173_v43, %v134_v15  ;;  %v72_v60 = vmul.f32 %v349_v58, %v69_v56  ;;  %vm77_vm12 = vweird.f32 %v349_v58  ;;  %v351_v3 = vpop.eup %350 }
  0xac   :  { %vm78_vm13 = vmor %vm76_vm11, %vm77_vm12  ;;  %v87_v5 = vmul.f32 %v351_v3, %v70_v59  ;;  %vm92_vm0 = vweird.f32 %v351_v3 }
  0xad   :  { %v178_v46 = vmul.f32 1.6666666, %v176_v45  ;;  %v73_v62 = vsub.f32 1.0, %v72_v60  ;;  %vm93_vm1 = vmor %vm91_vm15, %vm92_vm0 }
  0xae   :  { %v88_v9 = vsub.f32 1.0, %v87_v5 }
  0xaf   :  { %v206_v49 = vmul.f32 %v202_v47, %v178_v46  ;;  %v74_v0 = vmul.f32 %v349_v58, %v73_v62 }
  0xb0   :  { %v89_v12 = vmul.f32 %v351_v3, %v88_v9 }
  0xb1   :  { %v207_v50 = vpack.c.bf16 %v206_v49, %v205_v48  ;;  %v75_v2 = vadd.f32 %v349_v58, %v74_v0 }
  0xb2   :  { %v90_v14 = vadd.f32 %v351_v3, %v89_v12 }
  0xb3   :  { %327 = vmatmul.msk.bf16.vlgmr.msra.gmra.mxu3 %vm45_vm2, %v207_v50  ;;  %v79_v4 = vsel %vm78_vm13, %v349_v58, %v75_v2 }
  0xb4   :  { %v84_v6 = vsel %vm81_vm14, %v83_v1, %v79_v4  ;;  %v94_v15 = vsel %vm93_vm1, %v351_v3, %v90_v14 }
  0xb5   :  { %v101_v8 = vmul.f32 %v84_v6, %v58_v51  ;;  %v99_v16 = vsel %vm96_vm3, %v98_v13, %v94_v15 }
  0xb6   :  { %v102_v17 = vmul.f32 %v99_v16, %v60_v53 }
  0xb7   :  { %v103_v11 = vmul.f32 1.6666666, %v101_v8 }
  0xb8   :  { %v104_v18 = vmul.f32 1.6666666, %v102_v17 }
  0xb9   :  { %105 = vst.msk [vmem:[%s456_s6] sm:$0xff] %vm45_vm2, %v103_v11 }
  0xba   :  { %106 = vst.msk [vmem:[%s456_s6 + $0x8] sm:$0xff] %vm45_vm2, %v104_v18 }
 0x136   :  { %v236_v19 = vpop.f32.mrf.mxu3 }
 0x137   :  { %v328_v20 = vmul.f32 -1.442695, %v236_v19 }
 0x139   :  { %352 = vpow2.f32 %v328_v20 }
 0x13e   :  { %v238_v21 = vpop.f32.mrf.mxu3 }
 0x13f   :  { %v353_v22 = vpop.eup %352  ;;  %v329_v23 = vmul.f32 -1.442695, %v238_v21 }
 0x140   :  { %v247_v24 = vadd.f32 1.0, %v353_v22 }
 0x141   :  { %354 = vpow2.f32 %v329_v23 }
 0x142   :  { %356 = vrcp.f32 %v247_v24  ;;  %v260_v30 = vand.u32 2147483648, %v247_v24  ;;  %v258_v32 = vand.u32 2147483647, %v247_v24  ;;  %vm254_vm2 = vweird.f32 %v247_v24 }
 0x144   :  { %v261_v35 = vor.u32 1.1754944e-38, %v260_v30  ;;  %vm259_vm6 = vcmp.eq.f32.partialorder %v258_v32, 8.507059e+37 }
 0x147   :  { %v355_v25 = vpop.eup %354 }
 0x148   :  { %v357_v26 = vpop.eup %356  ;;  %v248_v27 = vadd.f32 1.0, %v355_v25 }
 0x149   :  { %v250_v28 = vmul.f32 %v357_v26, %v247_v24  ;;  %vm255_vm4 = vweird.f32 %v357_v26 }
 0x14a   :  { %358 = vrcp.f32 %v248_v27  ;;  %vm256_vm5 = vmor %vm254_vm2, %vm255_vm4  ;;  %v275_v41 = vand.u32 2147483648, %v248_v27  ;;  %v273_v44 = vand.u32 2147483647, %v248_v27  ;;  %vm269_vm9 = vweird.f32 %v248_v27 }
 0x14b   :  { %v251_v29 = vsub.f32 1.0, %v250_v28 }
 0x14c   :  { %v276_v47 = vor.u32 1.1754944e-38, %v275_v41  ;;  %vm274_vm11 = vcmp.eq.f32.partialorder %v273_v44, 8.507059e+37 }
 0x14d   :  { %v252_v31 = vmul.f32 %v357_v26, %v251_v29 }
 0x14f   :  { %v253_v33 = vadd.f32 %v357_v26, %v252_v31 }
 0x150   :  { %v359_v34 = vpop.eup %358 }
 0x151   :  { %v257_v36 = vsel %vm256_vm5, %v357_v26, %v253_v33  ;;  %v265_v37 = vmul.f32 %v359_v34, %v248_v27  ;;  %vm270_vm7 = vweird.f32 %v359_v34 }
 0x152   :  { %v262_v38 = vsel %vm259_vm6, %v261_v35, %v257_v36  ;;  %vm271_vm10 = vmor %vm269_vm9, %vm270_vm7 }
 0x153   :  { %v279_v39 = vmul.f32 %v262_v38, %v236_v19  ;;  %v266_v40 = vsub.f32 1.0, %v265_v37 }
 0x155   :  { %v281_v42 = vmul.f32 1.6666666, %v279_v39  ;;  %v267_v43 = vmul.f32 %v359_v34, %v266_v40 }
 0x157   :  { %v283_v45 = vpack.c.bf16 %v281_v42, %v281_v42  ;;  %v268_v46 = vadd.f32 %v359_v34, %v267_v43 }
 0x159   :  { %286 = vst.msk [vmem:[%s457_s7] sm:$0xf] %vm285_vm8, %v283_v45  ;;  %v272_v48 = vsel %vm271_vm10, %v359_v34, %v268_v46 }
 0x15a   :  { %v277_v49 = vsel %vm274_vm11, %v276_v47, %v272_v48 }
 0x15b   :  { %v280_v50 = vmul.f32 %v277_v49, %v238_v21 }
 0x15d   :  { %v282_v51 = vmul.f32 1.6666666, %v280_v50 }
 0x15f   :  { %v284_v52 = vpack.c.bf16 %v282_v51, %v282_v51 }
 0x161   :  { %287 = vst.msk [vmem:[%s457_s7 + $0x4] sm:$0xf] %vm285_vm8, %v284_v52 }

// kernel: interaction_block_forward.6
= control target key start
LH: loop header
LB: loop body
LE: loop exit
PB: predicated region body
PF: predicated region fallthrough
CT: control target
= control target key end

     0   :  { %vm154_vm0 = vcmask 261120   ;;  %v596_v0 = vmov 0.0   ;;  %s734_s0 = inlined_call_operand.<no memory space> [shape: s32[1], index: 0, kind: input, shape index: {}]   ;;  %s735_s1 = inlined_call_operand.<no memory space> [shape: s32[1], index: 1, kind: input, shape index: {}]   ;;  %s736_s4 = inlined_call_operand.vmem [shape: f32[8,32], index: 4, kind: input, shape index: {}]   ;;  %s737_s5 = inlined_call_operand.vmem [shape: bf16[32,32], index: 5, kind: input, shape index: {}]   ;;  %s738_s6 = inlined_call_operand.vmem [shape: bf16[1,32,32], index: 6, kind: input, shape index: {}]   ;;  %s739_s7 = inlined_call_operand.vmem [shape: bf16[1,32,32], index: 7, kind: input, shape index: {}]   ;;  %s740_s8 = inlined_call_operand.vmem [shape: bf16[1,32,32], index: 8, kind: input, shape index: {}]   ;;  %s741_s9 = inlined_call_operand.vmem [shape: bf16[1,32,32], index: 9, kind: input, shape index: {}]   ;;  %s742_s10 = inlined_call_operand.vmem [shape: f32[8,32], index: 10, kind: output, shape index: {}]   ;;  %s743_s2 = inlined_call_operand.vmem [shape: s32[1,16], index: 2, kind: input, shape index: {}]   ;;  %s744_s3 = inlined_call_operand.vmem [shape: bf16[16,32], index: 3, kind: input, shape index: {}]  }
   0x1   :  { %s500_s15 = sadd.s32 4294967295, %s735_s1  ;;  %p109_p0 = scmp.gt.s32.totalorder %s734_s0, 0  ;;  %155 = vst.msk [vmem:[#allocation2] sm:$0xff] %vm154_vm0, %v596_v0 }
   0x2   :  { %p107_p1 = scmp.gt.s32.totalorder %s500_s15, %s734_s0  ;;  %p504_p2 = scmp.le.s32.totalorder %s734_s0, 0 }
   0x3   :  { %s110_s24 = scalar_select %p109_p0, %s734_s0, 0 }
   0x4   :  { %s746_s15 = smov (!%p107_p1, %s500_s15), %s734_s0  ;;  %p505_p3 = scmp.gt.s32.totalorder %s735_s1, 0 }
   0x5   :  { %p111_p4 = scmp.lt.s32.totalorder %s746_s15, %s110_s24 }
   0x6   :  { %p160_p5 = pnand %p505_p3, %p504_p2 }
   0x7   :  { %s748_s15 = smov (!%p111_p4, %s746_s15), %s110_s24 }
   0x8   :  { %p113_p6 = scmp.lt.s32.totalorder %s748_s15, 0  ;;  %s502_s29 = sshll.u32 %s748_s15, 1 }
   0x9   :  { %p135_p7 = scmp.lt.s32.totalorder %s502_s29, 1  ;;  %163 = sbr.rel (%p160_p5) target bundleno = 156 (0x9c), region = 41 }
   0xa   :  { %s750_s15 = smov (!%p113_p6, %s748_s15), 0 }
   0xb   :  { %s752_s29 = smov (!%p135_p7, %s502_s29), 1  ;;  %s115_s12 = scalar_lea.vmem %s743_s2, %s750_s15 }
   0xc   :  { %s503_s13 = sshll.u32 %s752_s29, 2 }
   0xd   :  { %s138_s0 = scalar_lea.vmem %s744_s3, %s503_s13 }
   0xe   :  { %v562_v1 = vld [vmem:[%s138_s0] sm:$0xff]  ;;  %v165_v2 = vlaneseq  ;;  %v597_v5 = vmov 0.0   ;;  %vm184_vm2 = vcmask 130048  }
   0xf   :  { %v575_v3 = vld [vmem:[%s115_s12] ss:$0 sm:$0xff]  ;;  %195 = vmatpush.bf16.msra.mxu0 %v562_v1 }
  0x10   :  { %v166_v4 = vshrl.u32 %v165_v2, 7  ;;  %v175_v8 = vld [vmem:[#allocation2] sm:$0xff] }
  0x12   :  { %vm171_vm1 = vcmp.eq.s32.totalorder %v166_v4, %v575_v3 }
  0x13   :  { %v506_v6 = vsel %vm171_vm1, 1.0, %v597_v5 }
  0x14   :  { %v174_v7 = vpack.c.bf16 %v506_v6, %v506_v6 }
  0x16   :  { %511 = vmatmul.msk.bf16.vlgmr.msra.gmra.mxu0 %vm184_vm2, %v174_v7 }
  0x93   :  { %v197_v9 = vpop.f32.mrf.mxu0 }
  0x94   :  { %v201_v10 = vadd.f32 %v197_v9, %v175_v8 }
  0x96   :  { %203 = vst.msk [vmem:[#allocation2] sm:$0xff] %vm154_vm0, %v201_v10 }
  0x9b   :  { %v199_v11 = vpop.f32.mrf.mxu0 }
  0x9c PF:  { %v564_v12 = vld [vmem:[%s737_s5 + $0x8] sm:$0xff]  ;;  %v563_v14 = vld [vmem:[%s737_s5] sm:$0xff] }
  0x9d   :  { %v570_v13 = vld [vmem:[%s738_s6 + $0x8] sm:$0xff]  ;;  %235 = vmatpush.bf16.msra.mxu0 %v564_v12  ;;  %v207_v15 = vld [vmem:[#allocation2] sm:$0xff] }
  0x9e   :  { %404 = vmatpush.bf16.msra.mxu3 %v570_v13  ;;  %v569_v16 = vld [vmem:[%s738_s6] sm:$0xff]  ;;  %v208_v18 = vpack.c.bf16 %v207_v15, %v207_v15  ;;  %v566_v20 = vld [vmem:[%s740_s8 + $0x8] sm:$0xff] }
  0x9f   :  { %v697_v17 = vld [vmem:[%s736_s4] sm:$0xff]  ;;  %293 = vmatpush.bf16.msra.mxu1 %v566_v20  ;;  %v572_v27 = vld [vmem:[%s739_s7 + $0x8] sm:$0xff] }
  0xa0   :  { %v382_v19 = vpack.c.bf16 %v697_v17, %v697_v17  ;;  %v565_v21 = vld [vmem:[%s740_s8] sm:$0xff]  ;;  %v568_v60 = vld [vmem:[%s741_s9 + $0x8] sm:$0xff] }
  0xa1   :  { %236 = vmatpush.bf16.msra.mxu0 %v563_v14  ;;  %v571_v30 = vld [vmem:[%s739_s7] sm:$0xff]  ;;  %343 = vmatpush.bf16.msra.mxu2 %v568_v60 }
  0xa2   :  { %405 = vmatpush.bf16.msra.mxu3 %v569_v16  ;;  %v567_v61 = vld [vmem:[%s741_s9] sm:$0xff] }
  0xa3   :  { %294 = vmatpush.bf16.msra.mxu1 %v565_v21 }
  0xa4   :  { %520 = vmatmul.msk.bf16.vlgmr.msra.gmra.mxu0 %vm154_vm0, %v208_v18 }
  0xa5   :  { %550 = vmatmul.msk.bf16.vlgmr.msra.gmra.mxu3 %vm154_vm0, %v382_v19  ;;  %454 = vmatpush.bf16.msrb.mxu0 %v572_v27 }
  0xa6   :  { %344 = vmatpush.bf16.msra.mxu2 %v567_v61 }
  0xa9   :  { %455 = vmatpush.bf16.msrb.mxu0 %v571_v30 }
 0x121   :  { %v238_v22 = vpop.f32.mrf.mxu0 }
 0x122   :  { %v521_v23 = vmul.f32 -1.442695, %v238_v22 }
 0x124   :  { %576 = vpow2.f32 %v521_v23 }
 0x128   :  { %v407_v24 = vpop.f32.mrf.mxu3 }
 0x129   :  { %v240_v25 = vpop.f32.mrf.mxu0  ;;  %v551_v26 = vmul.f32 -1.442695, %v407_v24 }
 0x12a   :  { %v577_v28 = vpop.eup %576 }
 0x12b   :  { %v245_v29 = vadd.f32 1.0, %v577_v28  ;;  %578 = vpow2.f32 %v551_v26 }
 0x12d   :  { %580 = vrcp.f32 %v245_v29  ;;  %v257_v37 = vand.u32 2147483648, %v245_v29  ;;  %v255_v39 = vand.u32 2147483647, %v245_v29  ;;  %vm251_vm4 = vweird.f32 %v245_v29 }
 0x12f   :  { %v258_v42 = vor.u32 1.1754944e-38, %v257_v37  ;;  %vm256_vm6 = vcmp.eq.f32.partialorder %v255_v39, 8.507059e+37 }
 0x130   :  { %v409_v31 = vpop.f32.mrf.mxu3 }
 0x131   :  { %v579_v32 = vpop.eup %578 }
 0x132   :  { %v414_v33 = vadd.f32 1.0, %v579_v32 }
 0x133   :  { %v581_v34 = vpop.eup %580 }
 0x134   :  { %v247_v35 = vmul.f32 %v581_v34, %v245_v29  ;;  %582 = vrcp.f32 %v414_v33  ;;  %vm252_vm3 = vweird.f32 %v581_v34  ;;  %vm420_vm7 = vweird.f32 %v414_v33 }
 0x135   :  { %vm253_vm5 = vmor %vm251_vm4, %vm252_vm3  ;;  %v426_v45 = vand.u32 2147483648, %v414_v33  ;;  %v424_v48 = vand.u32 2147483647, %v414_v33 }
 0x136   :  { %v248_v36 = vsub.f32 1.0, %v247_v35 }
 0x137   :  { %v427_v52 = vor.u32 1.1754944e-38, %v426_v45  ;;  %vm425_vm10 = vcmp.eq.f32.partialorder %v424_v48, 8.507059e+37 }
 0x138   :  { %v249_v38 = vmul.f32 %v581_v34, %v248_v36 }
 0x13a   :  { %v583_v40 = vpop.eup %582  ;;  %v250_v41 = vadd.f32 %v581_v34, %v249_v38 }
 0x13b   :  { %v416_v43 = vmul.f32 %v583_v40, %v414_v33  ;;  %vm421_vm8 = vweird.f32 %v583_v40 }
 0x13c   :  { %v254_v44 = vsel %vm253_vm5, %v581_v34, %v250_v41  ;;  %vm422_vm9 = vmor %vm420_vm7, %vm421_vm8 }
 0x13d   :  { %v259_v46 = vsel %vm256_vm6, %v258_v42, %v254_v44  ;;  %v417_v47 = vsub.f32 1.0, %v416_v43 }
 0x13e   :  { %v261_v49 = vmul.f32 %v259_v46, %v238_v22 }
 0x13f   :  { %v418_v50 = vmul.f32 %v583_v40, %v417_v47 }
 0x140   :  { %v715_v51 = vmul.f32 1.6666666, %v261_v49 }
 0x141   :  { %v419_v53 = vadd.f32 %v583_v40, %v418_v50 }
 0x142   :  { %v271_v54 = vpack.c.bf16 %v715_v51, %v715_v51 }
 0x143   :  { %v423_v55 = vsel %vm422_vm9, %v583_v40, %v419_v53 }
 0x144   :  { %530 = vmatmul.msk.bf16.vlgmr.msra.gmra.mxu1 %vm154_vm0, %v271_v54  ;;  %v428_v56 = vsel %vm425_vm10, %v427_v52, %v423_v55 }
 0x145   :  { %v430_v57 = vmul.f32 %v428_v56, %v407_v24 }
 0x147   :  { %v431_v58 = vmul.f32 1.6666666, %v430_v57 }
 0x149   :  { %v432_v59 = vpack.c.bf16 %v431_v58, %v431_v58 }
 0x14b   :  { %560 = vmatmul.msk.bf16.vlgmr.msrb.gmra.mxu0 %vm154_vm0, %v432_v59 }
 0x1c1   :  { %v296_v62 = vpop.f32.mrf.mxu1 }
 0x1c2   :  { %v531_v63 = vmul.f32 -1.442695, %v296_v62 }
 0x1c4   :  { %584 = vpow2.f32 %v531_v63 }
 0x1c8   :  { %v457_v0 = vpop.f32.mrf.mxu0 }
 0x1c9   :  { %v298_v1 = vpop.f32.mrf.mxu1  ;;  %v561_v19 = vmul.f32 -1.442695, %v457_v0 }
 0x1ca   :  { %v585_v2 = vpop.eup %584 }
 0x1cb   :  { %v303_v3 = vadd.f32 1.0, %v585_v2 }
 0x1cd   :  { %586 = vrcp.f32 %v303_v3  ;;  %v315_v8 = vand.u32 2147483648, %v303_v3  ;;  %v313_v10 = vand.u32 2147483647, %v303_v3  ;;  %vm309_vm12 = vweird.f32 %v303_v3 }
 0x1ce   :  { %588 = vpow2.f32 %v561_v19 }
 0x1cf   :  { %v316_v12 = vor.u32 1.1754944e-38, %v315_v8  ;;  %vm314_vm14 = vcmp.eq.f32.partialorder %v313_v10, 8.507059e+37 }
 0x1d0   :  { %v459_v4 = vpop.f32.mrf.mxu0 }
 0x1d3   :  { %v587_v5 = vpop.eup %586 }
 0x1d4   :  { %v305_v6 = vmul.f32 %v587_v5, %v303_v3  ;;  %vm310_vm11 = vweird.f32 %v587_v5  ;;  %v589_v20 = vpop.eup %588 }
 0x1d5   :  { %vm311_vm13 = vmor %vm309_vm12, %vm310_vm11  ;;  %v464_v21 = vadd.f32 1.0, %v589_v20 }
 0x1d6   :  { %v306_v7 = vsub.f32 1.0, %v305_v6 }
 0x1d7   :  { %590 = vrcp.f32 %v464_v21  ;;  %vm470_vm15 = vweird.f32 %v464_v21  ;;  %v476_v31 = vand.u32 2147483648, %v464_v21  ;;  %v474_v33 = vand.u32 2147483647, %v464_v21 }
 0x1d8   :  { %v307_v9 = vmul.f32 %v587_v5, %v306_v7 }
 0x1d9   :  { %v477_v34 = vor.u32 1.1754944e-38, %v476_v31  ;;  %vm475_vm3 = vcmp.eq.f32.partialorder %v474_v33, 8.507059e+37 }
 0x1da   :  { %v308_v11 = vadd.f32 %v587_v5, %v307_v9 }
 0x1dc   :  { %v312_v13 = vsel %vm311_vm13, %v587_v5, %v308_v11 }
 0x1dd   :  { %v317_v14 = vsel %vm314_vm14, %v316_v12, %v312_v13  ;;  %v591_v22 = vpop.eup %590 }
 0x1de   :  { %v319_v15 = vmul.f32 %v317_v14, %v296_v62  ;;  %v466_v24 = vmul.f32 %v591_v22, %v464_v21  ;;  %vm471_vm1 = vweird.f32 %v591_v22 }
 0x1df   :  { %vm472_vm2 = vmor %vm470_vm15, %vm471_vm1 }
 0x1e0   :  { %v320_v16 = vmul.f32 1.6666666, %v319_v15  ;;  %v467_v26 = vsub.f32 1.0, %v466_v24 }
 0x1e2   :  { %v321_v18 = vpack.c.bf16 %v320_v16, %v320_v16  ;;  %v468_v29 = vmul.f32 %v591_v22, %v467_v26 }
 0x1e4   :  { %540 = vmatmul.msk.bf16.vlgmr.msra.gmra.mxu2 %vm154_vm0, %v321_v18  ;;  %v469_v32 = vadd.f32 %v591_v22, %v468_v29 }
 0x1e6   :  { %v473_v35 = vsel %vm472_vm2, %v591_v22, %v469_v32 }
 0x1e7   :  { %v478_v38 = vsel %vm475_vm3, %v477_v34, %v473_v35 }
 0x1e8   :  { %v480_v41 = vmul.f32 %v478_v38, %v457_v0 }
 0x1ea   :  { %v481_v46 = vmul.f32 1.6666666, %v480_v41 }
 0x1ec   :  { %v482_v50 = vadd.f32 %v481_v46, %v697_v17 }
 0x1ee   :  { %v483_v54 = vmul.f32 0.70710677, %v482_v50 }
 0x267   :  { %v346_v23 = vpop.f32.mrf.mxu2 }
 0x268   :  { %v541_v25 = vmul.f32 -1.442695, %v346_v23 }
 0x26a   :  { %592 = vpow2.f32 %v541_v25 }
 0x26f   :  { %v348_v27 = vpop.f32.mrf.mxu2 }
 0x270   :  { %v593_v28 = vpop.eup %592 }
 0x271   :  { %v353_v30 = vadd.f32 1.0, %v593_v28 }
 0x273   :  { %594 = vrcp.f32 %v353_v30  ;;  %v365_v40 = vand.u32 2147483648, %v353_v30  ;;  %v363_v43 = vand.u32 2147483647, %v353_v30  ;;  %vm359_vm5 = vweird.f32 %v353_v30 }
 0x275   :  { %v366_v45 = vor.u32 1.1754944e-38, %v365_v40  ;;  %vm364_vm7 = vcmp.eq.f32.partialorder %v363_v43, 8.507059e+37 }
 0x279   :  { %v595_v36 = vpop.eup %594 }
 0x27a   :  { %v355_v37 = vmul.f32 %v595_v36, %v353_v30  ;;  %vm360_vm4 = vweird.f32 %v595_v36 }
 0x27b   :  { %vm361_vm6 = vmor %vm359_vm5, %vm360_vm4 }
 0x27c   :  { %v356_v39 = vsub.f32 1.0, %v355_v37 }
 0x27e   :  { %v357_v42 = vmul.f32 %v595_v36, %v356_v39 }
 0x280   :  { %v358_v44 = vadd.f32 %v595_v36, %v357_v42 }
 0x282   :  { %v362_v47 = vsel %vm361_vm6, %v595_v36, %v358_v44 }
 0x283   :  { %v367_v48 = vsel %vm364_vm7, %v366_v45, %v362_v47 }
 0x284   :  { %v369_v49 = vmul.f32 %v367_v48, %v346_v23 }
 0x286   :  { %v370_v52 = vmul.f32 1.6666666, %v369_v49 }
 0x288   :  { %v371_v53 = vadd.f32 %v370_v52, %v715_v51 }
 0x28a   :  { %v372_v55 = vmul.f32 0.70710677, %v371_v53 }
 0x28c   :  { %v484_v56 = vadd.f32 %v483_v54, %v372_v55 }
 0x28e   :  { %v485_v57 = vmul.f32 0.70710677, %v484_v56 }
 0x290   :  { %486 = vst.msk [vmem:[%s742_s10] sm:$0xff] %vm154_vm0, %v485_v57 }

// kernel: interaction_block_forward.7
= control target key start
LH: loop header
LB: loop body
LE: loop exit
PB: predicated region body
PF: predicated region fallthrough
CT: control target
= control target key end

     0   :  { %s600_s0 = inlined_call_operand.vmem [shape: f32[16,32], index: 0, kind: input, shape index: {}]   ;;  %s601_s1 = inlined_call_operand.vmem [shape: f32[16,32], index: 1, kind: input, shape index: {}]   ;;  %s602_s2 = inlined_call_operand.vmem [shape: f32[16,32], index: 2, kind: input, shape index: {}]   ;;  %s603_s3 = inlined_call_operand.vmem [shape: bf16[32,32], index: 3, kind: input, shape index: {}]   ;;  %s604_s4 = inlined_call_operand.vmem [shape: bf16[32,32], index: 4, kind: input, shape index: {}]   ;;  %s605_s5 = inlined_call_operand.vmem [shape: bf16[32,32], index: 5, kind: input, shape index: {}]   ;;  %s606_s6 = inlined_call_operand.vmem [shape: bf16[1,32,32], index: 6, kind: input, shape index: {}]   ;;  %s607_s7 = inlined_call_operand.vmem [shape: bf16[1,32,32], index: 7, kind: input, shape index: {}]   ;;  %s608_s8 = inlined_call_operand.hbm [shape: f32[16,32], index: 8, kind: output, shape index: {}]  }
   0x1   :  { %v418_v0 = vld [vmem:[%s604_s4 + $0x8] sm:$0xff]  ;;  %v417_v3 = vld [vmem:[%s604_s4] sm:$0xff] }
   0x2   :  { %v416_v1 = vld [vmem:[%s603_s3 + $0x8] sm:$0xff]  ;;  %v415_v4 = vld [vmem:[%s603_s3] sm:$0xff]  ;;  %69 = vmatpush.bf16.msra.mxu0 %v418_v0 }
   0x3   :  { %v420_v2 = vld [vmem:[%s605_s5 + $0x8] sm:$0xff]  ;;  %v419_v5 = vld [vmem:[%s605_s5] sm:$0xff]  ;;  %98 = vmatpush.bf16.msra.mxu1 %v416_v1 }
   0x4   :  { %v40_v6 = vld [vmem:[%s601_s1] sm:$0xff]  ;;  %v41_v7 = vld [vmem:[%s601_s1 + $0x8] sm:$0xff]  ;;  %132 = vmatpush.bf16.msra.mxu2 %v420_v2 }
   0x5   :  { %v33_v8 = vld [vmem:[%s600_s0] sm:$0xff]  ;;  %v34_v9 = vld [vmem:[%s600_s0 + $0x8] sm:$0xff] }
   0x6   :  { %v559_v10 = vld [vmem:[%s602_s2] sm:$0xff]  ;;  %v564_v11 = vld [vmem:[%s602_s2 + $0x8] sm:$0xff] }
   0x7   :  { %13 = vsyncpa [#allocation3], 0  ;;  %v42_v12 = vpack.c.bf16 %v41_v7, %v40_v6  ;;  %v35_v13 = vpack.c.bf16 %v34_v9, %v33_v8  ;;  %70 = vmatpush.bf16.msra.mxu0 %v417_v3  ;;  %99 = vmatpush.bf16.msra.mxu1 %v415_v4  ;;  %vm59_vm0 = vcmask 261120   ;;  %v106_v14 = vpack.c.bf16 %v564_v11, %v559_v10  ;;  %v422_v23 = vld [vmem:[%s606_s6 + $0x8] sm:$0xff]  ;;  %v421_v26 = vld [vmem:[%s606_s6] sm:$0xff]  ;;  %s352_s11 = sshll.u32 %s608_s8, 4  ;;  %s353_s11 = int_to_ptr.hbm [resolvable:$true] %s352_s11 }
   0x8   :  { %133 = vmatpush.bf16.msra.mxu2 %v419_v5  ;;  %214 = vmatpush.bf16.msra.mxu3 %v422_v23  ;;  %v424_v60 = vld [vmem:[%s607_s7 + $0x8] sm:$0xff]  ;;  %v423_v61 = vld [vmem:[%s607_s7] sm:$0xff]  ;;  %s478_s7 = smov [#allocation2]   ;;  %s479_s12 = smov 128  }
   0x9   :  { %s350_s30 = sshll.u32 %s478_s7, 4  ;;  %s480_s13 = smov 8   ;;  %s351_s30 = int_to_ptr.vmem [resolvable:$true] %s350_s30 }
   0xa   :  { %372 = vmatmul.msk.bf16.vlgmr.msra.gmra.mxu0 %vm59_vm0, %v42_v12  ;;  %381 = vmatmul.msk.bf16.vlgmr.msra.gmra.mxu1 %vm59_vm0, %v35_v13 }
   0xb   :  { %390 = vmatmul.msk.bf16.vlgmr.msra.gmra.mxu2 %vm59_vm0, %v106_v14  ;;  %286 = vmatpush.bf16.msrb.mxu0 %v424_v60 }
   0xc   :  { %215 = vmatpush.bf16.msra.mxu3 %v421_v26 }
   0xf   :  { %287 = vmatpush.bf16.msrb.mxu0 %v423_v61 }
  0x87   :  { %v72_v15 = vpop.f32.mrf.mxu0  ;;  %v101_v16 = vpop.f32.mrf.mxu1 }
  0x88   :  { %v102_v17 = vadd.f32 %v101_v16, %v72_v15 }
  0x8e   :  { %v135_v18 = vpop.f32.mrf.mxu2 }
  0x8f   :  { %v140_v19 = vadd.f32 %v135_v18, %v102_v17  ;;  %v74_v21 = vpop.f32.mrf.mxu0  ;;  %v103_v22 = vpop.f32.mrf.mxu1 }
  0x90   :  { %v104_v24 = vadd.f32 %v103_v22, %v74_v21 }
  0x91   :  { %v391_v20 = vmul.f32 -1.442695, %v140_v19 }
  0x93   :  { %428 = vpow2.f32 %v391_v20 }
  0x96   :  { %v137_v25 = vpop.f32.mrf.mxu2 }
  0x97   :  { %v141_v27 = vadd.f32 %v137_v25, %v104_v24 }
  0x99   :  { %v429_v28 = vpop.eup %428  ;;  %v392_v29 = vmul.f32 -1.442695, %v141_v27 }
  0x9a   :  { %v148_v30 = vadd.f32 1.0, %v429_v28 }
  0x9b   :  { %430 = vpow2.f32 %v392_v29 }
  0x9c   :  { %432 = vrcp.f32 %v148_v30  ;;  %v161_v39 = vand.u32 2147483648, %v148_v30  ;;  %vm155_vm2 = vweird.f32 %v148_v30  ;;  %v159_v40 = vand.u32 2147483647, %v148_v30 }
  0x9e   :  { %v162_v44 = vor.u32 1.1754944e-38, %v161_v39  ;;  %vm160_vm4 = vcmp.eq.f32.partialorder %v159_v40, 8.507059e+37 }
  0xa1   :  { %v431_v31 = vpop.eup %430 }
  0xa2   :  { %v433_v32 = vpop.eup %432  ;;  %v149_v33 = vadd.f32 1.0, %v431_v31 }
  0xa3   :  { %v151_v34 = vmul.f32 %v433_v32, %v148_v30  ;;  %vm156_vm1 = vweird.f32 %v433_v32 }
  0xa4   :  { %434 = vrcp.f32 %v149_v33  ;;  %vm157_vm3 = vmor %vm155_vm2, %vm156_vm1  ;;  %v176_v45 = vand.u32 2147483648, %v149_v33  ;;  %v174_v47 = vand.u32 2147483647, %v149_v33  ;;  %vm170_vm6 = vweird.f32 %v149_v33 }
  0xa5   :  { %v152_v35 = vsub.f32 1.0, %v151_v34 }
  0xa6   :  { %v177_v50 = vor.u32 1.1754944e-38, %v176_v45  ;;  %vm175_vm8 = vcmp.eq.f32.partialorder %v174_v47, 8.507059e+37 }
  0xa7   :  { %v153_v36 = vmul.f32 %v433_v32, %v152_v35 }
  0xa9   :  { %v154_v37 = vadd.f32 %v433_v32, %v153_v36 }
  0xaa   :  { %v435_v38 = vpop.eup %434 }
  0xab   :  { %v166_v41 = vmul.f32 %v435_v38, %v149_v33  ;;  %v158_v42 = vsel %vm157_vm3, %v433_v32, %v154_v37  ;;  %vm171_vm5 = vweird.f32 %v435_v38 }
  0xac   :  { %v163_v48 = vsel %vm160_vm4, %v162_v44, %v158_v42  ;;  %vm172_vm7 = vmor %vm170_vm6, %vm171_vm5 }
  0xad   :  { %v167_v43 = vsub.f32 1.0, %v166_v41  ;;  %v180_v51 = vmul.f32 %v163_v48, %v140_v19 }
  0xaf   :  { %v168_v46 = vmul.f32 %v435_v38, %v167_v43  ;;  %v577_v55 = vmul.f32 1.6666666, %v180_v51 }
  0xb1   :  { %v169_v49 = vadd.f32 %v435_v38, %v168_v46 }
  0xb3   :  { %v173_v52 = vsel %vm172_vm7, %v435_v38, %v169_v49 }
  0xb4   :  { %v178_v53 = vsel %vm175_vm8, %v177_v50, %v173_v52 }
  0xb5   :  { %v181_v54 = vmul.f32 %v178_v53, %v141_v27 }
  0xb7   :  { %v579_v56 = vmul.f32 1.6666666, %v181_v54 }
  0xb9   :  { %v192_v57 = vpack.c.bf16 %v579_v56, %v577_v55 }
  0xbb   :  { %401 = vmatmul.msk.bf16.vlgmr.msra.gmra.mxu3 %vm59_vm0, %v192_v57 }
 0x13e   :  { %v217_v58 = vpop.f32.mrf.mxu3 }
 0x13f   :  { %v402_v59 = vmul.f32 -1.442695, %v217_v58 }
 0x141   :  { %436 = vpow2.f32 %v402_v59 }
 0x146   :  { %v219_v62 = vpop.f32.mrf.mxu3 }
 0x147   :  { %v437_v63 = vpop.eup %436  ;;  %v403_v0 = vmul.f32 -1.442695, %v219_v62 }
 0x148   :  { %v228_v1 = vadd.f32 1.0, %v437_v63 }
 0x149   :  { %438 = vpow2.f32 %v403_v0 }
 0x14a   :  { %440 = vrcp.f32 %v228_v1  ;;  %v241_v12 = vand.u32 2147483648, %v228_v1  ;;  %vm235_vm10 = vweird.f32 %v228_v1  ;;  %v239_v13 = vand.u32 2147483647, %v228_v1 }
 0x14c   :  { %v242_v17 = vor.u32 1.1754944e-38, %v241_v12  ;;  %vm240_vm12 = vcmp.eq.f32.partialorder %v239_v13, 8.507059e+37 }
 0x14f   :  { %v439_v2 = vpop.eup %438 }
 0x150   :  { %v441_v3 = vpop.eup %440  ;;  %v229_v4 = vadd.f32 1.0, %v439_v2 }
 0x151   :  { %v231_v5 = vmul.f32 %v441_v3, %v228_v1  ;;  %vm236_vm9 = vweird.f32 %v441_v3 }
 0x152   :  { %442 = vrcp.f32 %v229_v4  ;;  %vm237_vm11 = vmor %vm235_vm10, %vm236_vm9  ;;  %v256_v18 = vand.u32 2147483648, %v229_v4  ;;  %v254_v20 = vand.u32 2147483647, %v229_v4  ;;  %vm250_vm14 = vweird.f32 %v229_v4 }
 0x153   :  { %v232_v6 = vsub.f32 1.0, %v231_v5 }
 0x154   :  { %v257_v23 = vor.u32 1.1754944e-38, %v256_v18  ;;  %vm255_vm1 = vcmp.eq.f32.partialorder %v254_v20, 8.507059e+37 }
 0x155   :  { %v233_v7 = vmul.f32 %v441_v3, %v232_v6 }
 0x157   :  { %v234_v8 = vadd.f32 %v441_v3, %v233_v7 }
 0x158   :  { %v443_v9 = vpop.eup %442 }
 0x159   :  { %v246_v14 = vmul.f32 %v443_v9, %v229_v4  ;;  %v238_v15 = vsel %vm237_vm11, %v441_v3, %v234_v8  ;;  %vm251_vm13 = vweird.f32 %v443_v9 }
 0x15a   :  { %v243_v21 = vsel %vm240_vm12, %v242_v17, %v238_v15  ;;  %vm252_vm15 = vmor %vm250_vm14, %vm251_vm13 }
 0x15b   :  { %v247_v16 = vsub.f32 1.0, %v246_v14  ;;  %v260_v24 = vmul.f32 %v243_v21, %v217_v58 }
 0x15d   :  { %v248_v19 = vmul.f32 %v443_v9, %v247_v16  ;;  %v262_v28 = vmul.f32 1.6666666, %v260_v24 }
 0x15f   :  { %v249_v22 = vadd.f32 %v443_v9, %v248_v19 }
 0x161   :  { %v253_v25 = vsel %vm252_vm15, %v443_v9, %v249_v22 }
 0x162   :  { %v258_v26 = vsel %vm255_vm1, %v257_v23, %v253_v25 }
 0x163   :  { %v261_v27 = vmul.f32 %v258_v26, %v219_v62 }
 0x165   :  { %v263_v29 = vmul.f32 1.6666666, %v261_v27 }
 0x167   :  { %v264_v30 = vpack.c.bf16 %v263_v29, %v262_v28 }
 0x169   :  { %412 = vmatmul.msk.bf16.vlgmr.msrb.gmra.mxu0 %vm59_vm0, %v264_v30 }
 0x1e6   :  { %v289_v31 = vpop.f32.mrf.mxu0 }
 0x1e7   :  { %v413_v32 = vmul.f32 -1.442695, %v289_v31 }
 0x1e9   :  { %444 = vpow2.f32 %v413_v32 }
 0x1ee   :  { %v291_v33 = vpop.f32.mrf.mxu0 }
 0x1ef   :  { %v445_v34 = vpop.eup %444  ;;  %v414_v35 = vmul.f32 -1.442695, %v291_v33 }
 0x1f0   :  { %v300_v36 = vadd.f32 1.0, %v445_v34 }
 0x1f1   :  { %446 = vpow2.f32 %v414_v35 }
 0x1f2   :  { %448 = vrcp.f32 %v300_v36  ;;  %v313_v42 = vand.u32 2147483648, %v300_v36  ;;  %v311_v44 = vand.u32 2147483647, %v300_v36  ;;  %vm307_vm3 = vweird.f32 %v300_v36 }
 0x1f4   :  { %v314_v47 = vor.u32 1.1754944e-38, %v313_v42  ;;  %vm312_vm5 = vcmp.eq.f32.partialorder %v311_v44, 8.507059e+37 }
 0x1f7   :  { %v447_v37 = vpop.eup %446 }
 0x1f8   :  { %v449_v38 = vpop.eup %448  ;;  %v301_v39 = vadd.f32 1.0, %v447_v37 }
 0x1f9   :  { %v303_v40 = vmul.f32 %v449_v38, %v300_v36  ;;  %vm308_vm2 = vweird.f32 %v449_v38 }
 0x1fa   :  { %450 = vrcp.f32 %v301_v39  ;;  %vm309_vm4 = vmor %vm307_vm3, %vm308_vm2  ;;  %v328_v53 = vand.u32 2147483648, %v301_v39  ;;  %v326_v58 = vand.u32 2147483647, %v301_v39  ;;  %vm322_vm7 = vweird.f32 %v301_v39 }
 0x1fb   :  { %v304_v41 = vsub.f32 1.0, %v303_v40 }
 0x1fc   :  { %v329_v61 = vor.u32 1.1754944e-38, %v328_v53  ;;  %vm327_vm9 = vcmp.eq.f32.partialorder %v326_v58, 8.507059e+37 }
 0x1fd   :  { %v305_v43 = vmul.f32 %v449_v38, %v304_v41 }
 0x1ff   :  { %v306_v45 = vadd.f32 %v449_v38, %v305_v43 }
 0x200   :  { %v451_v46 = vpop.eup %450 }
 0x201   :  { %v310_v48 = vsel %vm309_vm4, %v449_v38, %v306_v45  ;;  %v318_v49 = vmul.f32 %v451_v46, %v301_v39  ;;  %vm323_vm6 = vweird.f32 %v451_v46 }
 0x202   :  { %v315_v50 = vsel %vm312_vm5, %v314_v47, %v310_v48  ;;  %vm324_vm8 = vmor %vm322_vm7, %vm323_vm6 }
 0x203   :  { %v332_v51 = vmul.f32 %v315_v50, %v289_v31  ;;  %v319_v52 = vsub.f32 1.0, %v318_v49 }
 0x205   :  { %v334_v54 = vmul.f32 1.6666666, %v332_v51  ;;  %v320_v57 = vmul.f32 %v451_v46, %v319_v52 }
 0x207   :  { %v336_v59 = vadd.f32 %v334_v54, %v577_v55  ;;  %v321_v60 = vadd.f32 %v451_v46, %v320_v57 }
 0x209   :  { %v338_v62 = vmul.f32 0.70710677, %v336_v59  ;;  %v325_v63 = vsel %vm324_vm8, %v451_v46, %v321_v60 }
 0x20a   :  { %v330_v0 = vsel %vm327_vm9, %v329_v61, %v325_v63 }
 0x20b   :  { %v340_v1 = vadd.f32 %v338_v62, %v559_v10  ;;  %v333_v2 = vmul.f32 %v330_v0, %v291_v33 }
 0x20d   :  { %v342_v3 = vmul.f32 0.70710677, %v340_v1  ;;  %v335_v4 = vmul.f32 1.6666666, %v333_v2 }
 0x20f   :  { %344 = vst.msk [vmem:[#allocation2] sm:$0xff] %vm59_vm0, %v342_v3  ;;  %v337_v5 = vadd.f32 %v335_v4, %v579_v56 }
 0x211   :  { %v339_v6 = vmul.f32 0.70710677, %v337_v5 }
 0x213   :  { %v341_v55 = vadd.f32 %v339_v6, %v564_v11 }
 0x215   :  { %v343_v7 = vmul.f32 0.70710677, %v341_v55 }
 0x217   :  { %345 = vst.msk [vmem:[#allocation2 + $0x8] sm:$0xff] %vm59_vm0, %v343_v7 }
 0x218   :  { %358 = dma.vmem_to_hbm [thread:$0]  %s351_s30, 256, %s353_s11, [#allocation3], %s479_s12, %s479_s12, %s480_s13  }
 0x219   :  { %476 = dma.done.wait [#allocation3], 256  }
 0x21a   :  { %477 = vsyncadd [#allocation3], 4294967040 }
 0x21b   :  { %363 = vsyncpa [#allocation3], 1 }

// kernel: interaction_block_forward.5
= control target key start
LH: loop header
LB: loop body
LE: loop exit
PB: predicated region body
PF: predicated region fallthrough
CT: control target
= control target key end

     0   :  { %v4777_v0 = vmov 0.0   ;;  %s8026_s0 = inlined_call_operand.<no memory space> [shape: s32[1], index: 0, kind: input, shape index: {}]   ;;  %s8027_s1 = inlined_call_operand.<no memory space> [shape: s32[1], index: 1, kind: input, shape index: {}]   ;;  %s8028_s4 = inlined_call_operand.vmem [shape: f32[16,64], index: 4, kind: input, shape index: {}]   ;;  %s8029_s5 = inlined_call_operand.vmem [shape: f32[16,32], index: 5, kind: input, shape index: {}]   ;;  %s8030_s6 = inlined_call_operand.vmem [shape: f32[16,32], index: 6, kind: input, shape index: {}]   ;;  %s8031_s7 = inlined_call_operand.vmem [shape: f32[16,8], index: 7, kind: input, shape index: {}]   ;;  %s8032_s8 = inlined_call_operand.vmem [shape: bf16[128,16], index: 8, kind: input, shape index: {}]   ;;  %s8033_s9 = inlined_call_operand.vmem [shape: bf16[16,32], index: 9, kind: input, shape index: {}]   ;;  %s8034_s10 = inlined_call_operand.vmem [shape: bf16[8,32], index: 10, kind: input, shape index: {}]   ;;  %s8035_s11 = inlined_call_operand.vmem [shape: bf16[1,32,32], index: 11, kind: input, shape index: {}]   ;;  %s8036_s12 = inlined_call_operand.vmem [shape: bf16[1,32,32], index: 12, kind: input, shape index: {}]   ;;  %s8037_s13 = inlined_call_operand.vmem [shape: bf16[1,32,32], index: 13, kind: input, shape index: {}]   ;;  %s8038_s14 = inlined_call_operand.vmem [shape: bf16[1,32,32], index: 14, kind: input, shape index: {}]   ;;  %s8039_s15 = inlined_call_operand.vmem [shape: f32[16,32], index: 15, kind: output, shape index: {0}]   ;;  %s8040_s16 = inlined_call_operand.vmem [shape: bf16[16,32], index: 16, kind: output, shape index: {1}]   ;;  %s8041_s2 = inlined_call_operand.vmem [shape: s32[1,32], index: 2, kind: input, shape index: {}]   ;;  %s8042_s3 = inlined_call_operand.vmem [shape: bf16[32,128], index: 3, kind: input, shape index: {}]  }
   0x1   :  { %8161 = sst [smem:[#allocation90_spill]] %s8026_s0  ;;  %s4551_s23 = sadd.s32 4294967295, %s8027_s1  ;;  %171 = vst [vmem:[#allocation2] sm:$0xff] %v4777_v0 }
   0x2   :  { %8162 = sst [smem:[#allocation91_spill]] %s8031_s7  ;;  %172 = vst [vmem:[#allocation2 + $0x8] sm:$0xff] %v4777_v0  ;;  %p4556_p3 = scmp.gt.s32.totalorder %s8027_s1, 0 }
   0x3   :  { %s8163_s7 = sld [smem:[#allocation90_spill]] }
   0x9   :  { %p126_p0 = scmp.gt.s32.totalorder %s8163_s7, 0  ;;  %p124_p1 = scmp.gt.s32.totalorder %s4551_s23, %s8163_s7 }
   0xa   :  { %p4555_p2 = scmp.le.s32.totalorder %s8163_s7, 0 }
   0xb   :  { %s127_s17 = scalar_select %p126_p0, %s8163_s7, 0 }
   0xc   :  { %s8554_s23 = smov (!%p124_p1, %s4551_s23), %s8163_s7  ;;  %p177_p5 = pnand %p4556_p3, %p4555_p2 }
   0xd   :  { %p128_p4 = scmp.lt.s32.totalorder %s8554_s23, %s127_s17 }
   0xf   :  { %s8556_s23 = smov (!%p128_p4, %s8554_s23), %s127_s17 }
  0x10   :  { %p130_p6 = scmp.lt.s32.totalorder %s8556_s23, 0  ;;  %s4553_s22 = sshll.u32 %s8556_s23, 2 }
  0x11   :  { %p152_p7 = scmp.lt.s32.totalorder %s4553_s22, 3  ;;  %180 = sbr.rel (%p177_p5) target bundleno = 169 (0xa9), region = 61 }
  0x12   :  { %s8558_s23 = smov (!%p130_p6, %s8556_s23), 0 }
  0x13   :  { %s8560_s22 = smov (!%p152_p7, %s4553_s22), 3  ;;  %s132_s26 = scalar_lea.vmem %s8041_s2, %s8558_s23 }
  0x14   :  { %s4554_s27 = sshll.u32 %s8560_s22, 2 }
  0x15   :  { %s155_s7 = scalar_lea.vmem %s8042_s3, %s4554_s27 }
  0x16   :  { %v4653_v1 = vld [vmem:[%s155_s7 + $0x8] sm:$0xff]  ;;  %v182_v2 = vlaneseq  ;;  %v4682_v3 = vld [vmem:[%s132_s26] ss:$0 sm:$0xff]  ;;  %v4778_v7 = vmov 0.0   ;;  %vm215_vm2 = vcmask 261120  }
  0x17   :  { %225 = vmatpush.bf16.msra.mxu0 %v4653_v1  ;;  %v4652_v4 = vld [vmem:[%s155_s7] sm:$0xff]  ;;  %v198_v14 = vld [vmem:[#allocation2 + $0x8] sm:$0xff] }
  0x18   :  { %v183_v5 = vshrl.u32 %v182_v2, 7  ;;  %v197_v11 = vld [vmem:[#allocation2] sm:$0xff] }
  0x1a   :  { %v184_v6 = vadd.s32 8, %v183_v5  ;;  %vm190_vm0 = vcmp.eq.s32.totalorder %v183_v5, %v4682_v3 }
  0x1b   :  { %v4557_v8 = vsel %vm190_vm0, 1.0, %v4778_v7  ;;  %226 = vmatpush.bf16.msra.mxu0 %v4652_v4 }
  0x1c   :  { %vm191_vm1 = vcmp.eq.s32.totalorder %v184_v6, %v4682_v3 }
  0x1d   :  { %v4558_v9 = vsel %vm191_vm1, 1.0, %v4778_v7 }
  0x1e   :  { %v196_v10 = vpack.c.bf16 %v4558_v9, %v4557_v8 }
  0x20   :  { %4567 = vmatmul.msk.bf16.vlgmr.msra.gmra.mxu0 %vm215_vm2, %v196_v10 }
  0x9d   :  { %v228_v12 = vpop.f32.mrf.mxu0 }
  0x9e   :  { %v233_v13 = vadd.f32 %v228_v12, %v197_v11 }
  0xa0   :  { %235 = vst [vmem:[#allocation2] sm:$0xff] %v233_v13 }
  0xa5   :  { %v230_v15 = vpop.f32.mrf.mxu0 }
  0xa6   :  { %v234_v16 = vadd.f32 %v230_v15, %v198_v14 }
  0xa8   :  { %236 = vst [vmem:[#allocation2 + $0x8] sm:$0xff] %v234_v16 }
  0xa9 PF:  { %v245_v17 = vlaneseq  ;;  %v242_v19 = vld [vmem:[%s8028_s4] sm:$0xff]  ;;  %v243_v26 = vld [vmem:[%s8028_s4 + $0x8] sm:$0xff]  ;;  %v4779_v59 = vmov 1983009808   ;;  %vm421_vm3 = vcmask 1047556   ;;  %s4781_s4 = smov 112  }
  0xaa   :  { %v4908_v20 = vperm.slane %v242_v19, 4  ;;  %v4910_v21 = vperm.slane %v242_v19, 2  ;;  %v4912_v22 = vperm.slane %v242_v19, 0  ;;  %v4917_v23 = vperm.slane %v242_v19, 5  ;;  %v240_v43 = vld [vmem:[#allocation2] sm:$0xff]  ;;  %s4782_s30 = smov 32  }
  0xab   :  { %v4900_v18 = vshrl.u32 %v245_v17, 7  ;;  %v4919_v24 = vperm.slane %v242_v19, 3  ;;  %v4921_v25 = vperm.slane %v242_v19, 1  ;;  %v4929_v27 = vperm.slane %v243_v26, 0  ;;  %s4783_s0 = smov 48   ;;  %s4784_s17 = smov 16  }
  0xac   :  { %8164 = vst [vmem:[#allocation6_spill] sm:$0xff] %v4908_v20  ;;  %v4931_v28 = vperm.slane %v242_v19, 7  ;;  %v4933_v29 = vperm.slane %v242_v19, 6  ;;  %v4938_v30 = vperm.slane %v243_v26, 3  ;;  %v4940_v31 = vperm.slane %v243_v26, 2  ;;  %s4785_s18 = smov 80  }
  0xad   :  { %4685 = vset.pattern.permute.xlu2 %v4900_v18  ;;  %4684 = vset.pattern.permute.xlu1 %v4900_v18  ;;  %8165 = vst [vmem:[#allocation7_spill] sm:$0xff] %v4912_v22  ;;  %v4942_v32 = vperm.slane %v243_v26, 1  ;;  %v4947_v33 = vperm.slane %v243_v26, 6  ;;  %v4949_v34 = vperm.slane %v243_v26, 5  ;;  %v4951_v35 = vperm.slane %v243_v26, 4  ;;  %s4786_s19 = smov 96  }
  0xae   :  { %4683 = vset.pattern.permute.xlu0 %v4900_v18  ;;  %8166 = vst [vmem:[#allocation8_spill] sm:$0xff] %v4917_v23  ;;  %v726_v36 = vadd.s32 8, %v4900_v18  ;;  %v4957_v37 = vperm.slane %v243_v26, 7  ;;  %v360_v45 = vrot.slane %v240_v43, 3  ;;  %v364_v48 = vrot.slane %v240_v43, 7  ;;  %s4787_s20 = smov 64  }
  0xaf   :  { %8167 = vst [vmem:[#allocation9_spill] sm:$0xff] %v4929_v27  ;;  %v363_v50 = vrot.slane %v240_v43, 6  ;;  %v362_v51 = vrot.slane %v240_v43, 5  ;;  %v361_v52 = vrot.slane %v240_v43, 4  ;;  %v359_v53 = vrot.slane %v240_v43, 2  ;;  %v241_v19 = vld [vmem:[#allocation2 + $0x8] sm:$0xff] }
  0xb0   :  { %8168 = vst [vmem:[#allocation10_spill] sm:$0xff] %v4951_v35  ;;  %v4980_v49 = vperm.slane %v360_v45, 0  ;;  %v358_v54 = vrot.slane %v240_v43, 1  ;;  %v4982_v55 = vperm.slane %v364_v48, 0  ;;  %v426_v60 = vunpack.c.l.s4 %v4779_v59 }
  0xb1   :  { %8169 = vst [vmem:[#allocation11_spill] sm:$0xff] %v4957_v37  ;;  %v4987_v57 = vperm.slane %v363_v50, 0  ;;  %v4989_v58 = vperm.slane %v362_v51, 0  ;;  %v4991_v61 = vperm.slane %v361_v52, 0  ;;  %v4993_v62 = vperm.slane %v359_v53, 0 }
  0xb2   :  { %v4997_v0 = vperm.slane %v358_v54, 0  ;;  %v5009_v7 = vunpack.c.0.s8 %v426_v60  ;;  %v5024_v14 = vperm.slane %v240_v43, 0  ;;  %v367_v48 = vrot.slane %v241_v19, 3 }
  0xb3   :  { %8170 = vst [vmem:[#allocation12_spill] sm:$0xff] %v4993_v62  ;;  %v366_v53 = vrot.slane %v241_v19, 2  ;;  %v365_v54 = vrot.slane %v241_v19, 1  ;;  %vm701_vm4 = vcmask 130048   ;;  %vm704_vm5 = vcmask 261120  }
  0xb4   :  { %8171 = vst [vmem:[#allocation13_spill] sm:$0xff] %v5009_v7  ;;  %vm707_vm6 = vcmask 392192   ;;  %vm710_vm7 = vcmask 523264   ;;  %vm713_vm8 = vcmask 654336   ;;  %vm716_vm9 = vcmask 785408  }
  0xb5   :  { %277 = vperm.xlu2 %4685, %v4908_v20   ;;  %263 = vperm.xlu1 %4684, %v4910_v21   ;;  %vm719_vm10 = vcmask 916480  }
  0xb6   :  { %249 = vperm.xlu0 %4683, %v4912_v22  }
  0xbd   :  { %284 = vperm.xlu2 %4685, %v4917_v23   ;;  %270 = vperm.xlu1 %4684, %v4919_v24  }
  0xbe   :  { %256 = vperm.xlu0 %4683, %v4921_v25  }
  0xc5   :  { %305 = vperm.xlu2 %4685, %v4929_v27   ;;  %298 = vperm.xlu1 %4684, %v4931_v28  }
  0xc6   :  { %291 = vperm.xlu0 %4683, %v4933_v29  }
  0xcd   :  { %326 = vperm.xlu2 %4685, %v4938_v30   ;;  %319 = vperm.xlu1 %4684, %v4940_v31  }
  0xce   :  { %312 = vperm.xlu0 %4683, %v4942_v32  }
  0xd5   :  { %347 = vperm.xlu2 %4685, %v4947_v33   ;;  %340 = vperm.xlu1 %4684, %v4949_v34  }
  0xd6   :  { %333 = vperm.xlu0 %4683, %v4951_v35  }
  0xdd   :  { %4688 = vset.pattern.permute.xlu2 %v726_v36  ;;  %4687 = vset.pattern.permute.xlu1 %v726_v36 }
  0xde   :  { %354 = vperm.xlu0 %4683, %v4957_v37  }
  0xe5   :  { %740 = vperm.xlu2 %4688, %v4910_v21   ;;  %734 = vperm.xlu1 %4687, %v4921_v25  }
  0xe6   :  { %4686 = vset.pattern.permute.xlu0 %v726_v36 }
  0xed   :  { %752 = vperm.xlu2 %4688, %v4908_v20   ;;  %746 = vperm.xlu1 %4687, %v4919_v24  }
  0xee   :  { %728 = vperm.xlu0 %4686, %v4912_v22  }
  0xf5   :  { %770 = vperm.xlu2 %4688, %v4931_v28   ;;  %764 = vperm.xlu1 %4687, %v4933_v29  }
  0xf6   :  { %758 = vperm.xlu0 %4686, %v4917_v23  }
  0xfd   :  { %788 = vperm.xlu2 %4688, %v4940_v31   ;;  %782 = vperm.xlu1 %4687, %v4942_v32  }
  0xfe   :  { %776 = vperm.xlu0 %4686, %v4929_v27  }
 0x105   :  { %806 = vperm.xlu2 %4688, %v4949_v34   ;;  %800 = vperm.xlu1 %4687, %v4951_v35  }
 0x106   :  { %794 = vperm.xlu0 %4686, %v4938_v30  }
 0x10d   :  { %818 = vperm.xlu1 %4687, %v4957_v37  }
 0x10e   :  { %812 = vperm.xlu0 %4686, %v4947_v33  }
 0x10f   :  { %v278_v38 = vpop.permute.xlu2 %277 }
 0x110   :  { %v5013_v9 = vmul.f32 %v4991_v61, %v278_v38 }
 0x117   :  { %v285_v39 = vpop.permute.xlu2 %284 }
 0x118   :  { %v5007_v6 = vmul.f32 %v4989_v58, %v285_v39  ;;  %v4780_v39 = vmov 1934713408  }
 0x11f   :  { %v4976_v40 = vpop.permute.xlu2 %305 }
 0x127   :  { %v264_v41 = vpop.permute.xlu1 %263  ;;  %v4978_v44 = vpop.permute.xlu2 %326 }
 0x128   :  { %v250_v42 = vpop.permute.xlu0 %249  ;;  %v5016_v10 = vmul.f32 %v4993_v62, %v264_v41  ;;  %v474_v41 = vunpack.c.l.s4 %v4780_v39 }
 0x129   :  { %v5043_v50 = vmul.f32 %v5024_v14, %v250_v42 }
 0x12a   :  { %v420_v26 = vrot.slane %v5016_v10, 4  ;;  %v5050_v59 = vunpack.c.0.s8 %v474_v41 }
 0x12c   :  { %v422_v52 = vsel %vm421_vm3, %v420_v26, %v5043_v50  ;;  %8172 = vst [vmem:[#allocation14_spill] sm:$0xff] %v5050_v59 }
 0x12f   :  { %v271_v46 = vpop.permute.xlu1 %270  ;;  %v4995_v63 = vpop.permute.xlu2 %347 }
 0x130   :  { %v257_v47 = vpop.permute.xlu0 %256  ;;  %v4985_v56 = vmul.f32 %v4980_v49, %v271_v46 }
 0x131   :  { %v5019_v11 = vmul.f32 %v4997_v0, %v257_v47 }
 0x132   :  { %v433_v4 = vrot.slane %v4985_v56, 4 }
 0x134   :  { %v434_v15 = vsel %vm421_vm3, %v433_v4, %v5019_v11  ;;  %v370_v4 = vrot.slane %v241_v19, 6 }
 0x135   :  { %v5036_v43 = vperm.slane %v434_v15, %v5009_v7 }
 0x136   :  { %v5072_v41 = vperm.slane %v370_v4, 0 }
 0x137   :  { %v299_v1 = vpop.permute.xlu1 %298  ;;  %v469_v60 = vrot.slane %v5036_v43, 4 }
 0x138   :  { %v5000_v2 = vmul.f32 %v4982_v55, %v299_v1  ;;  %v292_v3 = vpop.permute.xlu0 %291  ;;  %v5053_v1 = vperm.slane %v367_v48, 0  ;;  %8174 = vst [vmem:[#allocation16_spill] sm:$0xff] %v5072_v41 }
 0x139   :  { %v5004_v5 = vmul.f32 %v4987_v57, %v292_v3  ;;  %v5059_v3 = vperm.slane %v422_v52, %v5009_v7 }
 0x13a   :  { %v457_v8 = vrot.slane %v5000_v2, 4  ;;  %v5069_v26 = vmul.f32 %v5053_v1, %v4978_v44 }
 0x13b   :  { %v445_v12 = vrot.slane %v5004_v5, 4 }
 0x13c   :  { %v458_v13 = vsel %vm421_vm3, %v457_v8, %v5007_v6  ;;  %v545_v44 = vrot.slane %v5069_v26, 4 }
 0x13d   :  { %v5029_v16 = vperm.slane %v458_v13, %v5009_v7  ;;  %v446_v17 = vsel %vm421_vm3, %v445_v12, %v5013_v9  ;;  %v5061_v12 = vperm.slane %v366_v53, 0  ;;  %v5063_v13 = vperm.slane %v365_v54, 0 }
 0x13e   :  { %v5039_v45 = vperm.slane %v446_v17, %v5009_v7  ;;  %v470_v17 = vsel %vm421_vm3, %v469_v60, %v5059_v3  ;;  %v5083_v53 = vperm.slane %v241_v19, 0 }
 0x13f   :  { %v493_v36 = vrot.slane %v5029_v16, 4  ;;  %v741_v38 = vpop.permute.xlu2 %740  ;;  %v320_v8 = vpop.permute.xlu1 %319  ;;  %8173 = vst [vmem:[#allocation15_spill] sm:$0xff] %v5061_v12  ;;  %v5081_v52 = vperm.slane %v470_v17, %v5050_v59 }
 0x140   :  { %v822_v46 = vmul.f32 %v741_v38, %v4993_v62  ;;  %v313_v47 = vpop.permute.xlu0 %312  ;;  %v371_v38 = vrot.slane %v241_v19, 7  ;;  %v495_v35 = vrot.slane %v5039_v45, 4 }
 0x141   :  { %v494_v51 = vsel %vm421_vm3, %v493_v36, %v5039_v45  ;;  %v368_v36 = vrot.slane %v241_v19, 4  ;;  %v5078_v48 = vmul.f32 %v5063_v13, %v313_v47  ;;  %v5096_v47 = vmul.f32 %v5072_v41, %v4995_v63 }
 0x142   :  { %856 = vrot.lane.b32.xlu1 %v822_v46, %s4781_s4  ;;  %v5056_v42 = vperm.slane %v494_v51, %v5050_v59  ;;  %v5075_v46 = vmul.f32 %v5061_v12, %v320_v8  ;;  %v369_v51 = vrot.slane %v241_v19, 5  ;;  %v5088_v60 = vperm.slane %v371_v38, 0 }
 0x143   :  { %v5086_v54 = vperm.slane %v368_v36, 0  ;;  %v546_v19 = vsel %vm421_vm3, %v545_v44, %v5078_v48  ;;  %v5105_v38 = vmul.f32 %v5083_v53, %v4976_v40  ;;  %v557_v41 = vrot.slane %v5096_v47, 4 }
 0x144   :  { %v517_v39 = vrot.slane %v5056_v42, 4  ;;  %8175 = vst [vmem:[#allocation17_spill] sm:$0xff] %v5088_v60  ;;  %v533_v8 = vrot.slane %v5075_v46, 4  ;;  %v5101_v62 = vperm.slane %v369_v51, 0  ;;  %v552_v63 = vperm.slane %v546_v19, %v5009_v7 }
 0x146   :  { %v5092_v4 = vsel %vm421_vm3, %v517_v39, %v5081_v52  ;;  %v534_v44 = vsel %vm421_vm3, %v533_v8, %v5105_v38 }
 0x147   :  { %8176 = vst [vmem:[#allocation18_spill] sm:$0xff] %v5092_v4  ;;  %v341_v17 = vpop.permute.xlu1 %340 }
 0x148   :  { %v334_v15 = vpop.permute.xlu0 %333  ;;  %v5118_v51 = vmul.f32 %v5101_v62, %v341_v17 }
 0x149   :  { %v5108_v39 = vmul.f32 %v5086_v54, %v334_v15 }
 0x14b   :  { %v558_v40 = vsel %vm421_vm3, %v557_v41, %v5108_v39 }
 0x14c   :  { %v564_v23 = vperm.slane %v558_v40, %v5009_v7 }
 0x150   :  { %v355_v36 = vpop.permute.xlu0 %354 }
 0x151   :  { %v5111_v4 = vmul.f32 %v5088_v60, %v355_v36  ;;  %v540_v36 = vperm.slane %v534_v44, %v5009_v7  ;;  %v581_v60 = vrot.slane %v552_v63, 4  ;;  %v753_v44 = vpop.permute.xlu2 %752 }
 0x152   :  { %v824_v37 = vmul.f32 %v753_v44, %v4991_v61 }
 0x153   :  { %v569_v27 = vrot.slane %v5111_v4, 4  ;;  %v582_v41 = vsel %vm421_vm3, %v581_v60, %v540_v36 }
 0x155   :  { %v570_v15 = vsel %vm421_vm3, %v569_v27, %v5118_v51 }
 0x156   :  { %v576_v19 = vperm.slane %v570_v15, %v5009_v7  ;;  %v5137_v15 = vperm.slane %v582_v41, %v5050_v59  ;;  %v471_v41 = vrot.slane %v5059_v3, 4 }
 0x157   :  { %v735_v22 = vpop.permute.xlu1 %734 }
 0x158   :  { %v605_v8 = vrot.slane %v576_v19, 4  ;;  %v821_v17 = vmul.f32 %v735_v22, %v4997_v0  ;;  %v496_v22 = vsel %vm421_vm3, %v5029_v16, %v495_v35  ;;  %v583_v35 = vrot.slane %v540_v36, 4 }
 0x159   :  { %v472_v16 = vsel %vm421_vm3, %v5036_v43, %v471_v41  ;;  %v607_v43 = vrot.slane %v564_v23, 4 }
 0x15a   :  { %854 = vrot.lane.b32.xlu0 %v821_v17, %s4781_s4  ;;  %v606_v20 = vsel %vm421_vm3, %v605_v8, %v564_v23  ;;  %v435_v8 = vrot.slane %v5019_v11, 4  ;;  %v5150_v17 = vperm.slane %v496_v22, %v5050_v59  ;;  %v423_v22 = vrot.slane %v5043_v50, 4 }
 0x15b   :  { %v5134_v27 = vperm.slane %v606_v20, %v5050_v59  ;;  %v584_v41 = vsel %vm421_vm3, %v552_v63, %v583_v35  ;;  %v447_v23 = vrot.slane %v5013_v9, 4 }
 0x15c   :  { %v436_v11 = vsel %vm421_vm3, %v4985_v56, %v435_v8  ;;  %v559_v56 = vrot.slane %v5108_v39, 4  ;;  %v424_v63 = vsel %vm421_vm3, %v5016_v10, %v423_v22  ;;  %v571_v39 = vrot.slane %v5118_v51, 4 }
 0x15d   :  { %v629_v40 = vrot.slane %v5134_v27, 4  ;;  %v5169_v36 = vperm.slane %v436_v11, %v5009_v7  ;;  %v592_v35 = vperm.slane %v584_v41, %v5050_v59  ;;  %v448_v11 = vsel %vm421_vm3, %v5004_v5, %v447_v23 }
 0x15e   :  { %v560_v9 = vsel %vm421_vm3, %v5096_v47, %v559_v56  ;;  %v5195_v10 = vperm.slane %v424_v63, %v5009_v7  ;;  %v572_v22 = vsel %vm421_vm3, %v5111_v4, %v571_v39  ;;  %v5203_v5 = vperm.slane %v448_v11, %v5009_v7 }
 0x15f   :  { %v5145_v45 = vsel %vm421_vm3, %v629_v40, %v5137_v15  ;;  %v747_v44 = vpop.permute.xlu1 %746  ;;  %v459_v40 = vrot.slane %v5007_v6, 4  ;;  %v568_v47 = vperm.slane %v560_v9, %v5009_v7  ;;  %v580_v56 = vperm.slane %v572_v22, %v5009_v7 }
 0x160   :  { %8177 = vst [vmem:[#allocation19_spill] sm:$0xff] %v5145_v45  ;;  %v729_v60 = vpop.permute.xlu0 %728  ;;  %v631_v9 = vrot.slane %v5137_v15, 4 }
 0x161   :  { %v820_v20 = vmul.f32 %v729_v60, %v5024_v14  ;;  %v521_v60 = vrot.slane %v5150_v17, 4  ;;  %v460_v3 = vsel %vm421_vm3, %v5000_v2, %v459_v40  ;;  %v617_v22 = vrot.slane %v580_v56, 4 }
 0x162   :  { %860 = vrot.lane.b32.xlu0 %v824_v37, %s4781_s4  ;;  %v823_v37 = vmul.f32 %v747_v44, %v4980_v49  ;;  %v5177_v2 = vperm.slane %v460_v3, %v5009_v7  ;;  %v608_v44 = vsel %vm421_vm3, %v576_v19, %v607_v43  ;;  %v519_v43 = vrot.slane %v5081_v52, 4 }
 0x163   :  { %852 = vrot.lane.b32.xlu2 %v820_v20, %s4781_s4  ;;  %v5166_v20 = vperm.slane %v472_v16, %v5050_v59  ;;  %v481_v16 = vrot.slane %v5169_v36, 4  ;;  %v616_v19 = vperm.slane %v608_v44, %v5050_v59  ;;  %v619_v44 = vrot.slane %v568_v47, 4 }
 0x164   :  { %v505_v51 = vrot.slane %v5177_v2, 4 }
 0x165   :  { %v522_v50 = vsel %vm421_vm3, %v521_v60, %v5166_v20  ;;  %v535_v60 = vrot.slane %v5105_v38, 4  ;;  %v547_v38 = vrot.slane %v5078_v48, 4  ;;  %v5223_v48 = vadd.s32 16, %v4900_v18 }
 0x166   :  { %v506_v52 = vsel %vm421_vm3, %v505_v51, %v5203_v5  ;;  %v633_v63 = vrot.slane %v616_v19, 4  ;;  %v620_v39 = vsel %vm421_vm3, %v580_v56, %v619_v44  ;;  %v507_v44 = vrot.slane %v5203_v5, 4 }
 0x167   :  { %v765_v40 = vpop.permute.xlu1 %764  ;;  %v536_v41 = vsel %vm421_vm3, %v5075_v46, %v535_v60  ;;  %v548_v23 = vsel %vm421_vm3, %v5069_v26, %v547_v38  ;;  %4691 = vset.pattern.permute.xlu0 %v5223_v48  ;;  %4689 = vset.pattern.permute.xlu1 %v5223_v48  ;;  %v628_v26 = vperm.slane %v620_v39, %v5050_v59  ;;  %v771_v38 = vpop.permute.xlu2 %770 }
 0x168   :  { %v759_v6 = vpop.permute.xlu0 %758  ;;  %v826_v3 = vmul.f32 %v765_v40, %v4987_v57  ;;  %4690 = vset.pattern.permute.xlu2 %v5223_v48  ;;  %v556_v11 = vperm.slane %v548_v23, %v5009_v7  ;;  %v632_v60 = vsel %vm421_vm3, %v5134_v27, %v631_v9  ;;  %v523_v27 = vrot.slane %v5166_v20, 4 }
 0x169   :  { %v825_v8 = vmul.f32 %v759_v6, %v4989_v58  ;;  %v482_v6 = vsel %vm421_vm3, %v481_v16, %v5195_v10  ;;  %v827_v23 = vmul.f32 %v771_v38, %v4982_v55  ;;  %v5296_v38 = vadd.s32 24, %v4900_v18 }
 0x16a   :  { %655 = vrot.lane.b32.xlu0 %v522_v50, %s4782_s30  ;;  %v488_v46 = vperm.slane %v482_v6, %v5050_v59  ;;  %v544_v50 = vperm.slane %v536_v41, %v5009_v7  ;;  %v593_v15 = vrot.slane %v556_v11, 4  ;;  %v618_v41 = vsel %vm421_vm3, %v617_v22, %v568_v47 }
 0x16b   :  { %858 = vrot.lane.b32.xlu2 %v823_v37, %s4781_s4  ;;  %862 = vrot.lane.b32.xlu1 %v825_v8, %s4781_s4  ;;  %v635_v37 = vrot.slane %v592_v35, 4  ;;  %v520_v8 = vsel %vm421_vm3, %v5056_v42, %v519_v43  ;;  %v512_v42 = vperm.slane %v506_v52, %v5050_v59  ;;  %v524_v56 = vsel %vm421_vm3, %v5150_v17, %v523_v27 }
 0x16c   :  { %v527_v16 = vrot.slane %v488_v46, 4  ;;  %v595_v40 = vrot.slane %v544_v50, 4  ;;  %v624_v52 = vperm.slane %v618_v41, %v5050_v59  ;;  %v508_v17 = vsel %vm421_vm3, %v5177_v2, %v507_v44 }
 0x16d   :  { %v636_v4 = vsel %vm421_vm3, %v616_v19, %v635_v37  ;;  %v634_v19 = vsel %vm421_vm3, %v633_v63, %v592_v35  ;;  %v641_v37 = vrot.slane %v628_v26, 4  ;;  %v525_v43 = vrot.slane %v512_v42, 4 }
 0x16e   :  { %v528_v51 = vsel %vm421_vm3, %v512_v42, %v527_v16  ;;  %v594_v35 = vsel %vm421_vm3, %v593_v15, %v544_v50  ;;  %v637_v47 = vrot.slane %v624_v52, 4  ;;  %v483_v50 = vrot.slane %v5195_v10, 4 }
 0x16f   :  { %v600_v20 = vperm.slane %v594_v35, %v5050_v59  ;;  %v516_v39 = vperm.slane %v508_v17, %v5050_v59  ;;  %v789_v16 = vpop.permute.xlu2 %788  ;;  %v8181_v17 = vld [vmem:[#allocation11_spill] sm:$0xff] }
 0x170   :  { %v484_v42 = vsel %vm421_vm3, %v5169_v36, %v483_v50 }
 0x171   :  { %v638_v5 = vsel %vm421_vm3, %v637_v47, %v600_v20  ;;  %v492_v2 = vperm.slane %v484_v42, %v5050_v59  ;;  %v529_v10 = vrot.slane %v516_v39, 4 }
 0x172   :  { %665 = vrot.lane.b32.xlu0 %v636_v4, %s4783_s0 }
 0x173   :  { %864 = vrot.lane.b32.xlu2 %v826_v3, %s4781_s4  ;;  %647 = vrot.lane.b32.xlu1 %v520_v8, %s4784_s17  ;;  %v596_v3 = vsel %vm421_vm3, %v556_v11, %v595_v40  ;;  %v526_v8 = vsel %vm421_vm3, %v525_v43, %v488_v46  ;;  %v639_v46 = vrot.slane %v600_v20, 4  ;;  %v830_v40 = vmul.f32 %v789_v16, %v5061_v12  ;;  %v783_v43 = vpop.permute.xlu1 %782 }
 0x174   :  { %v604_v6 = vperm.slane %v596_v3, %v5050_v59  ;;  %v531_v11 = vrot.slane %v492_v2, 4  ;;  %v530_v36 = vsel %vm421_vm3, %v529_v10, %v492_v2  ;;  %v829_v41 = vmul.f32 %v783_v43, %v5063_v13  ;;  %v8186_v10 = vld [vmem:[#allocation10_spill] sm:$0xff] }
 0x175   :  { %v640_v63 = vsel %vm421_vm3, %v624_v52, %v639_v46 }
 0x176   :  { %v642_v4 = vsel %vm421_vm3, %v641_v37, %v604_v6  ;;  %v532_v9 = vsel %vm421_vm3, %v516_v39, %v531_v11  ;;  %v643_v22 = vrot.slane %v604_v6, 4  ;;  %v8183_v39 = vld [vmem:[#allocation6_spill] sm:$0xff] }
 0x178   :  { %v644_v15 = vsel %vm421_vm3, %v628_v26, %v643_v22 }
 0x17a   :  { %679 = vrot.lane.b32.xlu0 %v528_v51, %s4785_s18  ;;  %v777_v51 = vpop.permute.xlu0 %776 }
 0x17b   :  { %649 = vrot.lane.b32.xlu2 %v632_v60, %s4784_s17  ;;  %657 = vrot.lane.b32.xlu1 %v634_v19, %s4782_s30  ;;  %v807_v60 = vpop.permute.xlu2 %806  ;;  %v828_v3 = vmul.f32 %v777_v51, %v5083_v53  ;;  %v801_v6 = vpop.permute.xlu1 %800 }
 0x17c   :  { %v833_v19 = vmul.f32 %v807_v60, %v5101_v62  ;;  %v832_v26 = vmul.f32 %v801_v6, %v5086_v54 }
 0x182   :  { %689 = vrot.lane.b32.xlu0 %v642_v4, %s4786_s19  ;;  %v795_v37 = vpop.permute.xlu0 %794 }
 0x183   :  { %663 = vrot.lane.b32.xlu2 %v524_v56, %s4783_s0  ;;  %671 = vrot.lane.b32.xlu1 %v526_v8, %s4787_s20  ;;  %v831_v27 = vmul.f32 %v795_v37, %v5053_v1  ;;  %v5298_v4 = vpop.permute.xlu1 %818  ;;  %v5361_v37 = vadd.s32 32, %v4900_v18 }
 0x18a   :  { %866 = vrot.lane.b32.xlu0 %v827_v23, %s4781_s4  ;;  %v5311_v52 = vpop.permute.xlu0 %812 }
 0x18b   :  { %673 = vrot.lane.b32.xlu2 %v638_v5, %s4787_s20  ;;  %681 = vrot.lane.b32.xlu1 %v640_v63, %s4785_s18 }
 0x192   :  { %872 = vrot.lane.b32.xlu0 %v830_v40, %s4781_s4 }
 0x193   :  { %687 = vrot.lane.b32.xlu2 %v530_v36, %s4786_s19  ;;  %695 = vrot.lane.b32.xlu1 %v532_v9, %s4781_s4  ;;  %v8190_v9 = vld [vmem:[#allocation8_spill] sm:$0xff] }
 0x19a   :  { %878 = vrot.lane.b32.xlu0 %v833_v19, %s4781_s4  ;;  %v8193_v19 = vld [vmem:[#allocation7_spill] sm:$0xff] }
 0x19b   :  { %697 = vrot.lane.b32.xlu2 %v644_v15, %s4781_s4  ;;  %868 = vrot.lane.b32.xlu1 %v828_v3, %s4781_s4 }
 0x1a2   :  { %1236 = vperm.xlu0 %4691, %v4933_v29  }
 0x1a3   :  { %870 = vrot.lane.b32.xlu2 %v829_v41, %s4781_s4  ;;  %874 = vrot.lane.b32.xlu1 %v831_v27, %s4781_s4 }
 0x1aa   :  { %1254 = vperm.xlu0 %4691, %v4942_v32  }
 0x1ab   :  { %876 = vrot.lane.b32.xlu2 %v832_v26, %s4781_s4  ;;  %1218 = vperm.xlu1 %4689, %v4919_v24  }
 0x1b2   :  { %1278 = vperm.xlu0 %4691, %v4949_v34  }
 0x1b3   :  { %1266 = vperm.xlu2 %4690, %v4938_v30   ;;  %1284 = vperm.xlu1 %4689, %v4947_v33  }
 0x1b4   :  { %v5305_v56 = vpop.permute.xlu1 %856 }
 0x1b5   :  { %8179 = vst [vmem:[#allocation21_spill] sm:$0xff] %v5305_v56  ;;  %v900_v8 = vrot.slane %v5305_v56, 4 }
 0x1ba   :  { %4694 = vset.pattern.permute.xlu0 %v5296_v38 }
 0x1bb   :  { %1206 = vperm.xlu2 %4690, %v4921_v25   ;;  %1212 = vperm.xlu1 %4689, %v4910_v21  }
 0x1bd   :  { %v5303_v35 = vpop.permute.xlu2 %852 }
 0x1be   :  { %8178 = vst [vmem:[#allocation20_spill] sm:$0xff] %v5303_v35  ;;  %v901_v44 = vsel %vm421_vm3, %v900_v8, %v5303_v35  ;;  %v8200_v8 = vld [vmem:[#allocation9_spill] sm:$0xff] }
 0x1bf   :  { %v907_v50 = vperm.slane %v901_v44, %v5009_v7 }
 0x1c1   :  { %v950_v42 = vrot.slane %v907_v50, 4 }
 0x1c2   :  { %1690 = vperm.xlu0 %4694, %v4919_v24  }
 0x1c3   :  { %1242 = vperm.xlu2 %4690, %v4931_v28   ;;  %1260 = vperm.xlu1 %4689, %v4940_v31  }
 0x1c5   :  { %v5315_v20 = vpop.permute.xlu2 %858 }
 0x1c6   :  { %8180 = vst [vmem:[#allocation22_spill] sm:$0xff] %v5315_v20  ;;  %v912_v47 = vrot.slane %v5315_v20, 4 }
 0x1ca   :  { %1678 = vperm.xlu0 %4694, %v4921_v25  }
 0x1cb   :  { %1290 = vperm.xlu2 %4690, %v8181_v17   ;;  %4692 = vset.pattern.permute.xlu1 %v5296_v38 }
 0x1cc   :  { %v5322_v23 = vpop.permute.xlu0 %854 }
 0x1cd   :  { %8182 = vst [vmem:[#allocation11_spill] sm:$0xff] %v5322_v23  ;;  %v913_v46 = vsel %vm421_vm3, %v912_v47, %v5322_v23  ;;  %v5333_v2 = vpop.permute.xlu2 %864 }
 0x1ce   :  { %v919_v5 = vperm.slane %v913_v46, %v5009_v7  ;;  %8185 = vst [vmem:[#allocation23_spill] sm:$0xff] %v5333_v2  ;;  %v924_v41 = vrot.slane %v5333_v2, 4 }
 0x1d0   :  { %v951_v63 = vsel %vm421_vm3, %v919_v5, %v950_v42 }
 0x1d1   :  { %v959_v45 = vperm.slane %v951_v63, %v5050_v59 }
 0x1d2   :  { %1762 = vperm.xlu0 %4694, %v8181_v17  }
 0x1d3   :  { %1224 = vperm.xlu2 %4690, %v8183_v39   ;;  %1738 = vperm.xlu1 %4692, %v4938_v30  }
 0x1d4   :  { %v5331_v16 = vpop.permute.xlu0 %860 }
 0x1d5   :  { %8184 = vst [vmem:[#allocation6_spill] sm:$0xff] %v5331_v16  ;;  %v5342_v36 = vpop.permute.xlu2 %649  ;;  %v925_v26 = vsel %vm421_vm3, %v924_v41, %v5331_v16  ;;  %v948_v41 = vrot.slane %v919_v5, 4 }
 0x1d6   :  { %8189 = vst [vmem:[#allocation25_spill] sm:$0xff] %v5342_v36  ;;  %v931_v44 = vperm.slane %v925_v26, %v5009_v7 }
 0x1d7   :  { %v949_v36 = vsel %vm421_vm3, %v948_v41, %v907_v50 }
 0x1da   :  { %1696 = vperm.xlu0 %4694, %v8183_v39  }
 0x1db   :  { %1272 = vperm.xlu2 %4690, %v8186_v10   ;;  %4693 = vset.pattern.permute.xlu1 %v5223_v48 }
 0x1dc   :  { %v5338_v40 = vpop.permute.xlu0 %655 }
 0x1dd   :  { %8187 = vst [vmem:[#allocation10_spill] sm:$0xff] %v5338_v40  ;;  %v5340_v11 = vpop.permute.xlu1 %862  ;;  %v5352_v22 = vpop.permute.xlu2 %663 }
 0x1de   :  { %8188 = vst [vmem:[#allocation24_spill] sm:$0xff] %v5340_v11 }
 0x1df   :  { %8194 = vst [vmem:[#allocation7_spill] sm:$0xff] %v5352_v22 }
 0x1e2   :  { %1750 = vperm.xlu0 %4694, %v4949_v34  }
 0x1e3   :  { %4696 = vset.pattern.permute.xlu2 %v5296_v38  ;;  %1230 = vperm.xlu1 %4693, %v8190_v9  }
 0x1e4   :  { %v5347_v51 = vpop.permute.xlu0 %665 }
 0x1e5   :  { %8191 = vst [vmem:[#allocation8_spill] sm:$0xff] %v5347_v51  ;;  %v5349_v60 = vpop.permute.xlu1 %647  ;;  %v5369_v27 = vpop.permute.xlu2 %673  ;;  %v974_v51 = vrot.slane %v931_v44, 4 }
 0x1e6   :  { %8192 = vst [vmem:[#allocation26_spill] sm:$0xff] %v5349_v60 }
 0x1e7   :  { %8198 = vst [vmem:[#allocation30_spill] sm:$0xff] %v5369_v27 }
 0x1ea   :  { %1672 = vperm.xlu0 %4694, %v8193_v19  }
 0x1eb   :  { %1756 = vperm.xlu2 %4696, %v4947_v33   ;;  %4695 = vset.pattern.permute.xlu1 %v5296_v38 }
 0x1ec   :  { %v5356_v3 = vpop.permute.xlu0 %679 }
 0x1ed   :  { %8195 = vst [vmem:[#allocation27_spill] sm:$0xff] %v5356_v3  ;;  %v5358_v15 = vpop.permute.xlu1 %657  ;;  %v5403_v3 = vadd.s32 40, %v4900_v18 }
 0x1ee   :  { %8196 = vst [vmem:[#allocation28_spill] sm:$0xff] %v5358_v15 }
 0x1f2   :  { %4708 = vset.pattern.permute.xlu0 %v5361_v37 }
 0x1f3   :  { %4698 = vset.pattern.permute.xlu2 %v5223_v48  ;;  %1708 = vperm.xlu1 %4695, %v4933_v29  }
 0x1f4   :  { %v5366_v43 = vpop.permute.xlu0 %689 }
 0x1f5   :  { %8197 = vst [vmem:[#allocation29_spill] sm:$0xff] %v5366_v43  ;;  %v5371_v6 = vpop.permute.xlu1 %671  ;;  %v5384_v43 = vpop.permute.xlu2 %687 }
 0x1f6   :  { %8199 = vst [vmem:[#allocation31_spill] sm:$0xff] %v5371_v6 }
 0x1f7   :  { %8203 = vst [vmem:[#allocation33_spill] sm:$0xff] %v5384_v43  ;;  %v1002_v43 = vrot.slane %v959_v45, 4 }
 0x1fa   :  { %2156 = vperm.xlu0 %4708, %v4910_v21  }
 0x1fb   :  { %1248 = vperm.xlu2 %4698, %v8200_v8   ;;  %4697 = vset.pattern.permute.xlu1 %v5223_v48 }
 0x1fc   :  { %v5379_v47 = vpop.permute.xlu0 %866 }
 0x1fd   :  { %8201 = vst [vmem:[#allocation9_spill] sm:$0xff] %v5379_v47  ;;  %v936_v46 = vrot.slane %v5379_v47, 4  ;;  %v5382_v42 = vpop.permute.xlu1 %681  ;;  %v5415_v41 = vpop.permute.xlu2 %697 }
 0x1fe   :  { %8202 = vst [vmem:[#allocation32_spill] sm:$0xff] %v5382_v42 }
 0x1ff   :  { %v937_v27 = vsel %vm421_vm3, %v936_v46, %v5340_v11  ;;  %8209 = vst [vmem:[#allocation39_spill] sm:$0xff] %v5415_v41  ;;  %v8220_v11 = vld [vmem:[#allocation16_spill] sm:$0xff] }
 0x200   :  { %v943_v15 = vperm.slane %v937_v27, %v5009_v7 }
 0x202   :  { %v972_v48 = vrot.slane %v943_v15, 4  ;;  %2222 = vperm.xlu0 %4708, %v4949_v34   ;;  %v975_v26 = vsel %vm421_vm3, %v943_v15, %v974_v51  ;;  %v5406_v51 = vperm.slane %v949_v36, %v5050_v59 }
 0x203   :  { %4700 = vset.pattern.permute.xlu2 %v5296_v38  ;;  %1200 = vperm.xlu1 %4697, %v8193_v19   ;;  %v983_v42 = vperm.slane %v975_v26, %v5050_v59 }
 0x204   :  { %v973_v5 = vsel %vm421_vm3, %v972_v48, %v931_v44  ;;  %8206 = vst [vmem:[#allocation36_spill] sm:$0xff] %v5406_v51  ;;  %v873_v26 = vpop.permute.xlu0 %872 }
 0x205   :  { %v5397_v46 = vpop.permute.xlu1 %695  ;;  %v5400_v27 = vperm.slane %v973_v5, %v5050_v59  ;;  %v1000_v63 = vrot.slane %v983_v42, 4  ;;  %v5413_v44 = vsel %vm421_vm3, %v983_v42, %v1002_v43  ;;  %v871_v43 = vpop.permute.xlu2 %870  ;;  %v1012_v41 = vrot.slane %v873_v26, 4 }
 0x206   :  { %8204 = vst [vmem:[#allocation34_spill] sm:$0xff] %v5397_v46 }
 0x207   :  { %8205 = vst [vmem:[#allocation35_spill] sm:$0xff] %v5400_v27  ;;  %v5409_v15 = vsel %vm421_vm3, %v1000_v63, %v959_v45  ;;  %v996_v50 = vrot.slane %v5400_v27, 4  ;;  %v1026_v63 = vrot.slane %v871_v43, 4 }
 0x208   :  { %8207 = vst [vmem:[#allocation37_spill] sm:$0xff] %v5409_v15 }
 0x209   :  { %8208 = vst [vmem:[#allocation38_spill] sm:$0xff] %v5413_v44  ;;  %v5419_v48 = vsel %vm421_vm3, %v996_v50, %v5406_v51 }
 0x20a   :  { %8210 = vst [vmem:[#allocation40_spill] sm:$0xff] %v5419_v48  ;;  %4712 = vset.pattern.permute.xlu0 %v5403_v3 }
 0x20b   :  { %1714 = vperm.xlu2 %4700, %v4931_v28   ;;  %4699 = vset.pattern.permute.xlu1 %v5296_v38 }
 0x20d   :  { %v869_v36 = vpop.permute.xlu1 %868 }
 0x20e   :  { %v1014_v45 = vrot.slane %v869_v36, 4  ;;  %v1013_v40 = vsel %vm421_vm3, %v1012_v41, %v869_v36  ;;  %v5484_v41 = vpop.permute.xlu0 %878  ;;  %v5487_v36 = vadd.s32 56, %v4900_v18 }
 0x20f   :  { %8218 = vst [vmem:[#allocation48_spill] sm:$0xff] %v5484_v41 }
 0x210   :  { %v1015_v5 = vsel %vm421_vm3, %v873_v26, %v1014_v45  ;;  %v5447_v26 = vperm.slane %v1013_v40, %v5009_v7  ;;  %v5469_v40 = vadd.s32 48, %v4900_v18 }
 0x211   :  { %v5427_v42 = vperm.slane %v1015_v5, %v5009_v7 }
 0x212   :  { %2634 = vperm.xlu0 %4712, %v4919_v24   ;;  %8215 = vst [vmem:[#allocation45_spill] sm:$0xff] %v5447_v26 }
 0x213   :  { %8211 = vst [vmem:[#allocation41_spill] sm:$0xff] %v5427_v42  ;;  %1732 = vperm.xlu2 %4700, %v4940_v31   ;;  %1684 = vperm.xlu1 %4699, %v4910_v21   ;;  %v1074_v22 = vrot.slane %v5427_v42, 4 }
 0x215   :  { %v875_v50 = vpop.permute.xlu1 %874 }
 0x216   :  { %v1024_v46 = vrot.slane %v875_v50, 4  ;;  %v1027_v6 = vsel %vm421_vm3, %v875_v50, %v1026_v63  ;;  %v5494_v50 = vpop.permute.xlu0 %1236 }
 0x217   :  { %v5434_v45 = vperm.slane %v1027_v6, %v5009_v7 }
 0x218   :  { %v1025_v5 = vsel %vm421_vm3, %v1024_v46, %v871_v43 }
 0x219   :  { %8212 = vst [vmem:[#allocation42_spill] sm:$0xff] %v5434_v45  ;;  %v5439_v60 = vperm.slane %v1025_v5, %v5009_v7  ;;  %v5443_v44 = vsel %vm421_vm3, %v5434_v45, %v1074_v22  ;;  %v5474_v22 = vpop.permute.xlu2 %876 }
 0x21a   :  { %8214 = vst [vmem:[#allocation44_spill] sm:$0xff] %v5443_v44  ;;  %2622 = vperm.xlu0 %4712, %v4921_v25  }
 0x21b   :  { %8213 = vst [vmem:[#allocation43_spill] sm:$0xff] %v5439_v60  ;;  %v1060_v63 = vrot.slane %v5439_v60, 4  ;;  %4702 = vset.pattern.permute.xlu2 %v5361_v37  ;;  %1726 = vperm.xlu1 %4699, %v4942_v32  }
 0x21c   :  { %8217 = vst [vmem:[#allocation47_spill] sm:$0xff] %v5474_v22 }
 0x21d   :  { %v5454_v6 = vsel %vm421_vm3, %v1060_v63, %v5447_v26 }
 0x21e   :  { %8216 = vst [vmem:[#allocation46_spill] sm:$0xff] %v5454_v6  ;;  %v5499_v5 = vpop.permute.xlu0 %1254  ;;  %v1219_v6 = vpop.permute.xlu1 %1218 }
 0x21f   :  { %v1295_v45 = vmul.f32 %v1219_v6, %v4980_v49 }
 0x221   :  { %v5479_v46 = vpop.permute.xlu2 %1266 }
 0x222   :  { %2706 = vperm.xlu0 %4712, %v8181_v17  }
 0x223   :  { %2210 = vperm.xlu2 %4702, %v4938_v30   ;;  %4701 = vset.pattern.permute.xlu1 %v5361_v37 }
 0x226   :  { %v1279_v63 = vpop.permute.xlu0 %1278  ;;  %v1285_v2 = vpop.permute.xlu1 %1284 }
 0x227   :  { %v1306_v20 = vmul.f32 %v1285_v2, %v8220_v11 }
 0x229   :  { %v5490_v43 = vpop.permute.xlu2 %1206 }
 0x22a   :  { %2640 = vperm.xlu0 %4712, %v8183_v39  }
 0x22b   :  { %4704 = vset.pattern.permute.xlu2 %v5296_v38  ;;  %2162 = vperm.xlu1 %4701, %v4919_v24  }
 0x22e   :  { %v5519_v16 = vpop.permute.xlu1 %1212 }
 0x232   :  { %2694 = vperm.xlu0 %4712, %v4949_v34  }
 0x233   :  { %1744 = vperm.xlu2 %4704, %v8186_v10   ;;  %4703 = vset.pattern.permute.xlu1 %v5296_v38 }
 0x234   :  { %v5507_v15 = vpop.permute.xlu0 %1690 }
 0x236   :  { %v5530_v23 = vpop.permute.xlu1 %1260 }
 0x23a   :  { %2616 = vperm.xlu0 %4712, %v8193_v19  }
 0x23b   :  { %4706 = vset.pattern.permute.xlu2 %v5361_v37  ;;  %1702 = vperm.xlu1 %4703, %v8190_v9  }
 0x23c   :  { %v5517_v56 = vpop.permute.xlu0 %1678 }
 0x242   :  { %4726 = vset.pattern.permute.xlu0 %v5469_v40 }
 0x243   :  { %2228 = vperm.xlu2 %4706, %v4947_v33   ;;  %4705 = vset.pattern.permute.xlu1 %v5361_v37 }
 0x244   :  { %v5527_v35 = vpop.permute.xlu0 %1762 }
 0x245   :  { %8219 = vst [vmem:[#allocation49_spill] sm:$0xff] %v5527_v35  ;;  %v5540_v59 = vpop.permute.xlu1 %1738 }
 0x24a   :  { %3100 = vperm.xlu0 %4726, %v4910_v21  }
 0x24b   :  { %2150 = vperm.xlu2 %4706, %v4921_v25   ;;  %2180 = vperm.xlu1 %4705, %v4933_v29  }
 0x24c   :  { %v5538_v44 = vpop.permute.xlu0 %1696 }
 0x24d   :  { %8222 = vst [vmem:[#allocation50_spill] sm:$0xff] %v5538_v44 }
 0x252   :  { %3166 = vperm.xlu0 %4726, %v4949_v34  }
 0x253   :  { %2198 = vperm.xlu2 %4706, %v4942_v32   ;;  %4707 = vset.pattern.permute.xlu1 %v5296_v38  ;;  %v1243_v38 = vpop.permute.xlu2 %1242 }
 0x254   :  { %v5550_v7 = vpop.permute.xlu0 %1750 }
 0x255   :  { %v5548_v26 = vpop.permute.xlu1 %1230 }
 0x25a   :  { %4730 = vset.pattern.permute.xlu0 %v5487_v36 }
 0x25b   :  { %2234 = vperm.xlu2 %4706, %v8181_v17   ;;  %1720 = vperm.xlu1 %4707, %v8200_v8   ;;  %v1291_v18 = vpop.permute.xlu2 %1290 }
 0x25c   :  { %v5561_v27 = vpop.permute.xlu0 %1672 }
 0x25d   :  { %8227 = vst [vmem:[#allocation53_spill] sm:$0xff] %v5561_v27 }
 0x262   :  { %3578 = vperm.xlu0 %4730, %v4919_v24  }
 0x263   :  { %2168 = vperm.xlu2 %4706, %v8183_v39   ;;  %4709 = vset.pattern.permute.xlu1 %v5361_v37  ;;  %v1225_v48 = vpop.permute.xlu2 %1224 }
 0x265   :  { %v5556_v41 = vpop.permute.xlu1 %1708 }
 0x266   :  { %8226 = vst [vmem:[#allocation52_spill] sm:$0xff] %v5556_v41 }
 0x26a   :  { %3566 = vperm.xlu0 %4730, %v4921_v25  }
 0x26b   :  { %2216 = vperm.xlu2 %4706, %v8186_v10   ;;  %2186 = vperm.xlu1 %4709, %v4931_v28   ;;  %v5513_v42 = vpop.permute.xlu2 %1272 }
 0x26c   :  { %v5567_v22 = vpop.permute.xlu0 %2156 }
 0x26d   :  { %8228 = vst [vmem:[#allocation54_spill] sm:$0xff] %v5567_v22 }
 0x272   :  { %3650 = vperm.xlu0 %4730, %v8181_v17  }
 0x273   :  { %4714 = vset.pattern.permute.xlu2 %v5403_v3  ;;  %2204 = vperm.xlu1 %4709, %v4940_v31   ;;  %v5525_v47 = vpop.permute.xlu2 %1756 }
 0x275   :  { %v1201_v51 = vpop.permute.xlu1 %1200 }
 0x27a   :  { %3632 = vperm.xlu0 %4730, %v8186_v10  }
 0x27b   :  { %2700 = vperm.xlu2 %4714, %v4947_v33   ;;  %4710 = vset.pattern.permute.xlu1 %v5403_v3  ;;  %v5535_v6 = vpop.permute.xlu2 %1248 }
 0x27c   :  { %8221 = vst [vmem:[#allocation16_spill] sm:$0xff] %v5535_v6 }
 0x282   :  { %3608 = vperm.xlu0 %4730, %v8200_v8  }
 0x283   :  { %4716 = vset.pattern.permute.xlu2 %v5361_v37  ;;  %2682 = vperm.xlu1 %4710, %v4938_v30   ;;  %v5545_v2 = vpop.permute.xlu2 %1714 }
 0x284   :  { %8223 = vst [vmem:[#allocation51_spill] sm:$0xff] %v5545_v2 }
 0x28a   :  { %1330 = vrot.lane.b32.xlu0 %v1295_v45, %s4786_s19  ;;  %v1299_v45 = vmul.f32 %v1243_v38, %v4982_v55 }
 0x28b   :  { %2192 = vperm.xlu2 %4716, %v8200_v8   ;;  %4711 = vset.pattern.permute.xlu1 %v5361_v37  ;;  %v1733_v38 = vpop.permute.xlu2 %1732 }
 0x292   :  { %1352 = vrot.lane.b32.xlu0 %v1306_v20, %s4786_s19  ;;  %v8224_v20 = vld [vmem:[#allocation17_spill] sm:$0xff] }
 0x293   :  { %4718 = vset.pattern.permute.xlu2 %v5403_v3  ;;  %2174 = vperm.xlu1 %4711, %v8190_v9   ;;  %v1307_v60 = vmul.f32 %v1291_v18, %v8224_v20  ;;  %8225 = vst [vmem:[#allocation17_spill] sm:$0xff] %v5550_v7  ;;  %v2211_v18 = vpop.permute.xlu2 %2210  ;;  %v1685_v7 = vpop.permute.xlu1 %1684 }
 0x29a   :  { %1338 = vrot.lane.b32.xlu0 %v1299_v45, %s4786_s19  ;;  %v1296_v45 = vmul.f32 %v1225_v48, %v4991_v61 }
 0x29b   :  { %2658 = vperm.xlu2 %4718, %v4931_v28   ;;  %4713 = vset.pattern.permute.xlu1 %v5403_v3  ;;  %v1745_v48 = vpop.permute.xlu2 %1744  ;;  %v5577_v44 = vpop.permute.xlu1 %1726 }
 0x2a2   :  { %1354 = vrot.lane.b32.xlu0 %v1307_v60, %s4786_s19  ;;  %v1305_v60 = vmul.f32 %v1279_v63, %v5101_v62  ;;  %v8229_v63 = vld [vmem:[#allocation12_spill] sm:$0xff] }
 0x2a3   :  { %2676 = vperm.xlu2 %4718, %v4940_v31   ;;  %2652 = vperm.xlu1 %4713, %v4933_v29   ;;  %v1766_v27 = vmul.f32 %v1685_v7, %v8229_v63  ;;  %v5583_v35 = vpop.permute.xlu1 %2162  ;;  %v2247_v7 = vmul.f32 %v2211_v18, %v5053_v1 }
 0x2aa   :  { %1332 = vrot.lane.b32.xlu0 %v1296_v45, %s4786_s19  ;;  %v1292_v45 = vmul.f32 %v1201_v51, %v5024_v14  ;;  %v1774_v51 = vmul.f32 %v1733_v38, %v5061_v12 }
 0x2ab   :  { %4720 = vset.pattern.permute.xlu2 %v5469_v40  ;;  %4715 = vset.pattern.permute.xlu1 %v5361_v37  ;;  %v2229_v37 = vpop.permute.xlu2 %2228 }
 0x2b2   :  { %1350 = vrot.lane.b32.xlu0 %v1305_v60, %s4786_s19  ;;  %v5574_v60 = vpop.permute.xlu0 %2222 }
 0x2b3   :  { %3154 = vperm.xlu2 %4720, %v4938_v30   ;;  %2144 = vperm.xlu1 %4715, %v8193_v19   ;;  %8230 = vst [vmem:[#allocation55_spill] sm:$0xff] %v5574_v60  ;;  %v2250_v60 = vmul.f32 %v2229_v37, %v8220_v11 }
 0x2ba   :  { %1324 = vrot.lane.b32.xlu0 %v1292_v45, %s4786_s19  ;;  %v2151_v45 = vpop.permute.xlu2 %2150  ;;  %v2635_v22 = vpop.permute.xlu0 %2634 }
 0x2bb   :  { %4722 = vset.pattern.permute.xlu2 %v5403_v3  ;;  %4717 = vset.pattern.permute.xlu1 %v5403_v3 }
 0x2c2   :  { %1800 = vrot.lane.b32.xlu0 %v1766_v27, %s4785_s18  ;;  %v5589_v27 = vpop.permute.xlu1 %1702  ;;  %v2199_v38 = vpop.permute.xlu2 %2198 }
 0x2c3   :  { %2688 = vperm.xlu2 %4722, %v8186_v10   ;;  %2628 = vperm.xlu1 %4717, %v4910_v21   ;;  %v5593_v2 = vpop.permute.xlu0 %2622  ;;  %v2245_v37 = vmul.f32 %v2199_v38, %v5063_v13 }
 0x2c4   :  { %8231 = vst [vmem:[#allocation56_spill] sm:$0xff] %v5593_v2 }
 0x2ca   :  { %1816 = vrot.lane.b32.xlu0 %v1774_v51, %s4785_s18  ;;  %v1776_v51 = vmul.f32 %v1745_v48, %v5086_v54  ;;  %v5597_v6 = vpop.permute.xlu1 %2180  ;;  %v5601_v18 = vpop.permute.xlu2 %2234  ;;  %v2237_v48 = vmul.f32 %v2151_v45, %v4997_v0 }
 0x2cb   :  { %4724 = vset.pattern.permute.xlu2 %v5469_v40  ;;  %2670 = vperm.xlu1 %4717, %v4942_v32  }
 0x2d2   :  { %2290 = vrot.lane.b32.xlu0 %v2247_v7, %s4787_s20  ;;  %v2707_v7 = vpop.permute.xlu0 %2706  ;;  %v5605_v41 = vpop.permute.xlu1 %1720 }
 0x2d3   :  { %3172 = vperm.xlu2 %4724, %v4947_v33   ;;  %4719 = vset.pattern.permute.xlu1 %v5469_v40 }
 0x2da   :  { %1820 = vrot.lane.b32.xlu0 %v1776_v51, %s4785_s18  ;;  %v5610_v51 = vpop.permute.xlu2 %2168 }
 0x2db   :  { %3094 = vperm.xlu2 %4724, %v4921_v25   ;;  %3106 = vperm.xlu1 %4719, %v4919_v24   ;;  %8232 = vst [vmem:[#allocation57_spill] sm:$0xff] %v5610_v51  ;;  %v2641_v25 = vpop.permute.xlu0 %2640 }
 0x2dd   :  { %v5613_v24 = vpop.permute.xlu1 %2186 }
 0x2e2   :  { %2296 = vrot.lane.b32.xlu0 %v2250_v60, %s4787_s20  ;;  %v5618_v60 = vpop.permute.xlu2 %2216 }
 0x2e3   :  { %3142 = vperm.xlu2 %4724, %v4942_v32   ;;  %4721 = vset.pattern.permute.xlu1 %v5403_v3  ;;  %8233 = vst [vmem:[#allocation58_spill] sm:$0xff] %v5618_v60  ;;  %v2695_v2 = vpop.permute.xlu0 %2694 }
 0x2e5   :  { %v5623_v45 = vpop.permute.xlu1 %2204 }
 0x2e6   :  { %8234 = vst [vmem:[#allocation59_spill] sm:$0xff] %v5623_v45 }
 0x2ea   :  { %2270 = vrot.lane.b32.xlu0 %v2237_v48, %s4787_s20  ;;  %v2711_v48 = vmul.f32 %v2635_v22, %v4980_v49  ;;  %v5626_v51 = vpop.permute.xlu2 %2700 }
 0x2eb   :  { %3178 = vperm.xlu2 %4724, %v8181_v17   ;;  %2646 = vperm.xlu1 %4721, %v8190_v9   ;;  %8235 = vst [vmem:[#allocation60_spill] sm:$0xff] %v5626_v51  ;;  %v2617_v17 = vpop.permute.xlu0 %2616 }
 0x2f2   :  { %2286 = vrot.lane.b32.xlu0 %v2245_v37, %s4787_s20  ;;  %v2193_v37 = vpop.permute.xlu2 %2192 }
 0x2f3   :  { %3112 = vperm.xlu2 %4724, %v8183_v39   ;;  %4723 = vset.pattern.permute.xlu1 %v5469_v40  ;;  %v3101_v45 = vpop.permute.xlu0 %3100 }
 0x2f5   :  { %v5631_v38 = vpop.permute.xlu1 %2682 }
 0x2f6   :  { %8236 = vst [vmem:[#allocation61_spill] sm:$0xff] %v5631_v38 }
 0x2fa   :  { %2746 = vrot.lane.b32.xlu0 %v2711_v48, %s4783_s0 }
 0x2fb   :  { %3160 = vperm.xlu2 %4724, %v8186_v10   ;;  %3124 = vperm.xlu1 %4723, %v4933_v29   ;;  %v2659_v10 = vpop.permute.xlu2 %2658  ;;  %v5639_v48 = vpop.permute.xlu0 %3166 }
 0x2fc   :  { %8237 = vst [vmem:[#allocation62_spill] sm:$0xff] %v5639_v48 }
 0x303   :  { %4732 = vset.pattern.permute.xlu2 %v5487_v36  ;;  %4725 = vset.pattern.permute.xlu1 %v5403_v3  ;;  %v5644_v38 = vpop.permute.xlu2 %2676 }
 0x305   :  { %v2175_v60 = vpop.permute.xlu1 %2174 }
 0x306   :  { %v2241_v22 = vmul.f32 %v2175_v60, %v4989_v58  ;;  %v5647_v60 = vpop.permute.xlu0 %3578 }
 0x308   :  { %2278 = vrot.lane.b32.xlu0 %v2241_v22, %s4787_s20 }
 0x30b   :  { %3644 = vperm.xlu2 %4732, %v4947_v33   ;;  %2664 = vperm.xlu1 %4725, %v8200_v8   ;;  %v2244_v33 = vmul.f32 %v2193_v37, %v5083_v53  ;;  %v2723_v37 = vmul.f32 %v2707_v7, %v8224_v20 }
 0x30d   :  { %v5653_v22 = vpop.permute.xlu2 %3154 }
 0x313   :  { %4734 = vset.pattern.permute.xlu2 %v5469_v40  ;;  %4727 = vset.pattern.permute.xlu1 %v5469_v40 }
 0x315   :  { %v2653_v51 = vpop.permute.xlu1 %2652 }
 0x316   :  { %v2714_v3 = vmul.f32 %v2653_v51, %v4987_v57  ;;  %v5657_v51 = vpop.permute.xlu0 %3566 }
 0x318   :  { %2752 = vrot.lane.b32.xlu0 %v2714_v3, %s4783_s0  ;;  %v2715_v3 = vmul.f32 %v2659_v10, %v4982_v55  ;;  %v2712_v10 = vmul.f32 %v2641_v25, %v4991_v61  ;;  %v835_v25 = vmul.f32 %v5298_v4, %v8224_v20 }
 0x31b   :  { %3136 = vperm.xlu2 %4734, %v8200_v8   ;;  %3130 = vperm.xlu1 %4727, %v4931_v28  }
 0x31d   :  { %v5663_v8 = vpop.permute.xlu2 %2688 }
 0x320   :  { %2284 = vrot.lane.b32.xlu0 %v2244_v33, %s4787_s20  ;;  %v5666_v33 = vpop.permute.xlu0 %3650 }
 0x323   :  { %4736 = vset.pattern.permute.xlu2 %v5487_v36  ;;  %3148 = vperm.xlu1 %4727, %v4940_v31  }
 0x328   :  { %2754 = vrot.lane.b32.xlu0 %v2715_v3, %s4783_s0  ;;  %v5674_v3 = vpop.permute.xlu0 %3632 }
 0x32b   :  { %3602 = vperm.xlu2 %4736, %v4931_v28   ;;  %4728 = vset.pattern.permute.xlu1 %v5487_v36  ;;  %v2721_v28 = vmul.f32 %v2695_v2, %v5101_v62  ;;  %v3182_v2 = vmul.f32 %v3101_v45, %v8229_v63  ;;  %v1294_v45 = vmul.f32 %v5519_v16, %v8229_v63 }
 0x32d   :  { %v5672_v48 = vpop.permute.xlu2 %3172 }
 0x330   :  { %2770 = vrot.lane.b32.xlu0 %v2723_v37, %s4783_s0 }
 0x333   :  { %3620 = vperm.xlu2 %4736, %v4940_v31   ;;  %3626 = vperm.xlu1 %4728, %v4938_v30   ;;  %v5683_v31 = vpop.permute.xlu0 %3608  ;;  %v2708_v30 = vmul.f32 %v2617_v17, %v5024_v14  ;;  %v5701_v17 = vpop.permute.xlu1 %2144 }
 0x335   :  { %v5680_v7 = vpop.permute.xlu2 %3094 }
 0x338   :  { %2748 = vrot.lane.b32.xlu0 %v2712_v10, %s4783_s0 }
 0x33b   :  { %3590 = vperm.xlu2 %4736, %v8190_v9   ;;  %4729 = vset.pattern.permute.xlu1 %v5469_v40  ;;  %v5696_v10 = vpop.permute.xlu0 %1330 }
 0x33c   :  { %8238 = vst [vmem:[#allocation63_spill] sm:$0xff] %v5696_v10 }
 0x33d   :  { %v5691_v37 = vpop.permute.xlu2 %3142 }
 0x340   :  { %2766 = vrot.lane.b32.xlu0 %v2721_v28, %s4783_s0 }
 0x343   :  { %3560 = vperm.xlu2 %4736, %v8193_v19   ;;  %3118 = vperm.xlu1 %4729, %v8190_v9   ;;  %v1298_v9 = vmul.f32 %v5494_v50, %v4987_v57  ;;  %v5707_v28 = vpop.permute.xlu0 %1352 }
 0x345   :  { %v5705_v4 = vpop.permute.xlu2 %3178 }
 0x346   :  { %8239 = vst [vmem:[#allocation64_spill] sm:$0xff] %v5705_v4 }
 0x348   :  { %2740 = vrot.lane.b32.xlu0 %v2708_v30, %s4783_s0  ;;  %v5711_v30 = vpop.permute.xlu1 %2628 }
 0x34b   :  { %882 = vrot.lane.b32.xlu2 %v835_v25, %s4781_s4  ;;  %4731 = vset.pattern.permute.xlu1 %v5487_v36  ;;  %v5717_v25 = vpop.permute.xlu0 %1338 }
 0x34c   :  { %8241 = vst [vmem:[#allocation66_spill] sm:$0xff] %v5717_v25 }
 0x34d   :  { %v5715_v50 = vpop.permute.xlu2 %3112 }
 0x34e   :  { %8240 = vst [vmem:[#allocation65_spill] sm:$0xff] %v5715_v50 }
 0x350   :  { %3216 = vrot.lane.b32.xlu0 %v3182_v2, %s4782_s30  ;;  %v5723_v2 = vpop.permute.xlu1 %2670 }
 0x353   :  { %1336 = vrot.lane.b32.xlu2 %v1298_v9, %s4786_s19  ;;  %3596 = vperm.xlu1 %4731, %v4933_v29   ;;  %v1302_v29 = vmul.f32 %v5530_v23, %v5061_v12  ;;  %v1775_v9 = vmul.f32 %v5540_v59, %v5053_v1  ;;  %v1304_v23 = vmul.f32 %v5513_v42, %v5086_v54 }
 0x354   :  { %v1778_v59 = vmul.f32 %v5525_v47, %v8220_v11 }
 0x355   :  { %v3161_v16 = vpop.permute.xlu2 %3160 }
 0x35b   :  { %4733 = vset.pattern.permute.xlu1 %v5469_v40  ;;  %1328 = vrot.lane.b32.xlu2 %v1294_v45, %s4786_s19  ;;  %v5727_v40 = vpop.permute.xlu0 %1354  ;;  %v5731_v45 = vpop.permute.xlu1 %3106 }
 0x363   :  { %3088 = vperm.xlu1 %4733, %v8193_v19   ;;  %1344 = vrot.lane.b32.xlu2 %v1302_v29, %s4786_s19  ;;  %v5737_v29 = vpop.permute.xlu0 %1332  ;;  %v5739_v50 = vpop.permute.xlu1 %2646 }
 0x365   :  { %v3645_v19 = vpop.permute.xlu2 %3644 }
 0x36b   :  { %4735 = vset.pattern.permute.xlu1 %v5487_v36  ;;  %1818 = vrot.lane.b32.xlu2 %v1775_v9, %s4785_s18  ;;  %v5749_v42 = vpop.permute.xlu0 %1350 }
 0x36d   :  { %v5747_v9 = vpop.permute.xlu1 %3124 }
 0x373   :  { %3572 = vperm.xlu1 %4735, %v4910_v21   ;;  %1348 = vrot.lane.b32.xlu2 %v1304_v23, %s4786_s19  ;;  %v1765_v21 = vmul.f32 %v5517_v56, %v4997_v0 }
 0x375   :  { %v5745_v36 = vpop.permute.xlu2 %3136 }
 0x37b   :  { %3614 = vperm.xlu1 %4735, %v4942_v32   ;;  %1824 = vrot.lane.b32.xlu2 %v1778_v59, %s4785_s18  ;;  %v5759_v32 = vpop.permute.xlu0 %1324  ;;  %v1773_v59 = vmul.f32 %v5577_v44, %v5063_v13 }
 0x37c   :  { %8243 = vst [vmem:[#allocation68_spill] sm:$0xff] %v5759_v32 }
 0x37d   :  { %v5755_v23 = vpop.permute.xlu1 %2664 }
 0x37e   :  { %8242 = vst [vmem:[#allocation67_spill] sm:$0xff] %v5755_v23 }
 0x383   :  { %3584 = vperm.xlu1 %4735, %v8183_v39   ;;  %1798 = vrot.lane.b32.xlu2 %v1765_v21, %s4785_s18  ;;  %v834_v39 = vmul.f32 %v5311_v52, %v8220_v11  ;;  %v2239_v21 = vmul.f32 %v5583_v35, %v4980_v49  ;;  %v5773_v23 = vpop.permute.xlu0 %1800  ;;  %v1769_v52 = vmul.f32 %v5589_v27, %v4989_v58 }
 0x384   :  { %8245 = vst [vmem:[#allocation70_spill] sm:$0xff] %v5773_v23 }
 0x385   :  { %v5757_v47 = vpop.permute.xlu2 %3602 }
 0x38b   :  { %3638 = vperm.xlu1 %4735, %v4949_v34   ;;  %1814 = vrot.lane.b32.xlu2 %v1773_v59, %s4785_s18  ;;  %v5787_v35 = vpop.permute.xlu0 %1816 }
 0x38d   :  { %v5765_v4 = vpop.permute.xlu2 %3620  ;;  %v5767_v56 = vpop.permute.xlu1 %3130 }
 0x38e   :  { %8244 = vst [vmem:[#allocation69_spill] sm:$0xff] %v5765_v4  ;;  %v1303_v4 = vmul.f32 %v5479_v46, %v5053_v1 }
 0x393   :  { %880 = vrot.lane.b32.xlu1 %v834_v39, %s4781_s4  ;;  %2274 = vrot.lane.b32.xlu2 %v2239_v21, %s4787_s20  ;;  %v1293_v21 = vmul.f32 %v5490_v43, %v4997_v0  ;;  %v1772_v43 = vmul.f32 %v5605_v41, %v5083_v53  ;;  %v3666_v41 = vmul.f32 %v3645_v19, %v8220_v11 }
 0x395   :  { %v5777_v44 = vpop.permute.xlu2 %3590  ;;  %v3149_v34 = vpop.permute.xlu1 %3148 }
 0x396   :  { %8246 = vst [vmem:[#allocation71_spill] sm:$0xff] %v5777_v44  ;;  %v3190_v59 = vmul.f32 %v3149_v34, %v5061_v12  ;;  %v2242_v34 = vmul.f32 %v5597_v6, %v4987_v57 }
 0x398   :  { %3232 = vrot.lane.b32.xlu0 %v3190_v59, %s4782_s30 }
 0x39b   :  { %1346 = vrot.lane.b32.xlu1 %v1303_v4, %s4786_s19  ;;  %1806 = vrot.lane.b32.xlu2 %v1769_v52, %s4785_s18  ;;  %v5799_v4 = vpop.permute.xlu0 %2290  ;;  %v1301_v52 = vmul.f32 %v5499_v5, %v5063_v13  ;;  %v2243_v5 = vmul.f32 %v5613_v24, %v4982_v55  ;;  %v3653_v24 = vmul.f32 %v5657_v51, %v4997_v0  ;;  %v8254_v51 = vld [vmem:[#allocation55_spill] sm:$0xff] }
 0x39c   :  { %8248 = vst [vmem:[#allocation73_spill] sm:$0xff] %v5799_v4 }
 0x39d   :  { %v5789_v39 = vpop.permute.xlu2 %3560 }
 0x39e   :  { %8247 = vst [vmem:[#allocation72_spill] sm:$0xff] %v5789_v39  ;;  %v2236_v39 = vmul.f32 %v5701_v17, %v5024_v14 }
 0x3a3   :  { %1326 = vrot.lane.b32.xlu1 %v1293_v21, %s4786_s19  ;;  %2280 = vrot.lane.b32.xlu2 %v2242_v34, %s4787_s20  ;;  %v3192_v21 = vmul.f32 %v3161_v16, %v5086_v54  ;;  %v5812_v34 = vpop.permute.xlu0 %1820  ;;  %v1297_v16 = vmul.f32 %v5548_v26, %v4989_v58  ;;  %v8252_v26 = vld [vmem:[#allocation57_spill] sm:$0xff] }
 0x3a5   :  { %v5797_v46 = vpop.permute.xlu2 %882  ;;  %v3627_v27 = vpop.permute.xlu1 %3626 }
 0x3a6   :  { %v3663_v59 = vmul.f32 %v3627_v27, %v5053_v1  ;;  %v1767_v27 = vmul.f32 %v5507_v15, %v4980_v49 }
 0x3a8   :  { %3706 = vrot.lane.b32.xlu0 %v3663_v59, %s4784_s17 }
 0x3ab   :  { %1342 = vrot.lane.b32.xlu1 %v1301_v52, %s4786_s19  ;;  %1812 = vrot.lane.b32.xlu2 %v1772_v43, %s4785_s18  ;;  %v2251_v52 = vmul.f32 %v5601_v18, %v8224_v20  ;;  %v5829_v15 = vpop.permute.xlu0 %2296  ;;  %v8251_v43 = vld [vmem:[#allocation52_spill] sm:$0xff] }
 0x3ac   :  { %8250 = vst [vmem:[#allocation75_spill] sm:$0xff] %v5829_v15 }
 0x3ad   :  { %v5809_v6 = vpop.permute.xlu2 %1336 }
 0x3b0   :  { %3236 = vrot.lane.b32.xlu0 %v3192_v21, %s4782_s30  ;;  %v1770_v21 = vmul.f32 %v8251_v43, %v4987_v57 }
 0x3b3   :  { %1802 = vrot.lane.b32.xlu1 %v1767_v27, %s4785_s18  ;;  %2282 = vrot.lane.b32.xlu2 %v2243_v5, %s4787_s20  ;;  %v2240_v27 = vmul.f32 %v8252_v26, %v4991_v61  ;;  %v5844_v18 = vpop.permute.xlu0 %2270  ;;  %v8257_v26 = vld [vmem:[#allocation51_spill] sm:$0xff] }
 0x3b4   :  { %8253 = vst [vmem:[#allocation52_spill] sm:$0xff] %v5844_v18 }
 0x3b5   :  { %v5822_v59 = vpop.permute.xlu2 %1328 }
 0x3b6   :  { %8249 = vst [vmem:[#allocation74_spill] sm:$0xff] %v5822_v59 }
 0x3b8   :  { %3712 = vrot.lane.b32.xlu0 %v3666_v41, %s4784_s17  ;;  %v2249_v41 = vmul.f32 %v8254_v51, %v5101_v62 }
 0x3bb   :  { %1334 = vrot.lane.b32.xlu1 %v1297_v16, %s4786_s19  ;;  %2298 = vrot.lane.b32.xlu2 %v2251_v52, %s4787_s20  ;;  %v8255_v16 = vld [vmem:[#allocation16_spill] sm:$0xff] }
 0x3bc   :  { %v1300_v52 = vmul.f32 %v8255_v16, %v5083_v53 }
 0x3bd   :  { %v5835_v19 = vpop.permute.xlu2 %1344 }
 0x3c0   :  { %3686 = vrot.lane.b32.xlu0 %v3653_v24, %s4784_s17  ;;  %v5854_v24 = vpop.permute.xlu1 %3118 }
 0x3c3   :  { %1808 = vrot.lane.b32.xlu1 %v1770_v21, %s4785_s18  ;;  %2276 = vrot.lane.b32.xlu2 %v2240_v27, %s4787_s20  ;;  %v5858_v21 = vpop.permute.xlu0 %2286  ;;  %v1771_v27 = vmul.f32 %v8257_v26, %v4982_v55 }
 0x3c4   :  { %8256 = vst [vmem:[#allocation57_spill] sm:$0xff] %v5858_v21  ;;  %v2710_v21 = vmul.f32 %v5711_v30, %v8229_v63 }
 0x3c5   :  { %v5846_v5 = vpop.permute.xlu2 %1818 }
 0x3c8   :  { %v5866_v51 = vpop.permute.xlu1 %3596 }
 0x3cb   :  { %1340 = vrot.lane.b32.xlu1 %v1300_v52, %s4786_s19  ;;  %2294 = vrot.lane.b32.xlu2 %v2249_v41, %s4787_s20  ;;  %v5870_v41 = vpop.permute.xlu0 %2746  ;;  %v8259_v52 = vld [vmem:[#allocation49_spill] sm:$0xff] }
 0x3cc   :  { %8258 = vst [vmem:[#allocation55_spill] sm:$0xff] %v5870_v41  ;;  %v1779_v44 = vmul.f32 %v8259_v52, %v8224_v20  ;;  %v2718_v41 = vmul.f32 %v5644_v38, %v5061_v12  ;;  %v8266_v52 = vld [vmem:[#allocation17_spill] sm:$0xff] }
 0x3cd   :  { %v5856_v43 = vpop.permute.xlu2 %1348  ;;  %v1777_v15 = vmul.f32 %v8266_v52, %v5101_v62  ;;  %v2720_v52 = vmul.f32 %v5663_v8, %v5086_v54 }
 0x3d3   :  { %1810 = vrot.lane.b32.xlu1 %v1771_v27, %s4785_s18  ;;  %2268 = vrot.lane.b32.xlu2 %v2236_v39, %s4787_s20  ;;  %v5882_v39 = vpop.permute.xlu0 %2278  ;;  %v8263_v27 = vld [vmem:[#allocation50_spill] sm:$0xff] }
 0x3d4   :  { %8262 = vst [vmem:[#allocation49_spill] sm:$0xff] %v5882_v39  ;;  %v1768_v4 = vmul.f32 %v8263_v27, %v4991_v61  ;;  %v8267_v27 = vld [vmem:[#allocation53_spill] sm:$0xff] }
 0x3d5   :  { %v5868_v16 = vpop.permute.xlu2 %1824  ;;  %v5878_v17 = vpop.permute.xlu1 %3088 }
 0x3d6   :  { %8260 = vst [vmem:[#allocation16_spill] sm:$0xff] %v5878_v17 }
 0x3db   :  { %1826 = vrot.lane.b32.xlu1 %v1779_v44, %s4785_s18  ;;  %2744 = vrot.lane.b32.xlu2 %v2710_v21, %s4783_s0  ;;  %v5894_v21 = vpop.permute.xlu0 %2752 }
 0x3dc   :  { %8265 = vst [vmem:[#allocation76_spill] sm:$0xff] %v5894_v21  ;;  %v1764_v21 = vmul.f32 %v8267_v27, %v5024_v14  ;;  %v3194_v27 = vmul.f32 %v5672_v48, %v8220_v11  ;;  %v8274_v48 = vld [vmem:[#allocation47_spill] sm:$0xff] }
 0x3dd   :  { %v5880_v26 = vpop.permute.xlu2 %1798 }
 0x3de   :  { %8261 = vst [vmem:[#allocation51_spill] sm:$0xff] %v5880_v26  ;;  %v3191_v26 = vmul.f32 %v5653_v22, %v5053_v1 }
 0x3e3   :  { %1804 = vrot.lane.b32.xlu1 %v1768_v4, %s4785_s18  ;;  %2760 = vrot.lane.b32.xlu2 %v2718_v41, %s4783_s0 }
 0x3e5   :  { %v5890_v30 = vpop.permute.xlu2 %1814  ;;  %v5892_v44 = vpop.permute.xlu1 %3572 }
 0x3e6   :  { %8264 = vst [vmem:[#allocation50_spill] sm:$0xff] %v5892_v44  ;;  %v5910_v44 = vpop.permute.xlu0 %2284 }
 0x3e7   :  { %8268 = vst [vmem:[#allocation17_spill] sm:$0xff] %v5910_v44 }
 0x3eb   :  { %1822 = vrot.lane.b32.xlu1 %v1777_v15, %s4785_s18  ;;  %3234 = vrot.lane.b32.xlu2 %v3191_v26, %s4782_s30 }
 0x3ed   :  { %v5902_v38 = vpop.permute.xlu2 %2274  ;;  %v3615_v4 = vpop.permute.xlu1 %3614 }
 0x3ee   :  { %v3661_v41 = vmul.f32 %v3615_v4, %v5063_v13  ;;  %v8270_v4 = vld [vmem:[#allocation54_spill] sm:$0xff]  ;;  %v5924_v8 = vpop.permute.xlu0 %2754 }
 0x3ef   :  { %8271 = vst [vmem:[#allocation54_spill] sm:$0xff] %v5924_v8 }
 0x3f0   :  { %3702 = vrot.lane.b32.xlu0 %v3661_v41, %s4784_s17  ;;  %v2238_v41 = vmul.f32 %v8270_v4, %v8229_v63  ;;  %v3181_v4 = vmul.f32 %v5680_v7, %v4997_v0 }
 0x3f3   :  { %1796 = vrot.lane.b32.xlu1 %v1764_v21, %s4785_s18  ;;  %2764 = vrot.lane.b32.xlu2 %v2720_v52, %s4783_s0 }
 0x3f5   :  { %v5914_v22 = vpop.permute.xlu2 %1806  ;;  %v3585_v15 = vpop.permute.xlu1 %3584 }
 0x3f6   :  { %8269 = vst [vmem:[#allocation53_spill] sm:$0xff] %v5914_v22  ;;  %v3656_v26 = vmul.f32 %v3585_v15, %v4991_v61  ;;  %v8273_v15 = vld [vmem:[#allocation59_spill] sm:$0xff] }
 0x3f8   :  { %3692 = vrot.lane.b32.xlu0 %v3656_v26, %s4784_s17  ;;  %v2246_v26 = vmul.f32 %v8273_v15, %v5061_v12  ;;  %v8278_v12 = vld [vmem:[#allocation35_spill] sm:$0xff] }
 0x3fb   :  { %2272 = vrot.lane.b32.xlu1 %v2238_v41, %s4787_s20  ;;  %3240 = vrot.lane.b32.xlu2 %v3194_v27, %s4782_s30  ;;  %v1038_v41 = vrot.slane %v8274_v48, 4  ;;  %v1048_v27 = vrot.slane %v5797_v46, 4 }
 0x3fd   :  { %v5926_v21 = vpop.permute.xlu2 %2280  ;;  %v3639_v52 = vpop.permute.xlu1 %3638 }
 0x3fe   :  { %8272 = vst [vmem:[#allocation77_spill] sm:$0xff] %v5926_v21  ;;  %v3665_v44 = vmul.f32 %v3639_v52, %v5101_v62  ;;  %v8276_v52 = vld [vmem:[#allocation36_spill] sm:$0xff] }
 0x3ff   :  { %v998_v22 = vrot.slane %v8276_v52, 4  ;;  %v3189_v52 = vmul.f32 %v5691_v37, %v5063_v13 }
 0x400   :  { %3710 = vrot.lane.b32.xlu0 %v3665_v44, %s4784_s17  ;;  %v5941_v44 = vpop.permute.xlu0 %2770 }
 0x401   :  { %8277 = vst [vmem:[#allocation47_spill] sm:$0xff] %v5941_v44  ;;  %v999_v7 = vsel %vm421_vm3, %v8278_v12, %v998_v22  ;;  %v8281_v44 = vld [vmem:[#allocation13_spill] sm:$0xff] }
 0x402   :  { %v8283_v22 = vld [vmem:[#allocation45_spill] sm:$0xff] }
 0x403   :  { %2288 = vrot.lane.b32.xlu1 %v2246_v26, %s4787_s20  ;;  %3214 = vrot.lane.b32.xlu2 %v3181_v4, %s4782_s30  ;;  %v8279_v26 = vld [vmem:[#allocation48_spill] sm:$0xff] }
 0x404   :  { %v1049_v4 = vsel %vm421_vm3, %v1048_v27, %v8279_v26  ;;  %v1050_v12 = vrot.slane %v8279_v26, 4  ;;  %v8285_v27 = vld [vmem:[#allocation43_spill] sm:$0xff]  ;;  %v8286_v26 = vld [vmem:[#allocation14_spill] sm:$0xff] }
 0x405   :  { %v5938_v8 = vpop.permute.xlu2 %1812  ;;  %v881_v63 = vpop.permute.xlu1 %880 }
 0x406   :  { %8275 = vst [vmem:[#allocation59_spill] sm:$0xff] %v5938_v8  ;;  %v1036_v21 = vrot.slane %v881_v63, 4  ;;  %v1039_v15 = vsel %vm421_vm3, %v881_v63, %v1038_v41  ;;  %v8280_v8 = vld [vmem:[#allocation61_spill] sm:$0xff]  ;;  %v1062_v41 = vrot.slane %v8283_v22, 4 }
 0x407   :  { %v2719_v18 = vmul.f32 %v8280_v8, %v5053_v1  ;;  %v5959_v63 = vperm.slane %v1039_v15, %v8281_v44  ;;  %v1051_v1 = vsel %vm421_vm3, %v5797_v46, %v1050_v12 }
 0x408   :  { %v1037_v39 = vsel %vm421_vm3, %v1036_v21, %v8274_v48  ;;  %1126 = vrot.lane.b32.xlu0 %v999_v7, %s4784_s17  ;;  %v5964_v21 = vperm.slane %v1049_v4, %v8281_v44  ;;  %v1063_v15 = vsel %vm421_vm3, %v8285_v27, %v1062_v41  ;;  %v5986_v46 = vperm.slane %v1051_v1, %v8281_v44  ;;  %v5988_v12 = vpop.permute.xlu0 %2748 }
 0x409   :  { %v5956_v17 = vperm.slane %v1037_v39, %v8281_v44  ;;  %v1098_v37 = vrot.slane %v5959_v63, 4  ;;  %8288 = vst [vmem:[#allocation48_spill] sm:$0xff] %v5988_v12  ;;  %v5991_v22 = vperm.slane %v1063_v15, %v8286_v26  ;;  %v3655_v41 = vmul.f32 %v5647_v60, %v4980_v49 }
 0x40a   :  { %8284 = vst [vmem:[#allocation35_spill] sm:$0xff] %v5964_v21 }
 0x40b   :  { %8282 = vst [vmem:[#allocation36_spill] sm:$0xff] %v5956_v17  ;;  %v1086_v48 = vrot.slane %v5956_v17, 4  ;;  %2762 = vrot.lane.b32.xlu1 %v2719_v18, %s4783_s0  ;;  %3230 = vrot.lane.b32.xlu2 %v3189_v52, %s4782_s30  ;;  %v8287_v18 = vld [vmem:[#allocation44_spill] sm:$0xff] }
 0x40c   :  { %v1083_v52 = vperm.slane %v8287_v18, %v8286_v26 }
 0x40d   :  { %v5972_v39 = vpop.permute.xlu2 %2282  ;;  %v5974_v8 = vpop.permute.xlu1 %1346  ;;  %v1087_v7 = vsel %vm421_vm3, %v5964_v21, %v1086_v48  ;;  %v8289_v48 = vld [vmem:[#allocation58_spill] sm:$0xff] }
 0x40e   :  { %v5981_v4 = vperm.slane %v1087_v7, %v8286_v26  ;;  %v2248_v27 = vmul.f32 %v8289_v48, %v5086_v54  ;;  %v1099_v7 = vsel %vm421_vm3, %v5986_v46, %v1098_v37  ;;  %v1122_v12 = vrot.slane %v1083_v52, 4 }
 0x40f   :  { %v1107_v18 = vperm.slane %v1099_v7, %v8286_v26  ;;  %v8295_v7 = vld [vmem:[#allocation60_spill] sm:$0xff] }
 0x410   :  { %v1112_v17 = vrot.slane %v5981_v4, 4 }
 0x411   :  { %v1120_v15 = vrot.slane %v1107_v18, 4  ;;  %v6007_v60 = vsel %vm421_vm3, %v1107_v18, %v1122_v12  ;;  %v1384_v18 = vrot.slane %v5696_v10, 4 }
 0x412   :  { %v1113_v1 = vsel %vm421_vm3, %v1112_v17, %v5991_v22  ;;  %8290 = vst [vmem:[#allocation61_spill] sm:$0xff] %v6007_v60  ;;  %v6016_v17 = vpop.permute.xlu0 %2766  ;;  %v3658_v60 = vmul.f32 %v5866_v51, %v4987_v57 }
 0x413   :  { %2292 = vrot.lane.b32.xlu1 %v2248_v27, %s4787_s20  ;;  %3690 = vrot.lane.b32.xlu2 %v3655_v41, %s4784_s17  ;;  %v6014_v37 = vsel %vm421_vm3, %v1120_v15, %v1083_v52  ;;  %8294 = vst [vmem:[#allocation14_spill] sm:$0xff] %v6016_v17  ;;  %v2722_v27 = vmul.f32 %v8295_v7, %v8220_v11  ;;  %v8296_v52 = vld [vmem:[#allocation56_spill] sm:$0xff]  ;;  %v1372_v7 = vrot.slane %v5822_v59, 4  ;;  %v8303_v59 = vld [vmem:[#allocation22_spill] sm:$0xff] }
 0x414   :  { %1136 = vrot.lane.b32.xlu0 %v1113_v1, %s4782_s30  ;;  %8293 = vst [vmem:[#allocation43_spill] sm:$0xff] %v6014_v37  ;;  %v3185_v41 = vmul.f32 %v5854_v24, %v4989_v58  ;;  %v2709_v15 = vmul.f32 %v8296_v52, %v4997_v0  ;;  %v2717_v52 = vmul.f32 %v5723_v2, %v5063_v13  ;;  %v1408_v37 = vrot.slane %v5717_v25, 4  ;;  %v8315_v25 = vld [vmem:[#allocation23_spill] sm:$0xff] }
 0x415   :  { %v6009_v48 = vpop.permute.xlu2 %2298  ;;  %v6011_v21 = vpop.permute.xlu1 %1326  ;;  %v1373_v51 = vsel %vm421_vm3, %v1372_v7, %v5759_v32  ;;  %v3659_v17 = vmul.f32 %v5757_v47, %v4982_v55  ;;  %v8305_v47 = vld [vmem:[#allocation20_spill] sm:$0xff] }
 0x416   :  { %8291 = vst [vmem:[#allocation13_spill] sm:$0xff] %v6009_v48  ;;  %v1385_v24 = vsel %vm421_vm3, %v1384_v18, %v6011_v21  ;;  %v3188_v18 = vmul.f32 %v5745_v36, %v5083_v53  ;;  %v8302_v36 = vld [vmem:[#allocation11_spill] sm:$0xff] }
 0x417   :  { %8292 = vst [vmem:[#allocation45_spill] sm:$0xff] %v6011_v21  ;;  %v3667_v21 = vmul.f32 %v5666_v33, %v8224_v20 }
 0x41a   :  { %v6033_v11 = vpop.permute.xlu0 %2740 }
 0x41b   :  { %2768 = vrot.lane.b32.xlu1 %v2722_v27, %s4783_s0  ;;  %3222 = vrot.lane.b32.xlu2 %v3185_v41, %s4782_s30  ;;  %8297 = vst [vmem:[#allocation44_spill] sm:$0xff] %v6033_v11  ;;  %v6041_v27 = vperm.slane %v1385_v24, %v8281_v44  ;;  %v6056_v24 = vperm.slane %v1373_v51, %v8281_v44 }
 0x41d   :  { %v6024_v12 = vpop.permute.xlu2 %2276  ;;  %v6026_v1 = vpop.permute.xlu1 %1342 }
 0x422   :  { %v6061_v7 = vpop.permute.xlu0 %3216 }
 0x423   :  { %2742 = vrot.lane.b32.xlu1 %v2709_v15, %s4783_s0  ;;  %3696 = vrot.lane.b32.xlu2 %v3658_v60, %s4784_s17  ;;  %v1420_v60 = vrot.slane %v6041_v27, 4  ;;  %v1396_v15 = vrot.slane %v5809_v6, 4  ;;  %8300 = vst [vmem:[#allocation56_spill] sm:$0xff] %v6061_v7  ;;  %v3183_v7 = vmul.f32 %v5731_v45, %v4980_v49 }
 0x425   :  { %v6043_v41 = vpop.permute.xlu2 %2294  ;;  %v6045_v0 = vpop.permute.xlu1 %1802  ;;  %v1421_v2 = vsel %vm421_vm3, %v1420_v60, %v6056_v24  ;;  %v1397_v51 = vsel %vm421_vm3, %v1396_v15, %v5737_v29  ;;  %v1096_v60 = vrot.slane %v5986_v46, 4  ;;  %v902_v46 = vrot.slane %v8305_v47, 4 }
 0x426   :  { %8298 = vst [vmem:[#allocation58_spill] sm:$0xff] %v6043_v41  ;;  %v914_v41 = vrot.slane %v8302_v36, 4  ;;  %v1427_v48 = vperm.slane %v1421_v2, %v8286_v26  ;;  %v6084_v36 = vperm.slane %v1397_v51, %v8281_v44  ;;  %v8306_v2 = vld [vmem:[#allocation9_spill] sm:$0xff]  ;;  %v1496_v47 = vrot.slane %v5974_v8, 4 }
 0x427   :  { %8299 = vst [vmem:[#allocation60_spill] sm:$0xff] %v6045_v0  ;;  %v1097_v49 = vsel %vm421_vm3, %v1096_v60, %v5959_v63 }
 0x42b   :  { %2758 = vrot.lane.b32.xlu1 %v2717_v52, %s4783_s0  ;;  %3228 = vrot.lane.b32.xlu2 %v3188_v18, %s4782_s30 }
 0x42d   :  { %v6063_v11 = vpop.permute.xlu2 %2268  ;;  %v6065_v13 = vpop.permute.xlu1 %1334 }
 0x42e   :  { %8301 = vst [vmem:[#allocation78_spill] sm:$0xff] %v6063_v11  ;;  %v1409_v52 = vsel %vm421_vm3, %v1408_v37, %v6065_v13  ;;  %v915_v37 = vsel %vm421_vm3, %v8303_v59, %v914_v41  ;;  %v1470_v59 = vrot.slane %v1427_v48, 4 }
 0x42f   :  { %v6075_v18 = vperm.slane %v1409_v52, %v8281_v44  ;;  %v8304_v52 = vld [vmem:[#allocation24_spill] sm:$0xff]  ;;  %v6101_v41 = vperm.slane %v915_v37, %v8281_v44 }
 0x430   :  { %v938_v32 = vrot.slane %v8304_v52, 4  ;;  %v8307_v52 = vld [vmem:[#allocation42_spill] sm:$0xff] }
 0x431   :  { %v1444_v15 = vrot.slane %v6075_v18, 4  ;;  %v1072_v63 = vrot.slane %v8307_v52, 4  ;;  %v8313_v52 = vld [vmem:[#allocation21_spill] sm:$0xff] }
 0x432   :  { %v939_v51 = vsel %vm421_vm3, %v8306_v2, %v938_v32 }
 0x433   :  { %3218 = vrot.lane.b32.xlu1 %v3183_v7, %s4782_s30  ;;  %3698 = vrot.lane.b32.xlu2 %v3659_v17, %s4784_s17  ;;  %v1445_v45 = vsel %vm421_vm3, %v1444_v15, %v6084_v36  ;;  %v8310_v17 = vld [vmem:[#allocation6_spill] sm:$0xff]  ;;  %v6109_v15 = vpop.permute.xlu0 %3232  ;;  %v947_v37 = vperm.slane %v939_v51, %v8281_v44 }
 0x434   :  { %v1451_v10 = vperm.slane %v1445_v45, %v8286_v26  ;;  %v926_v11 = vrot.slane %v8310_v17, 4  ;;  %8311 = vst [vmem:[#allocation24_spill] sm:$0xff] %v6109_v15  ;;  %v6114_v45 = vperm.slane %v1097_v49, %v8286_v26  ;;  %v1497_v17 = vsel %vm421_vm3, %v1496_v47, %v6026_v1 }
 0x435   :  { %v6104_v60 = vpop.permute.xlu2 %2744  ;;  %v6106_v7 = vpop.permute.xlu1 %1808  ;;  %v960_v15 = vrot.slane %v6101_v41, 4  ;;  %v2713_v49 = vmul.f32 %v5739_v50, %v4989_v58  ;;  %v1503_v33 = vperm.slane %v1497_v17, %v8281_v44  ;;  %v1508_v50 = vrot.slane %v5707_v28, 4 }
 0x436   :  { %8308 = vst [vmem:[#allocation11_spill] sm:$0xff] %v6104_v60  ;;  %v1471_v32 = vsel %vm421_vm3, %v1451_v10, %v1470_v59  ;;  %v1468_v2 = vrot.slane %v1451_v10, 4  ;;  %v903_v60 = vsel %vm421_vm3, %v8313_v52, %v902_v46  ;;  %v8314_v59 = vld [vmem:[#allocation41_spill] sm:$0xff]  ;;  %v927_v10 = vsel %vm421_vm3, %v8315_v25, %v926_v11 }
 0x437   :  { %8309 = vst [vmem:[#allocation22_spill] sm:$0xff] %v6106_v7  ;;  %1598 = vrot.lane.b32.xlu0 %v1471_v32, %s4784_s17  ;;  %v1073_v51 = vsel %vm421_vm3, %v1072_v63, %v8314_v59  ;;  %v1116_v32 = vrot.slane %v6114_v45, 4  ;;  %v6136_v47 = vperm.slane %v903_v60, %v8281_v44  ;;  %v984_v52 = vrot.slane %v947_v37, 4 }
 0x438   :  { %8312 = vst [vmem:[#allocation20_spill] sm:$0xff] %v6114_v45  ;;  %v6133_v46 = vsel %vm421_vm3, %v1468_v2, %v1427_v48  ;;  %v1484_v63 = vrot.slane %v5835_v19, 4  ;;  %v6144_v25 = vperm.slane %v1073_v51, %v8286_v26  ;;  %v935_v48 = vperm.slane %v927_v10, %v8281_v44 }
 0x439   :  { %8316 = vst [vmem:[#allocation9_spill] sm:$0xff] %v6133_v46  ;;  %v961_v2 = vsel %vm421_vm3, %v960_v15, %v6136_v47  ;;  %v1509_v17 = vsel %vm421_vm3, %v1508_v50, %v5856_v43  ;;  %v1532_v51 = vrot.slane %v1503_v33, 4  ;;  %v3664_v15 = vmul.f32 %v5674_v3, %v5086_v54 }
 0x43a   :  { %v1117_v59 = vsel %vm421_vm3, %v1116_v32, %v6144_v25  ;;  %v985_v10 = vsel %vm421_vm3, %v984_v52, %v935_v48  ;;  %v3186_v50 = vmul.f32 %v5747_v9, %v4987_v57 }
 0x43b   :  { %2750 = vrot.lane.b32.xlu1 %v2713_v49, %s4783_s0  ;;  %3714 = vrot.lane.b32.xlu2 %v3667_v21, %s4784_s17  ;;  %v6153_v49 = vpop.permute.xlu0 %3706  ;;  %v6176_v52 = vperm.slane %v985_v10, %v8286_v26 }
 0x43c   :  { %8318 = vst [vmem:[#allocation6_spill] sm:$0xff] %v6153_v49 }
 0x43d   :  { %v6147_v11 = vpop.permute.xlu2 %2760  ;;  %v1341_v60 = vpop.permute.xlu1 %1340 }
 0x43e   :  { %8317 = vst [vmem:[#allocation42_spill] sm:$0xff] %v6147_v11  ;;  %v1485_v21 = vsel %vm421_vm3, %v1484_v63, %v1341_v60  ;;  %v6164_v11 = vperm.slane %v961_v2, %v8286_v26  ;;  %v6169_v63 = vperm.slane %v1509_v17, %v8281_v44 }
 0x43f   :  { %v1491_v45 = vperm.slane %v1485_v21, %v8281_v44  ;;  %1152 = vrot.lane.b32.xlu0 %v1117_v59, %s4787_s20  ;;  %v1520_v59 = vrot.slane %v5727_v40, 4 }
 0x440   :  { %v1006_v3 = vrot.slane %v6164_v11, 4  ;;  %v1558_v9 = vrot.slane %v6169_v63, 4 }
 0x441   :  { %v6172_v32 = vsel %vm421_vm3, %v1532_v51, %v1491_v45  ;;  %v1534_v21 = vrot.slane %v1491_v45, 4  ;;  %v1521_v57 = vsel %vm421_vm3, %v1520_v59, %v5749_v42  ;;  %v8322_v59 = vld [vmem:[#allocation67_spill] sm:$0xff] }
 0x442   :  { %v1007_v17 = vsel %vm421_vm3, %v6176_v52, %v1006_v3  ;;  %v6195_v10 = vperm.slane %v1521_v57, %v8281_v44  ;;  %v2716_v49 = vmul.f32 %v8322_v59, %v5083_v53  ;;  %v1510_v3 = vrot.slane %v5856_v43, 4 }
 0x443   :  { %3224 = vrot.lane.b32.xlu1 %v3186_v50, %s4782_s30  ;;  %3708 = vrot.lane.b32.xlu2 %v3664_v15, %s4784_s17  ;;  %v1535_v54 = vsel %vm421_vm3, %v1503_v33, %v1534_v21  ;;  %v1522_v33 = vrot.slane %v5749_v42, 4  ;;  %v6199_v15 = vpop.permute.xlu0 %3236  ;;  %v986_v50 = vrot.slane %v935_v48, 4  ;;  %v3660_v21 = vmul.f32 %v5683_v31, %v5083_v53 }
 0x444   :  { %v6192_v51 = vperm.slane %v1535_v54, %v8286_v26  ;;  %8321 = vst [vmem:[#allocation23_spill] sm:$0xff] %v6199_v15  ;;  %v1559_v54 = vsel %vm421_vm3, %v6195_v10, %v1558_v9  ;;  %v1498_v57 = vrot.slane %v6026_v1, 4  ;;  %v1486_v48 = vrot.slane %v1341_v60, 4 }
 0x445   :  { %v6185_v2 = vpop.permute.xlu2 %3234  ;;  %v6187_v45 = vpop.permute.xlu1 %1810  ;;  %v987_v42 = vsel %vm421_vm3, %v947_v37, %v986_v50  ;;  %v1523_v31 = vsel %vm421_vm3, %v5727_v40, %v1522_v33  ;;  %v6216_v53 = vperm.slane %v1559_v54, %v8286_v26  ;;  %v1511_v1 = vsel %vm421_vm3, %v5707_v28, %v1510_v3 }
 0x446   :  { %8319 = vst [vmem:[#allocation21_spill] sm:$0xff] %v6185_v2  ;;  %v1499_v37 = vsel %vm421_vm3, %v5974_v8, %v1498_v57  ;;  %v995_v50 = vperm.slane %v987_v42, %v8286_v26  ;;  %v962_v40 = vrot.slane %v6136_v47, 4  ;;  %v6231_v60 = vperm.slane %v1523_v31, %v8281_v44 }
 0x447   :  { %8320 = vst [vmem:[#allocation41_spill] sm:$0xff] %v6187_v45  ;;  %1158 = vrot.lane.b32.xlu0 %v1007_v17, %s4785_s18  ;;  %v1586_v17 = vrot.slane %v6192_v51, 4  ;;  %v1487_v33 = vsel %vm421_vm3, %v5835_v19, %v1486_v48  ;;  %v3187_v28 = vmul.f32 %v5767_v56, %v4982_v55  ;;  %v6241_v8 = vperm.slane %v1511_v1, %v8281_v44  ;;  %v8325_v19 = vld [vmem:[#allocation37_spill] sm:$0xff] }
 0x448   :  { %v6244_v59 = vperm.slane %v1499_v37, %v8281_v44  ;;  %v963_v47 = vsel %vm421_vm3, %v6101_v41, %v962_v40  ;;  %v1008_v54 = vrot.slane %v995_v50, 4  ;;  %v1568_v3 = vrot.slane %v6231_v60, 4  ;;  %v8329_v40 = vld [vmem:[#allocation64_spill] sm:$0xff] }
 0x449   :  { %v6250_v57 = vperm.slane %v1487_v33, %v8281_v44  ;;  %v971_v55 = vperm.slane %v963_v47, %v8286_v26  ;;  %v1114_v37 = vrot.slane %v5991_v22, 4  ;;  %v3195_v33 = vmul.f32 %v8329_v40, %v8224_v20 }
 0x44a   :  { %v1544_v56 = vrot.slane %v6244_v59, 4  ;;  %v1569_v41 = vsel %vm421_vm3, %v1568_v3, %v6241_v8  ;;  %v1398_v40 = vrot.slane %v5737_v29, 4  ;;  %v1956_v29 = vrot.slane %v5787_v35, 4 }
 0x44b   :  { %2756 = vrot.lane.b32.xlu1 %v2716_v49, %s4783_s0  ;;  %3700 = vrot.lane.b32.xlu2 %v3660_v21, %s4784_s17  ;;  %v1587_v49 = vsel %vm421_vm3, %v6216_v53, %v1586_v17  ;;  %v6236_v21 = vpop.permute.xlu0 %3712  ;;  %v1009_v31 = vsel %vm421_vm3, %v1008_v54, %v971_v55  ;;  %v1410_v15 = vrot.slane %v6065_v13, 4 }
 0x44c   :  { %8324 = vst [vmem:[#allocation79_spill] sm:$0xff] %v6236_v21  ;;  %v1545_v48 = vsel %vm421_vm3, %v1544_v56, %v6250_v57  ;;  %v1980_v56 = vrot.slane %v5868_v16, 4 }
 0x44d   :  { %v6218_v9 = vpop.permute.xlu2 %2764  ;;  %v6220_v43 = vpop.permute.xlu1 %1826  ;;  %v6278_v47 = vperm.slane %v1545_v48, %v8286_v26 }
 0x44e   :  { %8323 = vst [vmem:[#allocation67_spill] sm:$0xff] %v6218_v9 }
 0x44f   :  { %1616 = vrot.lane.b32.xlu0 %v1587_v49, %s4783_s0  ;;  %v6271_v49 = vperm.slane %v1569_v41, %v8286_v26 }
 0x451   :  { %v1588_v54 = vrot.slane %v6271_v49, 4 }
 0x453   :  { %3226 = vrot.lane.b32.xlu1 %v3187_v28, %s4782_s30  ;;  %1134 = vrot.lane.b32.xlu2 %v8325_v19, %s4782_s30  ;;  %v6267_v1 = vpop.permute.xlu0 %3686  ;;  %v1115_v28 = vsel %vm421_vm3, %v5981_v4, %v1114_v37  ;;  %v1968_v19 = vrot.slane %v5846_v5, 4  ;;  %v1589_v20 = vsel %vm421_vm3, %v1588_v54, %v6278_v47  ;;  %v1004_v4 = vrot.slane %v6176_v52, 4  ;;  %v8333_v54 = vld [vmem:[#allocation62_spill] sm:$0xff] }
 0x454   :  { %8328 = vst [vmem:[#allocation81_spill] sm:$0xff] %v6267_v1  ;;  %v1010_v37 = vrot.slane %v971_v55, 4  ;;  %v6315_v55 = vsel %vm421_vm3, %v5809_v6, %v1398_v40  ;;  %v8337_v6 = vld [vmem:[#allocation52_spill] sm:$0xff] }
 0x455   :  { %v6257_v17 = vpop.permute.xlu2 %3240  ;;  %v6259_v42 = vpop.permute.xlu1 %1804  ;;  %v1969_v41 = vsel %vm421_vm3, %v1968_v19, %v5890_v30  ;;  %v1005_v52 = vsel %vm421_vm3, %v1004_v4, %v6164_v11  ;;  %v2352_v11 = vrot.slane %v5972_v39, 4  ;;  %v1446_v4 = vrot.slane %v6084_v36, 4 }
 0x456   :  { %8326 = vst [vmem:[#allocation37_spill] sm:$0xff] %v6257_v17  ;;  %v6307_v19 = vperm.slane %v1969_v41, %v8281_v44  ;;  %v1422_v41 = vrot.slane %v6056_v24, 4  ;;  %v1584_v36 = vrot.slane %v6216_v53, 4  ;;  %v8339_v17 = vld [vmem:[#allocation49_spill] sm:$0xff] }
 0x457   :  { %8327 = vst [vmem:[#allocation80_spill] sm:$0xff] %v6259_v42  ;;  %1166 = vrot.lane.b32.xlu0 %v1009_v31, %s4786_s19  ;;  %v8331_v31 = vld [vmem:[#allocation65_spill] sm:$0xff] }
 0x458   :  { %v3184_v48 = vmul.f32 %v8331_v31, %v4991_v61  ;;  %v1011_v61 = vsel %vm421_vm3, %v995_v50, %v1010_v37  ;;  %v2004_v31 = vrot.slane %v6307_v19, 4 }
 0x45b   :  { %3242 = vrot.lane.b32.xlu1 %v3195_v33, %s4782_s30  ;;  %1144 = vrot.lane.b32.xlu2 %v1115_v28, %s4783_s0  ;;  %v2328_v33 = vrot.slane %v5902_v38, 4 }
 0x45d   :  { %v6283_v3 = vpop.permute.xlu2 %3214  ;;  %v6285_v22 = vpop.permute.xlu1 %1822  ;;  %v2329_v40 = vsel %vm421_vm3, %v2328_v33, %v8337_v6  ;;  %v2353_v33 = vsel %vm421_vm3, %v2352_v11, %v8339_v17 }
 0x45e   :  { %8330 = vst [vmem:[#allocation64_spill] sm:$0xff] %v6283_v3  ;;  %v1844_v3 = vrot.slane %v5773_v23, 4  ;;  %v1880_v23 = vrot.slane %v6187_v45, 4  ;;  %v1856_v45 = vrot.slane %v6045_v0, 4 }
 0x45f   :  { %1624 = vrot.lane.b32.xlu0 %v1589_v20, %s4787_s20  ;;  %v3193_v20 = vmul.f32 %v8333_v54, %v5101_v62  ;;  %v1981_v62 = vsel %vm421_vm3, %v1980_v56, %v5812_v34  ;;  %v1992_v56 = vrot.slane %v6220_v43, 4 }
 0x460   :  { %v6337_v24 = vperm.slane %v1981_v62, %v8281_v44 }
 0x461   :  { %v1993_v53 = vsel %vm421_vm3, %v1992_v56, %v6285_v22  ;;  %v1585_v56 = vsel %vm421_vm3, %v1584_v36, %v6192_v51 }
 0x462   :  { %v6299_v28 = vpop.permute.xlu0 %3702 }
 0x463   :  { %8332 = vst [vmem:[#allocation65_spill] sm:$0xff] %v6299_v28  ;;  %3220 = vrot.lane.b32.xlu1 %v3184_v48, %s4782_s30  ;;  %1150 = vrot.lane.b32.xlu2 %v1005_v52, %s4787_s20  ;;  %v8334_v48 = vld [vmem:[#allocation16_spill] sm:$0xff] }
 0x464   :  { %v6325_v50 = vmul.f32 %v8334_v48, %v5024_v14  ;;  %v8338_v48 = vld [vmem:[#allocation59_spill] sm:$0xff] }
 0x465   :  { %v6327_v37 = vpop.permute.xlu2 %3230  ;;  %v6329_v52 = vpop.permute.xlu1 %1796  ;;  %v1957_v28 = vsel %vm421_vm3, %v1956_v29, %v8338_v48  ;;  %v8340_v29 = vld [vmem:[#allocation77_spill] sm:$0xff] }
 0x466   :  { %8335 = vst [vmem:[#allocation62_spill] sm:$0xff] %v6327_v37  ;;  %v3386_v54 = vrot.slane %v6327_v37, 4  ;;  %v6354_v37 = vperm.slane %v2329_v40, %v8281_v44  ;;  %v2340_v46 = vrot.slane %v8340_v29, 4  ;;  %v6361_v11 = vperm.slane %v1957_v28, %v8281_v44 }
 0x467   :  { %8336 = vst [vmem:[#allocation16_spill] sm:$0xff] %v6329_v52  ;;  %1174 = vrot.lane.b32.xlu0 %v1011_v61, %s4781_s4  ;;  %v1423_v61 = vsel %vm421_vm3, %v6041_v27, %v1422_v41  ;;  %v1447_v40 = vsel %vm421_vm3, %v6075_v18, %v1446_v4  ;;  %v1868_v27 = vrot.slane %v6106_v7, 4  ;;  %v8342_v41 = vld [vmem:[#allocation53_spill] sm:$0xff]  ;;  %v6377_v28 = vperm.slane %v1993_v53, %v8281_v44 }
 0x468   :  { %v6351_v62 = vsel %vm421_vm3, %v6185_v2, %v3386_v54  ;;  %v1590_v54 = vrot.slane %v6278_v47, 4  ;;  %v6371_v2 = vperm.slane %v2353_v33, %v8281_v44  ;;  %v1881_v0 = vsel %vm421_vm3, %v1880_v23, %v8342_v41  ;;  %v8343_v47 = vld [vmem:[#allocation66_spill] sm:$0xff]  ;;  %v8345_v33 = vld [vmem:[#allocation45_spill] sm:$0xff] }
 0x469   :  { %v2341_v51 = vsel %vm421_vm3, %v2340_v46, %v6024_v12  ;;  %v1411_v18 = vsel %vm421_vm3, %v8343_v47, %v1410_v15  ;;  %v3746_v4 = vrot.slane %v6267_v1, 4  ;;  %v6387_v36 = vperm.slane %v1423_v61, %v8286_v26 }
 0x46a   :  { %v6363_v13 = vpop.permute.xlu0 %3692  ;;  %v1386_v23 = vrot.slane %v8345_v33, 4  ;;  %v6399_v46 = vperm.slane %v1447_v40, %v8286_v26  ;;  %v6402_v15 = vperm.slane %v1881_v0, %v8281_v44  ;;  %v6415_v33 = vperm.slane %v1411_v18, %v8281_v44 }
 0x46b   :  { %8341 = vst [vmem:[#allocation52_spill] sm:$0xff] %v6363_v13  ;;  %3238 = vrot.lane.b32.xlu1 %v3193_v20, %s4782_s30  ;;  %1608 = vrot.lane.b32.xlu2 %v1585_v56, %s4782_s30  ;;  %v8346_v13 = vld [vmem:[#allocation51_spill] sm:$0xff]  ;;  %v1869_v20 = vsel %vm421_vm3, %v1868_v27, %v6259_v42  ;;  %v6412_v27 = vperm.slane %v2341_v51, %v8281_v44  ;;  %v2028_v40 = vrot.slane %v6377_v28, 4  ;;  %v1474_v51 = vrot.slane %v6387_v36, 4 }
 0x46c   :  { %8344 = vst [vmem:[#allocation59_spill] sm:$0xff] %v6387_v36  ;;  %v1857_v53 = vsel %vm421_vm3, %v1856_v45, %v8346_v13  ;;  %v1591_v45 = vsel %vm421_vm3, %v6271_v49, %v1590_v54  ;;  %v1845_v0 = vsel %vm421_vm3, %v1844_v3, %v6329_v52  ;;  %v8353_v49 = vld [vmem:[#allocation78_spill] sm:$0xff]  ;;  %v2364_v18 = vrot.slane %v6354_v37, 4 }
 0x46d   :  { %v6394_v56 = vpop.permute.xlu2 %3690  ;;  %v6396_v7 = vpop.permute.xlu1 %2272  ;;  %8349 = vst [vmem:[#allocation66_spill] sm:$0xff] %v6402_v15  ;;  %v2005_v1 = vsel %vm421_vm3, %v2004_v31, %v6361_v11  ;;  %v2388_v3 = vrot.slane %v6371_v2, 4  ;;  %v6441_v52 = vperm.slane %v1845_v0, %v8281_v44  ;;  %v1475_v42 = vsel %vm421_vm3, %v6399_v46, %v1474_v51 }
 0x46e   :  { %8347 = vst [vmem:[#allocation49_spill] sm:$0xff] %v6394_v56  ;;  %v6406_v61 = vsel %vm421_vm3, %v6394_v56, %v3746_v4  ;;  %v2316_v47 = vrot.slane %v6396_v7, 4  ;;  %v6422_v4 = vperm.slane %v1857_v53, %v8281_v44  ;;  %v8354_v53 = vld [vmem:[#allocation63_spill] sm:$0xff]  ;;  %v1456_v31 = vrot.slane %v6415_v33, 4 }
 0x46f   :  { %8348 = vst [vmem:[#allocation53_spill] sm:$0xff] %v6396_v7  ;;  %1632 = vrot.lane.b32.xlu0 %v1591_v45, %s4785_s18  ;;  %v1387_v56 = vsel %vm421_vm3, %v8354_v53, %v1386_v23  ;;  %v2029_v0 = vsel %vm421_vm3, %v2028_v40, %v6337_v24  ;;  %v1546_v40 = vrot.slane %v6250_v57, 4 }
 0x470   :  { %8350 = vst [vmem:[#allocation45_spill] sm:$0xff] %v6406_v61  ;;  %v6425_v61 = vperm.slane %v1869_v20, %v8281_v44  ;;  %v2317_v54 = vsel %vm421_vm3, %v2316_v47, %v8353_v49  ;;  %v1916_v20 = vrot.slane %v6402_v15, 4  ;;  %v1892_v53 = vrot.slane %v6422_v4, 4  ;;  %v8368_v49 = vld [vmem:[#allocation50_spill] sm:$0xff] }
 0x471   :  { %8351 = vst [vmem:[#allocation51_spill] sm:$0xff] %v6422_v4  ;;  %v6435_v45 = vperm.slane %v2317_v54, %v8281_v44  ;;  %v2389_v54 = vsel %vm421_vm3, %v2388_v3, %v6412_v27  ;;  %v6462_v15 = vperm.slane %v2005_v1, %v8286_v26  ;;  %v6472_v3 = vperm.slane %v1387_v56, %v8281_v44 }
 0x472   :  { %8352 = vst [vmem:[#allocation82_spill] sm:$0xff] %v6425_v61  ;;  %v6443_v47 = vpop.permute.xlu0 %3710  ;;  %v1893_v1 = vsel %vm421_vm3, %v1892_v53, %v6441_v52  ;;  %v8364_v56 = vrot.slane %v6241_v8, 4  ;;  %v8366_v53 = vld [vmem:[#allocation74_spill] sm:$0xff] }
 0x473   :  { %8355 = vst [vmem:[#allocation63_spill] sm:$0xff] %v6441_v52  ;;  %3212 = vrot.lane.b32.xlu1 %v6325_v50, %s4782_s30  ;;  %1614 = vrot.lane.b32.xlu2 %v1475_v42, %s4783_s0  ;;  %v2365_v23 = vsel %vm421_vm3, %v2364_v18, %v6435_v45  ;;  %v1917_v42 = vsel %vm421_vm3, %v1916_v20, %v6425_v61  ;;  %v8359_v50 = vld [vmem:[#allocation68_spill] sm:$0xff]  ;;  %v1432_v36 = vrot.slane %v6472_v3, 4 }
 0x474   :  { %8356 = vst [vmem:[#allocation83_spill] sm:$0xff] %v6443_v47  ;;  %v6459_v51 = vperm.slane %v2365_v23, %v8286_v26  ;;  %v1374_v7 = vrot.slane %v8359_v50, 4  ;;  %v6469_v18 = vperm.slane %v6315_v55, %v8281_v44  ;;  %v6482_v20 = vperm.slane %v2389_v54, %v8286_v26  ;;  %v8367_v52 = vld [vmem:[#allocation12_spill] sm:$0xff] }
 0x475   :  { %8358 = vst [vmem:[#allocation85_spill] sm:$0xff] %v6462_v15  ;;  %v6475_v4 = vpop.permute.xlu2 %3222  ;;  %v6477_v23 = vpop.permute.xlu1 %2288  ;;  %v6486_v55 = vperm.slane %v2029_v0, %v8286_v26  ;;  %v1571_v57 = vsel %vm421_vm3, %v6231_v60, %v8364_v56  ;;  %v6495_v61 = vperm.slane %v1917_v42, %v8286_v26  ;;  %v2054_v0 = vrot.slane %v6462_v15, 4 }
 0x476   :  { %8357 = vst [vmem:[#allocation84_spill] sm:$0xff] %v6459_v51  ;;  %v2414_v50 = vrot.slane %v6459_v51, 4  ;;  %v1375_v54 = vsel %vm421_vm3, %v8366_v53, %v1374_v7  ;;  %v3654_v8 = vmul.f32 %v8368_v49, %v8367_v52  ;;  %v1547_v60 = vsel %vm421_vm3, %v6244_v59, %v1546_v40  ;;  %v8370_v59 = vld [vmem:[#allocation40_spill] sm:$0xff] }
 0x477   :  { %8360 = vst [vmem:[#allocation68_spill] sm:$0xff] %v6475_v4  ;;  %v1457_v4 = vsel %vm421_vm3, %v1456_v31, %v6469_v18  ;;  %v6509_v31 = vperm.slane %v1893_v1, %v8286_v26  ;;  %v2055_v42 = vsel %vm421_vm3, %v6486_v55, %v2054_v0  ;;  %v6520_v49 = vperm.slane %v1375_v54, %v8281_v44 }
 0x478   :  { %8361 = vst [vmem:[#allocation86_spill] sm:$0xff] %v6477_v23  ;;  %v2415_v51 = vsel %vm421_vm3, %v6482_v20, %v2414_v50  ;;  %v6514_v50 = vperm.slane %v1571_v57, %v8286_v26  ;;  %v6517_v52 = vperm.slane %v1457_v4, %v8286_v26  ;;  %v1940_v1 = vrot.slane %v6495_v61, 4 }
 0x479   :  { %8362 = vst [vmem:[#allocation87_spill] sm:$0xff] %v6482_v20  ;;  %2542 = vrot.lane.b32.xlu0 %v2415_v51, %s4784_s17  ;;  %v2390_v51 = vrot.slane %v6412_v27, 4  ;;  %v6531_v56 = vperm.slane %v1547_v60, %v8286_v26  ;;  %v2030_v4 = vrot.slane %v6337_v24, 4  ;;  %v2366_v57 = vrot.slane %v6435_v45, 4  ;;  %v8385_v20 = vld [vmem:[#allocation71_spill] sm:$0xff] }
 0x47a   :  { %8363 = vst [vmem:[#allocation88_spill] sm:$0xff] %v6486_v55  ;;  %v1127_v7 = vpop.permute.xlu0 %1126  ;;  %v1433_v54 = vsel %vm421_vm3, %v1432_v36, %v6520_v49  ;;  %v6543_v0 = vsel %vm421_vm3, %v1940_v1, %v6509_v31  ;;  %v1476_v60 = vrot.slane %v6517_v52, 4  ;;  %v8374_v36 = vld [vmem:[#allocation15_spill] sm:$0xff]  ;;  %v3395_v15 = vperm.slane %v6351_v62, %v8281_v44  ;;  %v8382_v55 = vld [vmem:[#allocation58_spill] sm:$0xff] }
 0x47b   :  { %8365 = vst [vmem:[#allocation89_spill] sm:$0xff] %v6495_v61  ;;  %v6525_v40 = vsel %vm701_vm4, %v8370_v59, %v1127_v7  ;;  %3688 = vrot.lane.b32.xlu1 %v3654_v8, %s4784_s17  ;;  %2072 = vrot.lane.b32.xlu2 %v2055_v42, %s4784_s17  ;;  %v1592_v8 = vrot.slane %v6514_v50, 4  ;;  %v2031_v24 = vsel %vm421_vm3, %v6377_v28, %v2030_v4  ;;  %v8375_v59 = vld [vmem:[#allocation69_spill] sm:$0xff]  ;;  %v8376_v4 = vld [vmem:[#allocation14_spill] sm:$0xff] }
 0x47c   :  { %8369 = vst [vmem:[#allocation74_spill] sm:$0xff] %v6509_v31  ;;  %v2391_v45 = vsel %vm421_vm3, %v6371_v2, %v2390_v51  ;;  %v6554_v42 = vperm.slane %v1433_v54, %v8286_v26  ;;  %v3662_v1 = vmul.f32 %v8375_v59, %v8374_v36  ;;  %v6568_v51 = vperm.slane %v2031_v24, %v8286_v26  ;;  %v8380_v59 = vld [vmem:[#allocation75_spill] sm:$0xff]  ;;  %v8384_v31 = vld [vmem:[#allocation73_spill] sm:$0xff] }
 0x47d   :  { %v6535_v53 = vpop.permute.xlu2 %3696  ;;  %v6537_v27 = vpop.permute.xlu1 %2762  ;;  %8373 = vst [vmem:[#allocation40_spill] sm:$0xff] %v6543_v0  ;;  %v1593_v7 = vsel %vm421_vm3, %v1592_v8, %v6531_v56  ;;  %v2006_v0 = vrot.slane %v6361_v11, 4  ;;  %v6565_v2 = vperm.slane %v2391_v45, %v8286_v26  ;;  %v2938_v54 = vrot.slane %v8376_v4, 4 }
 0x47e   :  { %8371 = vst [vmem:[#allocation12_spill] sm:$0xff] %v6535_v53  ;;  %v2367_v53 = vsel %vm421_vm3, %v6354_v37, %v2366_v57  ;;  %v1477_v28 = vsel %vm421_vm3, %v1476_v60, %v6554_v42  ;;  %v8379_v60 = vld [vmem:[#allocation13_spill] sm:$0xff]  ;;  %v2056_v36 = vrot.slane %v6568_v51, 4  ;;  %v1478_v29 = vrot.slane %v6554_v42, 4 }
 0x47f   :  { %8372 = vst [vmem:[#allocation50_spill] sm:$0xff] %v6537_v27  ;;  %v6574_v11 = vperm.slane %v2367_v53, %v8286_v26  ;;  %v2007_v57 = vsel %vm421_vm3, %v6307_v19, %v2006_v0  ;;  %v2464_v45 = vrot.slane %v8379_v60, 4  ;;  %v8383_v19 = vld [vmem:[#allocation24_spill] sm:$0xff] }
 0x480   :  { %v1479_v42 = vsel %vm421_vm3, %v6517_v52, %v1478_v29 }
 0x481   :  { %1640 = vrot.lane.b32.xlu0 %v1593_v7, %s4786_s19  ;;  %v2416_v7 = vrot.slane %v6565_v2, 4  ;;  %v2465_v61 = vsel %vm421_vm3, %v2464_v45, %v8382_v55  ;;  %v2418_v29 = vrot.slane %v6574_v11, 4 }
 0x482   :  { %v6613_v55 = vperm.slane %v2465_v61, %v8281_v44  ;;  %v8389_v61 = vld [vmem:[#allocation46_spill] sm:$0xff] }
 0x483   :  { %3704 = vrot.lane.b32.xlu1 %v3662_v1, %s4784_s17  ;;  %1622 = vrot.lane.b32.xlu2 %v1477_v28, %s4787_s20  ;;  %v2452_v1 = vrot.slane %v8380_v59, 4  ;;  %v8381_v28 = vld [vmem:[#allocation47_spill] sm:$0xff]  ;;  %v2417_v60 = vsel %vm421_vm3, %v2416_v7, %v6574_v11  ;;  %v2440_v59 = vrot.slane %v8384_v31, 4  ;;  %v3432_v31 = vrot.slane %v3395_v15, 4 }
 0x484   :  { %v2939_v53 = vsel %vm421_vm3, %v8381_v28, %v2938_v54  ;;  %v3657_v54 = vmul.f32 %v8385_v20, %v4989_v58  ;;  %8387 = vst [vmem:[#allocation14_spill] sm:$0xff] %v6613_v55  ;;  %v2926_v58 = vrot.slane %v6218_v9, 4  ;;  %v2428_v20 = vrot.slane %v6477_v23, 4  ;;  %v8391_v23 = vld [vmem:[#allocation72_spill] sm:$0xff] }
 0x485   :  { %v6576_v8 = vpop.permute.xlu2 %3228  ;;  %v6578_v37 = vpop.permute.xlu1 %2292  ;;  %v2500_v9 = vrot.slane %v6613_v55, 4 }
 0x486   :  { %8377 = vst [vmem:[#allocation15_spill] sm:$0xff] %v6576_v8  ;;  %v3374_v24 = vrot.slane %v6576_v8, 4  ;;  %v6598_v8 = vperm.slane %v2007_v57, %v8286_v26  ;;  %v2453_v62 = vsel %vm421_vm3, %v2452_v1, %v6578_v37  ;;  %v2947_v57 = vperm.slane %v2939_v53, %v8281_v44 }
 0x487   :  { %8378 = vst [vmem:[#allocation69_spill] sm:$0xff] %v6578_v37  ;;  %v6621_v1 = vperm.slane %v2453_v62, %v8281_v44  ;;  %v8392_v37 = vld [vmem:[#allocation35_spill] sm:$0xff] }
 0x488   :  { %v3375_v0 = vsel %vm421_vm3, %v8383_v19, %v3374_v24  ;;  %v2057_v45 = vsel %vm421_vm3, %v2056_v36, %v6598_v8  ;;  %v8386_v24 = vld [vmem:[#allocation57_spill] sm:$0xff]  ;;  %v1594_v36 = vrot.slane %v6531_v56, 4  ;;  %v3652_v56 = vmul.f32 %v8391_v23, %v5024_v14 }
 0x489   :  { %v3383_v27 = vperm.slane %v3375_v0, %v8281_v44  ;;  %2550 = vrot.lane.b32.xlu0 %v2417_v60, %s4782_s30  ;;  %v2441_v7 = vsel %vm421_vm3, %v2440_v59, %v8386_v24  ;;  %v6629_v0 = vperm.slane %v8389_v61, %v8286_v26  ;;  %v1084_v62 = vrot.slane %v8392_v37, 4  ;;  %v8395_v37 = vld [vmem:[#allocation44_spill] sm:$0xff] }
 0x48a   :  { %v2984_v24 = vrot.slane %v2947_v57, 4  ;;  %v1595_v14 = vsel %vm421_vm3, %v6514_v50, %v1594_v36  ;;  %v8397_v36 = vld [vmem:[#allocation11_spill] sm:$0xff] }
 0x48b   :  { %3694 = vrot.lane.b32.xlu1 %v3657_v54, %s4784_s17  ;;  %2080 = vrot.lane.b32.xlu2 %v2057_v45, %s4782_s30  ;;  %v3434_v60 = vrot.slane %v3383_v27, 4  ;;  %v6632_v54 = vsel %vm421_vm3, %v3432_v31, %v3383_v27  ;;  %v6635_v45 = vperm.slane %v2441_v7, %v8281_v44  ;;  %v1994_v31 = vrot.slane %v6285_v22, 4  ;;  %v8393_v27 = vld [vmem:[#allocation17_spill] sm:$0xff] }
 0x48c   :  { %8390 = vst [vmem:[#allocation24_spill] sm:$0xff] %v6632_v54  ;;  %v2429_v7 = vsel %vm421_vm3, %v2428_v20, %v8393_v27  ;;  %v2501_v22 = vsel %vm421_vm3, %v2500_v9, %v6621_v1  ;;  %v8396_v20 = vld [vmem:[#allocation36_spill] sm:$0xff]  ;;  %v1110_v52 = vrot.slane %v6629_v0, 4 }
 0x48d   :  { %v6623_v59 = vpop.permute.xlu2 %3698  ;;  %v6625_v53 = vpop.permute.xlu1 %2768  ;;  %v6651_v23 = vsel %vm421_vm3, %v3395_v15, %v3434_v60  ;;  %v1085_v50 = vsel %vm421_vm3, %v1084_v62, %v8396_v20  ;;  %v6667_v60 = vperm.slane %v2429_v7, %v8281_v44  ;;  %v1995_v9 = vsel %vm421_vm3, %v6220_v43, %v1994_v31 }
 0x48e   :  { %8388 = vst [vmem:[#allocation47_spill] sm:$0xff] %v6623_v59  ;;  %v2927_v59 = vsel %vm421_vm3, %v6625_v53, %v2926_v58  ;;  %v2790_v58 = vrot.slane %v8395_v37, 4  ;;  %v1982_v62 = vrot.slane %v5812_v34, 4  ;;  %v6689_v7 = vperm.slane %v1085_v50, %v8286_v26 }
 0x48f   :  { %v2935_v61 = vperm.slane %v2927_v59, %v8281_v44  ;;  %8394 = vst [vmem:[#allocation71_spill] sm:$0xff] %v6651_v23  ;;  %v6679_v59 = vperm.slane %v2501_v22, %v8286_v26  ;;  %v1970_v43 = vrot.slane %v5890_v30, 4  ;;  %v6696_v34 = vperm.slane %v1995_v9, %v8281_v44 }
 0x490   :  { %v2791_v15 = vsel %vm421_vm3, %v8397_v36, %v2790_v58  ;;  %v2419_v50 = vsel %vm421_vm3, %v6565_v2, %v2418_v29  ;;  %v1958_v9 = vrot.slane %v8338_v48, 4 }
 0x491   :  { %v6655_v54 = vsel %vm421_vm3, %v2984_v24, %v2935_v61  ;;  %v2986_v55 = vrot.slane %v2935_v61, 4  ;;  %1648 = vrot.lane.b32.xlu0 %v1595_v14, %s4781_s4  ;;  %v2476_v61 = vrot.slane %v6635_v45, 4  ;;  %v2799_v11 = vperm.slane %v2791_v15, %v8281_v44 }
 0x492   :  { %v2524_v15 = vrot.slane %v6679_v59, 4  ;;  %v2040_v48 = vrot.slane %v6696_v34, 4 }
 0x493   :  { %v6670_v24 = vsel %vm421_vm3, %v2947_v57, %v2986_v55  ;;  %3684 = vrot.lane.b32.xlu1 %v3652_v56, %s4784_s17  ;;  %1630 = vrot.lane.b32.xlu2 %v1479_v42, %s4785_s18  ;;  %v1458_v55 = vrot.slane %v6469_v18, 4  ;;  %v2058_v18 = vrot.slane %v6598_v8, 4  ;;  %v2477_v22 = vsel %vm421_vm3, %v2476_v61, %v6667_v60  ;;  %v8399_v42 = vld [vmem:[#allocation55_spill] sm:$0xff] }
 0x494   :  { %v1983_v8 = vsel %vm421_vm3, %v5868_v16, %v1982_v62  ;;  %v1111_v61 = vsel %vm421_vm3, %v6689_v7, %v1110_v52  ;;  %v6723_v29 = vperm.slane %v2477_v22, %v8286_v26  ;;  %v1434_v16 = vrot.slane %v6520_v49, 4 }
 0x495   :  { %v6684_v57 = vpop.permute.xlu2 %3714  ;;  %v6686_v56 = vpop.permute.xlu1 %2742  ;;  %v1459_v58 = vsel %vm421_vm3, %v6415_v33, %v1458_v55  ;;  %v2850_v55 = vrot.slane %v2799_v11, 4  ;;  %v3868_v52 = vrot.slane %v6236_v21, 4 }
 0x496   :  { %8398 = vst [vmem:[#allocation46_spill] sm:$0xff] %v6684_v57  ;;  %v3880_v31 = vrot.slane %v6684_v57, 4  ;;  %v2802_v14 = vrot.slane %v6686_v56, 4  ;;  %v6720_v2 = vperm.slane %v1459_v58, %v8286_v26  ;;  %v6738_v49 = vsel %vm421_vm3, %v2524_v15, %v6723_v29 }
 0x497   :  { %8400 = vst [vmem:[#allocation72_spill] sm:$0xff] %v6738_v49  ;;  %v6741_v58 = vperm.slane %v1983_v8, %v8281_v44 }
 0x498   :  { %v3881_v30 = vsel %vm421_vm3, %v3880_v31, %v6443_v47  ;;  %v2803_v20 = vsel %vm421_vm3, %v8399_v42, %v2802_v14  ;;  %v2059_v31 = vsel %vm421_vm3, %v6568_v51, %v2058_v18  ;;  %v1971_v51 = vsel %vm421_vm3, %v5846_v5, %v1970_v43  ;;  %v8402_v43 = vld [vmem:[#allocation48_spill] sm:$0xff] }
 0x499   :  { %v2811_v33 = vperm.slane %v2803_v20, %v8281_v44  ;;  %2558 = vrot.lane.b32.xlu0 %v2419_v50, %s4783_s0  ;;  %v3887_v62 = vperm.slane %v3881_v30, %v8281_v44  ;;  %v1435_v20 = vsel %vm421_vm3, %v6472_v3, %v1434_v16  ;;  %v2814_v50 = vrot.slane %v8402_v43, 4 }
 0x49a   :  { %v1480_v8 = vrot.slane %v6720_v2, 4  ;;  %v2041_v3 = vsel %vm421_vm3, %v2040_v48, %v6741_v58 }
 0x49b   :  { %v2848_v14 = vrot.slane %v2811_v33, 4  ;;  %1128 = vrot.lane.b32.xlu1 %v1111_v61, %s4784_s17  ;;  %2088 = vrot.lane.b32.xlu2 %v2059_v31, %s4783_s0  ;;  %v6734_v18 = vsel %vm421_vm3, %v2811_v33, %v2850_v55  ;;  %v1959_v33 = vsel %vm421_vm3, %v5787_v35, %v1958_v9  ;;  %v6759_v61 = vperm.slane %v1971_v51, %v8281_v44 }
 0x49c   :  { %v3916_v55 = vrot.slane %v3887_v62, 4  ;;  %v6767_v35 = vperm.slane %v1435_v20, %v8286_v26  ;;  %v6770_v9 = vperm.slane %v1959_v33, %v8281_v44  ;;  %v6786_v20 = vperm.slane %v2041_v3, %v8286_v26 }
 0x49d   :  { %v6743_v22 = vpop.permute.xlu2 %3708  ;;  %v6745_v30 = vpop.permute.xlu1 %2758  ;;  %v6750_v5 = vsel %vm421_vm3, %v2848_v14, %v2799_v11  ;;  %v8403_v11 = vld [vmem:[#allocation76_spill] sm:$0xff]  ;;  %v2936_v14 = vrot.slane %v8381_v28, 4  ;;  %v6783_v28 = vperm.slane %v6172_v32, %v8286_v26  ;;  %v1556_v33 = vrot.slane %v6195_v10, 4 }
 0x49e   :  { %8401 = vst [vmem:[#allocation35_spill] sm:$0xff] %v6743_v22  ;;  %v3869_v15 = vsel %vm421_vm3, %v3868_v52, %v6743_v22  ;;  %v2812_v16 = vrot.slane %v8403_v11, 4  ;;  %v6772_v52 = vpop.permute.xlu0 %1136  ;;  %v1481_v48 = vsel %vm421_vm3, %v1480_v8, %v6767_v35  ;;  %v2330_v32 = vrot.slane %v8337_v6, 4 }
 0x49f   :  { %v3875_v31 = vperm.slane %v3869_v15, %v8281_v44  ;;  %8404 = vst [vmem:[#allocation17_spill] sm:$0xff] %v6772_v52  ;;  %v2937_v8 = vsel %vm421_vm3, %v2936_v14, %v8376_v4  ;;  %v2354_v10 = vrot.slane %v8339_v17, 4  ;;  %v1582_v17 = vrot.slane %v6783_v28, 4 }
 0x4a0   :  { %v2813_v15 = vsel %vm421_vm3, %v2812_v16, %v8402_v43  ;;  %8406 = vst [vmem:[#allocation36_spill] sm:$0xff] %v6783_v28  ;;  %v8407_v43 = vld [vmem:[#allocation38_spill] sm:$0xff]  ;;  %v2331_v4 = vsel %vm421_vm3, %v5902_v38, %v2330_v32  ;;  %v2060_v16 = vrot.slane %v6786_v20, 4  ;;  %v2800_v14 = vrot.slane %v8399_v42, 4 }
 0x4a1   :  { %v6775_v51 = vsel %vm421_vm3, %v3916_v55, %v3875_v31  ;;  %v3918_v49 = vrot.slane %v3875_v31, 4  ;;  %v2815_v55 = vsel %vm421_vm3, %v8403_v11, %v2814_v50  ;;  %v2016_v31 = vrot.slane %v6759_v61, 4 }
 0x4a2   :  { %8405 = vst [vmem:[#allocation44_spill] sm:$0xff] %v6775_v51  ;;  %v6803_v3 = vperm.slane %v2813_v15, %v8281_v44  ;;  %v6814_v6 = vperm.slane %v2815_v55, %v8281_v44  ;;  %v6822_v15 = vperm.slane %v2937_v8, %v8281_v44  ;;  %v8409_v55 = vld [vmem:[#allocation54_spill] sm:$0xff]  ;;  %v6836_v42 = vperm.slane %v2331_v4, %v8281_v44 }
 0x4a3   :  { %v6793_v51 = vsel %vm421_vm3, %v3887_v62, %v3918_v49  ;;  %1142 = vrot.lane.b32.xlu1 %v8407_v43, %s4783_s0  ;;  %1638 = vrot.lane.b32.xlu2 %v1481_v48, %s4786_s19  ;;  %v1557_v62 = vsel %vm421_vm3, %v1556_v33, %v6169_v63  ;;  %v2017_v49 = vsel %vm421_vm3, %v2016_v31, %v6770_v9  ;;  %v2824_v31 = vrot.slane %v8409_v55, 4 }
 0x4a4   :  { %v2355_v63 = vsel %vm421_vm3, %v5972_v39, %v2354_v10  ;;  %v6827_v48 = vperm.slane %v1557_v62, %v8286_v26  ;;  %v6830_v33 = vperm.slane %v2017_v49, %v8286_v26  ;;  %v2801_v32 = vsel %vm421_vm3, %v2800_v14, %v6686_v56  ;;  %v8410_v10 = vld [vmem:[#allocation9_spill] sm:$0xff] }
 0x4a5   :  { %v6805_v50 = vpop.permute.xlu2 %3700  ;;  %v6807_v11 = vpop.permute.xlu1 %3218  ;;  %v2874_v39 = vrot.slane %v6814_v6, 4  ;;  %v6852_v23 = vperm.slane %v2355_v63, %v8281_v44  ;;  %v2788_v56 = vrot.slane %v8397_v36, 4  ;;  %v2342_v36 = vrot.slane %v6024_v12, 4 }
 0x4a6   :  { %8408 = vst [vmem:[#allocation11_spill] sm:$0xff] %v6827_v48  ;;  %v1583_v49 = vsel %vm421_vm3, %v6827_v48, %v1582_v17  ;;  %v2061_v38 = vsel %vm421_vm3, %v2060_v16, %v6830_v33  ;;  %v6861_v16 = vperm.slane %v2801_v32, %v8281_v44  ;;  %v1472_v32 = vrot.slane %v6399_v46, 4  ;;  %v8413_v46 = vld [vmem:[#allocation77_spill] sm:$0xff]  ;;  %v8443_v48 = vld [vmem:[#allocation63_spill] sm:$0xff] }
 0x4a7   :  { %v2400_v14 = vrot.slane %v6852_v23, 4  ;;  %v2789_v43 = vsel %vm421_vm3, %v2788_v56, %v8395_v37  ;;  %v2924_v4 = vrot.slane %v6625_v53, 4 }
 0x4a8   :  { %v2836_v63 = vrot.slane %v6861_v16, 4  ;;  %v6895_v57 = vperm.slane %v2789_v43, %v8281_v44 }
 0x4a9   :  { %v1599_v8 = vpop.permute.xlu0 %1598 }
 0x4aa   :  { %v6843_v62 = vsel %vm701_vm4, %v8410_v10, %v1599_v8  ;;  %v8412_v8 = vld [vmem:[#allocation56_spill] sm:$0xff]  ;;  %v2018_v10 = vrot.slane %v6770_v9, 4 }
 0x4ab   :  { %8411 = vst [vmem:[#allocation55_spill] sm:$0xff] %v6843_v62  ;;  %1600 = vrot.lane.b32.xlu1 %v1583_v49, %s4784_s17  ;;  %2096 = vrot.lane.b32.xlu2 %v2061_v38, %s4787_s20 }
 0x4ad   :  { %v1135_v49 = vpop.permute.xlu2 %1134  ;;  %v2751_v21 = vpop.permute.xlu1 %2750 }
 0x4ae   :  { %v6869_v38 = vsel %vm704_vm5, %v6525_v40, %v1135_v49  ;;  %v2825_v17 = vsel %vm421_vm3, %v2824_v31, %v2751_v21  ;;  %v2826_v9 = vrot.slane %v2751_v21, 4  ;;  %v1482_v31 = vrot.slane %v6767_v35, 4 }
 0x4af   :  { %v6878_v12 = vperm.slane %v2825_v17, %v8281_v44  ;;  %v2019_v21 = vsel %vm421_vm3, %v6759_v61, %v2018_v10  ;;  %v2343_v49 = vsel %vm421_vm3, %v8413_v46, %v2342_v36  ;;  %v2859_v17 = vperm.slane %v6734_v18, %v8286_v26  ;;  %v8416_v36 = vld [vmem:[#allocation67_spill] sm:$0xff]  ;;  %v8417_v46 = vld [vmem:[#allocation50_spill] sm:$0xff] }
 0x4b0   :  { %v2827_v40 = vsel %vm421_vm3, %v8409_v55, %v2826_v9  ;;  %v8415_v55 = vld [vmem:[#allocation59_spill] sm:$0xff]  ;;  %v1483_v61 = vsel %vm421_vm3, %v6720_v2, %v1482_v31  ;;  %v2855_v10 = vperm.slane %v6750_v5, %v8286_v26  ;;  %v2925_v9 = vsel %vm421_vm3, %v2924_v4, %v8416_v36 }
 0x4b1   :  { %v2835_v37 = vperm.slane %v2827_v40, %v8281_v44  ;;  %v2860_v53 = vrot.slane %v6878_v12, 4  ;;  %v6890_v56 = vpop.permute.xlu0 %1152  ;;  %v1473_v35 = vsel %vm421_vm3, %v1472_v32, %v8415_v55  ;;  %v2837_v32 = vsel %vm421_vm3, %v2836_v63, %v6895_v57 }
 0x4b2   :  { %8414 = vst [vmem:[#allocation48_spill] sm:$0xff] %v6890_v56  ;;  %v6916_v5 = vperm.slane %v2019_v21, %v8286_v26  ;;  %v2351_v31 = vperm.slane %v2343_v49, %v8281_v44  ;;  %v2912_v55 = vrot.slane %v8417_v46, 4  ;;  %v2898_v63 = vrot.slane %v2859_v17, 4 }
 0x4b3   :  { %v2872_v40 = vrot.slane %v2835_v37, 4  ;;  %1606 = vrot.lane.b32.xlu1 %v1473_v35, %s4782_s30  ;;  %1646 = vrot.lane.b32.xlu2 %v1483_v61, %s4781_s4  ;;  %v2861_v18 = vsel %vm421_vm3, %v2860_v53, %v6803_v3  ;;  %v2875_v43 = vsel %vm421_vm3, %v2835_v37, %v2874_v39  ;;  %v6928_v37 = vperm.slane %v2925_v9, %v8281_v44 }
 0x4b4   :  { %v6913_v2 = vperm.slane %v2861_v18, %v8286_v26  ;;  %v2883_v4 = vperm.slane %v2875_v43, %v8286_v26  ;;  %v2914_v21 = vrot.slane %v6745_v30, 4  ;;  %v2894_v36 = vrot.slane %v2855_v10, 4 }
 0x4b5   :  { %v6921_v35 = vpop.permute.xlu2 %1144  ;;  %v6923_v53 = vpop.permute.xlu1 %3224  ;;  %v2873_v39 = vsel %vm421_vm3, %v2872_v40, %v6814_v6  ;;  %v2843_v49 = vperm.slane %v2837_v32, %v8286_v26  ;;  %v2913_v6 = vsel %vm421_vm3, %v2912_v55, %v6745_v30  ;;  %v2062_v40 = vrot.slane %v6830_v33, 4  ;;  %v8422_v32 = vld [vmem:[#allocation20_spill] sm:$0xff] }
 0x4b6   :  { %8418 = vst [vmem:[#allocation76_spill] sm:$0xff] %v6921_v35  ;;  %v2879_v61 = vperm.slane %v2873_v39, %v8286_v26  ;;  %v2896_v18 = vrot.slane %v2883_v4, 4  ;;  %v2884_v43 = vrot.slane %v6913_v2, 4  ;;  %v6935_v56 = vsel %vm421_vm3, %v2883_v4, %v2898_v63  ;;  %v8433_v63 = vld [vmem:[#allocation87_spill] sm:$0xff] }
 0x4b7   :  { %8419 = vst [vmem:[#allocation38_spill] sm:$0xff] %v6935_v56  ;;  %v8421_v39 = vrot.slane %v6144_v25, 4  ;;  %v2401_v47 = vsel %vm421_vm3, %v2400_v14, %v2351_v31  ;;  %v2915_v33 = vsel %vm421_vm3, %v8417_v46, %v2914_v21  ;;  %v2063_v55 = vsel %vm421_vm3, %v6786_v20, %v2062_v40  ;;  %v8426_v21 = vld [vmem:[#allocation23_spill] sm:$0xff]  ;;  %v8434_v56 = vld [vmem:[#allocation74_spill] sm:$0xff] }
 0x4b8   :  { %v2892_v9 = vrot.slane %v2879_v61, 4  ;;  %v6941_v35 = vsel %vm421_vm3, %v2879_v61, %v2894_v36  ;;  %v6951_v4 = vsel %vm421_vm3, %v2896_v18, %v2859_v17  ;;  %v6954_v30 = vsel %vm421_vm3, %v2884_v43, %v2843_v49  ;;  %v8424_v61 = vld [vmem:[#allocation6_spill] sm:$0xff]  ;;  %v8428_v43 = vld [vmem:[#allocation60_spill] sm:$0xff] }
 0x4b9   :  { %v6943_v52 = vpop.permute.xlu0 %1158  ;;  %v1119_v62 = vsel %vm421_vm3, %v8422_v32, %v8421_v39  ;;  %8423 = vst [vmem:[#allocation9_spill] sm:$0xff] %v6954_v30  ;;  %v2402_v14 = vrot.slane %v2351_v31, 4  ;;  %v6966_v17 = vperm.slane %v2913_v6, %v8281_v44  ;;  %v8425_v46 = vrot.slane %v6822_v15, 4  ;;  %v8429_v31 = vld [vmem:[#allocation42_spill] sm:$0xff] }
 0x4ba   :  { %8420 = vst [vmem:[#allocation54_spill] sm:$0xff] %v6943_v52  ;;  %v6962_v25 = vsel %vm421_vm3, %v2892_v9, %v2855_v10  ;;  %v3398_v18 = vrot.slane %v8426_v21, 4  ;;  %v8427_v10 = vrot.slane %v8346_v13, 4  ;;  %v2900_v9 = vrot.slane %v8429_v31, 4 }
 0x4bb   :  { %1160 = vrot.lane.b32.xlu1 %v1119_v62, %s4785_s18  ;;  %2104 = vrot.lane.b32.xlu2 %v2063_v55, %s4785_s18  ;;  %v2973_v20 = vsel %vm421_vm3, %v8425_v46, %v6928_v37  ;;  %v6981_v6 = vperm.slane %v2401_v47, %v8286_v26  ;;  %v8430_v62 = vld [vmem:[#allocation78_spill] sm:$0xff]  ;;  %v2923_v32 = vperm.slane %v2915_v33, %v8281_v44  ;;  %v8432_v46 = vrot.slane %v6741_v58, 4  ;;  %v8435_v58 = vld [vmem:[#allocation53_spill] sm:$0xff] }
 0x4bc   :  { %v1859_v40 = vsel %vm421_vm3, %v8428_v43, %v8427_v10  ;;  %v2318_v39 = vrot.slane %v8430_v62, 4  ;;  %v1942_v47 = vrot.slane %v8434_v56, 4  ;;  %v2979_v30 = vperm.slane %v2973_v20, %v8286_v26 }
 0x4bd   :  { %v6985_v55 = vpop.permute.xlu2 %1150  ;;  %v2757_v36 = vpop.permute.xlu1 %2756  ;;  %v2043_v13 = vsel %vm421_vm3, %v6696_v34, %v8432_v46  ;;  %v6996_v62 = vperm.slane %v1859_v40, %v8281_v44  ;;  %v2948_v33 = vrot.slane %v6966_v17, 4  ;;  %v2403_v34 = vsel %vm421_vm3, %v6852_v23, %v2402_v14 }
 0x4be   :  { %8431 = vst [vmem:[#allocation56_spill] sm:$0xff] %v6985_v55  ;;  %v2901_v10 = vsel %vm421_vm3, %v2900_v9, %v2757_v36  ;;  %v2902_v43 = vrot.slane %v2757_v36, 4  ;;  %v2319_v46 = vsel %vm421_vm3, %v8435_v58, %v2318_v39  ;;  %v2886_v56 = vrot.slane %v2843_v49, 4  ;;  %v8437_v39 = vld [vmem:[#allocation89_spill] sm:$0xff] }
 0x4bf   :  { %v7000_v28 = vperm.slane %v2901_v10, %v8281_v44  ;;  %v7009_v20 = vperm.slane %v2043_v13, %v8286_v26  ;;  %v2991_v40 = vperm.slane %v6655_v54, %v8286_v26  ;;  %v2960_v9 = vrot.slane %v2923_v32, 4 }
 0x4c0   :  { %v2903_v36 = vsel %vm421_vm3, %v8429_v31, %v2902_v43  ;;  %v1943_v31 = vsel %vm421_vm3, %v8437_v39, %v1942_v47  ;;  %v2887_v49 = vsel %vm421_vm3, %v6913_v2, %v2886_v56  ;;  %v2996_v13 = vrot.slane %v2979_v30, 4  ;;  %v8438_v43 = vld [vmem:[#allocation82_spill] sm:$0xff] }
 0x4c1   :  { %v2911_v10 = vperm.slane %v2903_v36, %v8281_v44  ;;  %v2949_v22 = vsel %vm421_vm3, %v2948_v33, %v7000_v28  ;;  %v7016_v23 = vpop.permute.xlu0 %1616  ;;  %v1918_v58 = vrot.slane %v8438_v43, 4  ;;  %v7025_v54 = vperm.slane %v2319_v46, %v8281_v44 }
 0x4c2   :  { %8436 = vst [vmem:[#allocation77_spill] sm:$0xff] %v7016_v23  ;;  %v2955_v14 = vperm.slane %v2949_v22, %v8286_v26  ;;  %v2995_v47 = vperm.slane %v6670_v24, %v8286_v26  ;;  %v2064_v39 = vrot.slane %v7009_v20, 4  ;;  %v3004_v43 = vrot.slane %v2991_v40, 4 }
 0x4c3   :  { %v2962_v36 = vrot.slane %v2911_v10, 4  ;;  %2070 = vrot.lane.b32.xlu1 %v1943_v31, %s4784_s17  ;;  %3014 = vrot.lane.b32.xlu2 %v2887_v49, %s4784_s17  ;;  %v2961_v33 = vsel %vm421_vm3, %v2960_v9, %v2911_v10  ;;  %v2420_v31 = vrot.slane %v6981_v6, 4  ;;  %v2838_v9 = vrot.slane %v6895_v57, 4 }
 0x4c4   :  { %v2998_v22 = vrot.slane %v2955_v14, 4  ;;  %v2967_v23 = vperm.slane %v2961_v33, %v8286_v26  ;;  %v7034_v2 = vsel %vm421_vm3, %v2996_v13, %v2955_v14  ;;  %v8441_v10 = vrot.slane %v8342_v41, 4  ;;  %v8442_v33 = vld [vmem:[#allocation41_spill] sm:$0xff] }
 0x4c5   :  { %8439 = vst [vmem:[#allocation59_spill] sm:$0xff] %v7034_v2  ;;  %v7036_v56 = vpop.permute.xlu2 %1608  ;;  %v3227_v46 = vpop.permute.xlu1 %3226  ;;  %v2963_v49 = vsel %vm421_vm3, %v2923_v32, %v2962_v36  ;;  %v1894_v14 = vrot.slane %v8443_v48, 4  ;;  %v8444_v2 = vrot.slane %v6803_v3, 4  ;;  %v8445_v32 = vrot.slane %v6836_v42, 4 }
 0x4c6   :  { %8440 = vst [vmem:[#allocation67_spill] sm:$0xff] %v7036_v56  ;;  %v1883_v24 = vsel %vm421_vm3, %v8442_v33, %v8441_v10  ;;  %v2999_v13 = vsel %vm421_vm3, %v2979_v30, %v2998_v22  ;;  %v7058_v41 = vsel %vm421_vm3, %v3004_v43, %v2967_v23  ;;  %v3006_v36 = vrot.slane %v2967_v23, 4  ;;  %v8446_v10 = vld [vmem:[#allocation37_spill] sm:$0xff]  ;;  %v8447_v33 = vld [vmem:[#allocation66_spill] sm:$0xff] }
 0x4c7   :  { %v2863_v56 = vsel %vm421_vm3, %v6878_v12, %v8444_v2  ;;  %3016 = vrot.lane.b32.xlu0 %v2999_v13, %s4784_s17  ;;  %v2377_v57 = vsel %vm421_vm3, %v8445_v32, %v7025_v54  ;;  %v3396_v48 = vrot.slane %v8446_v10, 4  ;;  %v1919_v30 = vsel %vm421_vm3, %v8447_v33, %v1918_v58 }
 0x4c8   :  { %v2971_v3 = vperm.slane %v2963_v49, %v8286_v26  ;;  %v3008_v22 = vrot.slane %v2995_v47, 4  ;;  %v3399_v12 = vsel %vm421_vm3, %v8446_v10, %v3398_v18  ;;  %v2974_v2 = vrot.slane %v6928_v37, 4  ;;  %v8450_v10 = vld [vmem:[#allocation80_spill] sm:$0xff] }
 0x4c9   :  { %v7067_v13 = vpop.permute.xlu0 %1166  ;;  %v2065_v43 = vsel %vm421_vm3, %v2064_v39, %v6916_v5  ;;  %v7072_v23 = vsel %vm421_vm3, %v2991_v40, %v3006_v36  ;;  %v7075_v32 = vperm.slane %v2863_v56, %v8286_v26  ;;  %v7078_v58 = vperm.slane %v2377_v57, %v8286_v26  ;;  %v8452_v40 = vld [vmem:[#allocation51_spill] sm:$0xff] }
 0x4ca   :  { %8448 = vst [vmem:[#allocation50_spill] sm:$0xff] %v7067_v13  ;;  %v7081_v49 = vsel %vm421_vm3, %v3008_v22, %v2971_v3  ;;  %v3010_v18 = vrot.slane %v2971_v3, 4  ;;  %v1870_v37 = vrot.slane %v8450_v10, 4  ;;  %v2950_v33 = vrot.slane %v7000_v28, 4  ;;  %v8451_v13 = vld [vmem:[#allocation43_spill] sm:$0xff]  ;;  %v8454_v28 = vld [vmem:[#allocation21_spill] sm:$0xff] }
 0x4cb   :  { %8449 = vst [vmem:[#allocation20_spill] sm:$0xff] %v7081_v49  ;;  %1168 = vrot.lane.b32.xlu1 %v8451_v13, %s4786_s19  ;;  %2112 = vrot.lane.b32.xlu2 %v2065_v43, %s4786_s19  ;;  %v1895_v56 = vsel %vm421_vm3, %v8452_v40, %v1894_v14  ;;  %v7091_v39 = vperm.slane %v1919_v30, %v8286_v26  ;;  %v3296_v36 = vrot.slane %v3227_v46, 4  ;;  %v3384_v10 = vrot.slane %v8454_v28, 4 }
 0x4cc   :  { %v7095_v3 = vperm.slane %v2403_v34, %v8286_v26  ;;  %v7098_v22 = vsel %vm421_vm3, %v2995_v47, %v3010_v18  ;;  %v7102_v13 = vperm.slane %v1883_v24, %v8281_v44  ;;  %v2839_v14 = vsel %vm421_vm3, %v6861_v16, %v2838_v9  ;;  %v8456_v9 = vld [vmem:[#allocation22_spill] sm:$0xff] }
 0x4cd   :  { %8453 = vst [vmem:[#allocation6_spill] sm:$0xff] %v7098_v22  ;;  %v7106_v43 = vpop.permute.xlu2 %1614  ;;  %v7108_v30 = vpop.permute.xlu1 %3242  ;;  %v2975_v40 = vsel %vm421_vm3, %v6822_v15, %v2974_v2  ;;  %v7113_v34 = vperm.slane %v3399_v12, %v8281_v44  ;;  %v2421_v47 = vsel %vm421_vm3, %v2420_v31, %v7078_v58  ;;  %v7118_v18 = vperm.slane %v1895_v56, %v8286_v26  ;;  %v8457_v2 = vld [vmem:[#allocation68_spill] sm:$0xff] }
 0x4ce   :  { %8455 = vst [vmem:[#allocation23_spill] sm:$0xff] %v7106_v43  ;;  %v2888_v24 = vrot.slane %v7075_v32, 4  ;;  %v3397_v16 = vsel %vm421_vm3, %v3396_v48, %v8426_v21  ;;  %v1871_v28 = vsel %vm421_vm3, %v8456_v9, %v1870_v37  ;;  %v1944_v15 = vrot.slane %v7091_v39, 4  ;;  %v8458_v48 = vld [vmem:[#allocation62_spill] sm:$0xff]  ;;  %v8461_v43 = vld [vmem:[#allocation88_spill] sm:$0xff] }
 0x4cf   :  { %2566 = vrot.lane.b32.xlu0 %v2421_v47, %s4787_s20  ;;  %v2951_v12 = vsel %vm421_vm3, %v6966_v17, %v2950_v33  ;;  %v3298_v31 = vrot.slane %v8457_v2, 4  ;;  %v3297_v56 = vsel %vm421_vm3, %v3296_v36, %v8457_v2  ;;  %v7133_v57 = vperm.slane %v2839_v14, %v8286_v26  ;;  %v8459_v47 = vld [vmem:[#allocation16_spill] sm:$0xff]  ;;  %v8465_v33 = vld [vmem:[#allocation85_spill] sm:$0xff] }
 0x4d0   :  { %v7136_v21 = vperm.slane %v2975_v40, %v8286_v26  ;;  %v3385_v37 = vsel %vm421_vm3, %v3384_v10, %v8458_v48  ;;  %v1846_v9 = vrot.slane %v8459_v47, 4  ;;  %v2052_v17 = vrot.slane %v8461_v43, 4 }
 0x4d1   :  { %v7141_v22 = vpop.permute.xlu0 %1624  ;;  %v3299_v52 = vsel %vm421_vm3, %v3227_v46, %v3298_v31  ;;  %v1945_v36 = vsel %vm421_vm3, %v1944_v15, %v7118_v18  ;;  %v2889_v14 = vsel %vm421_vm3, %v2888_v24, %v7133_v57  ;;  %v7151_v40 = vperm.slane %v2951_v12, %v8286_v26 }
 0x4d2   :  { %8460 = vst [vmem:[#allocation60_spill] sm:$0xff] %v7141_v22  ;;  %v1928_v10 = vrot.slane %v7102_v13, 4  ;;  %v7155_v2 = vperm.slane %v3397_v16, %v8281_v44  ;;  %v7158_v43 = vperm.slane %v1871_v28, %v8281_v44  ;;  %v3303_v48 = vperm.slane %v3297_v56, %v8281_v44  ;;  %v8462_v16 = vld [vmem:[#allocation70_spill] sm:$0xff]  ;;  %v8463_v28 = vld [vmem:[#allocation15_spill] sm:$0xff] }
 0x4d3   :  { %2078 = vrot.lane.b32.xlu1 %v1945_v36, %s4782_s30  ;;  %3022 = vrot.lane.b32.xlu2 %v2889_v14, %s4782_s30  ;;  %v7165_v24 = vperm.slane %v3385_v37, %v8281_v44  ;;  %v3284_v15 = vrot.slane %v6923_v53, 4  ;;  %v3000_v12 = vrot.slane %v7136_v21, 4  ;;  %v1847_v31 = vsel %vm421_vm3, %v8462_v16, %v1846_v9 }
 0x4d4   :  { %v8464_v47 = vrot.slane %v8383_v19, 4  ;;  %v3307_v36 = vperm.slane %v3299_v52, %v8281_v44  ;;  %v2053_v46 = vsel %vm421_vm3, %v2052_v17, %v8465_v33  ;;  %v2378_v19 = vrot.slane %v7025_v54, 4 }
 0x4d5   :  { %v2073_v14 = vpop.permute.xlu2 %2072  ;;  %v3221_v37 = vpop.permute.xlu1 %3220  ;;  %v3001_v9 = vsel %vm421_vm3, %v3000_v12, %v7151_v40  ;;  %v3332_v16 = vrot.slane %v3303_v48, 4  ;;  %v1929_v52 = vsel %vm421_vm3, %v1928_v10, %v7158_v43  ;;  %v7190_v17 = vperm.slane %v1847_v31, %v8281_v44 }
 0x4d6   :  { %v3373_v56 = vsel %vm421_vm3, %v8464_v47, %v8463_v28  ;;  %v7179_v22 = vsel %vm701_vm4, %v2053_v46, %v2073_v14  ;;  %v3285_v49 = vsel %vm421_vm3, %v3284_v15, %v3221_v37  ;;  %v3286_v55 = vrot.slane %v3221_v37, 4 }
 0x4d7   :  { %v3291_v28 = vperm.slane %v3285_v49, %v8281_v44  ;;  %3024 = vrot.lane.b32.xlu0 %v3001_v9, %s4782_s30  ;;  %v7193_v33 = vperm.slane %v3373_v56, %v8281_v44  ;;  %v1946_v15 = vrot.slane %v7118_v18, 4  ;;  %v3344_v54 = vrot.slane %v3307_v36, 4  ;;  %v8467_v9 = vld [vmem:[#allocation61_spill] sm:$0xff] }
 0x4d8   :  { %v3287_v46 = vsel %vm421_vm3, %v6923_v53, %v3286_v55  ;;  %v3420_v31 = vrot.slane %v7165_v24, 4  ;;  %v8466_v56 = vrot.slane %v6916_v5, 4  ;;  %v2422_v53 = vrot.slane %v7078_v58, 4 }
 0x4d9   :  { %v3295_v12 = vperm.slane %v3287_v46, %v8281_v44  ;;  %v3333_v49 = vsel %vm421_vm3, %v3332_v16, %v3291_v28  ;;  %v3334_v47 = vrot.slane %v3291_v28, 4  ;;  %v7200_v14 = vpop.permute.xlu0 %1174  ;;  %v2379_v16 = vsel %vm421_vm3, %v6836_v42, %v2378_v19 }
 0x4da   :  { %v2067_v37 = vsel %vm421_vm3, %v7009_v20, %v8466_v56  ;;  %v3272_v5 = vrot.slane %v6807_v11, 4  ;;  %v3408_v46 = vrot.slane %v7108_v30, 4  ;;  %v8468_v20 = vrot.slane %v6996_v62, 4 }
 0x4db   :  { %v3335_v55 = vsel %vm421_vm3, %v3303_v48, %v3334_v47  ;;  %v3346_v18 = vrot.slane %v3295_v12, 4  ;;  %1176 = vrot.lane.b32.xlu1 %v8467_v9, %s4781_s4  ;;  %2120 = vrot.lane.b32.xlu2 %v2067_v37, %s4781_s4  ;;  %v3345_v28 = vsel %vm421_vm3, %v3344_v54, %v3295_v12  ;;  %v7223_v48 = vperm.slane %v1929_v52, %v8286_v26  ;;  %v8469_v47 = vld [vmem:[#allocation64_spill] sm:$0xff] }
 0x4dc   :  { %v1905_v58 = vsel %vm421_vm3, %v8468_v20, %v7190_v17  ;;  %v3274_v56 = vrot.slane %v8469_v47, 4  ;;  %v3421_v37 = vsel %vm421_vm3, %v3420_v31, %v7193_v33  ;;  %v1947_v54 = vsel %vm421_vm3, %v7091_v39, %v1946_v15  ;;  %v8471_v39 = vld [vmem:[#allocation84_spill] sm:$0xff] }
 0x4dd   :  { %v7228_v42 = vpop.permute.xlu2 %1622  ;;  %v3239_v19 = vpop.permute.xlu1 %3238  ;;  %v3347_v12 = vsel %vm421_vm3, %v3307_v36, %v3346_v18  ;;  %v2423_v52 = vsel %vm421_vm3, %v6981_v6, %v2422_v53  ;;  %v7237_v20 = vperm.slane %v2379_v16, %v8286_v26  ;;  %v8472_v36 = vrot.slane %v8433_v63, 4 }
 0x4de   :  { %8470 = vst [vmem:[#allocation42_spill] sm:$0xff] %v7228_v42  ;;  %v3409_v9 = vsel %vm421_vm3, %v3408_v46, %v3239_v19  ;;  %v3410_v10 = vrot.slane %v3239_v19, 4  ;;  %v3275_v31 = vsel %vm421_vm3, %v6807_v11, %v3274_v56  ;;  %v7250_v18 = vperm.slane %v1905_v58, %v8286_v26  ;;  %v8473_v58 = vld [vmem:[#allocation24_spill] sm:$0xff] }
 0x4df   :  { %v7242_v42 = vperm.slane %v3409_v9, %v8281_v44  ;;  %2574 = vrot.lane.b32.xlu0 %v2423_v52, %s4785_s18  ;;  %v2413_v15 = vsel %vm421_vm3, %v8472_v36, %v8471_v39  ;;  %v7253_v6 = vperm.slane %v3421_v37, %v8286_v26  ;;  %v3273_v53 = vsel %vm421_vm3, %v3272_v5, %v8469_v47 }
 0x4e0   :  { %v3411_v11 = vsel %vm421_vm3, %v7108_v30, %v3410_v10  ;;  %v2890_v16 = vrot.slane %v7133_v57, 4  ;;  %v3002_v56 = vrot.slane %v7151_v40, 4  ;;  %v3439_v19 = vperm.slane %v8473_v58, %v8286_v26 }
 0x4e1   :  { %v3419_v46 = vperm.slane %v3411_v11, %v8281_v44  ;;  %v3444_v63 = vrot.slane %v7242_v42, 4  ;;  %v3283_v37 = vperm.slane %v3275_v31, %v8281_v44  ;;  %v2526_v5 = vrot.slane %v6723_v29, 4  ;;  %v7274_v52 = vpop.permute.xlu0 %1632 }
 0x4e2   :  { %v2891_v9 = vsel %vm421_vm3, %v7075_v32, %v2890_v16  ;;  %v8474_v30 = vrot.slane %v7095_v3, 4  ;;  %v3279_v10 = vperm.slane %v3273_v53, %v8281_v44  ;;  %v8475_v32 = vrot.slane %v7113_v34, 4 }
 0x4e3   :  { %v3456_v47 = vrot.slane %v3419_v46, 4  ;;  %2086 = vrot.lane.b32.xlu1 %v1947_v54, %s4783_s0  ;;  %3030 = vrot.lane.b32.xlu2 %v2891_v9, %s4783_s0  ;;  %v3445_v40 = vsel %vm421_vm3, %v3444_v63, %v7155_v2  ;;  %v2502_v31 = vrot.slane %v6621_v1, 4  ;;  %v2527_v39 = vsel %vm421_vm3, %v6679_v59, %v2526_v5 }
 0x4e4   :  { %v2425_v57 = vsel %vm421_vm3, %v8474_v30, %v7237_v20  ;;  %v7283_v29 = vsel %vm421_vm3, %v3419_v46, %v8475_v32  ;;  %v3470_v36 = vrot.slane %v7253_v6, 4  ;;  %v3339_v53 = vperm.slane %v3333_v49, %v8286_v26 }
 0x4e5   :  { %v2081_v54 = vpop.permute.xlu2 %2080  ;;  %v3213_v11 = vpop.permute.xlu1 %3212  ;;  %v3003_v16 = vsel %vm421_vm3, %v7136_v21, %v3002_v56  ;;  %v3457_v63 = vsel %vm421_vm3, %v3456_v47, %v7113_v34  ;;  %v3478_v58 = vrot.slane %v3439_v19, 4  ;;  %v3343_v46 = vperm.slane %v3335_v55, %v8286_v26 }
 0x4e6   :  { %v7297_v1 = vsel %vm704_vm5, %v7179_v22, %v2081_v54  ;;  %v8476_v59 = vrot.slane %v8412_v8, 4  ;;  %v3262_v49 = vrot.slane %v3213_v11, 4  ;;  %v7303_v5 = vperm.slane %v3445_v40, %v8286_v26 }
 0x4e7   :  { %v3308_v30 = vrot.slane %v3279_v10, 4  ;;  %v3320_v21 = vrot.slane %v3283_v37, 4  ;;  %3032 = vrot.lane.b32.xlu0 %v3003_v16, %s4783_s0  ;;  %v3463_v34 = vperm.slane %v3457_v63, %v8286_v26  ;;  %v3355_v55 = vperm.slane %v3347_v12, %v8286_v26 }
 0x4e8   :  { %v3261_v9 = vsel %vm421_vm3, %v8476_v59, %v3213_v11  ;;  %v3263_v22 = vsel %vm421_vm3, %v8412_v8, %v3262_v49  ;;  %v3351_v47 = vperm.slane %v3345_v28, %v8286_v26  ;;  %v3356_v32 = vrot.slane %v3339_v53, 4 }
 0x4e9   :  { %v3267_v56 = vperm.slane %v3261_v9, %v8281_v44  ;;  %v3271_v54 = vperm.slane %v3263_v22, %v8281_v44  ;;  %v3476_v59 = vrot.slane %v3463_v34, 4  ;;  %v3471_v16 = vsel %vm421_vm3, %v7303_v5, %v3470_v36 }
 0x4ea   :  { %v7318_v63 = vsel %vm421_vm3, %v3463_v34, %v3478_v58  ;;  %v3360_v8 = vrot.slane %v3343_v46, 4 }
 0x4eb   :  { %v3309_v40 = vsel %vm421_vm3, %v3308_v30, %v3267_v56  ;;  %v3310_v11 = vrot.slane %v3267_v56, 4  ;;  %v3322_v49 = vrot.slane %v3271_v54, 4  ;;  %v2543_v12 = vpop.permute.xlu0 %2542  ;;  %2544 = vrot.lane.b32.xlu1 %v2527_v39, %s4784_s17  ;;  %3488 = vrot.lane.b32.xlu2 %v3471_v16, %s4784_s17  ;;  %v7323_v28 = vsel %vm421_vm3, %v3476_v59, %v3439_v19  ;;  %v8477_v16 = vld [vmem:[#allocation14_spill] sm:$0xff] }
 0x4ec   :  { %v3315_v9 = vperm.slane %v3309_v40, %v8286_v26  ;;  %v3321_v56 = vsel %vm421_vm3, %v3320_v21, %v3271_v54  ;;  %v7328_v22 = vsel %vm701_vm4, %v2413_v15, %v2543_v12  ;;  %v2503_v19 = vsel %vm421_vm3, %v8477_v16, %v2502_v31 }
 0x4ed   :  { %v3311_v30 = vsel %vm421_vm3, %v3279_v10, %v3310_v11  ;;  %v3327_v34 = vperm.slane %v3321_v56, %v8286_v26  ;;  %v7332_v40 = vpop.permute.xlu2 %1630  ;;  %v7334_v39 = vpop.permute.xlu1 %3688  ;;  %v3323_v59 = vsel %vm421_vm3, %v3283_v37, %v3322_v49  ;;  %v3364_v10 = vrot.slane %v3351_v47, 4  ;;  %v8481_v49 = vld [vmem:[#allocation65_spill] sm:$0xff] }
 0x4ee   :  { %v3358_v36 = vrot.slane %v3315_v9, 4  ;;  %v3319_v58 = vperm.slane %v3311_v30, %v8286_v26  ;;  %v7340_v21 = vsel %vm421_vm3, %v3356_v32, %v3315_v9  ;;  %v3331_v15 = vperm.slane %v3323_v59, %v8286_v26 }
 0x4ef   :  { %8478 = vst [vmem:[#allocation78_spill] sm:$0xff] %v7340_v21  ;;  %v3368_v54 = vrot.slane %v3355_v55, 4  ;;  %v8479_v30 = vrot.slane %v7155_v2, 4  ;;  %2582 = vrot.lane.b32.xlu0 %v2425_v57, %s4786_s19  ;;  %v7355_v32 = vsel %vm421_vm3, %v3364_v10, %v3327_v34  ;;  %v3366_v9 = vrot.slane %v3327_v34, 4 }
 0x4f0   :  { %v7344_v11 = vsel %vm421_vm3, %v3339_v53, %v3358_v36  ;;  %v7347_v12 = vsel %vm421_vm3, %v3360_v8, %v3319_v58  ;;  %v3362_v37 = vrot.slane %v3319_v58, 4  ;;  %8480 = vst [vmem:[#allocation87_spill] sm:$0xff] %v7355_v32  ;;  %v8482_v56 = vrot.slane %v8424_v61, 4  ;;  %v8495_v32 = vld [vmem:[#allocation47_spill] sm:$0xff] }
 0x4f1   :  { %v3447_v31 = vsel %vm421_vm3, %v7242_v42, %v8479_v30  ;;  %v1948_v8 = vrot.slane %v7223_v48, 4  ;;  %v7363_v36 = vsel %vm421_vm3, %v3368_v54, %v3331_v15  ;;  %v3370_v2 = vrot.slane %v3331_v15, 4 }
 0x4f2   :  { %v3857_v53 = vsel %vm421_vm3, %v8482_v56, %v8481_v49  ;;  %v2478_v42 = vrot.slane %v6667_v60, 4  ;;  %v3422_v57 = vrot.slane %v7193_v33, 4  ;;  %v7368_v58 = vsel %vm421_vm3, %v3343_v46, %v3362_v37  ;;  %v8485_v60 = vld [vmem:[#allocation57_spill] sm:$0xff]  ;;  %v8486_v46 = vld [vmem:[#allocation26_spill] sm:$0xff] }
 0x4f3   :  { %8483 = vst [vmem:[#allocation74_spill] sm:$0xff] %v7368_v58  ;;  %v7371_v34 = vsel %vm421_vm3, %v3351_v47, %v3366_v9  ;;  %v7374_v16 = vperm.slane %v3447_v31, %v8286_v26  ;;  %v1949_v59 = vsel %vm421_vm3, %v1948_v8, %v7250_v18  ;;  %v7379_v10 = vperm.slane %v2503_v19, %v8286_v26  ;;  %v7385_v54 = vpop.permute.xlu0 %1640  ;;  %v8487_v47 = vld [vmem:[#allocation18_spill] sm:$0xff] }
 0x4f4   :  { %8484 = vst [vmem:[#allocation53_spill] sm:$0xff] %v7371_v34  ;;  %v7382_v15 = vsel %vm421_vm3, %v3355_v55, %v3370_v2  ;;  %v2442_v33 = vrot.slane %v8485_v60, 4  ;;  %2094 = vrot.lane.b32.xlu1 %v1949_v59, %s4787_s20  ;;  %3038 = vrot.lane.b32.xlu2 %v6962_v25, %s4787_s20  ;;  %v702_v30 = vsel %vm701_vm4, %v8487_v47, %v8486_v46  ;;  %v8490_v60 = vld [vmem:[#allocation10_spill] sm:$0xff] }
 0x4f5   :  { %v3863_v19 = vperm.slane %v3857_v53, %v8281_v44  ;;  %v2089_v31 = vpop.permute.xlu2 %2088  ;;  %v7394_v37 = vpop.permute.xlu1 %3704  ;;  %v2479_v55 = vsel %vm421_vm3, %v6635_v45, %v2478_v42  ;;  %v3423_v9 = vsel %vm421_vm3, %v7165_v24, %v3422_v57  ;;  %v2528_v8 = vrot.slane %v7379_v10, 4  ;;  %v8488_v53 = vld [vmem:[#allocation73_spill] sm:$0xff]  ;;  %v8489_v45 = vld [vmem:[#allocation52_spill] sm:$0xff]  ;;  %v8491_v47 = vld [vmem:[#allocation58_spill] sm:$0xff] }
 0x4f6   :  { %v7402_v56 = vsel %vm707_vm6, %v7297_v1, %v2089_v31  ;;  %v3844_v25 = vrot.slane %v7394_v37, 4  ;;  %v3472_v2 = vrot.slane %v7374_v16, 4  ;;  %v2443_v59 = vsel %vm421_vm3, %v8488_v53, %v2442_v33  ;;  %v8492_v53 = vld [vmem:[#allocation12_spill] sm:$0xff] }
 0x4f7   :  { %3040 = vrot.lane.b32.xlu0 %v7058_v41, %s4787_s20  ;;  %v3758_v42 = vrot.slane %v8489_v45, 4  ;;  %v7415_v1 = vperm.slane %v2479_v55, %v8286_v26  ;;  %v7418_v57 = vperm.slane %v3423_v9, %v8286_v26  ;;  %v7422_v46 = vsel %vm704_vm5, %v702_v30, %v8490_v60 }
 0x4f8   :  { %v3845_v24 = vsel %vm421_vm3, %v3844_v25, %v6805_v50  ;;  %v2466_v33 = vrot.slane %v8491_v47, 4  ;;  %v3892_v31 = vrot.slane %v3863_v19, 4  ;;  %v2426_v9 = vrot.slane %v7237_v20, 4 }
 0x4f9   :  { %v3851_v41 = vperm.slane %v3845_v24, %v8281_v44  ;;  %v3759_v21 = vsel %vm421_vm3, %v8492_v53, %v3758_v42  ;;  %v2529_v25 = vsel %vm421_vm3, %v2528_v8, %v7415_v1  ;;  %v3473_v55 = vsel %vm421_vm3, %v3472_v2, %v7418_v57  ;;  %v8494_v8 = vld [vmem:[#allocation49_spill] sm:$0xff] }
 0x4fa   :  { %v7434_v34 = vperm.slane %v2443_v59, %v8281_v44  ;;  %v3756_v30 = vrot.slane %v8492_v53, 4  ;;  %v3744_v24 = vrot.slane %v8494_v8, 4  ;;  %v3768_v2 = vrot.slane %v8495_v32, 4 }
 0x4fb   :  { %v3894_v60 = vrot.slane %v3851_v41, 4  ;;  %v2551_v47 = vpop.permute.xlu0 %2550  ;;  %v7440_v42 = vsel %vm421_vm3, %v3892_v31, %v3851_v41  ;;  %v3927_v59 = vperm.slane %v6793_v51, %v8286_v26  ;;  %v3767_v31 = vperm.slane %v3759_v21, %v8281_v44 }
 0x4fc   :  { %2552 = vrot.lane.b32.xlu1 %v2529_v25, %s4782_s30  ;;  %3496 = vrot.lane.b32.xlu2 %v3473_v55, %s4782_s30  ;;  %8493 = vst [vmem:[#allocation89_spill] sm:$0xff] %v7440_v42  ;;  %v7446_v20 = vsel %vm704_vm5, %v7328_v22, %v2551_v47  ;;  %v8496_v25 = vld [vmem:[#allocation13_spill] sm:$0xff]  ;;  %v2427_v47 = vsel %vm421_vm3, %v7095_v3, %v2426_v9  ;;  %v1950_v51 = vrot.slane %v7250_v18, 4  ;;  %v1108_v21 = vrot.slane %v6689_v7, 4 }
 0x4fd   :  { %v2467_v55 = vsel %vm421_vm3, %v8496_v25, %v2466_v33  ;;  %v7454_v41 = vpop.permute.xlu2 %1638  ;;  %v3695_v8 = vpop.permute.xlu1 %3694  ;;  %v3895_v58 = vsel %vm421_vm3, %v3863_v19, %v3894_v60  ;;  %v3757_v53 = vsel %vm421_vm3, %v3756_v30, %v8489_v45  ;;  %v3944_v9 = vrot.slane %v3927_v59, 4 }
 0x4fe   :  { %v3769_v42 = vsel %vm421_vm3, %v3768_v2, %v3695_v8  ;;  %v3770_v22 = vrot.slane %v3695_v8, 4  ;;  %v3903_v19 = vperm.slane %v3895_v58, %v8286_v26  ;;  %v7470_v60 = vperm.slane %v2467_v55, %v8281_v44  ;;  %v8497_v2 = vld [vmem:[#allocation81_spill] sm:$0xff] }
 0x4ff   :  { %v7464_v33 = vperm.slane %v3769_v42, %v8281_v44  ;;  %2590 = vrot.lane.b32.xlu0 %v2427_v47, %s4781_s4  ;;  %v3745_v3 = vsel %vm421_vm3, %v3744_v24, %v8497_v2  ;;  %v1930_v45 = vrot.slane %v7158_v43, 4  ;;  %v3818_v30 = vrot.slane %v3767_v31, 4  ;;  %v8499_v8 = vld [vmem:[#allocation69_spill] sm:$0xff] }
 0x500   :  { %v3771_v18 = vsel %vm421_vm3, %v8495_v32, %v3770_v22  ;;  %v7480_v7 = vperm.slane %v3757_v53, %v8281_v44  ;;  %v1951_v58 = vsel %vm421_vm3, %v7223_v48, %v1950_v51  ;;  %v7485_v55 = vsel %vm421_vm3, %v3944_v9, %v3903_v19  ;;  %v8500_v48 = vld [vmem:[#allocation45_spill] sm:$0xff] }
 0x501   :  { %v3779_v42 = vperm.slane %v3771_v18, %v8281_v44  ;;  %v3804_v25 = vrot.slane %v7464_v33, 4  ;;  %8498 = vst [vmem:[#allocation82_spill] sm:$0xff] %v7485_v55  ;;  %v3946_v24 = vrot.slane %v3903_v19, 4  ;;  %v7488_v32 = vperm.slane %v3745_v3, %v8281_v44 }
 0x502   :  { %v2454_v43 = vrot.slane %v8499_v8, 4  ;;  %v3755_v51 = vperm.slane %v8500_v48, %v8281_v44  ;;  %v3732_v19 = vrot.slane %v7334_v39, 4  ;;  %v2512_v18 = vrot.slane %v7470_v60, 4 }
 0x503   :  { %v3816_v22 = vrot.slane %v3779_v42, 4  ;;  %v7491_v47 = vpop.permute.xlu0 %1648  ;;  %v3819_v53 = vsel %vm421_vm3, %v3779_v42, %v3818_v30  ;;  %v3805_v2 = vsel %vm421_vm3, %v3804_v25, %v7480_v7  ;;  %v7503_v3 = vsel %vm421_vm3, %v3927_v59, %v3946_v24 }
 0x504   :  { %2102 = vrot.lane.b32.xlu1 %v1951_v58, %s4785_s18  ;;  %3046 = vrot.lane.b32.xlu2 %v6941_v35, %s4785_s18  ;;  %8501 = vst [vmem:[#allocation41_spill] sm:$0xff] %v7503_v3  ;;  %v1906_v9 = vrot.slane %v7190_v17, 4  ;;  %v1109_v35 = vsel %vm421_vm3, %v1108_v21, %v6629_v0  ;;  %v1931_v59 = vsel %vm421_vm3, %v7102_v13, %v1930_v45  ;;  %v3780_v24 = vrot.slane %v7488_v32, 4  ;;  %v8502_v17 = vld [vmem:[#allocation75_spill] sm:$0xff] }
 0x505   :  { %v2097_v58 = vpop.permute.xlu2 %2096  ;;  %v3685_v8 = vpop.permute.xlu1 %3684  ;;  %v3817_v30 = vsel %vm421_vm3, %v3816_v22, %v3767_v31  ;;  %v2455_v3 = vsel %vm421_vm3, %v8502_v17, %v2454_v43  ;;  %v3811_v0 = vperm.slane %v3805_v2, %v8286_v26  ;;  %v2530_v21 = vrot.slane %v7415_v1, 4 }
 0x506   :  { %v7512_v42 = vsel %vm710_vm7, %v7402_v56, %v2097_v58  ;;  %v3733_v25 = vsel %vm421_vm3, %v3732_v19, %v3685_v8  ;;  %v3734_v48 = vrot.slane %v3685_v8, 4  ;;  %v3792_v56 = vrot.slane %v3755_v51, 4 }
 0x507   :  { %v7521_v55 = vperm.slane %v3733_v25, %v8281_v44  ;;  %3048 = vrot.lane.b32.xlu0 %v7072_v23, %s4785_s18  ;;  %v3474_v13 = vrot.slane %v7418_v57, 4  ;;  %v1907_v22 = vsel %vm421_vm3, %v6996_v62, %v1906_v9  ;;  %v3823_v23 = vperm.slane %v3817_v30, %v8286_v26 }
 0x508   :  { %v3735_v31 = vsel %vm421_vm3, %v7334_v39, %v3734_v48  ;;  %v7537_v19 = vperm.slane %v2455_v3, %v8281_v44  ;;  %v2531_v39 = vsel %vm421_vm3, %v7379_v10, %v2530_v21  ;;  %v3827_v9 = vperm.slane %v3819_v53, %v8286_v26  ;;  %v8504_v48 = vld [vmem:[#allocation86_spill] sm:$0xff] }
 0x509   :  { %v3743_v45 = vperm.slane %v3735_v31, %v8281_v44  ;;  %v3781_v43 = vsel %vm421_vm3, %v3780_v24, %v7521_v55  ;;  %v3475_v1 = vsel %vm421_vm3, %v7374_v16, %v3474_v13  ;;  %v3828_v3 = vrot.slane %v3811_v0, 4 }
 0x50a   :  { %v3787_v2 = vperm.slane %v3781_v43, %v8286_v26  ;;  %v7553_v10 = vperm.slane %v1931_v59, %v8286_v26  ;;  %v8503_v25 = vrot.slane %v8393_v27, 4  ;;  %v7571_v13 = vperm.slane %v1907_v22, %v8286_v26 }
 0x50b   :  { %v3794_v57 = vrot.slane %v3743_v45, 4  ;;  %v2559_v58 = vpop.permute.xlu0 %2558  ;;  %v3793_v62 = vsel %vm421_vm3, %v3792_v56, %v3743_v45  ;;  %v2513_v27 = vsel %vm421_vm3, %v2512_v18, %v7537_v19 }
 0x50c   :  { %2560 = vrot.lane.b32.xlu1 %v2531_v39, %s4783_s0  ;;  %3504 = vrot.lane.b32.xlu2 %v3475_v1, %s4783_s0  ;;  %v7550_v8 = vsel %vm707_vm6, %v7446_v20, %v2559_v58  ;;  %v3830_v30 = vrot.slane %v3787_v2, 4  ;;  %v3799_v16 = vperm.slane %v3793_v62, %v8286_v26  ;;  %v2431_v24 = vsel %vm421_vm3, %v8504_v48, %v8503_v25  ;;  %v8505_v39 = vld [vmem:[#allocation7_spill] sm:$0xff] }
 0x50d   :  { %v7560_v17 = vpop.permute.xlu2 %1646  ;;  %v1129_v56 = vpop.permute.xlu1 %1128  ;;  %v3795_v53 = vsel %vm421_vm3, %v3755_v51, %v3794_v57  ;;  %v7564_v31 = vsel %vm421_vm3, %v3828_v3, %v3787_v2  ;;  %v3836_v20 = vrot.slane %v3823_v23, 4  ;;  %v3840_v2 = vrot.slane %v3827_v9, 4  ;;  %v8506_v58 = vld [vmem:[#allocation31_spill] sm:$0xff] }
 0x50e   :  { %v7567_v21 = vsel %vm701_vm4, %v1109_v35, %v1129_v56  ;;  %v3831_v59 = vsel %vm421_vm3, %v3811_v0, %v3830_v30  ;;  %v3838_v45 = vrot.slane %v3799_v16, 4  ;;  %v3803_v51 = vperm.slane %v3795_v53, %v8286_v26 }
 0x50f   :  { %3958 = vrot.lane.b32.xlu0 %v3831_v59, %s4784_s17  ;;  %v7578_v43 = vsel %vm421_vm3, %v3836_v20, %v3799_v16  ;;  %v708_v35 = vsel %vm707_vm6, %v7422_v46, %v8505_v39  ;;  %v1952_v0 = vrot.slane %v7553_v10, 4  ;;  %v7585_v22 = vperm.slane %v2431_v24, %v8281_v44  ;;  %v8508_v59 = vld [vmem:[#allocation56_spill] sm:$0xff] }
 0x510   :  { %v7588_v18 = vsel %vm421_vm3, %v3823_v23, %v3838_v45  ;;  %v3842_v1 = vrot.slane %v3803_v51, 4  ;;  %v7591_v57 = vsel %vm421_vm3, %v3840_v2, %v3803_v51  ;;  %v711_v62 = vsel %vm710_vm7, %v708_v35, %v8506_v58  ;;  %v8510_v2 = vld [vmem:[#allocation54_spill] sm:$0xff] }
 0x511   :  { %v1953_v3 = vsel %vm421_vm3, %v1952_v0, %v7571_v13  ;;  %v7598_v46 = vperm.slane %v2513_v27, %v8286_v26  ;;  %v2488_v30 = vrot.slane %v7434_v34, 4  ;;  %v3806_v16 = vrot.slane %v7480_v7, 4  ;;  %v8507_v7 = vld [vmem:[#allocation27_spill] sm:$0xff]  ;;  %v8512_v0 = vld [vmem:[#allocation50_spill] sm:$0xff] }
 0x512   :  { %v3782_v23 = vrot.slane %v7521_v55, 4  ;;  %v7607_v25 = vsel %vm421_vm3, %v3827_v9, %v3842_v1  ;;  %v714_v55 = vsel %vm713_vm8, %v711_v62, %v8507_v7  ;;  %v8513_v58 = vld [vmem:[#allocation34_spill] sm:$0xff] }
 0x513   :  { %v3807_v48 = vsel %vm421_vm3, %v7464_v33, %v3806_v16  ;;  %v2489_v53 = vsel %vm421_vm3, %v2488_v30, %v7585_v22  ;;  %v2532_v9 = vrot.slane %v7598_v46, 4  ;;  %v8509_v33 = vld [vmem:[#allocation20_spill] sm:$0xff]  ;;  %v8514_v16 = vld [vmem:[#allocation11_spill] sm:$0xff] }
 0x514   :  { %2110 = vrot.lane.b32.xlu1 %v1953_v3, %s4786_s19  ;;  %3054 = vrot.lane.b32.xlu2 %v6951_v4, %s4786_s19  ;;  %v3783_v45 = vsel %vm421_vm3, %v7488_v32, %v3782_v23  ;;  %v7627_v51 = vperm.slane %v3807_v48, %v8286_v26  ;;  %v2495_v39 = vperm.slane %v2489_v53, %v8286_v26  ;;  %v1580_v23 = vrot.slane %v8514_v16, 4  ;;  %v8515_v53 = vld [vmem:[#allocation36_spill] sm:$0xff] }
 0x515   :  { %v2105_v24 = vpop.permute.xlu2 %2104  ;;  %v1143_v56 = vpop.permute.xlu1 %1142  ;;  %v3791_v3 = vperm.slane %v3783_v45, %v8286_v26  ;;  %v8518_v45 = vld [vmem:[#allocation77_spill] sm:$0xff] }
 0x516   :  { %v2133_v20 = vsel %vm713_vm8, %v7512_v42, %v2105_v24  ;;  %v1184_v4 = vsel %vm707_vm6, %v6869_v38, %v1143_v56  ;;  %v8511_v38 = vld [vmem:[#allocation33_spill] sm:$0xff]  ;;  %v2533_v32 = vsel %vm421_vm3, %v2532_v9, %v2495_v39  ;;  %v3832_v24 = vrot.slane %v7627_v51, 4 }
 0x517   :  { %v1186_v27 = vsel %vm710_vm7, %v1184_v4, %v8508_v59  ;;  %3056 = vrot.lane.b32.xlu0 %v8509_v33, %s4786_s19  ;;  %v717_v35 = vsel %vm716_vm9, %v714_v55, %v8511_v38  ;;  %v1581_v7 = vsel %vm421_vm3, %v1580_v23, %v8515_v53  ;;  %v8516_v4 = vld [vmem:[#allocation9_spill] sm:$0xff]  ;;  %v8522_v23 = vld [vmem:[#allocation83_spill] sm:$0xff] }
 0x518   :  { %v1188_v42 = vsel %vm713_vm8, %v1186_v27, %v8510_v2  ;;  %v720_v62 = vsel %vm719_vm10, %v717_v35, %v8513_v58  ;;  %v3833_v59 = vsel %vm421_vm3, %v3832_v24, %v3791_v3  ;;  %v1954_v27 = vrot.slane %v7571_v13, 4  ;;  %v8520_v13 = vld [vmem:[#allocation38_spill] sm:$0xff] }
 0x519   :  { %v1190_v1 = vsel %vm716_vm9, %v1188_v42, %v8512_v0  ;;  %v8519_v42 = vld [vmem:[#allocation60_spill] sm:$0xff]  ;;  %v3858_v58 = vrot.slane %v8481_v49, 4  ;;  %v8525_v49 = vld [vmem:[#allocation23_spill] sm:$0xff] }
 0x51a   :  { %v1192_v30 = vsel %vm719_vm10, %v1190_v1, %v7200_v14  ;;  %v1955_v35 = vsel %vm421_vm3, %v7553_v10, %v1954_v27  ;;  %v8528_v27 = vld [vmem:[#allocation42_spill] sm:$0xff] }
 0x51b   :  { %v1194_v48 = vadd.f32 %v1192_v30, %v720_v62 }
 0x51c   :  { %2568 = vrot.lane.b32.xlu1 %v2533_v32, %s4787_s20  ;;  %3512 = vrot.lane.b32.xlu2 %v7323_v28, %s4787_s20  ;;  %v8517_v28 = vld [vmem:[#allocation67_spill] sm:$0xff] }
 0x51d   :  { %v3015_v56 = vpop.permute.xlu2 %3014  ;;  %v1601_v55 = vpop.permute.xlu1 %1600  ;;  %v8521_v32 = vld [vmem:[#allocation35_spill] sm:$0xff] }
 0x51e   :  { %v3068_v9 = vsel %vm701_vm4, %v8516_v4, %v3015_v56  ;;  %v1653_v14 = vsel %vm701_vm4, %v1581_v7, %v1601_v55  ;;  %v3870_v30 = vrot.slane %v8521_v32, 4  ;;  %v8523_v56 = vld [vmem:[#allocation55_spill] sm:$0xff]  ;;  %v8524_v7 = vld [vmem:[#allocation17_spill] sm:$0xff]  ;;  %v2534_v4 = vrot.slane %v2495_v39, 4 }
 0x51f   :  { %v1655_v33 = vsel %vm704_vm5, %v1653_v14, %v8517_v28  ;;  %3966 = vrot.lane.b32.xlu0 %v3833_v59, %s4782_s30  ;;  %v3859_v14 = vsel %vm421_vm3, %v8424_v61, %v3858_v58  ;;  %v8527_v59 = vld [vmem:[#allocation46_spill] sm:$0xff]  ;;  %v8530_v61 = vld [vmem:[#allocation76_spill] sm:$0xff] }
 0x520   :  { %v1657_v2 = vsel %vm707_vm6, %v1655_v33, %v8518_v45  ;;  %v2514_v33 = vrot.slane %v7537_v19, 4  ;;  %v8529_v45 = vld [vmem:[#allocation79_spill] sm:$0xff]  ;;  %v2535_v39 = vsel %vm421_vm3, %v7598_v46, %v2534_v4 }
 0x521   :  { %v1659_v38 = vsel %vm710_vm7, %v1657_v2, %v8519_v42  ;;  %v3846_v42 = vrot.slane %v6805_v50, 4 }
 0x522   :  { %v1661_v0 = vsel %vm713_vm8, %v1659_v38, %v7274_v52  ;;  %v3882_v52 = vrot.slane %v8522_v23, 4 }
 0x523   :  { %v1663_v1 = vsel %vm716_vm9, %v1661_v0, %v7385_v54  ;;  %v1183_v54 = vsel %vm704_vm5, %v7567_v21, %v8524_v7  ;;  %v3871_v21 = vsel %vm421_vm3, %v8529_v45, %v3870_v30  ;;  %v3847_v50 = vsel %vm421_vm3, %v7394_v37, %v3846_v42 }
 0x524   :  { %2118 = vrot.lane.b32.xlu1 %v1955_v35, %s4781_s4  ;;  %3062 = vrot.lane.b32.xlu2 %v8520_v13, %s4781_s4  ;;  %v7673_v62 = vsel %vm719_vm10, %v1663_v1, %v7491_v47  ;;  %v8526_v47 = vld [vmem:[#allocation6_spill] sm:$0xff]  ;;  %v1185_v38 = vsel %vm707_vm6, %v1183_v54, %v8530_v61  ;;  %v3834_v35 = vrot.slane %v3791_v3, 4  ;;  %v3867_v3 = vperm.slane %v3859_v14, %v8281_v44  ;;  %v8531_v1 = vld [vmem:[#allocation48_spill] sm:$0xff]  ;;  %v8535_v61 = vld [vmem:[#allocation25_spill] sm:$0xff] }
 0x525   :  { %v2113_v10 = vpop.permute.xlu2 %2112  ;;  %v1607_v16 = vpop.permute.xlu1 %1606  ;;  %v3879_v13 = vperm.slane %v3871_v21, %v8281_v44  ;;  %v1187_v58 = vsel %vm710_vm7, %v1185_v38, %v8531_v1  ;;  %v8536_v38 = vld [vmem:[#allocation19_spill] sm:$0xff] }
 0x526   :  { %v2135_v24 = vsel %vm716_vm9, %v2133_v20, %v2113_v10  ;;  %v1654_v53 = vsel %vm704_vm5, %v8523_v56, %v1607_v16  ;;  %v3883_v20 = vsel %vm421_vm3, %v8527_v59, %v3882_v52  ;;  %v3835_v37 = vsel %vm421_vm3, %v7627_v51, %v3834_v35 }
 0x527   :  { %v1656_v55 = vsel %vm707_vm6, %v1654_v53, %v8525_v49  ;;  %3064 = vrot.lane.b32.xlu0 %v8526_v47, %s4781_s4  ;;  %v3891_v19 = vperm.slane %v3883_v20, %v8281_v44  ;;  %v3855_v16 = vperm.slane %v3847_v50, %v8281_v44  ;;  %v3904_v23 = vrot.slane %v3867_v3, 4  ;;  %v8532_v44 = vld [vmem:[#allocation71_spill] sm:$0xff]  ;;  %v8533_v47 = vld [vmem:[#allocation40_spill] sm:$0xff] }
 0x528   :  { %v1658_v28 = vsel %vm710_vm7, %v1656_v55, %v8528_v27  ;;  %v2490_v52 = vrot.slane %v7585_v22, 4  ;;  %v8534_v27 = vld [vmem:[#allocation59_spill] sm:$0xff]  ;;  %v703_v35 = vsel %vm701_vm4, %v8536_v38, %v8535_v61 }
 0x529   :  { %v1660_v2 = vsel %vm713_vm8, %v1658_v28, %v7332_v40  ;;  %v3928_v10 = vrot.slane %v3891_v19, 4  ;;  %v3905_v51 = vsel %vm421_vm3, %v3904_v23, %v3855_v16  ;;  %v3906_v42 = vrot.slane %v3855_v16, 4  ;;  %v8540_v16 = vld [vmem:[#allocation32_spill] sm:$0xff] }
 0x52a   :  { %v1662_v0 = vsel %vm716_vm9, %v1660_v2, %v7454_v41  ;;  %v2491_v54 = vsel %vm421_vm3, %v7434_v34, %v2490_v52  ;;  %v3911_v4 = vperm.slane %v3905_v51, %v8286_v26 }
 0x52b   :  { %v1664_v40 = vsel %vm719_vm10, %v1662_v0, %v7560_v17  ;;  %v2499_v14 = vperm.slane %v2491_v54, %v8286_v26  ;;  %v8537_v0 = vld [vmem:[#allocation28_spill] sm:$0xff] }
 0x52c   :  { %2576 = vrot.lane.b32.xlu1 %v2535_v39, %s4785_s18  ;;  %3520 = vrot.lane.b32.xlu2 %v7318_v63, %s4785_s18  ;;  %v7713_v46 = vadd.f32 %v1664_v40, %v1194_v48  ;;  %v2515_v63 = vsel %vm421_vm3, %v7470_v60, %v2514_v33  ;;  %v7727_v48 = vperm.slane %v7283_v29, %v8286_v26  ;;  %v3930_v33 = vrot.slane %v3879_v13, 4 }
 0x52d   :  { %v3023_v41 = vpop.permute.xlu2 %3022  ;;  %v1161_v32 = vpop.permute.xlu1 %1160  ;;  %v2523_v60 = vperm.slane %v2515_v63, %v8286_v26  ;;  %v7742_v29 = vperm.slane %v8532_v44, %v8286_v26  ;;  %v706_v40 = vsel %vm704_vm5, %v703_v35, %v8537_v0  ;;  %v2538_v52 = vrot.slane %v2499_v14, 4  ;;  %v8546_v0 = vld [vmem:[#allocation72_spill] sm:$0xff] }
 0x52e   :  { %v3070_v30 = vsel %vm704_vm5, %v3068_v9, %v3023_v41  ;;  %v1189_v17 = vsel %vm713_vm8, %v1187_v58, %v1161_v32  ;;  %v3929_v9 = vsel %vm421_vm3, %v3928_v10, %v3879_v13  ;;  %v3480_v56 = vrot.slane %v7727_v48, 4  ;;  %v8538_v32 = vld [vmem:[#allocation8_spill] sm:$0xff] }
 0x52f   :  { %3974 = vrot.lane.b32.xlu0 %v3835_v37, %s4783_s0  ;;  %v3935_v22 = vperm.slane %v3929_v9, %v8286_v26  ;;  %v2536_v49 = vrot.slane %v2523_v60, 4  ;;  %v3468_v13 = vrot.slane %v7303_v5, 4  ;;  %v3931_v41 = vsel %vm421_vm3, %v3891_v19, %v3930_v33 }
 0x530   :  { %v3950_v58 = vrot.slane %v3911_v4, 4  ;;  %v709_v63 = vsel %vm707_vm6, %v706_v40, %v8538_v32  ;;  %v2539_v51 = vsel %vm421_vm3, %v2523_v60, %v2538_v52  ;;  %v8548_v32 = vld [vmem:[#allocation82_spill] sm:$0xff] }
 0x531   :  { %v3948_v59 = vrot.slane %v3935_v22, 4  ;;  %v3469_v19 = vsel %vm421_vm3, %v3468_v13, %v7253_v6 }
 0x532   :  { %v3951_v37 = vsel %vm421_vm3, %v3935_v22, %v3950_v58  ;;  %v8541_v22 = vld [vmem:[#allocation29_spill] sm:$0xff] }
 0x533   :  { %v3949_v28 = vsel %vm421_vm3, %v3948_v59, %v3911_v4 }
 0x534   :  { %3526 = vrot.lane.b32.xlu2 %v7363_v36, %s4786_s19  ;;  %3486 = vrot.lane.b32.xlu1 %v7344_v11, %s4784_s17  ;;  %v3481_v11 = vsel %vm421_vm3, %v3480_v56, %v7742_v29 }
 0x535   :  { %v2121_v53 = vpop.permute.xlu2 %2120  ;;  %v2071_v7 = vpop.permute.xlu1 %2070 }
 0x536   :  { %v7748_v55 = vsel %vm719_vm10, %v2135_v24, %v2121_v53  ;;  %v2124_v36 = vsel %vm701_vm4, %v8533_v47, %v2071_v7  ;;  %v2537_v24 = vsel %vm421_vm3, %v2536_v49, %v2499_v14  ;;  %v8542_v47 = vld [vmem:[#allocation39_spill] sm:$0xff] }
 0x537   :  { %3528 = vrot.lane.b32.xlu0 %v3481_v11, %s4786_s19 }
 0x539   :  { %v3017_v20 = vpop.permute.xlu0 %3016 }
 0x53a   :  { %v3069_v34 = vsel %vm701_vm4, %v8534_v27, %v3017_v20  ;;  %v8543_v20 = vld [vmem:[#allocation89_spill] sm:$0xff] }
 0x53b   :  { %v7818_v27 = vperm.slane %v8543_v20, %v8286_v26 }
 0x53c   :  { %2584 = vrot.lane.b32.xlu1 %v2537_v24, %s4786_s19  ;;  %3984 = vrot.lane.b32.xlu2 %v3949_v28, %s4787_s20 }
 0x53d   :  { %v3031_v45 = vpop.permute.xlu2 %3030  ;;  %v1169_v21 = vpop.permute.xlu1 %1168 }
 0x53e   :  { %v3072_v2 = vsel %vm707_vm6, %v3070_v30, %v3031_v45  ;;  %v1191_v39 = vsel %vm716_vm9, %v1189_v17, %v1169_v21  ;;  %v7784_v30 = vperm.slane %v3931_v41, %v8286_v26  ;;  %v8545_v21 = vld [vmem:[#allocation44_spill] sm:$0xff] }
 0x53f   :  { %3534 = vrot.lane.b32.xlu0 %v7382_v15, %s4781_s4  ;;  %v3907_v15 = vsel %vm421_vm3, %v3867_v3, %v3906_v42  ;;  %v8539_v3 = vld [vmem:[#allocation30_spill] sm:$0xff] }
 0x540   :  { %v712_v10 = vsel %vm710_vm7, %v709_v63, %v8539_v3  ;;  %v3952_v6 = vrot.slane %v7784_v30, 4 }
 0x541   :  { %v2567_v50 = vpop.permute.xlu0 %2566  ;;  %v715_v23 = vsel %vm713_vm8, %v712_v10, %v8540_v16 }
 0x542   :  { %v2602_v1 = vsel %vm710_vm7, %v7550_v8, %v2567_v50  ;;  %v718_v53 = vsel %vm716_vm9, %v715_v23, %v8541_v22  ;;  %v8550_v23 = vld [vmem:[#allocation41_spill] sm:$0xff] }
 0x544   :  { %3494 = vrot.lane.b32.xlu1 %v7347_v12, %s4782_s30  ;;  %3990 = vrot.lane.b32.xlu2 %v7588_v18, %s4785_s18  ;;  %v7792_v18 = vperm.slane %v3907_v15, %v8286_v26 }
 0x545   :  { %v3489_v5 = vpop.permute.xlu2 %3488  ;;  %v2079_v8 = vpop.permute.xlu1 %2078 }
 0x546   :  { %v3541_v17 = vsel %vm701_vm4, %v3469_v19, %v3489_v5  ;;  %v2126_v12 = vsel %vm704_vm5, %v2124_v36, %v2079_v8  ;;  %v3953_v44 = vsel %vm421_vm3, %v3952_v6, %v7792_v18  ;;  %v721_v36 = vsel %vm719_vm10, %v718_v53, %v8542_v47 }
 0x547   :  { %3992 = vrot.lane.b32.xlu0 %v3951_v37, %s4785_s18  ;;  %v3954_v47 = vrot.slane %v7792_v18, 4  ;;  %v8551_v18 = vld [vmem:[#allocation78_spill] sm:$0xff] }
 0x549   :  { %v3025_v9 = vpop.permute.xlu0 %3024 }
 0x54a   :  { %v3071_v56 = vsel %vm704_vm5, %v3069_v34, %v3025_v9  ;;  %v8544_v34 = vld [vmem:[#allocation74_spill] sm:$0xff] }
 0x54c   :  { %2592 = vrot.lane.b32.xlu1 %v2539_v51, %s4781_s4  ;;  %4000 = vrot.lane.b32.xlu2 %v3953_v44, %s4786_s19  ;;  %v3482_v44 = vrot.slane %v7742_v29, 4 }
 0x54d   :  { %v1177_v54 = vpop.permute.xlu1 %1176 }
 0x54e   :  { %v3039_v7 = vpop.permute.xlu2 %3038  ;;  %v1193_v11 = vsel %vm719_vm10, %v1191_v39, %v1177_v54  ;;  %v3483_v22 = vsel %vm421_vm3, %v7727_v48, %v3482_v44 }
 0x54f   :  { %v3074_v49 = vsel %vm710_vm7, %v3072_v2, %v3039_v7  ;;  %v1195_v60 = vadd.f32 %v1193_v11, %v721_v36  ;;  %4006 = vrot.lane.b32.xlu0 %v7607_v25, %s4781_s4  ;;  %v7832_v2 = vperm.slane %v8545_v21, %v8286_v26  ;;  %v8547_v26 = vld [vmem:[#allocation87_spill] sm:$0xff] }
 0x551   :  { %v1667_v4 = vadd.f32 %v7673_v62, %v1195_v60  ;;  %v2575_v14 = vpop.permute.xlu0 %2574  ;;  %v3942_v62 = vrot.slane %v7818_v27, 4 }
 0x552   :  { %v2604_v59 = vsel %vm713_vm8, %v2602_v1, %v2575_v14 }
 0x553   :  { %v7823_v24 = vadd.f32 %v7748_v55, %v1667_v4  ;;  %v3943_v55 = vsel %vm421_vm3, %v7832_v2, %v3942_v62  ;;  %v3955_v4 = vsel %vm421_vm3, %v7784_v30, %v3954_v47 }
 0x554   :  { %3502 = vrot.lane.b32.xlu1 %v8544_v34, %s4783_s0 }
 0x555   :  { %v2087_v33 = vpop.permute.xlu1 %2086 }
 0x556   :  { %v3497_v28 = vpop.permute.xlu2 %3496  ;;  %v2128_v25 = vsel %vm707_vm6, %v2126_v12, %v2087_v33 }
 0x557   :  { %v7826_v45 = vsel %vm704_vm5, %v3541_v17, %v3497_v28  ;;  %v8549_v17 = vld [vmem:[#allocation53_spill] sm:$0xff] }
 0x559   :  { %v3033_v39 = vpop.permute.xlu0 %3032 }
 0x55a   :  { %v3073_v42 = vsel %vm707_vm6, %v3071_v56, %v3033_v39 }
 0x55c   :  { %3960 = vrot.lane.b32.xlu1 %v3943_v55, %s4784_s17 }
 0x55d   :  { %v2545_v38 = vpop.permute.xlu1 %2544 }
 0x55e   :  { %v3047_v61 = vpop.permute.xlu2 %3046  ;;  %v2597_v40 = vsel %vm701_vm4, %v8546_v0, %v2545_v38 }
 0x55f   :  { %v3076_v35 = vsel %vm713_vm8, %v3074_v49, %v3047_v61 }
 0x561   :  { %v2583_v50 = vpop.permute.xlu0 %2582 }
 0x562   :  { %v2606_v13 = vsel %vm716_vm9, %v2604_v59, %v2583_v50 }
 0x564   :  { %3510 = vrot.lane.b32.xlu1 %v8547_v26, %s4787_s20  ;;  %v4661_v26 = vld [vmem:[%s8032_s8 + $0x38] sm:$0xff] }
 0x565   :  { %4093 = vmatpush.bf16.msra.mxu0 %v4661_v26 }
 0x566   :  { %v2095_v41 = vpop.permute.xlu1 %2094  ;;  %v7853_v3 = vpop.permute.xlu2 %3504 }
 0x567   :  { %v2130_v1 = vsel %vm710_vm7, %v2128_v25, %v2095_v41 }
 0x569   :  { %v3041_v58 = vpop.permute.xlu0 %3040 }
 0x56a   :  { %v3075_v15 = vsel %vm710_vm7, %v3073_v42, %v3041_v58  ;;  %v4660_v58 = vld [vmem:[%s8032_s8 + $0x30] sm:$0xff] }
 0x56b   :  { %4094 = vmatpush.bf16.msra.mxu0 %v4660_v58  ;;  %v4663_v58 = vld [vmem:[%s8035_s11] sm:$0xff] }
 0x56c   :  { %3968 = vrot.lane.b32.xlu1 %v8548_v32, %s4782_s30 }
 0x56e   :  { %v2553_v63 = vpop.permute.xlu1 %2552  ;;  %v3055_v9 = vpop.permute.xlu2 %3054 }
 0x56f   :  { %v2599_v5 = vsel %vm704_vm5, %v2597_v40, %v2553_v63  ;;  %v3078_v48 = vsel %vm716_vm9, %v3076_v35, %v3055_v9 }
 0x571   :  { %v2591_v19 = vpop.permute.xlu0 %2590 }
 0x572   :  { %v2608_v8 = vsel %vm719_vm10, %v2606_v13, %v2591_v19  ;;  %v4657_v19 = vld [vmem:[%s8032_s8 + $0x18] sm:$0xff] }
 0x574   :  { %3518 = vrot.lane.b32.xlu1 %v8549_v17, %s4785_s18 }
 0x576   :  { %v2103_v12 = vpop.permute.xlu1 %2102  ;;  %v7866_v53 = vpop.permute.xlu2 %3512 }
 0x577   :  { %v2132_v37 = vsel %vm713_vm8, %v2130_v1, %v2103_v12 }
 0x579   :  { %v3049_v10 = vpop.permute.xlu0 %3048 }
 0x57a   :  { %v3077_v16 = vsel %vm713_vm8, %v3075_v15, %v3049_v10 }
 0x57c   :  { %3976 = vrot.lane.b32.xlu1 %v8550_v23, %s4783_s0  ;;  %v4656_v23 = vld [vmem:[%s8032_s8 + $0x10] sm:$0xff] }
 0x57e   :  { %v2561_v52 = vpop.permute.xlu1 %2560  ;;  %v3063_v36 = vpop.permute.xlu2 %3062 }
 0x57f   :  { %v2601_v6 = vsel %vm707_vm6, %v2599_v5, %v2561_v52  ;;  %v3080_v60 = vsel %vm719_vm10, %v3078_v48, %v3063_v36  ;;  %v4658_v5 = vld [vmem:[%s8032_s8 + $0x20] sm:$0xff] }
 0x581   :  { %v3959_v20 = vpop.permute.xlu0 %3958 }
 0x582   :  { %v4012_v48 = vsel %vm701_vm4, %v7564_v31, %v3959_v20 }
 0x584   :  { %3982 = vrot.lane.b32.xlu1 %v7578_v43, %s4787_s20 }
 0x586   :  { %v2111_v56 = vpop.permute.xlu1 %2110  ;;  %v3521_v15 = vpop.permute.xlu2 %3520 }
 0x587   :  { %v2134_v51 = vsel %vm716_vm9, %v2132_v37, %v2111_v56 }
 0x58c   :  { %3536 = vrot.lane.b32.xlu1 %v3483_v22, %s4781_s4 }
 0x58e   :  { %v2569_v7 = vpop.permute.xlu1 %2568  ;;  %v3527_v12 = vpop.permute.xlu2 %3526 }
 0x58f   :  { %v2603_v54 = vsel %vm710_vm7, %v2601_v6, %v2569_v7  ;;  %v4655_v6 = vld [vmem:[%s8032_s8 + $0x8] sm:$0xff]  ;;  %v3545_v7 = vsel %vm707_vm6, %v7826_v45, %v7853_v3 }
 0x594   :  { %3998 = vrot.lane.b32.xlu1 %v7591_v57, %s4786_s19  ;;  %s8552_s19 = sld [smem:[#allocation91_spill]] }
 0x596   :  { %v2119_v49 = vpop.permute.xlu1 %2118  ;;  %v3985_v22 = vpop.permute.xlu2 %3984 }
 0x597   :  { %v2136_v43 = vsel %vm719_vm10, %v2134_v51, %v2119_v49  ;;  %v4654_v51 = vld [vmem:[%s8032_s8] sm:$0xff] }
 0x598   :  { %v2138_v29 = vadd.f32 %v2136_v43, %v7713_v46  ;;  %v3057_v46 = vpop.permute.xlu0 %3056 }
 0x599   :  { %v3079_v61 = vsel %vm716_vm9, %v3077_v16, %v3057_v46 }
 0x59a   :  { %v2610_v11 = vadd.f32 %v2608_v8, %v2138_v29 }
 0x59c   :  { %v3082_v14 = vadd.f32 %v3080_v60, %v2610_v11  ;;  %4008 = vrot.lane.b32.xlu1 %v3955_v4, %s4781_s4  ;;  %v3940_v11 = vrot.slane %v7832_v2, 4 }
 0x59e   :  { %v2577_v57 = vpop.permute.xlu1 %2576  ;;  %v3941_v3 = vsel %vm421_vm3, %v3940_v11, %v7818_v27 }
 0x59f   :  { %v2605_v59 = vsel %vm713_vm8, %v2603_v54, %v2577_v57  ;;  %v3547_v54 = vsel %vm710_vm7, %v3545_v7, %v7866_v53  ;;  %v3991_v53 = vpop.permute.xlu2 %3990 }
 0x5a0   :  { %v3967_v62 = vpop.permute.xlu0 %3966  ;;  %v3549_v49 = vsel %vm713_vm8, %v3547_v54, %v3521_v15 }
 0x5a1   :  { %v4014_v4 = vsel %vm704_vm5, %v4012_v48, %v3967_v62 }
 0x5a6   :  { %v3487_v34 = vpop.permute.xlu1 %3486 }
 0x5a7   :  { %v3540_v28 = vsel %vm701_vm4, %v8551_v18, %v3487_v34 }
 0x5a8   :  { %v3065_v30 = vpop.permute.xlu0 %3064 }
 0x5a9   :  { %v3081_v35 = vsel %vm719_vm10, %v3079_v61, %v3065_v30 }
 0x5ae   :  { %v2585_v33 = vpop.permute.xlu1 %2584 }
 0x5af   :  { %v2607_v25 = vsel %vm716_vm9, %v2605_v59, %v2585_v33 }
 0x5b0   :  { %v3975_v41 = vpop.permute.xlu0 %3974 }
 0x5b1   :  { %v4016_v45 = vsel %vm707_vm6, %v4014_v4, %v3975_v41 }
 0x5b6   :  { %v3495_v21 = vpop.permute.xlu1 %3494 }
 0x5b7   :  { %v3542_v39 = vsel %vm704_vm5, %v3540_v28, %v3495_v21 }
 0x5b8   :  { %v3529_v32 = vpop.permute.xlu0 %3528 }
 0x5b9   :  { %v3551_v47 = vsel %vm716_vm9, %v3549_v49, %v3529_v32 }
 0x5be   :  { %v2593_v42 = vpop.permute.xlu1 %2592 }
 0x5bf   :  { %v2609_v55 = vsel %vm719_vm10, %v2607_v25, %v2593_v42  ;;  %v4001_v25 = vpop.permute.xlu2 %4000 }
 0x5c0   :  { %v2611_v38 = vadd.f32 %v2609_v55, %v7823_v24  ;;  %v4659_v24 = vld [vmem:[%s8032_s8 + $0x28] sm:$0xff]  ;;  %v3535_v10 = vpop.permute.xlu0 %3534  ;;  %v4662_v55 = vld [vmem:[%s8033_s9] sm:$0xff] }
 0x5c1   :  { %4095 = vmatpush.bf16.msra.mxu0 %v4659_v24  ;;  %4126 = vmatpush.bf16.msra.mxu1 %v4662_v55 }
 0x5c2   :  { %v3083_v0 = vadd.f32 %v3081_v35, %v2611_v38 }
 0x5c5   :  { %4096 = vmatpush.bf16.msra.mxu0 %v4658_v5 }
 0x5c6   :  { %v3503_v40 = vpop.permute.xlu1 %3502 }
 0x5c7   :  { %v3544_v50 = vsel %vm707_vm6, %v3542_v39, %v3503_v40 }
 0x5c8   :  { %v3993_v43 = vpop.permute.xlu0 %3992 }
 0x5c9   :  { %4097 = vmatpush.bf16.msra.mxu0 %v4657_v19 }
 0x5cd   :  { %4098 = vmatpush.bf16.msra.mxu0 %v4656_v23 }
 0x5ce   :  { %v3961_v13 = vpop.permute.xlu1 %3960 }
 0x5d0   :  { %v4007_v20 = vpop.permute.xlu0 %4006 }
 0x5d1   :  { %4099 = vmatpush.bf16.msra.mxu0 %v4655_v6 }
 0x5d5   :  { %4100 = vmatpush.bf16.msra.mxu0 %v4654_v51 }
 0x5d6   :  { %v3511_v1 = vpop.permute.xlu1 %3510 }
 0x5d7   :  { %v3546_v8 = vsel %vm710_vm7, %v3544_v50, %v3511_v1  ;;  %v4664_v1 = vld [vmem:[%s8035_s11 + $0x8] sm:$0xff] }
 0x5d8   :  { %4211 = vmatpush.bf16.msra.mxu2 %v4664_v1 }
 0x5dc   :  { %4212 = vmatpush.bf16.msra.mxu2 %v4663_v58 }
 0x5de   :  { %v3969_v63 = vpop.permute.xlu1 %3968 }
 0x5e6   :  { %v3519_v17 = vpop.permute.xlu1 %3518 }
 0x5e7   :  { %v3548_v37 = vsel %vm713_vm8, %v3546_v8, %v3519_v17 }
 0x5e8   :  { %v3550_v16 = vsel %vm716_vm9, %v3548_v37, %v3527_v12 }
 0x5e9   :  { %v3552_v52 = vsel %vm719_vm10, %v3550_v16, %v3535_v10 }
 0x5ea   :  { %v3554_v9 = vadd.f32 %v3552_v52, %v3082_v14  ;;  %v4013_v14 = vsel %vm701_vm4, %v3941_v3, %v3961_v13 }
 0x5eb   :  { %v4015_v59 = vsel %vm704_vm5, %v4013_v14, %v3969_v63 }
 0x5ee   :  { %v3977_v56 = vpop.permute.xlu1 %3976 }
 0x5ef   :  { %v4017_v34 = vsel %vm707_vm6, %v4015_v59, %v3977_v56 }
 0x5f0   :  { %v4019_v28 = vsel %vm710_vm7, %v4017_v34, %v3985_v22 }
 0x5f1   :  { %v4021_v33 = vsel %vm713_vm8, %v4019_v28, %v3993_v43  ;;  %v4175_v43 = vld [vmem:[%s8029_s5] sm:$0xff] }
 0x5f2   :  { %v4023_v62 = vsel %vm716_vm9, %v4021_v33, %v4001_v25 }
 0x5f6   :  { %v3983_v44 = vpop.permute.xlu1 %3982 }
 0x5f7   :  { %v4018_v57 = vsel %vm710_vm7, %v4016_v45, %v3983_v44 }
 0x5f8   :  { %v4020_v31 = vsel %vm713_vm8, %v4018_v57, %v3991_v53  ;;  %v4666_v57 = vld [vmem:[%s8036_s12 + $0x8] sm:$0xff] }
 0x5f9   :  { %4283 = vmatpush.bf16.msra.mxu3 %v4666_v57 }
 0x5fe   :  { %v3537_v36 = vpop.permute.xlu1 %3536 }
 0x5ff   :  { %v3553_v29 = vsel %vm719_vm10, %v3551_v47, %v3537_v36 }
 0x600   :  { %v3555_v60 = vadd.f32 %v3553_v29, %v3083_v0  ;;  %v4176_v29 = vld [vmem:[%s8029_s5 + $0x8] sm:$0xff] }
 0x606   :  { %v3999_v2 = vpop.permute.xlu1 %3998 }
 0x607   :  { %v4022_v18 = vsel %vm716_vm9, %v4020_v31, %v3999_v2  ;;  %v4665_v2 = vld [vmem:[%s8036_s12] sm:$0xff] }
 0x608   :  { %v4024_v46 = vsel %vm719_vm10, %v4022_v18, %v4007_v20  ;;  %4284 = vmatpush.bf16.msra.mxu3 %v4665_v2 }
 0x609   :  { %v4026_v27 = vadd.f32 %v4024_v46, %v3554_v9 }
 0x60e   :  { %v4009_v21 = vpop.permute.xlu1 %4008 }
 0x60f   :  { %v4025_v39 = vsel %vm719_vm10, %v4023_v62, %v4009_v21 }
 0x610   :  { %v4027_v30 = vadd.f32 %v4025_v39, %v3555_v60 }
 0x612   :  { %v4028_v42 = vpack.c.bf16 %v4027_v30, %v4026_v27 }
 0x614   :  { %4101 = vmatmul.bf16.vlgmr.msra.gmra.mxu0 %v4028_v42 }
 0x691   :  { %v4102_v61 = vpop.f32.mrf.mxu0 }
 0x699   :  { %v4104_v38 = vpop.f32.mrf.mxu0 }
 0x69a   :  { %v4107_v35 = vpack.c.bf16 %v4104_v38, %v4102_v61 }
 0x69c   :  { %4604 = vmatmul.msk.bf16.vlgmr.msra.gmra.mxu1 %vm701_vm4, %v4107_v35 }
 0x719   :  { %v4128_v0 = vpop.f32.mrf.mxu1 }
 0x71a   :  { %v4605_v40 = vmul.f32 -1.442695, %v4128_v0 }
 0x71c   :  { %4737 = vpow2.f32 %v4605_v40 }
 0x721   :  { %v4130_v50 = vpop.f32.mrf.mxu1 }
 0x722   :  { %v4738_v13 = vpop.eup %4737  ;;  %v4606_v26 = vmul.f32 -1.442695, %v4130_v50 }
 0x723   :  { %v4139_v41 = vadd.f32 1.0, %v4738_v13 }
 0x724   :  { %4739 = vpow2.f32 %v4606_v26 }
 0x725   :  { %4741 = vrcp.f32 %v4139_v41  ;;  %v4152_v19 = vand.u32 2147483648, %v4139_v41  ;;  %v4150_v17 = vand.u32 2147483647, %v4139_v41  ;;  %vm4146_vm12 = vweird.f32 %v4139_v41 }
 0x727   :  { %v4153_v10 = vor.u32 1.1754944e-38, %v4152_v19  ;;  %vm4151_vm14 = vcmp.eq.f32.partialorder %v4150_v17, 8.507059e+37 }
 0x72a   :  { %v4740_v24 = vpop.eup %4739 }
 0x72b   :  { %v4742_v15 = vpop.eup %4741  ;;  %v4140_v32 = vadd.f32 1.0, %v4740_v24 }
 0x72c   :  { %v4142_v63 = vmul.f32 %v4742_v15, %v4139_v41  ;;  %vm4147_vm11 = vweird.f32 %v4742_v15 }
 0x72d   :  { %4743 = vrcp.f32 %v4140_v32  ;;  %vm4148_vm13 = vmor %vm4146_vm12, %vm4147_vm11  ;;  %v4167_v9 = vand.u32 2147483648, %v4140_v32  ;;  %v4165_v44 = vand.u32 2147483647, %v4140_v32  ;;  %vm4161_vm0 = vweird.f32 %v4140_v32 }
 0x72e   :  { %v4143_v5 = vsub.f32 1.0, %v4142_v63 }
 0x72f   :  { %v4168_v7 = vor.u32 1.1754944e-38, %v4167_v9  ;;  %vm4166_vm2 = vcmp.eq.f32.partialorder %v4165_v44, 8.507059e+37 }
 0x730   :  { %v4144_v8 = vmul.f32 %v4742_v15, %v4143_v5 }
 0x732   :  { %v4145_v12 = vadd.f32 %v4742_v15, %v4144_v8 }
 0x733   :  { %v4744_v37 = vpop.eup %4743 }
 0x734   :  { %v4149_v16 = vsel %vm4148_vm13, %v4742_v15, %v4145_v12  ;;  %v4157_v23 = vmul.f32 %v4744_v37, %v4140_v32  ;;  %vm4162_vm15 = vweird.f32 %v4744_v37 }
 0x735   :  { %v4154_v52 = vsel %vm4151_vm14, %v4153_v10, %v4149_v16  ;;  %vm4163_vm1 = vmor %vm4161_vm0, %vm4162_vm15  ;;  %v4668_v10 = vld [vmem:[%s8037_s13 + $0x8] sm:$0xff] }
 0x736   :  { %v4158_v6 = vsub.f32 1.0, %v4157_v23  ;;  %v4171_v56 = vmul.f32 %v4154_v52, %v4128_v0  ;;  %4373 = vmatpush.bf16.msrb.mxu1 %v4668_v10  ;;  %v4667_v23 = vld [vmem:[%s8037_s13] sm:$0xff] }
 0x738   :  { %v4159_v51 = vmul.f32 %v4744_v37, %v4158_v6  ;;  %v4173_v54 = vmul.f32 1.6666666, %v4171_v56 }
 0x73a   :  { %v4160_v22 = vadd.f32 %v4744_v37, %v4159_v51  ;;  %v4177_v48 = vadd.f32 %v4175_v43, %v4173_v54  ;;  %4374 = vmatpush.bf16.msrb.mxu1 %v4667_v23 }
 0x73c   :  { %v4164_v49 = vsel %vm4163_vm1, %v4744_v37, %v4160_v22  ;;  %v7959_v4 = vmul.f32 0.70710677, %v4177_v48 }
 0x73d   :  { %v4169_v47 = vsel %vm4166_vm2, %v4168_v7, %v4164_v49 }
 0x73e   :  { %v4172_v36 = vmul.f32 %v4169_v47, %v4130_v50 }
 0x740   :  { %v4174_v11 = vmul.f32 1.6666666, %v4172_v36 }
 0x742   :  { %v4178_v60 = vadd.f32 %v4176_v29, %v4174_v11 }
 0x744   :  { %v7961_v45 = vmul.f32 0.70710677, %v4178_v60 }
 0x746   :  { %v4189_v3 = vpack.c.bf16 %v7961_v45, %v7959_v4 }
 0x748   :  { %4615 = vmatmul.msk.bf16.vlgmr.msra.gmra.mxu2 %vm704_vm5, %v4189_v3 }
 0x7cb   :  { %v4214_v53 = vpop.f32.mrf.mxu2 }
 0x7cc   :  { %v4616_v14 = vmul.f32 -1.442695, %v4214_v53 }
 0x7ce   :  { %4745 = vpow2.f32 %v4616_v14 }
 0x7d3   :  { %v4216_v59 = vpop.f32.mrf.mxu2 }
 0x7d4   :  { %v4746_v34 = vpop.eup %4745  ;;  %v4617_v31 = vmul.f32 -1.442695, %v4216_v59 }
 0x7d5   :  { %v4225_v20 = vadd.f32 1.0, %v4746_v34 }
 0x7d6   :  { %4747 = vpow2.f32 %v4617_v31 }
 0x7d7   :  { %4749 = vrcp.f32 %v4225_v20  ;;  %v4238_v39 = vand.u32 2147483648, %v4225_v20  ;;  %vm4232_vm4 = vweird.f32 %v4225_v20  ;;  %v4236_v30 = vand.u32 2147483647, %v4225_v20 }
 0x7d9   :  { %v4239_v38 = vor.u32 1.1754944e-38, %v4238_v39  ;;  %vm4237_vm7 = vcmp.eq.f32.partialorder %v4236_v30, 8.507059e+37 }
 0x7dc   :  { %v4748_v18 = vpop.eup %4747 }
 0x7dd   :  { %v4750_v28 = vpop.eup %4749  ;;  %v4226_v46 = vadd.f32 1.0, %v4748_v18 }
 0x7de   :  { %v4228_v27 = vmul.f32 %v4750_v28, %v4225_v20  ;;  %vm4233_vm3 = vweird.f32 %v4750_v28 }
 0x7df   :  { %4751 = vrcp.f32 %v4226_v46  ;;  %vm4234_vm6 = vmor %vm4232_vm4, %vm4233_vm3  ;;  %v4253_v35 = vand.u32 2147483648, %v4226_v46  ;;  %v4251_v40 = vand.u32 2147483647, %v4226_v46  ;;  %vm4247_vm9 = vweird.f32 %v4226_v46 }
 0x7e0   :  { %v4229_v33 = vsub.f32 1.0, %v4228_v27  ;;  %v4338_v27 = vld [vmem:[%s8030_s6 + $0x8] sm:$0xff]  ;;  %vm4509_vm4 = vcmask 1043456  }
 0x7e1   :  { %v4254_v26 = vor.u32 1.1754944e-38, %v4253_v35  ;;  %vm4252_vm11 = vcmp.eq.f32.partialorder %v4251_v40, 8.507059e+37  ;;  %v4504_v40 = vld [vmem:[%s8034_s10] sm:$0xf] }
 0x7e2   :  { %v4230_v25 = vmul.f32 %v4750_v28, %v4229_v33 }
 0x7e4   :  { %v4231_v62 = vadd.f32 %v4750_v28, %v4230_v25 }
 0x7e5   :  { %v4752_v21 = vpop.eup %4751 }
 0x7e6   :  { %v4243_v42 = vmul.f32 %v4752_v21, %v4226_v46  ;;  %v4235_v55 = vsel %vm4234_vm6, %v4750_v28, %v4231_v62  ;;  %vm4248_vm8 = vweird.f32 %v4752_v21  ;;  %v4337_v28 = vld [vmem:[%s8030_s6] sm:$0xff]  ;;  %vm4505_vm6 = vcmask 64512  }
 0x7e7   :  { %v4240_v50 = vsel %vm4237_vm7, %v4239_v38, %v4235_v55  ;;  %vm4249_vm10 = vmor %vm4247_vm9, %vm4248_vm8  ;;  %v4670_v38 = vld [vmem:[%s8038_s14 + $0x8] sm:$0xff] }
 0x7e8   :  { %v4244_v61 = vsub.f32 1.0, %v4243_v42  ;;  %v4257_v41 = vmul.f32 %v4240_v50, %v4214_v53  ;;  %4445 = vmatpush.bf16.msrb.mxu2 %v4670_v38  ;;  %v4501_v50 = vld [vmem:[%s8552_s19] sm:$0xff] }
 0x7ea   :  { %v4245_v0 = vmul.f32 %v4752_v21, %v4244_v61  ;;  %v4259_v15 = vmul.f32 1.6666666, %v4257_v41 }
 0x7ec   :  { %v4246_v13 = vadd.f32 %v4752_v21, %v4245_v0  ;;  %v4669_v0 = vld [vmem:[%s8038_s14] sm:$0xff] }
 0x7ed   :  { %4446 = vmatpush.bf16.msrb.mxu2 %v4669_v0 }
 0x7ee   :  { %v4250_v1 = vsel %vm4249_vm10, %v4752_v21, %v4246_v13  ;;  %v4502_v13 = vld [vmem:[%s8552_s19 + $0x8] sm:$0xff] }
 0x7ef   :  { %v4255_v58 = vsel %vm4252_vm11, %v4254_v26, %v4250_v1  ;;  %v4511_v26 = vsel %vm4509_vm4, %v4504_v40, 0  ;;  %v4503_v41 = vpack.c.bf16 %v4502_v13, %v4501_v50 }
 0x7f0   :  { %v4258_v24 = vmul.f32 %v4255_v58, %v4216_v59  ;;  %4520 = vmatpush.bf16.msrb.mxu3 %v4511_v26 }
 0x7f2   :  { %v4260_v32 = vmul.f32 1.6666666, %v4258_v24 }
 0x7f4   :  { %v4261_v63 = vpack.c.bf16 %v4260_v32, %v4259_v15 }
 0x7f6   :  { %4626 = vmatmul.msk.bf16.vlgmr.msra.gmra.mxu3 %vm704_vm5, %v4261_v63 }
 0x806   :  { %4651 = vmatmul.msk.bf16.vlgmr.msrb.gmra.mxu3 %vm4505_vm6, %v4503_v41 }
 0x879   :  { %v4286_v5 = vpop.f32.mrf.mxu3 }
 0x87a   :  { %v4627_v19 = vmul.f32 -1.442695, %v4286_v5 }
 0x87c   :  { %4753 = vpow2.f32 %v4627_v19 }
 0x881   :  { %v4288_v8 = vpop.f32.mrf.mxu3 }
 0x882   :  { %v4754_v17 = vpop.eup %4753  ;;  %v4628_v12 = vmul.f32 -1.442695, %v4288_v8 }
 0x883   :  { %v4297_v37 = vadd.f32 1.0, %v4754_v17 }
 0x884   :  { %4755 = vpow2.f32 %v4628_v12 }
 0x885   :  { %4757 = vrcp.f32 %v4297_v37  ;;  %v4310_v51 = vand.u32 2147483648, %v4297_v37  ;;  %v4308_v22 = vand.u32 2147483647, %v4297_v37  ;;  %vm4304_vm13 = vweird.f32 %v4297_v37 }
 0x887   :  { %v4311_v49 = vor.u32 1.1754944e-38, %v4310_v51  ;;  %vm4309_vm15 = vcmp.eq.f32.partialorder %v4308_v22, 8.507059e+37 }
 0x889   :  { %v4522_v0 = vpop.f32.mrf.mxu3 }
 0x88a   :  { %v4756_v16 = vpop.eup %4755 }
 0x88b   :  { %v4758_v52 = vpop.eup %4757  ;;  %v4298_v6 = vadd.f32 1.0, %v4756_v16 }
 0x88c   :  { %v4300_v9 = vmul.f32 %v4758_v52, %v4297_v37  ;;  %vm4305_vm12 = vweird.f32 %v4758_v52 }
 0x88d   :  { %4759 = vrcp.f32 %v4298_v6  ;;  %vm4306_vm14 = vmor %vm4304_vm13, %vm4305_vm12  ;;  %v4325_v11 = vand.u32 2147483648, %v4298_v6  ;;  %v4323_v53 = vand.u32 2147483647, %v4298_v6  ;;  %vm4319_vm1 = vweird.f32 %v4298_v6 }
 0x88e   :  { %v4301_v56 = vsub.f32 1.0, %v4300_v9 }
 0x88f   :  { %v4326_v57 = vor.u32 1.1754944e-38, %v4325_v11  ;;  %vm4324_vm3 = vcmp.eq.f32.partialorder %v4323_v53, 8.507059e+37 }
 0x890   :  { %v4302_v44 = vmul.f32 %v4758_v52, %v4301_v56 }
 0x892   :  { %v4303_v7 = vadd.f32 %v4758_v52, %v4302_v44 }
 0x893   :  { %v4760_v54 = vpop.eup %4759 }
 0x894   :  { %v4307_v43 = vsel %vm4306_vm14, %v4758_v52, %v4303_v7  ;;  %v4315_v47 = vmul.f32 %v4760_v54, %v4298_v6  ;;  %vm4320_vm0 = vweird.f32 %v4760_v54 }
 0x895   :  { %v4312_v36 = vsel %vm4309_vm15, %v4311_v49, %v4307_v43  ;;  %vm4321_vm2 = vmor %vm4319_vm1, %vm4320_vm0 }
 0x896   :  { %v4329_v29 = vmul.f32 %v4312_v36, %v4286_v5  ;;  %v4316_v48 = vsub.f32 1.0, %v4315_v47 }
 0x898   :  { %v4331_v60 = vmul.f32 1.6666666, %v4329_v29  ;;  %v4317_v3 = vmul.f32 %v4760_v54, %v4316_v48 }
 0x89a   :  { %v4318_v14 = vadd.f32 %v4760_v54, %v4317_v3  ;;  %v4333_v59 = vadd.f32 %v4331_v60, %v7959_v4 }
 0x89c   :  { %v4322_v34 = vsel %vm4321_vm2, %v4760_v54, %v4318_v14  ;;  %v4335_v20 = vmul.f32 0.70710677, %v4333_v59 }
 0x89d   :  { %v4327_v31 = vsel %vm4324_vm3, %v4326_v57, %v4322_v34 }
 0x89e   :  { %v4330_v2 = vmul.f32 %v4327_v31, %v4288_v8  ;;  %v4339_v33 = vadd.f32 %v4337_v28, %v4335_v20 }
 0x8a0   :  { %v4332_v18 = vmul.f32 1.6666666, %v4330_v2  ;;  %v7987_v4 = vmul.f32 0.70710677, %v4339_v33 }
 0x8a2   :  { %v4334_v46 = vadd.f32 %v4332_v18, %v7961_v45 }
 0x8a4   :  { %v4336_v25 = vmul.f32 0.70710677, %v4334_v46 }
 0x8a6   :  { %v4340_v62 = vadd.f32 %v4338_v27, %v4336_v25 }
 0x8a8   :  { %v7989_v21 = vmul.f32 0.70710677, %v4340_v62 }
 0x8aa   :  { %v4351_v39 = vpack.c.bf16 %v7989_v21, %v7987_v4 }
 0x8ac   :  { %4637 = vmatmul.msk.bf16.vlgmr.msrb.gmra.mxu1 %vm704_vm5, %v4351_v39 }
 0x929   :  { %v4376_v30 = vpop.f32.mrf.mxu1 }
 0x92a   :  { %v4638_v42 = vmul.f32 -1.442695, %v4376_v30 }
 0x92c   :  { %4761 = vpow2.f32 %v4638_v42 }
 0x931   :  { %v4378_v45 = vpop.f32.mrf.mxu1 }
 0x932   :  { %v4762_v55 = vpop.eup %4761  ;;  %v4639_v61 = vmul.f32 -1.442695, %v4378_v45 }
 0x933   :  { %v4387_v35 = vadd.f32 1.0, %v4762_v55 }
 0x934   :  { %4763 = vpow2.f32 %v4639_v61 }
 0x935   :  { %4765 = vrcp.f32 %v4387_v35  ;;  %v4400_v8 = vand.u32 2147483648, %v4387_v35  ;;  %vm4394_vm8 = vweird.f32 %v4387_v35  ;;  %v4398_v17 = vand.u32 2147483647, %v4387_v35 }
 0x937   :  { %v4401_v16 = vor.u32 1.1754944e-38, %v4400_v8  ;;  %vm4399_vm10 = vcmp.eq.f32.partialorder %v4398_v17, 8.507059e+37 }
 0x93a   :  { %v4764_v1 = vpop.eup %4763 }
 0x93b   :  { %v4766_v58 = vpop.eup %4765  ;;  %v4388_v24 = vadd.f32 1.0, %v4764_v1 }
 0x93c   :  { %v4390_v15 = vmul.f32 %v4766_v58, %v4387_v35  ;;  %vm4395_vm7 = vweird.f32 %v4766_v58 }
 0x93d   :  { %4767 = vrcp.f32 %v4388_v24  ;;  %vm4396_vm9 = vmor %vm4394_vm8, %vm4395_vm7  ;;  %v4415_v23 = vand.u32 2147483648, %v4388_v24  ;;  %v4413_v6 = vand.u32 2147483647, %v4388_v24  ;;  %vm4409_vm12 = vweird.f32 %v4388_v24 }
 0x93e   :  { %v4391_v32 = vsub.f32 1.0, %v4390_v15  ;;  %vm4531_vm8 = vcmask 257024   ;;  %v4524_v15 = vpop.f32.mrf.mxu3 }
 0x93f   :  { %v4416_v51 = vor.u32 1.1754944e-38, %v4415_v23  ;;  %vm4414_vm14 = vcmp.eq.f32.partialorder %v4413_v6, 8.507059e+37 }
 0x940   :  { %v4392_v63 = vmul.f32 %v4766_v58, %v4391_v32 }
 0x942   :  { %v4393_v5 = vadd.f32 %v4766_v58, %v4392_v63 }
 0x943   :  { %v4768_v19 = vpop.eup %4767 }
 0x944   :  { %v4405_v12 = vmul.f32 %v4768_v19, %v4388_v24  ;;  %v4397_v37 = vsel %vm4396_vm9, %v4766_v58, %v4393_v5  ;;  %vm4410_vm11 = vweird.f32 %v4768_v19 }
 0x945   :  { %v4402_v9 = vsel %vm4399_vm10, %v4401_v16, %v4397_v37  ;;  %vm4411_vm13 = vmor %vm4409_vm12, %vm4410_vm11 }
 0x946   :  { %v4406_v10 = vsub.f32 1.0, %v4405_v12  ;;  %v4419_v44 = vmul.f32 %v4402_v9, %v4376_v30 }
 0x948   :  { %v4407_v52 = vmul.f32 %v4768_v19, %v4406_v10  ;;  %v4421_v49 = vmul.f32 1.6666666, %v4419_v44 }
 0x94a   :  { %v4408_v56 = vadd.f32 %v4768_v19, %v4407_v52 }
 0x94c   :  { %v4412_v22 = vsel %vm4411_vm13, %v4768_v19, %v4408_v56 }
 0x94d   :  { %v4417_v7 = vsel %vm4414_vm14, %v4416_v51, %v4412_v22 }
 0x94e   :  { %v4420_v54 = vmul.f32 %v4417_v7, %v4378_v45 }
 0x950   :  { %v4422_v43 = vmul.f32 1.6666666, %v4420_v54 }
 0x952   :  { %v4423_v47 = vpack.c.bf16 %v4422_v43, %v4421_v49 }
 0x954   :  { %4648 = vmatmul.msk.bf16.vlgmr.msrb.gmra.mxu2 %vm704_vm5, %v4423_v47 }
 0x9d7   :  { %v4448_v36 = vpop.f32.mrf.mxu2 }
 0x9d8   :  { %v4649_v29 = vmul.f32 -1.442695, %v4448_v36 }
 0x9da   :  { %4769 = vpow2.f32 %v4649_v29 }
 0x9df   :  { %v4450_v48 = vpop.f32.mrf.mxu2 }
 0x9e0   :  { %v4770_v11 = vpop.eup %4769  ;;  %v4650_v60 = vmul.f32 -1.442695, %v4450_v48 }
 0x9e1   :  { %v4459_v3 = vadd.f32 1.0, %v4770_v11 }
 0x9e2   :  { %4771 = vpow2.f32 %v4650_v60 }
 0x9e3   :  { %4773 = vrcp.f32 %v4459_v3  ;;  %v4472_v31 = vand.u32 2147483648, %v4459_v3  ;;  %v4470_v20 = vand.u32 2147483647, %v4459_v3  ;;  %vm4466_vm0 = vweird.f32 %v4459_v3 }
 0x9e5   :  { %v4473_v46 = vor.u32 1.1754944e-38, %v4472_v31  ;;  %vm4471_vm2 = vcmp.eq.f32.partialorder %v4470_v20, 8.507059e+37 }
 0x9e8   :  { %v4772_v53 = vpop.eup %4771 }
 0x9e9   :  { %v4774_v14 = vpop.eup %4773  ;;  %v4460_v57 = vadd.f32 1.0, %v4772_v53 }
 0x9ea   :  { %v4462_v59 = vmul.f32 %v4774_v14, %v4459_v3  ;;  %vm4467_vm15 = vweird.f32 %v4774_v14 }
 0x9eb   :  { %4775 = vrcp.f32 %v4460_v57  ;;  %vm4468_vm1 = vmor %vm4466_vm0, %vm4467_vm15  ;;  %v4487_v30 = vand.u32 2147483648, %v4460_v57  ;;  %v4485_v55 = vand.u32 2147483647, %v4460_v57  ;;  %vm4481_vm4 = vweird.f32 %v4460_v57 }
 0x9ec   :  { %v4463_v34 = vsub.f32 1.0, %v4462_v59 }
 0x9ed   :  { %v4488_v35 = vor.u32 1.1754944e-38, %v4487_v30  ;;  %vm4486_vm7 = vcmp.eq.f32.partialorder %v4485_v55, 8.507059e+37 }
 0x9ee   :  { %v4464_v2 = vmul.f32 %v4774_v14, %v4463_v34 }
 0x9f0   :  { %v4465_v18 = vadd.f32 %v4774_v14, %v4464_v2 }
 0x9f1   :  { %v4776_v28 = vpop.eup %4775 }
 0x9f2   :  { %v4469_v27 = vsel %vm4468_vm1, %v4774_v14, %v4465_v18  ;;  %v4477_v33 = vmul.f32 %v4776_v28, %v4460_v57  ;;  %vm4482_vm3 = vweird.f32 %v4776_v28 }
 0x9f3   :  { %v4474_v25 = vsel %vm4471_vm2, %v4473_v46, %v4469_v27  ;;  %vm4483_vm6 = vmor %vm4481_vm4, %vm4482_vm3 }
 0x9f4   :  { %v4491_v62 = vmul.f32 %v4474_v25, %v4448_v36  ;;  %v4478_v39 = vsub.f32 1.0, %v4477_v33 }
 0x9f6   :  { %v4493_v42 = vmul.f32 1.6666666, %v4491_v62  ;;  %v4479_v45 = vmul.f32 %v4776_v28, %v4478_v39 }
 0x9f8   :  { %v4480_v61 = vadd.f32 %v4776_v28, %v4479_v45  ;;  %v4495_v38 = vadd.f32 %v4493_v42, %v7987_v4 }
 0x9fa   :  { %v4484_v40 = vsel %vm4483_vm6, %v4776_v28, %v4480_v61  ;;  %v4497_v50 = vmul.f32 0.70710677, %v4495_v38 }
 0x9fb   :  { %v4489_v13 = vsel %vm4486_vm7, %v4488_v35, %v4484_v40 }
 0x9fc   :  { %v4492_v26 = vmul.f32 %v4489_v13, %v4450_v48  ;;  %4499 = vst.msk [vmem:[%s8039_s15] sm:$0xff] %vm704_vm5, %v4497_v50  ;;  %v4527_v41 = vmul.f32 %v4522_v0, %v4497_v50 }
 0x9fe   :  { %v4494_v1 = vmul.f32 1.6666666, %v4492_v26  ;;  %v4529_v58 = vpack.c.bf16 %v4527_v41, %v4527_v41 }
 0xa00   :  { %4532 = vst.msk [vmem:[%s8040_s16] sm:$0xf] %vm4531_vm8, %v4529_v58  ;;  %v4496_v4 = vadd.f32 %v4494_v1, %v7989_v21 }
 0xa02   :  { %v4498_v24 = vmul.f32 0.70710677, %v4496_v4 }
 0xa04   :  { %4500 = vst.msk [vmem:[%s8039_s15 + $0x8] sm:$0xff] %vm704_vm5, %v4498_v24  ;;  %v4528_v32 = vmul.f32 %v4524_v15, %v4498_v24 }
 0xa06   :  { %v4530_v63 = vpack.c.bf16 %v4528_v32, %v4528_v32 }
 0xa08   :  { %4533 = vst.msk [vmem:[%s8040_s16 + $0x4] sm:$0xf] %vm4531_vm8, %v4530_v63 }

</bundles_post_ra>
